<compile_context>
chip_gen: v7x
topology: tpu7x:2x2x1
jax: 0.10.0
libtpu: 0.0.40
codegen_flags: <defaults>
</compile_context>

<pallas_src>
import functools

import numpy as np
import jax
import jax.numpy as jnp
from jax.experimental import pallas as pl
from jax.experimental.pallas import tpu as pltpu

MXU_DTYPE = jnp.bfloat16            # MXU operand dtype (accumulate in f32)
TRI_COMPUTE_DTYPE = jnp.float32     # bilinear-weight chain dtype (bf16 ok on v6e/v7x)
Q_TILE = 512                        # query-row tile (sweep 256-1024)
HW_CHUNK = 2048                     # key-axis chunk for the weight build
LN_EPS = 1e-5


def _round_up(x, m):
    return (x + m - 1) // m * m


@functools.lru_cache(maxsize=1)
def _vmem_limit():
    """Per-generation VMEM budget: ~70% of physical (≈45MB v7x, ≈90MB v5e/v6e)."""
    try:
        cap = int(pltpu.get_tpu_info().vmem_capacity_bytes)
        return int(min(max(cap * 0.70, 32 * 1024 * 1024), 100 * 1024 * 1024))
    except Exception:
        return 48 * 1024 * 1024


# --------------------------------------------------------------------------
# host-side constant builders (column permutations, one-hot head matrices)
# --------------------------------------------------------------------------

def _offset_col_perm(M, L, P):
    """new column (l, c, m, p)  <-  PyTorch column ((m*L+l)*P+p)*2+c."""
    perm = np.zeros((L, 2, M, P), np.int32)
    for m in range(M):
        for l in range(L):
            for p in range(P):
                for c in range(2):
                    perm[l, c, m, p] = ((m * L + l) * P + p) * 2 + c
    return perm.reshape(-1)


def _attn_col_perm(M, L, P):
    """new column (l, m, p)  <-  PyTorch column (m*L+l)*P+p."""
    perm = np.zeros((L, M, P), np.int32)
    for m in range(M):
        for l in range(L):
            for p in range(P):
                perm[l, m, p] = (m * L + l) * P + p
    return perm.reshape(-1)


def _head_onehot(M, L, P):
    A = M * L * P
    E = np.zeros((A, M), np.float32)
    for l in range(L):
        for m in range(M):
            for p in range(P):
                E[(l * M + m) * P + p, m] = 1.0
    return E


# --------------------------------------------------------------------------
# Kernel 1: fused value / offset / attention projections + softmax + pixel
#           coordinates, written as level-major samp slabs
# --------------------------------------------------------------------------

def _fused_proj_kernel(src_ref, pos_ref, ref_ref, vw_ref, vb_ref, qaw_ref,
                       qab_ref, eh_ref, eht_ref, val_ref, samp_ref, *,
                       spatial_shapes, n_heads, n_points, n_off):
    src = src_ref[...]                               # (TQ, C) f32
    q = src + pos_ref[...]                           # with_pos_embed (fused)

    # value projection (input = src, NOT src+pos)
    val = jnp.dot(src.astype(vw_ref.dtype), vw_ref[...],
                  preferred_element_type=jnp.float32) + vb_ref[...]
    val_ref[...] = val.astype(val_ref.dtype)

    # single matmul for [sampling_offsets | attention_logits]
    qa = jnp.dot(q.astype(qaw_ref.dtype), qaw_ref[...],
                 preferred_element_type=jnp.float32) + qab_ref[...]
    off = qa[:, :n_off]                              # order (L, {x,y}, M, P)
    logits = qa[:, n_off:]                           # order (L, M, P)

    # Per-head softmax with one-hot MXU matmuls (lane-dense, no per-head
    # slicing).  Row-global max is used for stability; softmax is shift
    # invariant so this is exact unless a head's logits sit >~80 below the
    # row max (clamp below then yields ~0 weights instead of NaN).
    mx = jnp.max(logits, axis=-1, keepdims=True)
    e = jnp.exp(logits - mx)
    s_h = jnp.dot(e, eh_ref[...], preferred_element_type=jnp.float32)   # (TQ,M)
    r_h = pl.reciprocal(jnp.maximum(s_h, 1e-20), approx=True)
    attn = e * jnp.dot(r_h, eht_ref[...], preferred_element_type=jnp.float32)

    # pixel-coordinate sampling locations per level:
    #   pixel = ref*[W,H] + off - 0.5  (grid_sample, align_corners=False)
    MP = n_heads * n_points
    ref = ref_ref[...]                               # (TQ, 2L): [x_l, y_l]...
    for l, (H, W) in enumerate(spatial_shapes):
        off_x = off[:, (2 * l) * MP:(2 * l + 1) * MP]
        off_y = off[:, (2 * l + 1) * MP:(2 * l + 2) * MP]
        a_l = attn[:, l * MP:(l + 1) * MP]
        x_pix = ref[:, 2 * l:2 * l + 1] * float(W) + off_x - 0.5
        y_pix = ref[:, 2 * l + 1:2 * l + 2] * float(H) + off_y - 0.5
        samp_ref[l] = jnp.concatenate([x_pix, y_pix, a_l], axis=-1)


def fused_input_projections(src_p, pos_p, ref_p, params, spatial_shapes,
                            M, L, P, TQ, Eh, EhT):
    N, R, C = src_p.shape
    MP = M * P
    A = M * L * P
    n_off = 2 * A
    n_qa = params['qa_w'].shape[1]
    kernel = functools.partial(_fused_proj_kernel,
                               spatial_shapes=tuple(spatial_shapes),
                               n_heads=M, n_points=P, n_off=n_off)
    value, samp = pl.pallas_call(
        kernel,
        out_shape=(jax.ShapeDtypeStruct((N, R, C), params['value_w'].dtype),
                   jax.ShapeDtypeStruct((N, L, R, 3 * MP), jnp.float32)),
        grid=(N, R // TQ),
        in_specs=[
            pl.BlockSpec((pl.Squeezed(), TQ, C), lambda n, i: (n, i, 0)),
            pl.BlockSpec((pl.Squeezed(), TQ, C), lambda n, i: (n, i, 0)),
            pl.BlockSpec((pl.Squeezed(), TQ, 2 * L), lambda n, i: (n, i, 0)),
            pl.BlockSpec((C, C), lambda n, i: (0, 0)),
            pl.BlockSpec((1, C), lambda n, i: (0, 0)),
            pl.BlockSpec((C, n_qa), lambda n, i: (0, 0)),
            pl.BlockSpec((1, n_qa), lambda n, i: (0, 0)),
            pl.BlockSpec((A, M), lambda n, i: (0, 0)),
            pl.BlockSpec((M, A), lambda n, i: (0, 0)),
        ],
        out_specs=[
            pl.BlockSpec((pl.Squeezed(), TQ, C), lambda n, i: (n, i, 0)),
            pl.BlockSpec((pl.Squeezed(), L, TQ, 3 * MP),
                         lambda n, i: (n, 0, i, 0)),
        ],
        compiler_params=pltpu.CompilerParams(
            dimension_semantics=("parallel", "parallel"),
            vmem_limit_bytes=_vmem_limit()),
    )(src_p, pos_p, ref_p, params['value_w'], params['value_b'],
      params['qa_w'], params['qa_b'], Eh, EhT)
    return value, samp


# --------------------------------------------------------------------------
# Kernel 2: deformable sampling (levels innermost) + out-proj + add + LN1
# --------------------------------------------------------------------------

def _deform_attn_ln_kernel(samp_ref, pxpy_ref, val_ref, src_ref, ow_ref,
                           ob_ref, g_ref, b_ref, o_ref, acc_ref, *,
                           n_heads, n_points, level_starts, eps, hw_chunk,
                           tri_dtype):
    l = pl.program_id(2)

    @pl.when(l == 0)
    def _init():
        acc_ref[...] = jnp.zeros_like(acc_ref)

    MP = n_heads * n_points
    C = val_ref.shape[-1]
    d = C // n_heads
    HWp = pxpy_ref.shape[-1]
    TQ = samp_ref.shape[0]

    s = samp_ref[...]                    # (TQ, 3MP) f32: [x | y | a]
    pg = pxpy_ref[...]                   # (2, HWp) f32 (padded cols = -1e6)

    # static select chain over the (static, 8-aligned) level window starts
    s0 = jnp.int32(level_starts[0])
    for li in range(1, len(level_starts)):
        s0 = jnp.where(l == li, jnp.int32(level_starts[li]), s0)

    head_outs = []
    for h in range(n_heads):
        o_h = jnp.zeros((TQ, d), jnp.float32)
        for c0 in range(0, HWp, hw_chunk):
            cw = min(hw_chunk, HWp - c0)
            px = pg[0:1, c0:c0 + cw]     # (1, cw)
            py = pg[1:2, c0:c0 + cw]
            w = None
            for p_ in range(n_points):   # fold attn into the bilinear weights
                col = h * n_points + p_
                x = s[:, col:col + 1]                       # (TQ, 1)
                y = s[:, MP + col:MP + col + 1]
                a = s[:, 2 * MP + col:2 * MP + col + 1]
                # coordinate subtraction stays f32; clamp/mul chain may be bf16
                wx = jnp.maximum(0.0, 1.0 - jnp.abs(x - px)).astype(tri_dtype)
                wy = jnp.maximum(0.0, 1.0 - jnp.abs(y - py)).astype(tri_dtype)
                wp = a.astype(tri_dtype) * (wx * wy)        # (TQ, cw)
                w = wp if w is None else w + wp
            start = pl.multiple_of(s0 + c0, 8)
            v_chunk = val_ref[pl.ds(start, cw), pl.ds(h * d, d)]   # (cw, d)
            o_h = o_h + jnp.dot(w.astype(v_chunk.dtype), v_chunk,
                                preferred_element_type=jnp.float32)
        head_outs.append(o_h)
    acc_ref[...] += jnp.concatenate(head_outs, axis=-1)     # (TQ, C)

    @pl.when(l == len(level_starts) - 1)
    def _finalize():
        attn_out = acc_ref[...]
        proj = jnp.dot(attn_out.astype(ow_ref.dtype), ow_ref[...],
                       preferred_element_type=jnp.float32) + ob_ref[...]
        resid = src_ref[...] + proj                          # residual
        mean = jnp.mean(resid, axis=-1, keepdims=True)
        var = jnp.mean((resid - mean) ** 2, axis=-1, keepdims=True)
        o_ref[...] = ((resid - mean) * jax.lax.rsqrt(var + eps) * g_ref[...]
                      + b_ref[...]).astype(o_ref.dtype)


def deform_attn_block(samp, pxpy, value, src_p, params, M, P, L, TQ,
                      level_starts):
    N, _, R, c3mp = samp.shape
    C = value.shape[-1]
    HWp = pxpy.shape[-1]
    kernel = functools.partial(_deform_attn_ln_kernel, n_heads=M, n_points=P,
                               level_starts=tuple(level_starts), eps=LN_EPS,
                               hw_chunk=HW_CHUNK, tri_dtype=TRI_COMPUTE_DTYPE)
    return pl.pallas_call(
        kernel,
        out_shape=jax.ShapeDtypeStruct((N, R, C), jnp.float32),
        grid=(N, R // TQ, L),
        in_specs=[
            pl.BlockSpec((pl.Squeezed(), pl.Squeezed(), TQ, c3mp),
                         lambda n, qt, l: (n, l, qt, 0)),
            pl.BlockSpec((pl.Squeezed(), 2, HWp), lambda n, qt, l: (l, 0, 0)),
            pl.BlockSpec((pl.Squeezed(), R, C), lambda n, qt, l: (n, 0, 0)),
            pl.BlockSpec((pl.Squeezed(), TQ, C), lambda n, qt, l: (n, qt, 0)),
            pl.BlockSpec((C, C), lambda n, qt, l: (0, 0)),
            pl.BlockSpec((1, C), lambda n, qt, l: (0, 0)),
            pl.BlockSpec((1, C), lambda n, qt, l: (0, 0)),
            pl.BlockSpec((1, C), lambda n, qt, l: (0, 0)),
        ],
        out_specs=pl.BlockSpec((pl.Squeezed(), TQ, C),
                               lambda n, qt, l: (n, qt, 0)),
        scratch_shapes=[pltpu.VMEM((TQ, C), jnp.float32)],
        compiler_params=pltpu.CompilerParams(
            dimension_semantics=("parallel", "parallel", "arbitrary"),
            vmem_limit_bytes=_vmem_limit()),
    )(samp, pxpy, value, src_p, params['out_w'], params['out_b'],
      params['ln1_g'], params['ln1_b'])


# --------------------------------------------------------------------------
# Kernel 3: FFN (linear -> relu -> linear) + residual + LayerNorm2
# --------------------------------------------------------------------------

def _ffn_ln_kernel(x_ref, w1_ref, b1_ref, w2_ref, b2_ref, g_ref, b_ref,
                   o_ref, *, eps):
    x = x_ref[...]
    h = jnp.dot(x.astype(w1_ref.dtype), w1_ref[...],
                preferred_element_type=jnp.float32) + b1_ref[...]
    h = jnp.maximum(h, 0.0)                                  # relu
    y = jnp.dot(h.astype(w2_ref.dtype), w2_ref[...],
                preferred_element_type=jnp.float32) + b2_ref[...]
    v = x + y                                                # residual
    mean = jnp.mean(v, axis=-1, keepdims=True)
    var = jnp.mean((v - mean) ** 2, axis=-1, keepdims=True)
    o_ref[...] = ((v - mean) * jax.lax.rsqrt(var + eps) * g_ref[...]
                  + b_ref[...]).astype(o_ref.dtype)


def ffn_ln(x, params, TQ):
    N, R, C = x.shape
    F = params['ffn_w1'].shape[1]
    return pl.pallas_call(
        functools.partial(_ffn_ln_kernel, eps=LN_EPS),
        out_shape=jax.ShapeDtypeStruct((N, R, C), jnp.float32),
        grid=(N, R // TQ),
        in_specs=[pl.BlockSpec((pl.Squeezed(), TQ, C), lambda n, i: (n, i, 0)),
                  pl.BlockSpec((C, F), lambda n, i: (0, 0)),
                  pl.BlockSpec((1, F), lambda n, i: (0, 0)),
                  pl.BlockSpec((F, C), lambda n, i: (0, 0)),
                  pl.BlockSpec((1, C), lambda n, i: (0, 0)),
                  pl.BlockSpec((1, C), lambda n, i: (0, 0)),
                  pl.BlockSpec((1, C), lambda n, i: (0, 0))],
        out_specs=pl.BlockSpec((pl.Squeezed(), TQ, C), lambda n, i: (n, i, 0)),
        compiler_params=pltpu.CompilerParams(
            dimension_semantics=("parallel", "parallel"),
            vmem_limit_bytes=_vmem_limit()),
    )(x, params['ffn_w1'], params['ffn_b1'], params['ffn_w2'],
      params['ffn_b2'], params['ln2_g'], params['ln2_b'])


# --------------------------- module-level forward ---------------------------

def encoder_layer_forward(src, pos, reference_points, params, *,
                          spatial_shapes, level_start_index,
                          n_heads, n_levels, n_points, q_tile=Q_TILE):
    """DeformableTransformerEncoderLayer.forward (eval: dropouts = identity)."""
    N, Len, C = src.shape
    M, L, P = n_heads, n_levels, n_points
    Lq = Len

    TQ = min(q_tile, _round_up(Lq, 8))
    R = _round_up(Lq, TQ)

    def padr(x):
        return x if R == Lq else jnp.pad(x, ((0, 0), (0, R - Lq), (0, 0)))

    src_p = padr(src)
    pos_p = padr(pos)
    ref_p = padr(reference_points.reshape(N, Lq, L * 2))

    Eh_np = _head_onehot(M, L, P)
    Eh = jnp.asarray(Eh_np)
    EhT = jnp.asarray(np.ascontiguousarray(Eh_np.T))

    # 1) fused value / pixel-coordinate offsets / softmaxed-attention proj.
    value, samp = fused_input_projections(src_p, pos_p, ref_p, params,
                                          spatial_shapes, M, L, P, TQ, Eh, EhT)

    # 2) static per-level value-window geometry (no padded value copies):
    #    each level reads a uniform-length window of the shared value slab;
    #    its pixel grid is placed at offset delta_l, other columns get a
    #    -1e6 sentinel (-> exactly zero bilinear weight).
    hw_list = [h * w for (h, w) in spatial_shapes]
    hw_max = max(hw_list)
    HWp = min(_round_up(hw_max + 8, 128), R)
    starts, deltas = [], []
    for l in range(L):
        s0 = min((int(level_start_index[l]) // 8) * 8, R - HWp)
        s0 = max(s0, 0)
        starts.append(s0)
        deltas.append(int(level_start_index[l]) - s0)
        assert deltas[-1] + hw_list[l] <= HWp
    grids = np.full((L, 2, HWp), -1e6, np.float32)
    for l, (H, W) in enumerate(spatial_shapes):
        HW = H * W
        d0 = deltas[l]
        idx = np.arange(HW)
        grids[l, 0, d0:d0 + HW] = (idx % W).astype(np.float32)
        grids[l, 1, d0:d0 + HW] = (idx // W).astype(np.float32)
    pxpy = jnp.asarray(grids)

    # deformable attention + out-proj + residual + LayerNorm1 (one kernel)
    src_ln1 = deform_attn_block(samp, pxpy, value, src_p, params,
                                M, P, L, TQ, starts)

    # FFN + residual + LayerNorm2 (one kernel); slice padding at the very end
    out = ffn_ln(src_ln1, params, TQ)
    return out[:, :Lq]


# ------------------------------- parameters --------------------------------

def init_params(key, d_model, d_ffn, n_heads, n_levels, n_points):
    # Weights stored transposed to (in, out) layout for y = x @ W + b.
    keys = jax.random.split(key, 12)

    def w(k, shape, scale=0.02):
        return (scale * jax.random.normal(k, shape)).astype(jnp.float32)

    off_out = n_heads * n_levels * n_points * 2
    attn_out = n_heads * n_levels * n_points
    return {
        'off_w': w(keys[0], (d_model, off_out)),
        'off_b': w(keys[1], (off_out,), 0.5),
        'attn_w': w(keys[2], (d_model, attn_out)),
        'attn_b': w(keys[3], (attn_out,)),
        'value_w': w(keys[4], (d_model, d_model)),
        'value_b': w(keys[5], (d_model,)),
        'out_w': w(keys[6], (d_model, d_model)),
        'out_b': w(keys[7], (d_model,)),
        'ln1_g': jnp.ones((d_model,), jnp.float32),
        'ln1_b': jnp.zeros((d_model,), jnp.float32),
        'ffn_w1': w(keys[8], (d_model, d_ffn)),
        'ffn_b1': w(keys[9], (d_ffn,)),
        'ffn_w2': w(keys[10], (d_ffn, d_model)),
        'ffn_b2': w(keys[11], (d_model,)),
        'ln2_g': jnp.ones((d_model,), jnp.float32),
        'ln2_b': jnp.zeros((d_model,), jnp.float32),
    }


def prepare_params(p, n_heads, n_levels, n_points, mxu_dtype=MXU_DTYPE):
    """Permute offset/attn columns to level-major order, concat into one
    projection, cast MXU weight operands, reshape biases to 2-D."""
    C = p['value_w'].shape[0]
    F = p['ffn_w1'].shape[1]
    M, L, P = n_heads, n_levels, n_points
    perm_off = _offset_col_perm(M, L, P)
    perm_attn = _attn_col_perm(M, L, P)
    off_w = p['off_w'][:, perm_off]
    off_b = p['off_b'][perm_off]
    attn_w = p['attn_w'][:, perm_attn]
    attn_b = p['attn_b'][perm_attn]
    qa_w = jnp.concatenate([off_w, attn_w], axis=1)
    qa_b = jnp.concatenate([off_b, attn_b])
    n_qa = qa_w.shape[1]
    return {
        'value_w': p['value_w'].astype(mxu_dtype),
        'value_b': p['value_b'].reshape(1, C),
        'qa_w': qa_w.astype(mxu_dtype),
        'qa_b': qa_b.reshape(1, n_qa),
        'out_w': p['out_w'].astype(mxu_dtype),
        'out_b': p['out_b'].reshape(1, C),
        'ln1_g': p['ln1_g'].reshape(1, C),
        'ln1_b': p['ln1_b'].reshape(1, C),
        'ffn_w1': p['ffn_w1'].astype(mxu_dtype),
        'ffn_b1': p['ffn_b1'].reshape(1, F),
        'ffn_w2': p['ffn_w2'].astype(mxu_dtype),
        'ffn_b2': p['ffn_b2'].reshape(1, C),
        'ln2_g': p['ln2_g'].reshape(1, C),
        'ln2_b': p['ln2_b'].reshape(1, C),
    }


# ---------------------------------- main ------------------------------------

if __name__ == "__main__":
    key = jax.random.PRNGKey(0)
    d_model, d_ffn = 32, 64
    n_heads, n_levels, n_points = 4, 2, 4
    spatial_shapes = [(8, 8), (4, 4)]           # (H, W) per level
    N = 2
    Len = sum(h * w for h, w in spatial_shapes)

    level_start_index = [0]
    for (h, w) in spatial_shapes[:-1]:
        level_start_index.append(level_start_index[-1] + h * w)

    k1, k2, k3 = jax.random.split(key, 3)
    src = jax.random.normal(k1, (N, Len, d_model), dtype=jnp.float32)
    pos = jax.random.normal(k2, (N, Len, d_model), dtype=jnp.float32)
    params = prepare_params(
        init_params(k3, d_model, d_ffn, n_heads, n_levels, n_points),
        n_heads, n_levels, n_points)

    # Encoder reference points: per-pixel normalized centers (valid_ratios==1).
    refs = []
    for (H, W) in spatial_shapes:
        ry = (jnp.arange(H, dtype=jnp.float32) + 0.5) / H
        rx = (jnp.arange(W, dtype=jnp.float32) + 0.5) / W
        gy, gx = jnp.meshgrid(ry, rx, indexing='ij')
        refs.append(jnp.stack([gx.reshape(-1), gy.reshape(-1)], axis=-1))
    ref = jnp.concatenate(refs, axis=0)                           # (Len, 2)
    reference_points = jnp.broadcast_to(ref[None, :, None, :],
                                        (N, Len, n_levels, 2))

    fwd = jax.jit(functools.partial(
        encoder_layer_forward,
        spatial_shapes=tuple(spatial_shapes),
        level_start_index=tuple(level_start_index),
        n_heads=n_heads, n_levels=n_levels, n_points=n_points))

    out = jax.block_until_ready(fwd(src, pos, reference_points, params))
    assert out.shape == (N, Len, d_model)
    assert bool(jnp.all(jnp.isfinite(out)))
    print("KERNEL_OK")
</pallas_src>

<mosaic_0001>
module attributes {stable_mosaic.version = 11 : i64} {
  func.func @_fused_proj_kernel(%arg0: i32, %arg1: i32, %arg2: memref<1x80x32xf32, #tpu.memory_space<vmem>>, %arg3: memref<1x80x32xf32, #tpu.memory_space<vmem>>, %arg4: memref<1x80x4xf32, #tpu.memory_space<vmem>>, %arg5: memref<32x32xbf16, #tpu.memory_space<vmem>>, %arg6: memref<1x32xf32, #tpu.memory_space<vmem>>, %arg7: memref<32x96xbf16, #tpu.memory_space<vmem>>, %arg8: memref<1x96xf32, #tpu.memory_space<vmem>>, %arg9: memref<32x4xf32, #tpu.memory_space<vmem>>, %arg10: memref<4x32xf32, #tpu.memory_space<vmem>>, %arg11: memref<1x80x32xbf16, #tpu.memory_space<vmem>>, %arg12: memref<1x2x80x48xf32, #tpu.memory_space<vmem>>) attributes {dimension_semantics = [#tpu.dimension_semantics<parallel>, #tpu.dimension_semantics<parallel>], iteration_bounds = array<i64: 2, 1>, scalar_prefetch = 0 : i64, scratch_operands = 0 : i64, tpu.core_type = #tpu.core_type<tc>, window_params = [{transform_indices = @transform_0, window_bounds = array<i64: 1, 80, 32>}, {transform_indices = @transform_1, window_bounds = array<i64: 1, 80, 32>}, {transform_indices = @transform_2, window_bounds = array<i64: 1, 80, 4>}, {pipeline_mode = #tpu.pipeline_mode<synchronous>, transform_indices = @transform_3, window_bounds = array<i64: 32, 32>}, {pipeline_mode = #tpu.pipeline_mode<synchronous>, transform_indices = @transform_4, window_bounds = array<i64: 1, 32>}, {pipeline_mode = #tpu.pipeline_mode<synchronous>, transform_indices = @transform_5, window_bounds = array<i64: 32, 96>}, {pipeline_mode = #tpu.pipeline_mode<synchronous>, transform_indices = @transform_6, window_bounds = array<i64: 1, 96>}, {pipeline_mode = #tpu.pipeline_mode<synchronous>, transform_indices = @transform_7, window_bounds = array<i64: 32, 4>}, {pipeline_mode = #tpu.pipeline_mode<synchronous>, transform_indices = @transform_8, window_bounds = array<i64: 4, 32>}, {transform_indices = @transform_9, window_bounds = array<i64: 1, 80, 32>}, {transform_indices = @transform_10, window_bounds = array<i64: 1, 2, 80, 48>}]} {
    %c0 = arith.constant 0 : index
    %c0_0 = arith.constant 0 : index
    %c0_1 = arith.constant 0 : index
    %0 = vector.load %arg2[%c0, %c0_0, %c0_1] : memref<1x80x32xf32, #tpu.memory_space<vmem>>, vector<1x80x32xf32>
    %1 = vector.shape_cast %0 : vector<1x80x32xf32> to vector<80x32xf32>
    %c0_2 = arith.constant 0 : index
    %c0_3 = arith.constant 0 : index
    %c0_4 = arith.constant 0 : index
    %2 = vector.load %arg3[%c0_2, %c0_3, %c0_4] : memref<1x80x32xf32, #tpu.memory_space<vmem>>, vector<1x80x32xf32>
    %3 = vector.shape_cast %2 : vector<1x80x32xf32> to vector<80x32xf32>
    %4 = arith.addf %1, %3 : vector<80x32xf32>
    %5 = arith.truncf %1 : vector<80x32xf32> to vector<80x32xbf16>
    %c0_5 = arith.constant 0 : index
    %c0_6 = arith.constant 0 : index
    %6 = vector.load %arg5[%c0_5, %c0_6] : memref<32x32xbf16, #tpu.memory_space<vmem>>, vector<32x32xbf16>
    %cst = arith.constant dense<0.000000e+00> : vector<80x32xf32>
    %7 = tpu.matmul %5, %6, %cst {dimension_numbers = #tpu.dot_dimension_numbers<[1], [0], [0], [1], [0, 0, 1, 1], [], []>} : vector<80x32xbf16>, vector<32x32xbf16>, vector<80x32xf32> -> vector<80x32xf32>
    %c0_7 = arith.constant 0 : index
    %c0_8 = arith.constant 0 : index
    %8 = vector.load %arg6[%c0_7, %c0_8] : memref<1x32xf32, #tpu.memory_space<vmem>>, vector<1x32xf32>
    %9 = vector.broadcast %8 : vector<1x32xf32> to vector<80x32xf32>
    %10 = arith.addf %7, %9 : vector<80x32xf32>
    %11 = arith.truncf %10 : vector<80x32xf32> to vector<80x32xbf16>
    %c0_9 = arith.constant 0 : index
    %c0_10 = arith.constant 0 : index
    %c0_11 = arith.constant 0 : index
    %12 = vector.load %arg11[%c0_9, %c0_10, %c0_11] : memref<1x80x32xbf16, #tpu.memory_space<vmem>>, vector<1x80x32xbf16>
    %13 = vector.shape_cast %12 : vector<1x80x32xbf16> to vector<80x32xbf16>
    %14 = vector.shape_cast %11 : vector<80x32xbf16> to vector<1x80x32xbf16>
    tpu.vector_store %arg11[%c0_9, %c0_10, %c0_11], %14 {strides = array<i32>} : memref<1x80x32xbf16, #tpu.memory_space<vmem>>, vector<1x80x32xbf16>,
    %15 = arith.truncf %4 : vector<80x32xf32> to vector<80x32xbf16>
    %c0_12 = arith.constant 0 : index
    %c0_13 = arith.constant 0 : index
    %16 = vector.load %arg7[%c0_12, %c0_13] : memref<32x96xbf16, #tpu.memory_space<vmem>>, vector<32x96xbf16>
    %cst_14 = arith.constant dense<0.000000e+00> : vector<80x96xf32>
    %17 = tpu.matmul %15, %16, %cst_14 {dimension_numbers = #tpu.dot_dimension_numbers<[1], [0], [0], [1], [0, 0, 1, 1], [], []>} : vector<80x32xbf16>, vector<32x96xbf16>, vector<80x96xf32> -> vector<80x96xf32>
    %c0_15 = arith.constant 0 : index
    %c0_16 = arith.constant 0 : index
    %18 = vector.load %arg8[%c0_15, %c0_16] : memref<1x96xf32, #tpu.memory_space<vmem>>, vector<1x96xf32>
    %19 = vector.broadcast %18 : vector<1x96xf32> to vector<80x96xf32>
    %20 = arith.addf %17, %19 : vector<80x96xf32>
    %21 = vector.extract_strided_slice %20 {offsets = [0, 0], sizes = [80, 64], strides = [1, 1]} : vector<80x96xf32> to vector<80x64xf32>
    %22 = vector.extract_strided_slice %20 {offsets = [0, 64], sizes = [80, 32], strides = [1, 1]} : vector<80x96xf32> to vector<80x32xf32>
    %cst_17 = arith.constant dense<0xFF800000> : vector<80xf32>
    %23 = vector.multi_reduction <maximumf>, %22, %cst_17 [1] : vector<80x32xf32> to vector<80xf32>
    %24 = vector.shape_cast %23 : vector<80xf32> to vector<80x1xf32>
    %25 = vector.broadcast %24 : vector<80x1xf32> to vector<80x32xf32>
    %26 = arith.subf %22, %25 : vector<80x32xf32>
    %27 = math.exp %26 : vector<80x32xf32>
    %c0_18 = arith.constant 0 : index
    %c0_19 = arith.constant 0 : index
    %28 = vector.load %arg9[%c0_18, %c0_19] : memref<32x4xf32, #tpu.memory_space<vmem>>, vector<32x4xf32>
    %cst_20 = arith.constant dense<0.000000e+00> : vector<80x4xf32>
    %29 = tpu.matmul %27, %28, %cst_20 {dimension_numbers = #tpu.dot_dimension_numbers<[1], [0], [0], [1], [0, 0, 1, 1], [], []>} : vector<80x32xf32>, vector<32x4xf32>, vector<80x4xf32> -> vector<80x4xf32>
    %cst_21 = arith.constant 9.99999968E-21 : f32
    %30 = vector.broadcast %cst_21 : f32 to vector<80x4xf32>
    %31 = arith.maximumf %29, %30 : vector<80x4xf32>
    %32 = tpu.reciprocal %31 {approx = true} : vector<80x4xf32> -> vector<80x4xf32>
    %c0_22 = arith.constant 0 : index
    %c0_23 = arith.constant 0 : index
    %33 = vector.load %arg10[%c0_22, %c0_23] : memref<4x32xf32, #tpu.memory_space<vmem>>, vector<4x32xf32>
    %cst_24 = arith.constant dense<0.000000e+00> : vector<80x32xf32>
    %34 = tpu.matmul %32, %33, %cst_24 {dimension_numbers = #tpu.dot_dimension_numbers<[1], [0], [0], [1], [0, 0, 1, 1], [], []>} : vector<80x4xf32>, vector<4x32xf32>, vector<80x32xf32> -> vector<80x32xf32>
    %35 = arith.mulf %27, %34 : vector<80x32xf32>
    %c0_25 = arith.constant 0 : index
    %c0_26 = arith.constant 0 : index
    %c0_27 = arith.constant 0 : index
    %36 = vector.load %arg4[%c0_25, %c0_26, %c0_27] : memref<1x80x4xf32, #tpu.memory_space<vmem>>, vector<1x80x4xf32>
    %37 = vector.shape_cast %36 : vector<1x80x4xf32> to vector<80x4xf32>
    %38 = vector.extract_strided_slice %21 {offsets = [0, 0], sizes = [80, 16], strides = [1, 1]} : vector<80x64xf32> to vector<80x16xf32>
    %39 = vector.extract_strided_slice %21 {offsets = [0, 16], sizes = [80, 16], strides = [1, 1]} : vector<80x64xf32> to vector<80x16xf32>
    %40 = vector.extract_strided_slice %35 {offsets = [0, 0], sizes = [80, 16], strides = [1, 1]} : vector<80x32xf32> to vector<80x16xf32>
    %41 = vector.extract_strided_slice %37 {offsets = [0, 0], sizes = [80, 1], strides = [1, 1]} : vector<80x4xf32> to vector<80x1xf32>
    %cst_28 = arith.constant 8.000000e+00 : f32
    %42 = vector.broadcast %cst_28 : f32 to vector<80x1xf32>
    %43 = arith.mulf %41, %42 : vector<80x1xf32>
    %44 = vector.broadcast %43 : vector<80x1xf32> to vector<80x16xf32>
    %45 = arith.addf %44, %38 : vector<80x16xf32>
    %cst_29 = arith.constant 5.000000e-01 : f32
    %46 = vector.broadcast %cst_29 : f32 to vector<80x16xf32>
    %47 = arith.subf %45, %46 : vector<80x16xf32>
    %48 = vector.extract_strided_slice %37 {offsets = [0, 1], sizes = [80, 1], strides = [1, 1]} : vector<80x4xf32> to vector<80x1xf32>
    %cst_30 = arith.constant 8.000000e+00 : f32
    %49 = vector.broadcast %cst_30 : f32 to vector<80x1xf32>
    %50 = arith.mulf %48, %49 : vector<80x1xf32>
    %51 = vector.broadcast %50 : vector<80x1xf32> to vector<80x16xf32>
    %52 = arith.addf %51, %39 : vector<80x16xf32>
    %cst_31 = arith.constant 5.000000e-01 : f32
    %53 = vector.broadcast %cst_31 : f32 to vector<80x16xf32>
    %54 = arith.subf %52, %53 : vector<80x16xf32>
    %55 = tpu.concatenate %47, %54, %40 in 1 : vector<80x16xf32>, vector<80x16xf32>, vector<80x16xf32> -> vector<80x48xf32>
    %c0_32 = arith.constant 0 : index
    %c0_33 = arith.constant 0 : index
    %c0_34 = arith.constant 0 : index
    %c0_35 = arith.constant 0 : index
    %56 = vector.load %arg12[%c0_32, %c0_33, %c0_34, %c0_35] : memref<1x2x80x48xf32, #tpu.memory_space<vmem>>, vector<1x1x80x48xf32>
    %57 = vector.shape_cast %56 : vector<1x1x80x48xf32> to vector<80x48xf32>
    %58 = vector.shape_cast %55 : vector<80x48xf32> to vector<1x1x80x48xf32>
    tpu.vector_store %arg12[%c0_32, %c0_33, %c0_34, %c0_35], %58 {strides = array<i32>} : memref<1x2x80x48xf32, #tpu.memory_space<vmem>>, vector<1x1x80x48xf32>,
    %59 = vector.extract_strided_slice %21 {offsets = [0, 32], sizes = [80, 16], strides = [1, 1]} : vector<80x64xf32> to vector<80x16xf32>
    %60 = vector.extract_strided_slice %21 {offsets = [0, 48], sizes = [80, 16], strides = [1, 1]} : vector<80x64xf32> to vector<80x16xf32>
    %61 = vector.extract_strided_slice %35 {offsets = [0, 16], sizes = [80, 16], strides = [1, 1]} : vector<80x32xf32> to vector<80x16xf32>
    %62 = vector.extract_strided_slice %37 {offsets = [0, 2], sizes = [80, 1], strides = [1, 1]} : vector<80x4xf32> to vector<80x1xf32>
    %cst_36 = arith.constant 4.000000e+00 : f32
    %63 = vector.broadcast %cst_36 : f32 to vector<80x1xf32>
    %64 = arith.mulf %62, %63 : vector<80x1xf32>
    %65 = vector.broadcast %64 : vector<80x1xf32> to vector<80x16xf32>
    %66 = arith.addf %65, %59 : vector<80x16xf32>
    %cst_37 = arith.constant 5.000000e-01 : f32
    %67 = vector.broadcast %cst_37 : f32 to vector<80x16xf32>
    %68 = arith.subf %66, %67 : vector<80x16xf32>
    %69 = vector.extract_strided_slice %37 {offsets = [0, 3], sizes = [80, 1], strides = [1, 1]} : vector<80x4xf32> to vector<80x1xf32>
    %cst_38 = arith.constant 4.000000e+00 : f32
    %70 = vector.broadcast %cst_38 : f32 to vector<80x1xf32>
    %71 = arith.mulf %69, %70 : vector<80x1xf32>
    %72 = vector.broadcast %71 : vector<80x1xf32> to vector<80x16xf32>
    %73 = arith.addf %72, %60 : vector<80x16xf32>
    %cst_39 = arith.constant 5.000000e-01 : f32
    %74 = vector.broadcast %cst_39 : f32 to vector<80x16xf32>
    %75 = arith.subf %73, %74 : vector<80x16xf32>
    %76 = tpu.concatenate %68, %75, %61 in 1 : vector<80x16xf32>, vector<80x16xf32>, vector<80x16xf32> -> vector<80x48xf32>
    %c0_40 = arith.constant 0 : index
    %c1 = arith.constant 1 : index
    %c0_41 = arith.constant 0 : index
    %c0_42 = arith.constant 0 : index
    %77 = vector.load %arg12[%c0_40, %c1, %c0_41, %c0_42] : memref<1x2x80x48xf32, #tpu.memory_space<vmem>>, vector<1x1x80x48xf32>
    %78 = vector.shape_cast %77 : vector<1x1x80x48xf32> to vector<80x48xf32>
    %79 = vector.shape_cast %76 : vector<80x48xf32> to vector<1x1x80x48xf32>
    tpu.vector_store %arg12[%c0_40, %c1, %c0_41, %c0_42], %79 {strides = array<i32>} : memref<1x2x80x48xf32, #tpu.memory_space<vmem>>, vector<1x1x80x48xf32>,
    return
  }
  func.func @transform_0(%arg0: i32, %arg1: i32) -> (i32, i32, i32) {
    %c0_i32 = arith.constant 0 : i32
    %c0_i32_0 = arith.constant 0 : i32
    return %arg0, %arg1, %c0_i32 : i32, i32, i32
  }
  func.func @transform_1(%arg0: i32, %arg1: i32) -> (i32, i32, i32) {
    %c0_i32 = arith.constant 0 : i32
    %c0_i32_0 = arith.constant 0 : i32
    return %arg0, %arg1, %c0_i32 : i32, i32, i32
  }
  func.func @transform_2(%arg0: i32, %arg1: i32) -> (i32, i32, i32) {
    %c0_i32 = arith.constant 0 : i32
    %c0_i32_0 = arith.constant 0 : i32
    return %arg0, %arg1, %c0_i32 : i32, i32, i32
  }
  func.func @transform_3(%arg0: i32, %arg1: i32) -> (i32, i32) {
    %c0_i32 = arith.constant 0 : i32
    %c0_i32_0 = arith.constant 0 : i32
    %c0_i32_1 = arith.constant 0 : i32
    return %c0_i32, %c0_i32_0 : i32, i32
  }
  func.func @transform_4(%arg0: i32, %arg1: i32) -> (i32, i32) {
    %c0_i32 = arith.constant 0 : i32
    %c0_i32_0 = arith.constant 0 : i32
    %c0_i32_1 = arith.constant 0 : i32
    return %c0_i32, %c0_i32_0 : i32, i32
  }
  func.func @transform_5(%arg0: i32, %arg1: i32) -> (i32, i32) {
    %c0_i32 = arith.constant 0 : i32
    %c0_i32_0 = arith.constant 0 : i32
    %c0_i32_1 = arith.constant 0 : i32
    return %c0_i32, %c0_i32_0 : i32, i32
  }
  func.func @transform_6(%arg0: i32, %arg1: i32) -> (i32, i32) {
    %c0_i32 = arith.constant 0 : i32
    %c0_i32_0 = arith.constant 0 : i32
    %c0_i32_1 = arith.constant 0 : i32
    return %c0_i32, %c0_i32_0 : i32, i32
  }
  func.func @transform_7(%arg0: i32, %arg1: i32) -> (i32, i32) {
    %c0_i32 = arith.constant 0 : i32
    %c0_i32_0 = arith.constant 0 : i32
    %c0_i32_1 = arith.constant 0 : i32
    return %c0_i32, %c0_i32_0 : i32, i32
  }
  func.func @transform_8(%arg0: i32, %arg1: i32) -> (i32, i32) {
    %c0_i32 = arith.constant 0 : i32
    %c0_i32_0 = arith.constant 0 : i32
    %c0_i32_1 = arith.constant 0 : i32
    return %c0_i32, %c0_i32_0 : i32, i32
  }
  func.func @transform_9(%arg0: i32, %arg1: i32) -> (i32, i32, i32) {
    %c0_i32 = arith.constant 0 : i32
    %c0_i32_0 = arith.constant 0 : i32
    return %arg0, %arg1, %c0_i32 : i32, i32, i32
  }
  func.func @transform_10(%arg0: i32, %arg1: i32) -> (i32, i32, i32, i32) {
    %c0_i32 = arith.constant 0 : i32
    %c0_i32_0 = arith.constant 0 : i32
    %c0_i32_1 = arith.constant 0 : i32
    return %arg0, %c0_i32, %arg1, %c0_i32_0 : i32, i32, i32, i32
  }
}

module attributes {stable_mosaic.version = 11 : i64} {
  func.func @_ffn_ln_kernel(%arg0: i32, %arg1: i32, %arg2: memref<1x80x32xf32, #tpu.memory_space<vmem>>, %arg3: memref<32x64xbf16, #tpu.memory_space<vmem>>, %arg4: memref<1x64xf32, #tpu.memory_space<vmem>>, %arg5: memref<64x32xbf16, #tpu.memory_space<vmem>>, %arg6: memref<1x32xf32, #tpu.memory_space<vmem>>, %arg7: memref<1x32xf32, #tpu.memory_space<vmem>>, %arg8: memref<1x32xf32, #tpu.memory_space<vmem>>, %arg9: memref<1x80x32xf32, #tpu.memory_space<vmem>>) attributes {dimension_semantics = [#tpu.dimension_semantics<parallel>, #tpu.dimension_semantics<parallel>], iteration_bounds = array<i64: 2, 1>, scalar_prefetch = 0 : i64, scratch_operands = 0 : i64, tpu.core_type = #tpu.core_type<tc>, window_params = [{transform_indices = @transform_0, window_bounds = array<i64: 1, 80, 32>}, {pipeline_mode = #tpu.pipeline_mode<synchronous>, transform_indices = @transform_1, window_bounds = array<i64: 32, 64>}, {pipeline_mode = #tpu.pipeline_mode<synchronous>, transform_indices = @transform_2, window_bounds = array<i64: 1, 64>}, {pipeline_mode = #tpu.pipeline_mode<synchronous>, transform_indices = @transform_3, window_bounds = array<i64: 64, 32>}, {pipeline_mode = #tpu.pipeline_mode<synchronous>, transform_indices = @transform_4, window_bounds = array<i64: 1, 32>}, {pipeline_mode = #tpu.pipeline_mode<synchronous>, transform_indices = @transform_5, window_bounds = array<i64: 1, 32>}, {pipeline_mode = #tpu.pipeline_mode<synchronous>, transform_indices = @transform_6, window_bounds = array<i64: 1, 32>}, {transform_indices = @transform_7, window_bounds = array<i64: 1, 80, 32>}]} {
    %c0 = arith.constant 0 : index
    %c0_0 = arith.constant 0 : index
    %c0_1 = arith.constant 0 : index
    %0 = vector.load %arg2[%c0, %c0_0, %c0_1] : memref<1x80x32xf32, #tpu.memory_space<vmem>>, vector<1x80x32xf32>
    %1 = vector.shape_cast %0 : vector<1x80x32xf32> to vector<80x32xf32>
    %2 = arith.truncf %1 : vector<80x32xf32> to vector<80x32xbf16>
    %c0_2 = arith.constant 0 : index
    %c0_3 = arith.constant 0 : index
    %3 = vector.load %arg3[%c0_2, %c0_3] : memref<32x64xbf16, #tpu.memory_space<vmem>>, vector<32x64xbf16>
    %cst = arith.constant dense<0.000000e+00> : vector<80x64xf32>
    %4 = tpu.matmul %2, %3, %cst {dimension_numbers = #tpu.dot_dimension_numbers<[1], [0], [0], [1], [0, 0, 1, 1], [], []>} : vector<80x32xbf16>, vector<32x64xbf16>, vector<80x64xf32> -> vector<80x64xf32>
    %c0_4 = arith.constant 0 : index
    %c0_5 = arith.constant 0 : index
    %5 = vector.load %arg4[%c0_4, %c0_5] : memref<1x64xf32, #tpu.memory_space<vmem>>, vector<1x64xf32>
    %6 = vector.broadcast %5 : vector<1x64xf32> to vector<80x64xf32>
    %7 = arith.addf %4, %6 : vector<80x64xf32>
    %cst_6 = arith.constant 0.000000e+00 : f32
    %8 = vector.broadcast %cst_6 : f32 to vector<80x64xf32>
    %9 = arith.maximumf %7, %8 : vector<80x64xf32>
    %10 = arith.truncf %9 : vector<80x64xf32> to vector<80x64xbf16>
    %c0_7 = arith.constant 0 : index
    %c0_8 = arith.constant 0 : index
    %11 = vector.load %arg5[%c0_7, %c0_8] : memref<64x32xbf16, #tpu.memory_space<vmem>>, vector<64x32xbf16>
    %cst_9 = arith.constant dense<0.000000e+00> : vector<80x32xf32>
    %12 = tpu.matmul %10, %11, %cst_9 {dimension_numbers = #tpu.dot_dimension_numbers<[1], [0], [0], [1], [0, 0, 1, 1], [], []>} : vector<80x64xbf16>, vector<64x32xbf16>, vector<80x32xf32> -> vector<80x32xf32>
    %c0_10 = arith.constant 0 : index
    %c0_11 = arith.constant 0 : index
    %13 = vector.load %arg6[%c0_10, %c0_11] : memref<1x32xf32, #tpu.memory_space<vmem>>, vector<1x32xf32>
    %14 = vector.broadcast %13 : vector<1x32xf32> to vector<80x32xf32>
    %15 = arith.addf %12, %14 : vector<80x32xf32>
    %16 = arith.addf %1, %15 : vector<80x32xf32>
    %cst_12 = arith.constant dense<0.000000e+00> : vector<80xf32>
    %17 = vector.multi_reduction <add>, %16, %cst_12 [1] : vector<80x32xf32> to vector<80xf32>
    %18 = vector.shape_cast %17 : vector<80xf32> to vector<80x1xf32>
    %cst_13 = arith.constant 3.200000e+01 : f32
    %19 = vector.broadcast %cst_13 : f32 to vector<80x1xf32>
    %20 = arith.divf %18, %19 : vector<80x1xf32>
    %21 = vector.broadcast %20 : vector<80x1xf32> to vector<80x32xf32>
    %22 = arith.subf %16, %21 : vector<80x32xf32>
    %23 = arith.mulf %22, %22 : vector<80x32xf32>
    %cst_14 = arith.constant dense<0.000000e+00> : vector<80xf32>
    %24 = vector.multi_reduction <add>, %23, %cst_14 [1] : vector<80x32xf32> to vector<80xf32>
    %25 = vector.shape_cast %24 : vector<80xf32> to vector<80x1xf32>
    %cst_15 = arith.constant 3.200000e+01 : f32
    %26 = vector.broadcast %cst_15 : f32 to vector<80x1xf32>
    %27 = arith.divf %25, %26 : vector<80x1xf32>
    %28 = vector.broadcast %20 : vector<80x1xf32> to vector<80x32xf32>
    %29 = arith.subf %16, %28 : vector<80x32xf32>
    %cst_16 = arith.constant 9.99999974E-6 : f32
    %30 = vector.broadcast %cst_16 : f32 to vector<80x1xf32>
    %31 = arith.addf %27, %30 : vector<80x1xf32>
    %32 = math.rsqrt %31 : vector<80x1xf32>
    %33 = vector.broadcast %32 : vector<80x1xf32> to vector<80x32xf32>
    %34 = arith.mulf %29, %33 : vector<80x32xf32>
    %c0_17 = arith.constant 0 : index
    %c0_18 = arith.constant 0 : index
    %35 = vector.load %arg7[%c0_17, %c0_18] : memref<1x32xf32, #tpu.memory_space<vmem>>, vector<1x32xf32>
    %36 = vector.broadcast %35 : vector<1x32xf32> to vector<80x32xf32>
    %37 = arith.mulf %34, %36 : vector<80x32xf32>
    %c0_19 = arith.constant 0 : index
    %c0_20 = arith.constant 0 : index
    %38 = vector.load %arg8[%c0_19, %c0_20] : memref<1x32xf32, #tpu.memory_space<vmem>>, vector<1x32xf32>
    %39 = vector.broadcast %38 : vector<1x32xf32> to vector<80x32xf32>
    %40 = arith.addf %37, %39 : vector<80x32xf32>
    %c0_21 = arith.constant 0 : index
    %c0_22 = arith.constant 0 : index
    %c0_23 = arith.constant 0 : index
    %41 = vector.load %arg9[%c0_21, %c0_22, %c0_23] : memref<1x80x32xf32, #tpu.memory_space<vmem>>, vector<1x80x32xf32>
    %42 = vector.shape_cast %41 : vector<1x80x32xf32> to vector<80x32xf32>
    %43 = vector.shape_cast %40 : vector<80x32xf32> to vector<1x80x32xf32>
    tpu.vector_store %arg9[%c0_21, %c0_22, %c0_23], %43 {strides = array<i32>} : memref<1x80x32xf32, #tpu.memory_space<vmem>>, vector<1x80x32xf32>,
    return
  }
  func.func @transform_0(%arg0: i32, %arg1: i32) -> (i32, i32, i32) {
    %c0_i32 = arith.constant 0 : i32
    %c0_i32_0 = arith.constant 0 : i32
    return %arg0, %arg1, %c0_i32 : i32, i32, i32
  }
  func.func @transform_1(%arg0: i32, %arg1: i32) -> (i32, i32) {
    %c0_i32 = arith.constant 0 : i32
    %c0_i32_0 = arith.constant 0 : i32
    %c0_i32_1 = arith.constant 0 : i32
    return %c0_i32, %c0_i32_0 : i32, i32
  }
  func.func @transform_2(%arg0: i32, %arg1: i32) -> (i32, i32) {
    %c0_i32 = arith.constant 0 : i32
    %c0_i32_0 = arith.constant 0 : i32
    %c0_i32_1 = arith.constant 0 : i32
    return %c0_i32, %c0_i32_0 : i32, i32
  }
  func.func @transform_3(%arg0: i32, %arg1: i32) -> (i32, i32) {
    %c0_i32 = arith.constant 0 : i32
    %c0_i32_0 = arith.constant 0 : i32
    %c0_i32_1 = arith.constant 0 : i32
    return %c0_i32, %c0_i32_0 : i32, i32
  }
  func.func @transform_4(%arg0: i32, %arg1: i32) -> (i32, i32) {
    %c0_i32 = arith.constant 0 : i32
    %c0_i32_0 = arith.constant 0 : i32
    %c0_i32_1 = arith.constant 0 : i32
    return %c0_i32, %c0_i32_0 : i32, i32
  }
  func.func @transform_5(%arg0: i32, %arg1: i32) -> (i32, i32) {
    %c0_i32 = arith.constant 0 : i32
    %c0_i32_0 = arith.constant 0 : i32
    %c0_i32_1 = arith.constant 0 : i32
    return %c0_i32, %c0_i32_0 : i32, i32
  }
  func.func @transform_6(%arg0: i32, %arg1: i32) -> (i32, i32) {
    %c0_i32 = arith.constant 0 : i32
    %c0_i32_0 = arith.constant 0 : i32
    %c0_i32_1 = arith.constant 0 : i32
    return %c0_i32, %c0_i32_0 : i32, i32
  }
  func.func @transform_7(%arg0: i32, %arg1: i32) -> (i32, i32, i32) {
    %c0_i32 = arith.constant 0 : i32
    %c0_i32_0 = arith.constant 0 : i32
    return %arg0, %arg1, %c0_i32 : i32, i32, i32
  }
}

module attributes {stable_mosaic.version = 11 : i64} {
  func.func @_deform_attn_ln_kernel(%arg0: i32, %arg1: i32, %arg2: i32, %arg3: memref<1x1x80x48xf32, #tpu.memory_space<vmem>>, %arg4: memref<1x2x80xf32, #tpu.memory_space<vmem>>, %arg5: memref<1x80x32xbf16, #tpu.memory_space<vmem>>, %arg6: memref<1x80x32xf32, #tpu.memory_space<vmem>>, %arg7: memref<32x32xbf16, #tpu.memory_space<vmem>>, %arg8: memref<1x32xf32, #tpu.memory_space<vmem>>, %arg9: memref<1x32xf32, #tpu.memory_space<vmem>>, %arg10: memref<1x32xf32, #tpu.memory_space<vmem>>, %arg11: memref<1x80x32xf32, #tpu.memory_space<vmem>>, %arg12: memref<80x32xf32, #tpu.memory_space<vmem>>) attributes {dimension_semantics = [#tpu.dimension_semantics<parallel>, #tpu.dimension_semantics<parallel>, #tpu.dimension_semantics<arbitrary>], iteration_bounds = array<i64: 2, 1, 2>, scalar_prefetch = 0 : i64, scratch_operands = 1 : i64, tpu.core_type = #tpu.core_type<tc>, window_params = [{transform_indices = @transform_0, window_bounds = array<i64: 1, 1, 80, 48>}, {transform_indices = @transform_1, window_bounds = array<i64: 1, 2, 80>}, {transform_indices = @transform_2, window_bounds = array<i64: 1, 80, 32>}, {transform_indices = @transform_3, window_bounds = array<i64: 1, 80, 32>}, {pipeline_mode = #tpu.pipeline_mode<synchronous>, transform_indices = @transform_4, window_bounds = array<i64: 32, 32>}, {pipeline_mode = #tpu.pipeline_mode<synchronous>, transform_indices = @transform_5, window_bounds = array<i64: 1, 32>}, {pipeline_mode = #tpu.pipeline_mode<synchronous>, transform_indices = @transform_6, window_bounds = array<i64: 1, 32>}, {pipeline_mode = #tpu.pipeline_mode<synchronous>, transform_indices = @transform_7, window_bounds = array<i64: 1, 32>}, {transform_indices = @transform_8, window_bounds = array<i64: 1, 80, 32>}]} {
    %c0_i32 = arith.constant 0 : i32
    %0 = arith.cmpi eq, %arg2, %c0_i32 : i32
    %1 = arith.extui %0 : i1 to i32
    %c0_i32_0 = arith.constant 0 : i32
    %2 = arith.cmpi ne, %1, %c0_i32_0 : i32
    scf.if %2 {
      %cst_95 = arith.constant 0.000000e+00 : f32
      %424 = vector.broadcast %cst_95 : f32 to vector<80x32xf32>
      %c0_96 = arith.constant 0 : index
      %c0_97 = arith.constant 0 : index
      %425 = vector.load %arg12[%c0_96, %c0_97] : memref<80x32xf32, #tpu.memory_space<vmem>>, vector<80x32xf32>
      tpu.vector_store %arg12[%c0_96, %c0_97], %424 {strides = array<i32>} : memref<80x32xf32, #tpu.memory_space<vmem>>, vector<80x32xf32>,
    } else {
    }
    %c0 = arith.constant 0 : index
    %c0_1 = arith.constant 0 : index
    %c0_2 = arith.constant 0 : index
    %c0_3 = arith.constant 0 : index
    %3 = vector.load %arg3[%c0, %c0_1, %c0_2, %c0_3] : memref<1x1x80x48xf32, #tpu.memory_space<vmem>>, vector<1x1x80x48xf32>
    %4 = vector.shape_cast %3 : vector<1x1x80x48xf32> to vector<80x48xf32>
    %c0_4 = arith.constant 0 : index
    %c0_5 = arith.constant 0 : index
    %c0_6 = arith.constant 0 : index
    %5 = vector.load %arg4[%c0_4, %c0_5, %c0_6] : memref<1x2x80xf32, #tpu.memory_space<vmem>>, vector<1x2x80xf32>
    %6 = vector.shape_cast %5 : vector<1x2x80xf32> to vector<2x80xf32>
    %c1_i32 = arith.constant 1 : i32
    %7 = arith.cmpi eq, %arg2, %c1_i32 : i32
    %c0_i32_7 = arith.constant 0 : i32
    %c0_i32_8 = arith.constant 0 : i32
    %8 = arith.select %7, %c0_i32_7, %c0_i32_8 : i32
    %cst = arith.constant 0.000000e+00 : f32
    %9 = vector.broadcast %cst : f32 to vector<80x8xf32>
    %10 = vector.extract_strided_slice %6 {offsets = [0, 0], sizes = [1, 80], strides = [1, 1]} : vector<2x80xf32> to vector<1x80xf32>
    %11 = vector.extract_strided_slice %6 {offsets = [1, 0], sizes = [1, 80], strides = [1, 1]} : vector<2x80xf32> to vector<1x80xf32>
    %12 = vector.extract_strided_slice %4 {offsets = [0, 0], sizes = [80, 1], strides = [1, 1]} : vector<80x48xf32> to vector<80x1xf32>
    %13 = vector.extract_strided_slice %4 {offsets = [0, 16], sizes = [80, 1], strides = [1, 1]} : vector<80x48xf32> to vector<80x1xf32>
    %14 = vector.extract_strided_slice %4 {offsets = [0, 32], sizes = [80, 1], strides = [1, 1]} : vector<80x48xf32> to vector<80x1xf32>
    %15 = vector.broadcast %12 : vector<80x1xf32> to vector<80x80xf32>
    %16 = vector.broadcast %10 : vector<1x80xf32> to vector<80x80xf32>
    %17 = arith.subf %15, %16 : vector<80x80xf32>
    %18 = math.absf %17 : vector<80x80xf32>
    %cst_9 = arith.constant 1.000000e+00 : f32
    %19 = vector.broadcast %cst_9 : f32 to vector<80x80xf32>
    %20 = arith.subf %19, %18 : vector<80x80xf32>
    %cst_10 = arith.constant 0.000000e+00 : f32
    %21 = vector.broadcast %cst_10 : f32 to vector<80x80xf32>
    %22 = arith.maximumf %21, %20 : vector<80x80xf32>
    %23 = vector.broadcast %13 : vector<80x1xf32> to vector<80x80xf32>
    %24 = vector.broadcast %11 : vector<1x80xf32> to vector<80x80xf32>
    %25 = arith.subf %23, %24 : vector<80x80xf32>
    %26 = math.absf %25 : vector<80x80xf32>
    %cst_11 = arith.constant 1.000000e+00 : f32
    %27 = vector.broadcast %cst_11 : f32 to vector<80x80xf32>
    %28 = arith.subf %27, %26 : vector<80x80xf32>
    %cst_12 = arith.constant 0.000000e+00 : f32
    %29 = vector.broadcast %cst_12 : f32 to vector<80x80xf32>
    %30 = arith.maximumf %29, %28 : vector<80x80xf32>
    %31 = arith.mulf %22, %30 : vector<80x80xf32>
    %32 = vector.broadcast %14 : vector<80x1xf32> to vector<80x80xf32>
    %33 = arith.mulf %32, %31 : vector<80x80xf32>
    %34 = vector.extract_strided_slice %4 {offsets = [0, 1], sizes = [80, 1], strides = [1, 1]} : vector<80x48xf32> to vector<80x1xf32>
    %35 = vector.extract_strided_slice %4 {offsets = [0, 17], sizes = [80, 1], strides = [1, 1]} : vector<80x48xf32> to vector<80x1xf32>
    %36 = vector.extract_strided_slice %4 {offsets = [0, 33], sizes = [80, 1], strides = [1, 1]} : vector<80x48xf32> to vector<80x1xf32>
    %37 = vector.broadcast %34 : vector<80x1xf32> to vector<80x80xf32>
    %38 = vector.broadcast %10 : vector<1x80xf32> to vector<80x80xf32>
    %39 = arith.subf %37, %38 : vector<80x80xf32>
    %40 = math.absf %39 : vector<80x80xf32>
    %cst_13 = arith.constant 1.000000e+00 : f32
    %41 = vector.broadcast %cst_13 : f32 to vector<80x80xf32>
    %42 = arith.subf %41, %40 : vector<80x80xf32>
    %cst_14 = arith.constant 0.000000e+00 : f32
    %43 = vector.broadcast %cst_14 : f32 to vector<80x80xf32>
    %44 = arith.maximumf %43, %42 : vector<80x80xf32>
    %45 = vector.broadcast %35 : vector<80x1xf32> to vector<80x80xf32>
    %46 = vector.broadcast %11 : vector<1x80xf32> to vector<80x80xf32>
    %47 = arith.subf %45, %46 : vector<80x80xf32>
    %48 = math.absf %47 : vector<80x80xf32>
    %cst_15 = arith.constant 1.000000e+00 : f32
    %49 = vector.broadcast %cst_15 : f32 to vector<80x80xf32>
    %50 = arith.subf %49, %48 : vector<80x80xf32>
    %cst_16 = arith.constant 0.000000e+00 : f32
    %51 = vector.broadcast %cst_16 : f32 to vector<80x80xf32>
    %52 = arith.maximumf %51, %50 : vector<80x80xf32>
    %53 = arith.mulf %44, %52 : vector<80x80xf32>
    %54 = vector.broadcast %36 : vector<80x1xf32> to vector<80x80xf32>
    %55 = arith.mulf %54, %53 : vector<80x80xf32>
    %56 = arith.addf %33, %55 : vector<80x80xf32>
    %57 = vector.extract_strided_slice %4 {offsets = [0, 2], sizes = [80, 1], strides = [1, 1]} : vector<80x48xf32> to vector<80x1xf32>
    %58 = vector.extract_strided_slice %4 {offsets = [0, 18], sizes = [80, 1], strides = [1, 1]} : vector<80x48xf32> to vector<80x1xf32>
    %59 = vector.extract_strided_slice %4 {offsets = [0, 34], sizes = [80, 1], strides = [1, 1]} : vector<80x48xf32> to vector<80x1xf32>
    %60 = vector.broadcast %57 : vector<80x1xf32> to vector<80x80xf32>
    %61 = vector.broadcast %10 : vector<1x80xf32> to vector<80x80xf32>
    %62 = arith.subf %60, %61 : vector<80x80xf32>
    %63 = math.absf %62 : vector<80x80xf32>
    %cst_17 = arith.constant 1.000000e+00 : f32
    %64 = vector.broadcast %cst_17 : f32 to vector<80x80xf32>
    %65 = arith.subf %64, %63 : vector<80x80xf32>
    %cst_18 = arith.constant 0.000000e+00 : f32
    %66 = vector.broadcast %cst_18 : f32 to vector<80x80xf32>
    %67 = arith.maximumf %66, %65 : vector<80x80xf32>
    %68 = vector.broadcast %58 : vector<80x1xf32> to vector<80x80xf32>
    %69 = vector.broadcast %11 : vector<1x80xf32> to vector<80x80xf32>
    %70 = arith.subf %68, %69 : vector<80x80xf32>
    %71 = math.absf %70 : vector<80x80xf32>
    %cst_19 = arith.constant 1.000000e+00 : f32
    %72 = vector.broadcast %cst_19 : f32 to vector<80x80xf32>
    %73 = arith.subf %72, %71 : vector<80x80xf32>
    %cst_20 = arith.constant 0.000000e+00 : f32
    %74 = vector.broadcast %cst_20 : f32 to vector<80x80xf32>
    %75 = arith.maximumf %74, %73 : vector<80x80xf32>
    %76 = arith.mulf %67, %75 : vector<80x80xf32>
    %77 = vector.broadcast %59 : vector<80x1xf32> to vector<80x80xf32>
    %78 = arith.mulf %77, %76 : vector<80x80xf32>
    %79 = arith.addf %56, %78 : vector<80x80xf32>
    %80 = vector.extract_strided_slice %4 {offsets = [0, 3], sizes = [80, 1], strides = [1, 1]} : vector<80x48xf32> to vector<80x1xf32>
    %81 = vector.extract_strided_slice %4 {offsets = [0, 19], sizes = [80, 1], strides = [1, 1]} : vector<80x48xf32> to vector<80x1xf32>
    %82 = vector.extract_strided_slice %4 {offsets = [0, 35], sizes = [80, 1], strides = [1, 1]} : vector<80x48xf32> to vector<80x1xf32>
    %83 = vector.broadcast %80 : vector<80x1xf32> to vector<80x80xf32>
    %84 = vector.broadcast %10 : vector<1x80xf32> to vector<80x80xf32>
    %85 = arith.subf %83, %84 : vector<80x80xf32>
    %86 = math.absf %85 : vector<80x80xf32>
    %cst_21 = arith.constant 1.000000e+00 : f32
    %87 = vector.broadcast %cst_21 : f32 to vector<80x80xf32>
    %88 = arith.subf %87, %86 : vector<80x80xf32>
    %cst_22 = arith.constant 0.000000e+00 : f32
    %89 = vector.broadcast %cst_22 : f32 to vector<80x80xf32>
    %90 = arith.maximumf %89, %88 : vector<80x80xf32>
    %91 = vector.broadcast %81 : vector<80x1xf32> to vector<80x80xf32>
    %92 = vector.broadcast %11 : vector<1x80xf32> to vector<80x80xf32>
    %93 = arith.subf %91, %92 : vector<80x80xf32>
    %94 = math.absf %93 : vector<80x80xf32>
    %cst_23 = arith.constant 1.000000e+00 : f32
    %95 = vector.broadcast %cst_23 : f32 to vector<80x80xf32>
    %96 = arith.subf %95, %94 : vector<80x80xf32>
    %cst_24 = arith.constant 0.000000e+00 : f32
    %97 = vector.broadcast %cst_24 : f32 to vector<80x80xf32>
    %98 = arith.maximumf %97, %96 : vector<80x80xf32>
    %99 = arith.mulf %90, %98 : vector<80x80xf32>
    %100 = vector.broadcast %82 : vector<80x1xf32> to vector<80x80xf32>
    %101 = arith.mulf %100, %99 : vector<80x80xf32>
    %102 = arith.addf %79, %101 : vector<80x80xf32>
    %c0_i32_25 = arith.constant 0 : i32
    %103 = arith.addi %8, %c0_i32_25 : i32
    %104 = tpu.assume_multiple %103, 8 : i32
    %c0_26 = arith.constant 0 : index
    %105 = arith.index_cast %104 : i32 to index
    %c0_27 = arith.constant 0 : index
    %106 = vector.load %arg5[%c0_26, %105, %c0_27] : memref<1x80x32xbf16, #tpu.memory_space<vmem>>, vector<1x80x8xbf16>
    %107 = vector.shape_cast %106 : vector<1x80x8xbf16> to vector<80x8xbf16>
    %108 = arith.truncf %102 : vector<80x80xf32> to vector<80x80xbf16>
    %cst_28 = arith.constant dense<0.000000e+00> : vector<80x8xf32>
    %109 = tpu.matmul %108, %107, %cst_28 {dimension_numbers = #tpu.dot_dimension_numbers<[1], [0], [0], [1], [0, 0, 1, 1], [], []>} : vector<80x80xbf16>, vector<80x8xbf16>, vector<80x8xf32> -> vector<80x8xf32>
    %110 = arith.addf %9, %109 : vector<80x8xf32>
    %cst_29 = arith.constant 0.000000e+00 : f32
    %111 = vector.broadcast %cst_29 : f32 to vector<80x8xf32>
    %112 = vector.extract_strided_slice %6 {offsets = [0, 0], sizes = [1, 80], strides = [1, 1]} : vector<2x80xf32> to vector<1x80xf32>
    %113 = vector.extract_strided_slice %6 {offsets = [1, 0], sizes = [1, 80], strides = [1, 1]} : vector<2x80xf32> to vector<1x80xf32>
    %114 = vector.extract_strided_slice %4 {offsets = [0, 4], sizes = [80, 1], strides = [1, 1]} : vector<80x48xf32> to vector<80x1xf32>
    %115 = vector.extract_strided_slice %4 {offsets = [0, 20], sizes = [80, 1], strides = [1, 1]} : vector<80x48xf32> to vector<80x1xf32>
    %116 = vector.extract_strided_slice %4 {offsets = [0, 36], sizes = [80, 1], strides = [1, 1]} : vector<80x48xf32> to vector<80x1xf32>
    %117 = vector.broadcast %114 : vector<80x1xf32> to vector<80x80xf32>
    %118 = vector.broadcast %112 : vector<1x80xf32> to vector<80x80xf32>
    %119 = arith.subf %117, %118 : vector<80x80xf32>
    %120 = math.absf %119 : vector<80x80xf32>
    %cst_30 = arith.constant 1.000000e+00 : f32
    %121 = vector.broadcast %cst_30 : f32 to vector<80x80xf32>
    %122 = arith.subf %121, %120 : vector<80x80xf32>
    %cst_31 = arith.constant 0.000000e+00 : f32
    %123 = vector.broadcast %cst_31 : f32 to vector<80x80xf32>
    %124 = arith.maximumf %123, %122 : vector<80x80xf32>
    %125 = vector.broadcast %115 : vector<80x1xf32> to vector<80x80xf32>
    %126 = vector.broadcast %113 : vector<1x80xf32> to vector<80x80xf32>
    %127 = arith.subf %125, %126 : vector<80x80xf32>
    %128 = math.absf %127 : vector<80x80xf32>
    %cst_32 = arith.constant 1.000000e+00 : f32
    %129 = vector.broadcast %cst_32 : f32 to vector<80x80xf32>
    %130 = arith.subf %129, %128 : vector<80x80xf32>
    %cst_33 = arith.constant 0.000000e+00 : f32
    %131 = vector.broadcast %cst_33 : f32 to vector<80x80xf32>
    %132 = arith.maximumf %131, %130 : vector<80x80xf32>
    %133 = arith.mulf %124, %132 : vector<80x80xf32>
    %134 = vector.broadcast %116 : vector<80x1xf32> to vector<80x80xf32>
    %135 = arith.mulf %134, %133 : vector<80x80xf32>
    %136 = vector.extract_strided_slice %4 {offsets = [0, 5], sizes = [80, 1], strides = [1, 1]} : vector<80x48xf32> to vector<80x1xf32>
    %137 = vector.extract_strided_slice %4 {offsets = [0, 21], sizes = [80, 1], strides = [1, 1]} : vector<80x48xf32> to vector<80x1xf32>
    %138 = vector.extract_strided_slice %4 {offsets = [0, 37], sizes = [80, 1], strides = [1, 1]} : vector<80x48xf32> to vector<80x1xf32>
    %139 = vector.broadcast %136 : vector<80x1xf32> to vector<80x80xf32>
    %140 = vector.broadcast %112 : vector<1x80xf32> to vector<80x80xf32>
    %141 = arith.subf %139, %140 : vector<80x80xf32>
    %142 = math.absf %141 : vector<80x80xf32>
    %cst_34 = arith.constant 1.000000e+00 : f32
    %143 = vector.broadcast %cst_34 : f32 to vector<80x80xf32>
    %144 = arith.subf %143, %142 : vector<80x80xf32>
    %cst_35 = arith.constant 0.000000e+00 : f32
    %145 = vector.broadcast %cst_35 : f32 to vector<80x80xf32>
    %146 = arith.maximumf %145, %144 : vector<80x80xf32>
    %147 = vector.broadcast %137 : vector<80x1xf32> to vector<80x80xf32>
    %148 = vector.broadcast %113 : vector<1x80xf32> to vector<80x80xf32>
    %149 = arith.subf %147, %148 : vector<80x80xf32>
    %150 = math.absf %149 : vector<80x80xf32>
    %cst_36 = arith.constant 1.000000e+00 : f32
    %151 = vector.broadcast %cst_36 : f32 to vector<80x80xf32>
    %152 = arith.subf %151, %150 : vector<80x80xf32>
    %cst_37 = arith.constant 0.000000e+00 : f32
    %153 = vector.broadcast %cst_37 : f32 to vector<80x80xf32>
    %154 = arith.maximumf %153, %152 : vector<80x80xf32>
    %155 = arith.mulf %146, %154 : vector<80x80xf32>
    %156 = vector.broadcast %138 : vector<80x1xf32> to vector<80x80xf32>
    %157 = arith.mulf %156, %155 : vector<80x80xf32>
    %158 = arith.addf %135, %157 : vector<80x80xf32>
    %159 = vector.extract_strided_slice %4 {offsets = [0, 6], sizes = [80, 1], strides = [1, 1]} : vector<80x48xf32> to vector<80x1xf32>
    %160 = vector.extract_strided_slice %4 {offsets = [0, 22], sizes = [80, 1], strides = [1, 1]} : vector<80x48xf32> to vector<80x1xf32>
    %161 = vector.extract_strided_slice %4 {offsets = [0, 38], sizes = [80, 1], strides = [1, 1]} : vector<80x48xf32> to vector<80x1xf32>
    %162 = vector.broadcast %159 : vector<80x1xf32> to vector<80x80xf32>
    %163 = vector.broadcast %112 : vector<1x80xf32> to vector<80x80xf32>
    %164 = arith.subf %162, %163 : vector<80x80xf32>
    %165 = math.absf %164 : vector<80x80xf32>
    %cst_38 = arith.constant 1.000000e+00 : f32
    %166 = vector.broadcast %cst_38 : f32 to vector<80x80xf32>
    %167 = arith.subf %166, %165 : vector<80x80xf32>
    %cst_39 = arith.constant 0.000000e+00 : f32
    %168 = vector.broadcast %cst_39 : f32 to vector<80x80xf32>
    %169 = arith.maximumf %168, %167 : vector<80x80xf32>
    %170 = vector.broadcast %160 : vector<80x1xf32> to vector<80x80xf32>
    %171 = vector.broadcast %113 : vector<1x80xf32> to vector<80x80xf32>
    %172 = arith.subf %170, %171 : vector<80x80xf32>
    %173 = math.absf %172 : vector<80x80xf32>
    %cst_40 = arith.constant 1.000000e+00 : f32
    %174 = vector.broadcast %cst_40 : f32 to vector<80x80xf32>
    %175 = arith.subf %174, %173 : vector<80x80xf32>
    %cst_41 = arith.constant 0.000000e+00 : f32
    %176 = vector.broadcast %cst_41 : f32 to vector<80x80xf32>
    %177 = arith.maximumf %176, %175 : vector<80x80xf32>
    %178 = arith.mulf %169, %177 : vector<80x80xf32>
    %179 = vector.broadcast %161 : vector<80x1xf32> to vector<80x80xf32>
    %180 = arith.mulf %179, %178 : vector<80x80xf32>
    %181 = arith.addf %158, %180 : vector<80x80xf32>
    %182 = vector.extract_strided_slice %4 {offsets = [0, 7], sizes = [80, 1], strides = [1, 1]} : vector<80x48xf32> to vector<80x1xf32>
    %183 = vector.extract_strided_slice %4 {offsets = [0, 23], sizes = [80, 1], strides = [1, 1]} : vector<80x48xf32> to vector<80x1xf32>
    %184 = vector.extract_strided_slice %4 {offsets = [0, 39], sizes = [80, 1], strides = [1, 1]} : vector<80x48xf32> to vector<80x1xf32>
    %185 = vector.broadcast %182 : vector<80x1xf32> to vector<80x80xf32>
    %186 = vector.broadcast %112 : vector<1x80xf32> to vector<80x80xf32>
    %187 = arith.subf %185, %186 : vector<80x80xf32>
    %188 = math.absf %187 : vector<80x80xf32>
    %cst_42 = arith.constant 1.000000e+00 : f32
    %189 = vector.broadcast %cst_42 : f32 to vector<80x80xf32>
    %190 = arith.subf %189, %188 : vector<80x80xf32>
    %cst_43 = arith.constant 0.000000e+00 : f32
    %191 = vector.broadcast %cst_43 : f32 to vector<80x80xf32>
    %192 = arith.maximumf %191, %190 : vector<80x80xf32>
    %193 = vector.broadcast %183 : vector<80x1xf32> to vector<80x80xf32>
    %194 = vector.broadcast %113 : vector<1x80xf32> to vector<80x80xf32>
    %195 = arith.subf %193, %194 : vector<80x80xf32>
    %196 = math.absf %195 : vector<80x80xf32>
    %cst_44 = arith.constant 1.000000e+00 : f32
    %197 = vector.broadcast %cst_44 : f32 to vector<80x80xf32>
    %198 = arith.subf %197, %196 : vector<80x80xf32>
    %cst_45 = arith.constant 0.000000e+00 : f32
    %199 = vector.broadcast %cst_45 : f32 to vector<80x80xf32>
    %200 = arith.maximumf %199, %198 : vector<80x80xf32>
    %201 = arith.mulf %192, %200 : vector<80x80xf32>
    %202 = vector.broadcast %184 : vector<80x1xf32> to vector<80x80xf32>
    %203 = arith.mulf %202, %201 : vector<80x80xf32>
    %204 = arith.addf %181, %203 : vector<80x80xf32>
    %c0_i32_46 = arith.constant 0 : i32
    %205 = arith.addi %8, %c0_i32_46 : i32
    %206 = tpu.assume_multiple %205, 8 : i32
    %c0_47 = arith.constant 0 : index
    %207 = arith.index_cast %206 : i32 to index
    %c8 = arith.constant 8 : index
    %208 = vector.load %arg5[%c0_47, %207, %c8] : memref<1x80x32xbf16, #tpu.memory_space<vmem>>, vector<1x80x8xbf16>
    %209 = vector.shape_cast %208 : vector<1x80x8xbf16> to vector<80x8xbf16>
    %210 = arith.truncf %204 : vector<80x80xf32> to vector<80x80xbf16>
    %cst_48 = arith.constant dense<0.000000e+00> : vector<80x8xf32>
    %211 = tpu.matmul %210, %209, %cst_48 {dimension_numbers = #tpu.dot_dimension_numbers<[1], [0], [0], [1], [0, 0, 1, 1], [], []>} : vector<80x80xbf16>, vector<80x8xbf16>, vector<80x8xf32> -> vector<80x8xf32>
    %212 = arith.addf %111, %211 : vector<80x8xf32>
    %cst_49 = arith.constant 0.000000e+00 : f32
    %213 = vector.broadcast %cst_49 : f32 to vector<80x8xf32>
    %214 = vector.extract_strided_slice %6 {offsets = [0, 0], sizes = [1, 80], strides = [1, 1]} : vector<2x80xf32> to vector<1x80xf32>
    %215 = vector.extract_strided_slice %6 {offsets = [1, 0], sizes = [1, 80], strides = [1, 1]} : vector<2x80xf32> to vector<1x80xf32>
    %216 = vector.extract_strided_slice %4 {offsets = [0, 8], sizes = [80, 1], strides = [1, 1]} : vector<80x48xf32> to vector<80x1xf32>
    %217 = vector.extract_strided_slice %4 {offsets = [0, 24], sizes = [80, 1], strides = [1, 1]} : vector<80x48xf32> to vector<80x1xf32>
    %218 = vector.extract_strided_slice %4 {offsets = [0, 40], sizes = [80, 1], strides = [1, 1]} : vector<80x48xf32> to vector<80x1xf32>
    %219 = vector.broadcast %216 : vector<80x1xf32> to vector<80x80xf32>
    %220 = vector.broadcast %214 : vector<1x80xf32> to vector<80x80xf32>
    %221 = arith.subf %219, %220 : vector<80x80xf32>
    %222 = math.absf %221 : vector<80x80xf32>
    %cst_50 = arith.constant 1.000000e+00 : f32
    %223 = vector.broadcast %cst_50 : f32 to vector<80x80xf32>
    %224 = arith.subf %223, %222 : vector<80x80xf32>
    %cst_51 = arith.constant 0.000000e+00 : f32
    %225 = vector.broadcast %cst_51 : f32 to vector<80x80xf32>
    %226 = arith.maximumf %225, %224 : vector<80x80xf32>
    %227 = vector.broadcast %217 : vector<80x1xf32> to vector<80x80xf32>
    %228 = vector.broadcast %215 : vector<1x80xf32> to vector<80x80xf32>
    %229 = arith.subf %227, %228 : vector<80x80xf32>
    %230 = math.absf %229 : vector<80x80xf32>
    %cst_52 = arith.constant 1.000000e+00 : f32
    %231 = vector.broadcast %cst_52 : f32 to vector<80x80xf32>
    %232 = arith.subf %231, %230 : vector<80x80xf32>
    %cst_53 = arith.constant 0.000000e+00 : f32
    %233 = vector.broadcast %cst_53 : f32 to vector<80x80xf32>
    %234 = arith.maximumf %233, %232 : vector<80x80xf32>
    %235 = arith.mulf %226, %234 : vector<80x80xf32>
    %236 = vector.broadcast %218 : vector<80x1xf32> to vector<80x80xf32>
    %237 = arith.mulf %236, %235 : vector<80x80xf32>
    %238 = vector.extract_strided_slice %4 {offsets = [0, 9], sizes = [80, 1], strides = [1, 1]} : vector<80x48xf32> to vector<80x1xf32>
    %239 = vector.extract_strided_slice %4 {offsets = [0, 25], sizes = [80, 1], strides = [1, 1]} : vector<80x48xf32> to vector<80x1xf32>
    %240 = vector.extract_strided_slice %4 {offsets = [0, 41], sizes = [80, 1], strides = [1, 1]} : vector<80x48xf32> to vector<80x1xf32>
    %241 = vector.broadcast %238 : vector<80x1xf32> to vector<80x80xf32>
    %242 = vector.broadcast %214 : vector<1x80xf32> to vector<80x80xf32>
    %243 = arith.subf %241, %242 : vector<80x80xf32>
    %244 = math.absf %243 : vector<80x80xf32>
    %cst_54 = arith.constant 1.000000e+00 : f32
    %245 = vector.broadcast %cst_54 : f32 to vector<80x80xf32>
    %246 = arith.subf %245, %244 : vector<80x80xf32>
    %cst_55 = arith.constant 0.000000e+00 : f32
    %247 = vector.broadcast %cst_55 : f32 to vector<80x80xf32>
    %248 = arith.maximumf %247, %246 : vector<80x80xf32>
    %249 = vector.broadcast %239 : vector<80x1xf32> to vector<80x80xf32>
    %250 = vector.broadcast %215 : vector<1x80xf32> to vector<80x80xf32>
    %251 = arith.subf %249, %250 : vector<80x80xf32>
    %252 = math.absf %251 : vector<80x80xf32>
    %cst_56 = arith.constant 1.000000e+00 : f32
    %253 = vector.broadcast %cst_56 : f32 to vector<80x80xf32>
    %254 = arith.subf %253, %252 : vector<80x80xf32>
    %cst_57 = arith.constant 0.000000e+00 : f32
    %255 = vector.broadcast %cst_57 : f32 to vector<80x80xf32>
    %256 = arith.maximumf %255, %254 : vector<80x80xf32>
    %257 = arith.mulf %248, %256 : vector<80x80xf32>
    %258 = vector.broadcast %240 : vector<80x1xf32> to vector<80x80xf32>
    %259 = arith.mulf %258, %257 : vector<80x80xf32>
    %260 = arith.addf %237, %259 : vector<80x80xf32>
    %261 = vector.extract_strided_slice %4 {offsets = [0, 10], sizes = [80, 1], strides = [1, 1]} : vector<80x48xf32> to vector<80x1xf32>
    %262 = vector.extract_strided_slice %4 {offsets = [0, 26], sizes = [80, 1], strides = [1, 1]} : vector<80x48xf32> to vector<80x1xf32>
    %263 = vector.extract_strided_slice %4 {offsets = [0, 42], sizes = [80, 1], strides = [1, 1]} : vector<80x48xf32> to vector<80x1xf32>
    %264 = vector.broadcast %261 : vector<80x1xf32> to vector<80x80xf32>
    %265 = vector.broadcast %214 : vector<1x80xf32> to vector<80x80xf32>
    %266 = arith.subf %264, %265 : vector<80x80xf32>
    %267 = math.absf %266 : vector<80x80xf32>
    %cst_58 = arith.constant 1.000000e+00 : f32
    %268 = vector.broadcast %cst_58 : f32 to vector<80x80xf32>
    %269 = arith.subf %268, %267 : vector<80x80xf32>
    %cst_59 = arith.constant 0.000000e+00 : f32
    %270 = vector.broadcast %cst_59 : f32 to vector<80x80xf32>
    %271 = arith.maximumf %270, %269 : vector<80x80xf32>
    %272 = vector.broadcast %262 : vector<80x1xf32> to vector<80x80xf32>
    %273 = vector.broadcast %215 : vector<1x80xf32> to vector<80x80xf32>
    %274 = arith.subf %272, %273 : vector<80x80xf32>
    %275 = math.absf %274 : vector<80x80xf32>
    %cst_60 = arith.constant 1.000000e+00 : f32
    %276 = vector.broadcast %cst_60 : f32 to vector<80x80xf32>
    %277 = arith.subf %276, %275 : vector<80x80xf32>
    %cst_61 = arith.constant 0.000000e+00 : f32
    %278 = vector.broadcast %cst_61 : f32 to vector<80x80xf32>
    %279 = arith.maximumf %278, %277 : vector<80x80xf32>
    %280 = arith.mulf %271, %279 : vector<80x80xf32>
    %281 = vector.broadcast %263 : vector<80x1xf32> to vector<80x80xf32>
    %282 = arith.mulf %281, %280 : vector<80x80xf32>
    %283 = arith.addf %260, %282 : vector<80x80xf32>
    %284 = vector.extract_strided_slice %4 {offsets = [0, 11], sizes = [80, 1], strides = [1, 1]} : vector<80x48xf32> to vector<80x1xf32>
    %285 = vector.extract_strided_slice %4 {offsets = [0, 27], sizes = [80, 1], strides = [1, 1]} : vector<80x48xf32> to vector<80x1xf32>
    %286 = vector.extract_strided_slice %4 {offsets = [0, 43], sizes = [80, 1], strides = [1, 1]} : vector<80x48xf32> to vector<80x1xf32>
    %287 = vector.broadcast %284 : vector<80x1xf32> to vector<80x80xf32>
    %288 = vector.broadcast %214 : vector<1x80xf32> to vector<80x80xf32>
    %289 = arith.subf %287, %288 : vector<80x80xf32>
    %290 = math.absf %289 : vector<80x80xf32>
    %cst_62 = arith.constant 1.000000e+00 : f32
    %291 = vector.broadcast %cst_62 : f32 to vector<80x80xf32>
    %292 = arith.subf %291, %290 : vector<80x80xf32>
    %cst_63 = arith.constant 0.000000e+00 : f32
    %293 = vector.broadcast %cst_63 : f32 to vector<80x80xf32>
    %294 = arith.maximumf %293, %292 : vector<80x80xf32>
    %295 = vector.broadcast %285 : vector<80x1xf32> to vector<80x80xf32>
    %296 = vector.broadcast %215 : vector<1x80xf32> to vector<80x80xf32>
    %297 = arith.subf %295, %296 : vector<80x80xf32>
    %298 = math.absf %297 : vector<80x80xf32>
    %cst_64 = arith.constant 1.000000e+00 : f32
    %299 = vector.broadcast %cst_64 : f32 to vector<80x80xf32>
    %300 = arith.subf %299, %298 : vector<80x80xf32>
    %cst_65 = arith.constant 0.000000e+00 : f32
    %301 = vector.broadcast %cst_65 : f32 to vector<80x80xf32>
    %302 = arith.maximumf %301, %300 : vector<80x80xf32>
    %303 = arith.mulf %294, %302 : vector<80x80xf32>
    %304 = vector.broadcast %286 : vector<80x1xf32> to vector<80x80xf32>
    %305 = arith.mulf %304, %303 : vector<80x80xf32>
    %306 = arith.addf %283, %305 : vector<80x80xf32>
    %c0_i32_66 = arith.constant 0 : i32
    %307 = arith.addi %8, %c0_i32_66 : i32
    %308 = tpu.assume_multiple %307, 8 : i32
    %c0_67 = arith.constant 0 : index
    %309 = arith.index_cast %308 : i32 to index
    %c16 = arith.constant 16 : index
    %310 = vector.load %arg5[%c0_67, %309, %c16] : memref<1x80x32xbf16, #tpu.memory_space<vmem>>, vector<1x80x8xbf16>
    %311 = vector.shape_cast %310 : vector<1x80x8xbf16> to vector<80x8xbf16>
    %312 = arith.truncf %306 : vector<80x80xf32> to vector<80x80xbf16>
    %cst_68 = arith.constant dense<0.000000e+00> : vector<80x8xf32>
    %313 = tpu.matmul %312, %311, %cst_68 {dimension_numbers = #tpu.dot_dimension_numbers<[1], [0], [0], [1], [0, 0, 1, 1], [], []>} : vector<80x80xbf16>, vector<80x8xbf16>, vector<80x8xf32> -> vector<80x8xf32>
    %314 = arith.addf %213, %313 : vector<80x8xf32>
    %cst_69 = arith.constant 0.000000e+00 : f32
    %315 = vector.broadcast %cst_69 : f32 to vector<80x8xf32>
    %316 = vector.extract_strided_slice %6 {offsets = [0, 0], sizes = [1, 80], strides = [1, 1]} : vector<2x80xf32> to vector<1x80xf32>
    %317 = vector.extract_strided_slice %6 {offsets = [1, 0], sizes = [1, 80], strides = [1, 1]} : vector<2x80xf32> to vector<1x80xf32>
    %318 = vector.extract_strided_slice %4 {offsets = [0, 12], sizes = [80, 1], strides = [1, 1]} : vector<80x48xf32> to vector<80x1xf32>
    %319 = vector.extract_strided_slice %4 {offsets = [0, 28], sizes = [80, 1], strides = [1, 1]} : vector<80x48xf32> to vector<80x1xf32>
    %320 = vector.extract_strided_slice %4 {offsets = [0, 44], sizes = [80, 1], strides = [1, 1]} : vector<80x48xf32> to vector<80x1xf32>
    %321 = vector.broadcast %318 : vector<80x1xf32> to vector<80x80xf32>
    %322 = vector.broadcast %316 : vector<1x80xf32> to vector<80x80xf32>
    %323 = arith.subf %321, %322 : vector<80x80xf32>
    %324 = math.absf %323 : vector<80x80xf32>
    %cst_70 = arith.constant 1.000000e+00 : f32
    %325 = vector.broadcast %cst_70 : f32 to vector<80x80xf32>
    %326 = arith.subf %325, %324 : vector<80x80xf32>
    %cst_71 = arith.constant 0.000000e+00 : f32
    %327 = vector.broadcast %cst_71 : f32 to vector<80x80xf32>
    %328 = arith.maximumf %327, %326 : vector<80x80xf32>
    %329 = vector.broadcast %319 : vector<80x1xf32> to vector<80x80xf32>
    %330 = vector.broadcast %317 : vector<1x80xf32> to vector<80x80xf32>
    %331 = arith.subf %329, %330 : vector<80x80xf32>
    %332 = math.absf %331 : vector<80x80xf32>
    %cst_72 = arith.constant 1.000000e+00 : f32
    %333 = vector.broadcast %cst_72 : f32 to vector<80x80xf32>
    %334 = arith.subf %333, %332 : vector<80x80xf32>
    %cst_73 = arith.constant 0.000000e+00 : f32
    %335 = vector.broadcast %cst_73 : f32 to vector<80x80xf32>
    %336 = arith.maximumf %335, %334 : vector<80x80xf32>
    %337 = arith.mulf %328, %336 : vector<80x80xf32>
    %338 = vector.broadcast %320 : vector<80x1xf32> to vector<80x80xf32>
    %339 = arith.mulf %338, %337 : vector<80x80xf32>
    %340 = vector.extract_strided_slice %4 {offsets = [0, 13], sizes = [80, 1], strides = [1, 1]} : vector<80x48xf32> to vector<80x1xf32>
    %341 = vector.extract_strided_slice %4 {offsets = [0, 29], sizes = [80, 1], strides = [1, 1]} : vector<80x48xf32> to vector<80x1xf32>
    %342 = vector.extract_strided_slice %4 {offsets = [0, 45], sizes = [80, 1], strides = [1, 1]} : vector<80x48xf32> to vector<80x1xf32>
    %343 = vector.broadcast %340 : vector<80x1xf32> to vector<80x80xf32>
    %344 = vector.broadcast %316 : vector<1x80xf32> to vector<80x80xf32>
    %345 = arith.subf %343, %344 : vector<80x80xf32>
    %346 = math.absf %345 : vector<80x80xf32>
    %cst_74 = arith.constant 1.000000e+00 : f32
    %347 = vector.broadcast %cst_74 : f32 to vector<80x80xf32>
    %348 = arith.subf %347, %346 : vector<80x80xf32>
    %cst_75 = arith.constant 0.000000e+00 : f32
    %349 = vector.broadcast %cst_75 : f32 to vector<80x80xf32>
    %350 = arith.maximumf %349, %348 : vector<80x80xf32>
    %351 = vector.broadcast %341 : vector<80x1xf32> to vector<80x80xf32>
    %352 = vector.broadcast %317 : vector<1x80xf32> to vector<80x80xf32>
    %353 = arith.subf %351, %352 : vector<80x80xf32>
    %354 = math.absf %353 : vector<80x80xf32>
    %cst_76 = arith.constant 1.000000e+00 : f32
    %355 = vector.broadcast %cst_76 : f32 to vector<80x80xf32>
    %356 = arith.subf %355, %354 : vector<80x80xf32>
    %cst_77 = arith.constant 0.000000e+00 : f32
    %357 = vector.broadcast %cst_77 : f32 to vector<80x80xf32>
    %358 = arith.maximumf %357, %356 : vector<80x80xf32>
    %359 = arith.mulf %350, %358 : vector<80x80xf32>
    %360 = vector.broadcast %342 : vector<80x1xf32> to vector<80x80xf32>
    %361 = arith.mulf %360, %359 : vector<80x80xf32>
    %362 = arith.addf %339, %361 : vector<80x80xf32>
    %363 = vector.extract_strided_slice %4 {offsets = [0, 14], sizes = [80, 1], strides = [1, 1]} : vector<80x48xf32> to vector<80x1xf32>
    %364 = vector.extract_strided_slice %4 {offsets = [0, 30], sizes = [80, 1], strides = [1, 1]} : vector<80x48xf32> to vector<80x1xf32>
    %365 = vector.extract_strided_slice %4 {offsets = [0, 46], sizes = [80, 1], strides = [1, 1]} : vector<80x48xf32> to vector<80x1xf32>
    %366 = vector.broadcast %363 : vector<80x1xf32> to vector<80x80xf32>
    %367 = vector.broadcast %316 : vector<1x80xf32> to vector<80x80xf32>
    %368 = arith.subf %366, %367 : vector<80x80xf32>
    %369 = math.absf %368 : vector<80x80xf32>
    %cst_78 = arith.constant 1.000000e+00 : f32
    %370 = vector.broadcast %cst_78 : f32 to vector<80x80xf32>
    %371 = arith.subf %370, %369 : vector<80x80xf32>
    %cst_79 = arith.constant 0.000000e+00 : f32
    %372 = vector.broadcast %cst_79 : f32 to vector<80x80xf32>
    %373 = arith.maximumf %372, %371 : vector<80x80xf32>
    %374 = vector.broadcast %364 : vector<80x1xf32> to vector<80x80xf32>
    %375 = vector.broadcast %317 : vector<1x80xf32> to vector<80x80xf32>
    %376 = arith.subf %374, %375 : vector<80x80xf32>
    %377 = math.absf %376 : vector<80x80xf32>
    %cst_80 = arith.constant 1.000000e+00 : f32
    %378 = vector.broadcast %cst_80 : f32 to vector<80x80xf32>
    %379 = arith.subf %378, %377 : vector<80x80xf32>
    %cst_81 = arith.constant 0.000000e+00 : f32
    %380 = vector.broadcast %cst_81 : f32 to vector<80x80xf32>
    %381 = arith.maximumf %380, %379 : vector<80x80xf32>
    %382 = arith.mulf %373, %381 : vector<80x80xf32>
    %383 = vector.broadcast %365 : vector<80x1xf32> to vector<80x80xf32>
    %384 = arith.mulf %383, %382 : vector<80x80xf32>
    %385 = arith.addf %362, %384 : vector<80x80xf32>
    %386 = vector.extract_strided_slice %4 {offsets = [0, 15], sizes = [80, 1], strides = [1, 1]} : vector<80x48xf32> to vector<80x1xf32>
    %387 = vector.extract_strided_slice %4 {offsets = [0, 31], sizes = [80, 1], strides = [1, 1]} : vector<80x48xf32> to vector<80x1xf32>
    %388 = vector.extract_strided_slice %4 {offsets = [0, 47], sizes = [80, 1], strides = [1, 1]} : vector<80x48xf32> to vector<80x1xf32>
    %389 = vector.broadcast %386 : vector<80x1xf32> to vector<80x80xf32>
    %390 = vector.broadcast %316 : vector<1x80xf32> to vector<80x80xf32>
    %391 = arith.subf %389, %390 : vector<80x80xf32>
    %392 = math.absf %391 : vector<80x80xf32>
    %cst_82 = arith.constant 1.000000e+00 : f32
    %393 = vector.broadcast %cst_82 : f32 to vector<80x80xf32>
    %394 = arith.subf %393, %392 : vector<80x80xf32>
    %cst_83 = arith.constant 0.000000e+00 : f32
    %395 = vector.broadcast %cst_83 : f32 to vector<80x80xf32>
    %396 = arith.maximumf %395, %394 : vector<80x80xf32>
    %397 = vector.broadcast %387 : vector<80x1xf32> to vector<80x80xf32>
    %398 = vector.broadcast %317 : vector<1x80xf32> to vector<80x80xf32>
    %399 = arith.subf %397, %398 : vector<80x80xf32>
    %400 = math.absf %399 : vector<80x80xf32>
    %cst_84 = arith.constant 1.000000e+00 : f32
    %401 = vector.broadcast %cst_84 : f32 to vector<80x80xf32>
    %402 = arith.subf %401, %400 : vector<80x80xf32>
    %cst_85 = arith.constant 0.000000e+00 : f32
    %403 = vector.broadcast %cst_85 : f32 to vector<80x80xf32>
    %404 = arith.maximumf %403, %402 : vector<80x80xf32>
    %405 = arith.mulf %396, %404 : vector<80x80xf32>
    %406 = vector.broadcast %388 : vector<80x1xf32> to vector<80x80xf32>
    %407 = arith.mulf %406, %405 : vector<80x80xf32>
    %408 = arith.addf %385, %407 : vector<80x80xf32>
    %c0_i32_86 = arith.constant 0 : i32
    %409 = arith.addi %8, %c0_i32_86 : i32
    %410 = tpu.assume_multiple %409, 8 : i32
    %c0_87 = arith.constant 0 : index
    %411 = arith.index_cast %410 : i32 to index
    %c24 = arith.constant 24 : index
    %412 = vector.load %arg5[%c0_87, %411, %c24] : memref<1x80x32xbf16, #tpu.memory_space<vmem>>, vector<1x80x8xbf16>
    %413 = vector.shape_cast %412 : vector<1x80x8xbf16> to vector<80x8xbf16>
    %414 = arith.truncf %408 : vector<80x80xf32> to vector<80x80xbf16>
    %cst_88 = arith.constant dense<0.000000e+00> : vector<80x8xf32>
    %415 = tpu.matmul %414, %413, %cst_88 {dimension_numbers = #tpu.dot_dimension_numbers<[1], [0], [0], [1], [0, 0, 1, 1], [], []>} : vector<80x80xbf16>, vector<80x8xbf16>, vector<80x8xf32> -> vector<80x8xf32>
    %416 = arith.addf %315, %415 : vector<80x8xf32>
    %c0_89 = arith.constant 0 : index
    %c0_90 = arith.constant 0 : index
    %417 = vector.load %arg12[%c0_89, %c0_90] : memref<80x32xf32, #tpu.memory_space<vmem>>, vector<80x32xf32>
    %418 = tpu.concatenate %110, %212, %314, %416 in 1 : vector<80x8xf32>, vector<80x8xf32>, vector<80x8xf32>, vector<80x8xf32> -> vector<80x32xf32>
    %419 = arith.addf %417, %418 : vector<80x32xf32>
    %c0_91 = arith.constant 0 : index
    %c0_92 = arith.constant 0 : index
    %420 = vector.load %arg12[%c0_91, %c0_92] : memref<80x32xf32, #tpu.memory_space<vmem>>, vector<80x32xf32>
    tpu.vector_store %arg12[%c0_91, %c0_92], %419 {strides = array<i32>} : memref<80x32xf32, #tpu.memory_space<vmem>>, vector<80x32xf32>,
    %c1_i32_93 = arith.constant 1 : i32
    %421 = arith.cmpi eq, %arg2, %c1_i32_93 : i32
    %422 = arith.extui %421 : i1 to i32
    %c0_i32_94 = arith.constant 0 : i32
    %423 = arith.cmpi ne, %422, %c0_i32_94 : i32
    scf.if %423 {
      %c0_95 = arith.constant 0 : index
      %c0_96 = arith.constant 0 : index
      %424 = vector.load %arg12[%c0_95, %c0_96] : memref<80x32xf32, #tpu.memory_space<vmem>>, vector<80x32xf32>
      %425 = arith.truncf %424 : vector<80x32xf32> to vector<80x32xbf16>
      %c0_97 = arith.constant 0 : index
      %c0_98 = arith.constant 0 : index
      %426 = vector.load %arg7[%c0_97, %c0_98] : memref<32x32xbf16, #tpu.memory_space<vmem>>, vector<32x32xbf16>
      %cst_99 = arith.constant dense<0.000000e+00> : vector<80x32xf32>
      %427 = tpu.matmul %425, %426, %cst_99 {dimension_numbers = #tpu.dot_dimension_numbers<[1], [0], [0], [1], [0, 0, 1, 1], [], []>} : vector<80x32xbf16>, vector<32x32xbf16>, vector<80x32xf32> -> vector<80x32xf32>
      %c0_100 = arith.constant 0 : index
      %c0_101 = arith.constant 0 : index
      %428 = vector.load %arg8[%c0_100, %c0_101] : memref<1x32xf32, #tpu.memory_space<vmem>>, vector<1x32xf32>
      %429 = vector.broadcast %428 : vector<1x32xf32> to vector<80x32xf32>
      %430 = arith.addf %427, %429 : vector<80x32xf32>
      %c0_102 = arith.constant 0 : index
      %c0_103 = arith.constant 0 : index
      %c0_104 = arith.constant 0 : index
      %431 = vector.load %arg6[%c0_102, %c0_103, %c0_104] : memref<1x80x32xf32, #tpu.memory_space<vmem>>, vector<1x80x32xf32>
      %432 = vector.shape_cast %431 : vector<1x80x32xf32> to vector<80x32xf32>
      %433 = arith.addf %432, %430 : vector<80x32xf32>
      %cst_105 = arith.constant dense<0.000000e+00> : vector<80xf32>
      %434 = vector.multi_reduction <add>, %433, %cst_105 [1] : vector<80x32xf32> to vector<80xf32>
      %435 = vector.shape_cast %434 : vector<80xf32> to vector<80x1xf32>
      %cst_106 = arith.constant 3.200000e+01 : f32
      %436 = vector.broadcast %cst_106 : f32 to vector<80x1xf32>
      %437 = arith.divf %435, %436 : vector<80x1xf32>
      %438 = vector.broadcast %437 : vector<80x1xf32> to vector<80x32xf32>
      %439 = arith.subf %433, %438 : vector<80x32xf32>
      %440 = arith.mulf %439, %439 : vector<80x32xf32>
      %cst_107 = arith.constant dense<0.000000e+00> : vector<80xf32>
      %441 = vector.multi_reduction <add>, %440, %cst_107 [1] : vector<80x32xf32> to vector<80xf32>
      %442 = vector.shape_cast %441 : vector<80xf32> to vector<80x1xf32>
      %cst_108 = arith.constant 3.200000e+01 : f32
      %443 = vector.broadcast %cst_108 : f32 to vector<80x1xf32>
      %444 = arith.divf %442, %443 : vector<80x1xf32>
      %445 = vector.broadcast %437 : vector<80x1xf32> to vector<80x32xf32>
      %446 = arith.subf %433, %445 : vector<80x32xf32>
      %cst_109 = arith.constant 9.99999974E-6 : f32
      %447 = vector.broadcast %cst_109 : f32 to vector<80x1xf32>
      %448 = arith.addf %444, %447 : vector<80x1xf32>
      %449 = math.rsqrt %448 : vector<80x1xf32>
      %450 = vector.broadcast %449 : vector<80x1xf32> to vector<80x32xf32>
      %451 = arith.mulf %446, %450 : vector<80x32xf32>
      %c0_110 = arith.constant 0 : index
      %c0_111 = arith.constant 0 : index
      %452 = vector.load %arg9[%c0_110, %c0_111] : memref<1x32xf32, #tpu.memory_space<vmem>>, vector<1x32xf32>
      %453 = vector.broadcast %452 : vector<1x32xf32> to vector<80x32xf32>
      %454 = arith.mulf %451, %453 : vector<80x32xf32>
      %c0_112 = arith.constant 0 : index
      %c0_113 = arith.constant 0 : index
      %455 = vector.load %arg10[%c0_112, %c0_113] : memref<1x32xf32, #tpu.memory_space<vmem>>, vector<1x32xf32>
      %456 = vector.broadcast %455 : vector<1x32xf32> to vector<80x32xf32>
      %457 = arith.addf %454, %456 : vector<80x32xf32>
      %c0_114 = arith.constant 0 : index
      %c0_115 = arith.constant 0 : index
      %c0_116 = arith.constant 0 : index
      %458 = vector.load %arg11[%c0_114, %c0_115, %c0_116] : memref<1x80x32xf32, #tpu.memory_space<vmem>>, vector<1x80x32xf32>
      %459 = vector.shape_cast %458 : vector<1x80x32xf32> to vector<80x32xf32>
      %460 = vector.shape_cast %457 : vector<80x32xf32> to vector<1x80x32xf32>
      tpu.vector_store %arg11[%c0_114, %c0_115, %c0_116], %460 {strides = array<i32>} : memref<1x80x32xf32, #tpu.memory_space<vmem>>, vector<1x80x32xf32>,
    } else {
    }
    return
  }
  func.func @transform_0(%arg0: i32, %arg1: i32, %arg2: i32) -> (i32, i32, i32, i32) {
    %c0_i32 = arith.constant 0 : i32
    %c0_i32_0 = arith.constant 0 : i32
    return %arg0, %arg2, %arg1, %c0_i32 : i32, i32, i32, i32
  }
  func.func @transform_1(%arg0: i32, %arg1: i32, %arg2: i32) -> (i32, i32, i32) {
    %c0_i32 = arith.constant 0 : i32
    %c0_i32_0 = arith.constant 0 : i32
    %c0_i32_1 = arith.constant 0 : i32
    return %arg2, %c0_i32, %c0_i32_0 : i32, i32, i32
  }
  func.func @transform_2(%arg0: i32, %arg1: i32, %arg2: i32) -> (i32, i32, i32) {
    %c0_i32 = arith.constant 0 : i32
    %c0_i32_0 = arith.constant 0 : i32
    %c0_i32_1 = arith.constant 0 : i32
    return %arg0, %c0_i32, %c0_i32_0 : i32, i32, i32
  }
  func.func @transform_3(%arg0: i32, %arg1: i32, %arg2: i32) -> (i32, i32, i32) {
    %c0_i32 = arith.constant 0 : i32
    %c0_i32_0 = arith.constant 0 : i32
    return %arg0, %arg1, %c0_i32 : i32, i32, i32
  }
  func.func @transform_4(%arg0: i32, %arg1: i32, %arg2: i32) -> (i32, i32) {
    %c0_i32 = arith.constant 0 : i32
    %c0_i32_0 = arith.constant 0 : i32
    %c0_i32_1 = arith.constant 0 : i32
    return %c0_i32, %c0_i32_0 : i32, i32
  }
  func.func @transform_5(%arg0: i32, %arg1: i32, %arg2: i32) -> (i32, i32) {
    %c0_i32 = arith.constant 0 : i32
    %c0_i32_0 = arith.constant 0 : i32
    %c0_i32_1 = arith.constant 0 : i32
    return %c0_i32, %c0_i32_0 : i32, i32
  }
  func.func @transform_6(%arg0: i32, %arg1: i32, %arg2: i32) -> (i32, i32) {
    %c0_i32 = arith.constant 0 : i32
    %c0_i32_0 = arith.constant 0 : i32
    %c0_i32_1 = arith.constant 0 : i32
    return %c0_i32, %c0_i32_0 : i32, i32
  }
  func.func @transform_7(%arg0: i32, %arg1: i32, %arg2: i32) -> (i32, i32) {
    %c0_i32 = arith.constant 0 : i32
    %c0_i32_0 = arith.constant 0 : i32
    %c0_i32_1 = arith.constant 0 : i32
    return %c0_i32, %c0_i32_0 : i32, i32
  }
  func.func @transform_8(%arg0: i32, %arg1: i32, %arg2: i32) -> (i32, i32, i32) {
    %c0_i32 = arith.constant 0 : i32
    %c0_i32_0 = arith.constant 0 : i32
    return %arg0, %arg1, %c0_i32 : i32, i32, i32
  }
}

</mosaic_0001>

<bundles_post_ra>
// kernel: encoder_layer_forward.5
= control target key start
LH: loop header
LB: loop body
LE: loop exit
PB: predicated region body
PF: predicated region fallthrough
CT: control target
= control target key end

     0   :  { %s1077_s24 = smov 0   ;;  %s1079_s25 = smov 0   ;;  %s1339_s0 = inlined_call_operand.vmem [shape: f32[2,80,32], index: 0, kind: input, shape index: {}]   ;;  %s1340_s1 = inlined_call_operand.vmem [shape: bf16[32,64], index: 1, kind: input, shape index: {}]   ;;  %s1341_s2 = inlined_call_operand.vmem [shape: f32[1,64], index: 2, kind: input, shape index: {}]   ;;  %s1342_s3 = inlined_call_operand.vmem [shape: bf16[64,32], index: 3, kind: input, shape index: {}]   ;;  %s1343_s4 = inlined_call_operand.vmem [shape: f32[1,32], index: 4, kind: input, shape index: {}]   ;;  %s1344_s5 = inlined_call_operand.vmem [shape: f32[1,32], index: 5, kind: input, shape index: {}]   ;;  %s1345_s6 = inlined_call_operand.vmem [shape: f32[1,32], index: 6, kind: input, shape index: {}]   ;;  %s1346_s7 = inlined_call_operand.vmem [shape: f32[2,80,32], index: 7, kind: output, shape index: {}]  }
   0x1   :  { %s1081_s26 = smov 0  }
   0x2 LB: > { %s29_s27 = sadd.s32 1, %s1029_s25  ;;  %p865_p0 = scmp.ge.s32.totalorder %s1033_s26, 1  ;;  %s1033_s26 = sphi %s1081_s26, %s17_s26   ;;  %s1029_s25 = sphi %s1079_s25, %s1348_s25   ;;  %s1025_s24 = sphi %s1077_s24, %s1347_s24  }
   0x3   : > { %p31_p1 = scmp.ge.s32.totalorder %s29_s27, 2  ;;  %p258_p2 = scmp.lt.s32.totalorder %s1033_s26, 3 }
   0x5   : > { %s1350_s27 = smov (%p31_p1, %s29_s27), 0  ;;  %p259_p3 = pnand %p865_p0, %p258_p2 }
   0x6   : > { %v985_v0 = vld [vmem:[%s1340_s1] sm:$0xff] (!%p259_p3)   ;;  %v1035_v1 = vmov (!%p259_p3), 0.0   ;;  %v986_v2 = vld [vmem:[%s1340_s1 + $0x8] sm:$0xff] (!%p259_p3)   ;;  %vm1036_vm0 = vmmov (!%p259_p3), 0   ;;  %p299_p4 = scmp.lt.s32.totalorder (!%p259_p3), %s1025_s24, 1  ;;  %vm357_vm1 = vcmask (!%p259_p3), 261120  }
   0x7   : > { %262 = sbr.rel (%p259_p3) target bundleno = 805 (0x325), region = 48  ;;  %906 = vmatprep.subr.bf16.mxu0 (!%p259_p3), %v1035_v1  ;;  %930 = vmatprep.subr.bf16.mxu1 (!%p259_p3), %v1035_v1  ;;  %v987_v3 = vld [vmem:[%s1342_s3] sm:$0xff] (!%p259_p3)   ;;  %v988_v4 = vld [vmem:[%s1342_s3 + $0x8] sm:$0xff] (!%p259_p3)   ;;  %v989_v20 = vld [vmem:[%s1342_s3 + $0x10] sm:$0xff] (!%p259_p3)   ;;  %vm500_vm2 = vcmask (!%p259_p3), 523264  }
   0x8   : > { %907 = vmatpush3.bf16.msra.mxu0 (!%p259_p3), %v985_v0  ;;  %910 = vmatprep.mubr.msk.bf16.mxu0 (!%p259_p3), %vm1036_vm0, %v1035_v1  ;;  %v990_v21 = vld [vmem:[%s1342_s3 + $0x18] sm:$0xff] (!%p259_p3)   ;;  %v868_v22 = vld [vmem:[%s1341_s2] ss:$0 sm:$0xff] (!%p259_p3) }
   0x9   : > { %908 = vmatprep.subr.bf16.mxu0 (!%p259_p3), %v1035_v1  ;;  %938 = vmatprep.mubr.msk.bf16.mxu1 (!%p259_p3), %vm1036_vm0, %v1035_v1 }
   0xa   : > { %931 = vmatpush3.bf16.msra.mxu1 (!%p259_p3), %v987_v3 }
   0xb   : > { %932 = vmatprep.subr.bf16.mxu1 (!%p259_p3), %v1035_v1 }
   0xc   : > { %909 = vmatpush3.bf16.msra.mxu0 (!%p259_p3), %v986_v2 }
   0xe   : > { %s1352_s24 = smov (!%p299_p4, %s1025_s24), 1  ;;  %933 = vmatpush3.bf16.msra.mxu1 %v988_v4 }
   0xf   : > { %s958_s13 = smul.u32 80, %s1352_s24  ;;  %934 = vmatprep.subr.bf16.mxu1 %v1035_v1 }
  0x11   : > { %s306_s16 = scalar_lea.vmem %s1339_s0, %s958_s13  ;;  %s1280_s12 = scalar_lea.vmem %s1346_s7, %s958_s13 }
  0x12   : > { %v1123_v5 = vld [vmem:[%s306_s16] sm:$0xff]  ;;  %v1125_v6 = vld [vmem:[%s306_s16 + $0x8] sm:$0xff]  ;;  %v1133_v8 = vld [vmem:[%s306_s16 + $0x10] sm:$0xff]  ;;  %935 = vmatpush3.bf16.msra.mxu1 %v989_v20 }
  0x13   : > { %v329_v7 = vpack.c.bf16 %v1125_v6, %v1123_v5  ;;  %v1135_v9 = vld [vmem:[%s306_s16 + $0x18] sm:$0xff]  ;;  %v1142_v11 = vld [vmem:[%s306_s16 + $0x20] sm:$0xff]  ;;  %v1144_v12 = vld [vmem:[%s306_s16 + $0x28] sm:$0xff]  ;;  %936 = vmatprep.subr.bf16.mxu1 %v1035_v1 }
  0x14   : > { %v330_v10 = vpack.c.bf16 %v1135_v9, %v1133_v8  ;;  %v331_v13 = vpack.c.bf16 %v1144_v12, %v1142_v11  ;;  %v1151_v14 = vld [vmem:[%s306_s16 + $0x30] sm:$0xff]  ;;  %v1153_v15 = vld [vmem:[%s306_s16 + $0x38] sm:$0xff]  ;;  %v1160_v17 = vld [vmem:[%s306_s16 + $0x40] sm:$0xff] }
  0x15   : > { %911 = vmatmul.mubr.msk.bf16.vlgmr.msra.gmra.mrb[0].mxu0 %vm357_vm1, %v329_v7  ;;  %v332_v16 = vpack.c.bf16 %v1153_v15, %v1151_v14  ;;  %v1162_v18 = vld [vmem:[%s306_s16 + $0x48] sm:$0xff]  ;;  %v876_v7 = vld [vmem:[%s1343_s4] ss:$0 sm:$0xff] }
  0x16   : > { %914 = vmatprep.mubr.msk.bf16.mxu0 %vm1036_vm0, %v1035_v1  ;;  %v333_v19 = vpack.c.bf16 %v1162_v18, %v1160_v17  ;;  %937 = vmatpush3.bf16.msra.mxu1 %v990_v21 }
  0x1d   : > { %915 = vmatmul.mubr.msk.bf16.gmra.mrb[4].mxu0 %vm357_vm1, %v330_v10 }
  0x1e   : > { %918 = vmatprep.mubr.msk.bf16.mxu0 %vm1036_vm0, %v1035_v1 }
  0x25   : > { %919 = vmatmul.mubr.msk.bf16.gmra.mrb[8].mxu0 %vm357_vm1, %v331_v13 }
  0x26   : > { %922 = vmatprep.mubr.msk.bf16.mxu0 %vm1036_vm0, %v1035_v1 }
  0x2d   : > { %923 = vmatmul.mubr.msk.bf16.gmra.mrb[12].mxu0 %vm357_vm1, %v332_v16 }
  0x2e   : > { %926 = vmatprep.mubr.msk.bf16.mxu0 %vm1036_vm0, %v1035_v1 }
  0x35   : > { %927 = vmatmul.mubr.msk.bf16.gmra.mrb[16].mxu0 %vm357_vm1, %v333_v19 }
  0xe8   : > { %v407_v23 = vpop.f32.mrb[0].mxu0 }
  0xe9   : > { %v408_v24 = vadd.f32 %v868_v22, %v407_v23  ;;  %v912_v25 = vpop.f32.mrb[1].mxu0 }
  0xea   : > { %v410_v26 = vpop.f32.mrb[2].mxu0 }
  0xeb   : > { %v411_v27 = vadd.f32 %v868_v22, %v410_v26  ;;  %v913_v28 = vpop.f32.mrb[3].mxu0  ;;  %v446_v29 = vmax.f32 %v408_v24, 0.0 }
  0xed   : > { %v447_v30 = vmax.f32 %v411_v27, 0.0 }
  0xef   : > { %v456_v31 = vpack.c.bf16 %v447_v30, %v446_v29 }
  0xf0   : > { %v415_v32 = vpop.f32.mrb[4].mxu0 }
  0xf1   : > { %v416_v33 = vadd.f32 %v868_v22, %v415_v32  ;;  %v916_v34 = vpop.f32.mrb[5].mxu0  ;;  %939 = vmatmul.mubr.msk.bf16.vlgmr.msra.gmra.mrb[0].mxu1 %vm500_vm2, %v456_v31 }
  0xf2   : > { %v418_v35 = vpop.f32.mrb[6].mxu0  ;;  %942 = vmatprep.mubr.msk.bf16.mxu1 %vm1036_vm0, %v1035_v1 }
  0xf3   : > { %v419_v36 = vadd.f32 %v868_v22, %v418_v35  ;;  %v917_v37 = vpop.f32.mrb[7].mxu0  ;;  %v448_v38 = vmax.f32 %v416_v33, 0.0 }
  0xf5   : > { %v449_v39 = vmax.f32 %v419_v36, 0.0 }
  0xf7   : > { %v457_v40 = vpack.c.bf16 %v449_v39, %v448_v38 }
  0xf8   : > { %v423_v41 = vpop.f32.mrb[8].mxu0 }
  0xf9   : > { %v424_v42 = vadd.f32 %v868_v22, %v423_v41  ;;  %v920_v43 = vpop.f32.mrb[9].mxu0  ;;  %943 = vmatmul.mubr.msk.bf16.gmra.mrb[4].mxu1 %vm500_vm2, %v457_v40 }
  0xfa   : > { %v426_v44 = vpop.f32.mrb[10].mxu0  ;;  %946 = vmatprep.mubr.msk.bf16.mxu1 %vm1036_vm0, %v1035_v1 }
  0xfb   : > { %v427_v45 = vadd.f32 %v868_v22, %v426_v44  ;;  %v921_v46 = vpop.f32.mrb[11].mxu0  ;;  %v450_v47 = vmax.f32 %v424_v42, 0.0 }
  0xfd   : > { %v451_v48 = vmax.f32 %v427_v45, 0.0 }
  0xff   : > { %v458_v49 = vpack.c.bf16 %v451_v48, %v450_v47 }
 0x100   : > { %v431_v50 = vpop.f32.mrb[12].mxu0 }
 0x101   : > { %v432_v51 = vadd.f32 %v868_v22, %v431_v50  ;;  %v924_v52 = vpop.f32.mrb[13].mxu0  ;;  %947 = vmatmul.mubr.msk.bf16.gmra.mrb[8].mxu1 %vm500_vm2, %v458_v49 }
 0x102   : > { %v434_v53 = vpop.f32.mrb[14].mxu0  ;;  %950 = vmatprep.mubr.msk.bf16.mxu1 %vm1036_vm0, %v1035_v1 }
 0x103   : > { %v435_v54 = vadd.f32 %v868_v22, %v434_v53  ;;  %v925_v55 = vpop.f32.mrb[15].mxu0  ;;  %v452_v56 = vmax.f32 %v432_v51, 0.0 }
 0x105   : > { %v453_v57 = vmax.f32 %v435_v54, 0.0 }
 0x107   : > { %v459_v58 = vpack.c.bf16 %v453_v57, %v452_v56 }
 0x108   : > { %v439_v59 = vpop.f32.mrb[16].mxu0 }
 0x109   : > { %v440_v60 = vadd.f32 %v868_v22, %v439_v59  ;;  %v928_v61 = vpop.f32.mrb[17].mxu0  ;;  %951 = vmatmul.mubr.msk.bf16.gmra.mrb[12].mxu1 %vm500_vm2, %v459_v58 }
 0x10a   : > { %v442_v62 = vpop.f32.mrb[18].mxu0  ;;  %954 = vmatprep.mubr.msk.bf16.mxu1 %vm1036_vm0, %v1035_v1 }
 0x10b   : > { %v443_v63 = vadd.f32 %v868_v22, %v442_v62  ;;  %v929_v0 = vpop.f32.mrb[19].mxu0  ;;  %v454_v2 = vmax.f32 %v440_v60, 0.0 }
 0x10d   : > { %v455_v3 = vmax.f32 %v443_v63, 0.0 }
 0x10f   : > { %v460_v4 = vpack.c.bf16 %v455_v3, %v454_v2 }
 0x111   : > { %955 = vmatmul.mubr.msk.bf16.gmra.mrb[16].mxu1 %vm500_vm2, %v460_v4 }
 0x1c4   : > { %v550_v10 = vpop.f32.mrb[0].mxu1 }
 0x1c5   : > { %v551_v13 = vadd.f32 %v876_v7, %v550_v10  ;;  %v940_v16 = vpop.f32.mrb[1].mxu1 }
 0x1c6   : > { %v553_v19 = vpop.f32.mrb[2].mxu1 }
 0x1c7   : > { %v554_v20 = vadd.f32 %v876_v7, %v553_v19  ;;  %v941_v21 = vpop.f32.mrb[3].mxu1  ;;  %v589_v23 = vadd.f32 %v551_v13, %v1123_v5 }
 0x1c9   : > { %v599_v1 = vsel %vm357_vm1, %v589_v23, 0.0  ;;  %v590_v22 = vadd.f32 %v554_v20, %v1125_v6 }
 0x1ca   : > { %600 = vadd.xlane.f32.xlu0 %v599_v1 }
 0x1cb   : > { %v602_v27 = vsel %vm357_vm1, %v590_v22, 0.0 }
 0x1cc   : > { %v558_v24 = vpop.f32.mrb[4].mxu1 }
 0x1cd   : > { %v559_v25 = vadd.f32 %v876_v7, %v558_v24  ;;  %v944_v26 = vpop.f32.mrb[5].mxu1 }
 0x1ce   : > { %603 = vadd.xlane.f32.xlu0 %v602_v27  ;;  %v561_v28 = vpop.f32.mrb[6].mxu1 }
 0x1cf   : > { %v562_v29 = vadd.f32 %v876_v7, %v561_v28  ;;  %v945_v30 = vpop.f32.mrb[7].mxu1  ;;  %v591_v31 = vadd.f32 %v559_v25, %v1133_v8 }
 0x1d1   : > { %v605_v32 = vsel %vm357_vm1, %v591_v31, 0.0  ;;  %v592_v5 = vadd.f32 %v562_v29, %v1135_v9 }
 0x1d2   : > { %606 = vadd.xlane.f32.xlu1 %v605_v32 }
 0x1d3   : > { %v608_v35 = vsel %vm357_vm1, %v592_v5, 0.0 }
 0x1d4   : > { %v566_v33 = vpop.f32.mrb[8].mxu1 }
 0x1d5   : > { %v567_v34 = vadd.f32 %v876_v7, %v566_v33  ;;  %v948_v6 = vpop.f32.mrb[9].mxu1 }
 0x1d6   : > { %609 = vadd.xlane.f32.xlu1 %v608_v35  ;;  %v569_v36 = vpop.f32.mrb[10].mxu1 }
 0x1d7   : > { %v570_v37 = vadd.f32 %v876_v7, %v569_v36  ;;  %v949_v38 = vpop.f32.mrb[11].mxu1  ;;  %v593_v39 = vadd.f32 %v567_v34, %v1142_v11 }
 0x1d9   : > { %v611_v40 = vsel %vm357_vm1, %v593_v39, 0.0  ;;  %v594_v8 = vadd.f32 %v570_v37, %v1144_v12 }
 0x1da   : > { %612 = vadd.xlane.f32.xlu0 %v611_v40 }
 0x1db   : > { %v614_v41 = vsel %vm357_vm1, %v594_v8, 0.0 }
 0x1dc   : > { %615 = vadd.xlane.f32.xlu1 %v614_v41  ;;  %v574_v9 = vpop.f32.mrb[12].mxu1 }
 0x1dd   : > { %v575_v42 = vadd.f32 %v876_v7, %v574_v9  ;;  %v952_v43 = vpop.f32.mrb[13].mxu1 }
 0x1de   : > { %v577_v44 = vpop.f32.mrb[14].mxu1 }
 0x1df   : > { %v578_v45 = vadd.f32 %v876_v7, %v577_v44  ;;  %v953_v46 = vpop.f32.mrb[15].mxu1  ;;  %v595_v47 = vadd.f32 %v575_v42, %v1151_v14 }
 0x1e1   : > { %v617_v48 = vsel %vm357_vm1, %v595_v47, 0.0  ;;  %v596_v11 = vadd.f32 %v578_v45, %v1153_v15 }
 0x1e2   : > { %618 = vadd.xlane.f32.xlu0 %v617_v48 }
 0x1e3   : > { %v620_v49 = vsel %vm357_vm1, %v596_v11, 0.0 }
 0x1e4   : > { %621 = vadd.xlane.f32.xlu1 %v620_v49  ;;  %v582_v12 = vpop.f32.mrb[16].mxu1 }
 0x1e5   : > { %v583_v50 = vadd.f32 %v876_v7, %v582_v12  ;;  %v956_v51 = vpop.f32.mrb[17].mxu1 }
 0x1e6   : > { %v585_v52 = vpop.f32.mrb[18].mxu1 }
 0x1e7   : > { %v586_v53 = vadd.f32 %v876_v7, %v585_v52  ;;  %v957_v54 = vpop.f32.mrb[19].mxu1  ;;  %v597_v55 = vadd.f32 %v583_v50, %v1160_v17 }
 0x1e9   : > { %v623_v56 = vsel %vm357_vm1, %v597_v55, 0.0  ;;  %v598_v14 = vadd.f32 %v586_v53, %v1162_v18 }
 0x1ea   : > { %624 = vadd.xlane.f32.xlu0 %v623_v56 }
 0x1eb   : > { %v626_v57 = vsel %vm357_vm1, %v598_v14, 0.0 }
 0x1ec   : > { %627 = vadd.xlane.f32.xlu1 %v626_v57 }
 0x257   : > { %v601_v15 = vpop.xlane.xlu0 %600 }
 0x258   : > { %v630_v58 = vmul.f32 0.03125, %v601_v15 }
 0x25a   : > { %v1213_v59 = vsub.f32 %v589_v23, %v630_v58 }
 0x25b   : > { %v604_v60 = vpop.xlane.xlu0 %603 }
 0x25c   : > { %v631_v61 = vmul.f32 0.03125, %v604_v60  ;;  %v650_v62 = vmul.f32 %v1213_v59, %v1213_v59  ;;  %v1272_v60 = vld [vmem:[%s1345_s6] ss:$0 sm:$0xff] }
 0x25e   : > { %v1217_v63 = vsub.f32 %v590_v22, %v631_v61  ;;  %v660_v17 = vsel %vm357_vm1, %v650_v62, 0.0 }
 0x25f   : > { %v607_v0 = vpop.xlane.xlu1 %606  ;;  %661 = vadd.xlane.f32.xlu0 %v660_v17 }
 0x260   : > { %v632_v18 = vmul.f32 0.03125, %v607_v0  ;;  %v651_v2 = vmul.f32 %v1217_v63, %v1217_v63 }
 0x262   : > { %v1222_v3 = vsub.f32 %v591_v31, %v632_v18  ;;  %v663_v4 = vsel %vm357_vm1, %v651_v2, 0.0 }
 0x263   : > { %v610_v7 = vpop.xlane.xlu1 %609  ;;  %664 = vadd.xlane.f32.xlu1 %v663_v4 }
 0x264   : > { %v633_v10 = vmul.f32 0.03125, %v610_v7  ;;  %v652_v13 = vmul.f32 %v1222_v3, %v1222_v3 }
 0x266   : > { %v1227_v16 = vsub.f32 %v592_v5, %v633_v10  ;;  %v666_v19 = vsel %vm357_vm1, %v652_v13, 0.0 }
 0x267   : > { %v613_v20 = vpop.xlane.xlu0 %612  ;;  %667 = vadd.xlane.f32.xlu0 %v666_v19 }
 0x268   : > { %v634_v21 = vmul.f32 0.03125, %v613_v20  ;;  %v653_v23 = vmul.f32 %v1227_v16, %v1227_v16 }
 0x269   : > { %v616_v1 = vpop.xlane.xlu1 %615 }
 0x26a   : > { %v1232_v22 = vsub.f32 %v593_v39, %v634_v21  ;;  %v635_v24 = vmul.f32 0.03125, %v616_v1  ;;  %v669_v25 = vsel %vm357_vm1, %v653_v23, 0.0 }
 0x26b   : > { %670 = vadd.xlane.f32.xlu1 %v669_v25 }
 0x26c   : > { %v1235_v26 = vsub.f32 %v594_v8, %v635_v24  ;;  %v654_v27 = vmul.f32 %v1232_v22, %v1232_v22 }
 0x26e   : > { %v672_v28 = vsel %vm357_vm1, %v654_v27, 0.0  ;;  %v655_v29 = vmul.f32 %v1235_v26, %v1235_v26 }
 0x26f   : > { %v619_v30 = vpop.xlane.xlu0 %618  ;;  %673 = vadd.xlane.f32.xlu0 %v672_v28 }
 0x270   : > { %v636_v31 = vmul.f32 0.03125, %v619_v30  ;;  %v675_v32 = vsel %vm357_vm1, %v655_v29, 0.0 }
 0x271   : > { %v622_v5 = vpop.xlane.xlu1 %621  ;;  %676 = vadd.xlane.f32.xlu1 %v675_v32 }
 0x272   : > { %v1243_v33 = vsub.f32 %v595_v47, %v636_v31  ;;  %v637_v34 = vmul.f32 0.03125, %v622_v5 }
 0x274   : > { %v1245_v6 = vsub.f32 %v596_v11, %v637_v34  ;;  %v656_v35 = vmul.f32 %v1243_v33, %v1243_v33 }
 0x276   : > { %v678_v36 = vsel %vm357_vm1, %v656_v35, 0.0  ;;  %v657_v37 = vmul.f32 %v1245_v6, %v1245_v6 }
 0x277   : > { %679 = vadd.xlane.f32.xlu0 %v678_v36  ;;  %v625_v38 = vpop.xlane.xlu0 %624 }
 0x278   : > { %v638_v39 = vmul.f32 0.03125, %v625_v38  ;;  %v681_v40 = vsel %vm357_vm1, %v657_v37, 0.0 }
 0x279   : > { %682 = vadd.xlane.f32.xlu1 %v681_v40  ;;  %v628_v8 = vpop.xlane.xlu1 %627 }
 0x27a   : > { %v1253_v41 = vsub.f32 %v597_v55, %v638_v39  ;;  %v639_v9 = vmul.f32 0.03125, %v628_v8 }
 0x27c   : > { %v1255_v42 = vsub.f32 %v598_v14, %v639_v9  ;;  %v658_v43 = vmul.f32 %v1253_v41, %v1253_v41  ;;  %v1266_v14 = vld [vmem:[%s1344_s5] ss:$0 sm:$0xff] }
 0x27e   : > { %v684_v44 = vsel %vm357_vm1, %v658_v43, 0.0  ;;  %v659_v45 = vmul.f32 %v1255_v42, %v1255_v42 }
 0x27f   : > { %685 = vadd.xlane.f32.xlu0 %v684_v44 }
 0x280   : > { %v687_v46 = vsel %vm357_vm1, %v659_v45, 0.0 }
 0x281   : > { %688 = vadd.xlane.f32.xlu1 %v687_v46 }
 0x2ec   : > { %v662_v47 = vpop.xlane.xlu0 %661 }
 0x2ed   : > { %v690_v48 = vmul.f32 0.03125, %v662_v47 }
 0x2ef   : > { %v700_v11 = vadd.f32 1e-05, %v690_v48 }
 0x2f0   : > { %v665_v49 = vpop.xlane.xlu1 %664 }
 0x2f1   : > { %991 = vrsqrt.f32 %v700_v11  ;;  %v691_v12 = vmul.f32 0.03125, %v665_v49 }
 0x2f3   : > { %v701_v50 = vadd.f32 1e-05, %v691_v12 }
 0x2f4   : > { %v668_v51 = vpop.xlane.xlu0 %667 }
 0x2f5   : > { %993 = vrsqrt.f32 %v701_v50  ;;  %v692_v52 = vmul.f32 0.03125, %v668_v51 }
 0x2f7   : > { %v702_v53 = vadd.f32 1e-05, %v692_v52 }
 0x2f8   : > { %v671_v54 = vpop.xlane.xlu1 %670 }
 0x2f9   : > { %995 = vrsqrt.f32 %v702_v53  ;;  %v693_v55 = vmul.f32 0.03125, %v671_v54 }
 0x2fb   : > { %v992_v56 = vpop.eup %991  ;;  %v703_v57 = vadd.f32 1e-05, %v693_v55 }
 0x2fc   : > { %v720_v15 = vmul.f32 %v992_v56, %v1213_v59  ;;  %v674_v58 = vpop.xlane.xlu0 %673 }
 0x2fd   : > { %997 = vrsqrt.f32 %v703_v57  ;;  %v694_v61 = vmul.f32 0.03125, %v674_v58 }
 0x2fe   : > { %v737_v62 = vmul.f32 %v1266_v14, %v720_v15  ;;  %v677_v17 = vpop.xlane.xlu1 %676 }
 0x2ff   : > { %v994_v0 = vpop.eup %993  ;;  %v704_v59 = vadd.f32 1e-05, %v694_v61  ;;  %v695_v18 = vmul.f32 0.03125, %v677_v17 }
 0x300   : > { %v754_v2 = vadd.f32 %v1272_v60, %v737_v62  ;;  %v721_v4 = vmul.f32 %v994_v0, %v1217_v63 }
 0x301   : > { %999 = vrsqrt.f32 %v704_v59  ;;  %v705_v7 = vadd.f32 1e-05, %v695_v18 }
 0x302   : > { %764 = vst.msk [vmem:[%s1280_s12] sm:$0xff] %vm357_vm1, %v754_v2  ;;  %v738_v10 = vmul.f32 %v1266_v14, %v721_v4 }
 0x303   : > { %v996_v13 = vpop.eup %995  ;;  %1001 = vrsqrt.f32 %v705_v7 }
 0x304   : > { %v755_v19 = vadd.f32 %v1272_v60, %v738_v10  ;;  %v722_v20 = vmul.f32 %v996_v13, %v1222_v3  ;;  %v680_v21 = vpop.xlane.xlu0 %679 }
 0x305   : > { %v696_v23 = vmul.f32 0.03125, %v680_v21 }
 0x306   : > { %765 = vst.msk [vmem:[%s1280_s12 + $0x8] sm:$0xff] %vm357_vm1, %v755_v19  ;;  %v739_v1 = vmul.f32 %v1266_v14, %v722_v20  ;;  %v683_v63 = vpop.xlane.xlu1 %682 }
 0x307   : > { %v998_v24 = vpop.eup %997  ;;  %v706_v25 = vadd.f32 1e-05, %v696_v23  ;;  %v697_v27 = vmul.f32 0.03125, %v683_v63 }
 0x308   : > { %v756_v28 = vadd.f32 %v1272_v60, %v739_v1  ;;  %v723_v29 = vmul.f32 %v998_v24, %v1227_v16 }
 0x309   : > { %1003 = vrsqrt.f32 %v706_v25  ;;  %v707_v30 = vadd.f32 1e-05, %v697_v27 }
 0x30a   : > { %766 = vst.msk [vmem:[%s1280_s12 + $0x10] sm:$0xff] %vm357_vm1, %v756_v28  ;;  %v740_v3 = vmul.f32 %v1266_v14, %v723_v29 }
 0x30b   : > { %v1000_v31 = vpop.eup %999  ;;  %1005 = vrsqrt.f32 %v707_v30 }
 0x30c   : > { %v757_v32 = vadd.f32 %v1272_v60, %v740_v3  ;;  %v724_v5 = vmul.f32 %v1000_v31, %v1232_v22  ;;  %v686_v34 = vpop.xlane.xlu0 %685 }
 0x30d   : > { %v1002_v35 = vpop.eup %1001  ;;  %v698_v36 = vmul.f32 0.03125, %v686_v34 }
 0x30e   : > { %767 = vst.msk [vmem:[%s1280_s12 + $0x18] sm:$0xff] %vm357_vm1, %v757_v32  ;;  %v741_v16 = vmul.f32 %v1266_v14, %v724_v5  ;;  %v725_v37 = vmul.f32 %v1002_v35, %v1235_v26  ;;  %v689_v38 = vpop.xlane.xlu1 %688 }
 0x30f   : > { %v708_v39 = vadd.f32 1e-05, %v698_v36  ;;  %v699_v40 = vmul.f32 0.03125, %v689_v38 }
 0x310   : > { %v758_v8 = vadd.f32 %v1272_v60, %v741_v16  ;;  %v742_v9 = vmul.f32 %v1266_v14, %v725_v37 }
 0x311   : > { %1007 = vrsqrt.f32 %v708_v39  ;;  %v709_v22 = vadd.f32 1e-05, %v699_v40 }
 0x312   : > { %768 = vst.msk [vmem:[%s1280_s12 + $0x20] sm:$0xff] %vm357_vm1, %v758_v8  ;;  %v759_v43 = vadd.f32 %v1272_v60, %v742_v9 }
 0x313   : > { %v1004_v44 = vpop.eup %1003  ;;  %1009 = vrsqrt.f32 %v709_v22 }
 0x314   : > { %769 = vst.msk [vmem:[%s1280_s12 + $0x28] sm:$0xff] %vm357_vm1, %v759_v43  ;;  %v726_v26 = vmul.f32 %v1004_v44, %v1243_v33 }
 0x315   : > { %v1006_v45 = vpop.eup %1005 }
 0x316   : > { %v743_v46 = vmul.f32 %v1266_v14, %v726_v26  ;;  %v727_v47 = vmul.f32 %v1006_v45, %v1245_v6 }
 0x318   : > { %v760_v48 = vadd.f32 %v1272_v60, %v743_v46  ;;  %v744_v11 = vmul.f32 %v1266_v14, %v727_v47 }
 0x31a   : > { %770 = vst.msk [vmem:[%s1280_s12 + $0x30] sm:$0xff] %vm357_vm1, %v760_v48  ;;  %v761_v49 = vadd.f32 %v1272_v60, %v744_v11 }
 0x31b   : > { %v1008_v12 = vpop.eup %1007 }
 0x31c   : > { %771 = vst.msk [vmem:[%s1280_s12 + $0x38] sm:$0xff] %vm357_vm1, %v761_v49  ;;  %v728_v33 = vmul.f32 %v1008_v12, %v1253_v41 }
 0x31d   : > { %v1010_v50 = vpop.eup %1009 }
 0x31e   : > { %v745_v51 = vmul.f32 %v1266_v14, %v728_v33  ;;  %v729_v52 = vmul.f32 %v1010_v50, %v1255_v42 }
 0x320   : > { %v762_v6 = vadd.f32 %v1272_v60, %v745_v51  ;;  %v746_v53 = vmul.f32 %v1266_v14, %v729_v52 }
 0x322   : > { %772 = vst.msk [vmem:[%s1280_s12 + $0x40] sm:$0xff] %vm357_vm1, %v762_v6  ;;  %v763_v54 = vadd.f32 %v1272_v60, %v746_v53 }
 0x324   : > { %773 = vst.msk [vmem:[%s1280_s12 + $0x48] sm:$0xff] %vm357_vm1, %v763_v54 }
 0x325 PF: > { %s17_s26 = sadd.s32 1, %s1033_s26   ;;  %s1347_s24 = smov %s1029_s25 }
 0x326   : > { %p14_p5 = scmp.ge.s32.totalorder %s17_s26, 4   ;;  %s1348_s25 = smov %s1350_s27 }
 0x328   :  { %16 = sbr.rel (!%p14_p5) target bundleno = 2 (0x2), region = 78 }

// kernel: encoder_layer_forward.3
= control target key start
LH: loop header
LB: loop body
LE: loop exit
PB: predicated region body
PF: predicated region fallthrough
CT: control target
= control target key end

     0   :  { %s2367_s13 = smov 0   ;;  %s2369_s14 = smov 0   ;;  %s2951_s0 = inlined_call_operand.vmem [shape: f32[2,80,32], index: 0, kind: input, shape index: {}]   ;;  %s2952_s1 = inlined_call_operand.vmem [shape: f32[2,80,32], index: 1, kind: input, shape index: {}]   ;;  %s2953_s2 = inlined_call_operand.vmem [shape: f32[2,80,4], index: 2, kind: input, shape index: {}]   ;;  %s2954_s3 = inlined_call_operand.vmem [shape: bf16[32,32], index: 3, kind: input, shape index: {}]   ;;  %s2955_s4 = inlined_call_operand.vmem [shape: f32[1,32], index: 4, kind: input, shape index: {}]   ;;  %s2956_s5 = inlined_call_operand.vmem [shape: bf16[32,96], index: 5, kind: input, shape index: {}]   ;;  %s2957_s6 = inlined_call_operand.vmem [shape: f32[1,96], index: 6, kind: input, shape index: {}]   ;;  %s2958_s7 = inlined_call_operand.vmem [shape: f32[32,4], index: 7, kind: input, shape index: {}]   ;;  %s2959_s8 = inlined_call_operand.vmem [shape: f32[4,32], index: 8, kind: input, shape index: {}]   ;;  %s2960_s9 = inlined_call_operand.vmem [shape: bf16[2,80,32], index: 9, kind: output, shape index: {0}]   ;;  %s2961_s10 = inlined_call_operand.vmem [shape: f32[2,2,80,48], index: 10, kind: output, shape index: {1}]  }
   0x1   :  { %s2371_s15 = smov 0  }
   0x2 LB: > { %s33_s16 = sadd.s32 1, %s2297_s14  ;;  %p1941_p0 = scmp.ge.s32.totalorder %s2301_s15, 1  ;;  %s2301_s15 = sphi %s2371_s15, %s21_s15   ;;  %s2297_s14 = sphi %s2369_s14, %s2963_s14   ;;  %s2293_s13 = sphi %s2367_s13, %s2962_s13  }
   0x3   : > { %p35_p1 = scmp.ge.s32.totalorder %s33_s16, 2  ;;  %p372_p2 = scmp.lt.s32.totalorder %s2301_s15, 3 }
   0x5   : > { %s2965_s16 = smov (%p35_p1, %s33_s16), 0  ;;  %p373_p3 = pnand %p1941_p0, %p372_p2 }
   0x6   : > { %v2235_v0 = vld [vmem:[%s2956_s5] sm:$0xff] (!%p373_p3)   ;;  %v2303_v1 = vmov (!%p373_p3), 0.0   ;;  %v2236_v2 = vld [vmem:[%s2956_s5 + $0x8] sm:$0xff] (!%p373_p3)   ;;  %vm2304_vm0 = vmmov (!%p373_p3), 0   ;;  %p446_p4 = scmp.lt.s32.totalorder (!%p373_p3), %s2293_s13, 1  ;;  %vm554_vm1 = vcmask (!%p373_p3), 261120  }
   0x7   : > { %376 = sbr.rel (%p373_p3) target bundleno = 1225 (0x4c9), region = 56  ;;  %2119 = vmatprep.subr.bf16.mxu1 (!%p373_p3), %v2303_v1  ;;  %2095 = vmatprep.subr.bf16.mxu0 (!%p373_p3), %v2303_v1  ;;  %v1965_v38 = vld [vmem:[%s2957_s6] ss:$0 sm:$0xff] (!%p373_p3)  ;;  %vm810_vm2 = vcmask (!%p373_p3), 785920   ;;  %vm1092_vm3 = vcmask (!%p373_p3), 1043456   ;;  %vm683_vm4 = vcmask (!%p373_p3), 257024  }
   0x8   : > { %2120 = vmatpush3.bf16.msra.mxu1 (!%p373_p3), %v2235_v0  ;;  %2123 = vmatprep.mubr.msk.bf16.mxu1 (!%p373_p3), %vm2304_vm0, %v2303_v1  ;;  %vm1451_vm5 = vcmask (!%p373_p3), 130048   ;;  %s2310_s23 = smov (!%p373_p3), 96   ;;  %vm1061_vm6 = vcmask (!%p373_p3), 31744   ;;  %vm1472_vm7 = vcmask (!%p373_p3), 392192  }
   0x9   : > { %2121 = vmatprep.subr.bf16.mxu1 (!%p373_p3), %v2303_v1  ;;  %2099 = vmatprep.mubr.msk.bf16.mxu0 (!%p373_p3), %vm2304_vm0, %v2303_v1 }
   0xc   : > { %2122 = vmatpush3.bf16.msra.mxu1 (!%p373_p3), %v2236_v2 }
   0xe   : > { %s2967_s13 = smov (!%p446_p4, %s2293_s13), 1 }
   0xf   : > { %s2401_s21 = smul.u32 80, %s2967_s13 }
  0x10   : > { %s2192_s12 = smul.u32 40, %s2967_s13 }
  0x11   : > { %s2407_s24 = scalar_lea.vmem %s2951_s0, %s2401_s21  ;;  %s2413_s27 = scalar_lea.vmem %s2952_s1, %s2401_s21 }
  0x12   : > { %v2416_v3 = vld [vmem:[%s2407_s24] sm:$0xff]  ;;  %v2419_v4 = vld [vmem:[%s2407_s24 + $0x8] sm:$0xff]  ;;  %v2426_v9 = vld [vmem:[%s2407_s24 + $0x10] sm:$0xff]  ;;  %s473_s30 = scalar_lea.vmem %s2953_s2, %s2401_s21  ;;  %s2640_s22 = scalar_lea.vmem %s2960_s9, %s2192_s12 }
  0x13   : > { %v506_v5 = vld [vmem:[%s2413_s27] sm:$0xff]  ;;  %v507_v6 = vld [vmem:[%s2413_s27 + $0x8] sm:$0xff]  ;;  %v2429_v10 = vld [vmem:[%s2407_s24 + $0x18] sm:$0xff]  ;;  %s2193_s25 = smul.u32 160, %s2967_s13 }
  0x14   : > { %v516_v7 = vadd.f32 %v506_v5, %v2416_v3  ;;  %v517_v8 = vadd.f32 %v507_v6, %v2419_v4  ;;  %v508_v11 = vld [vmem:[%s2413_s27 + $0x10] sm:$0xff]  ;;  %v509_v12 = vld [vmem:[%s2413_s27 + $0x18] sm:$0xff]  ;;  %v2439_v17 = vld [vmem:[%s2407_s24 + $0x20] sm:$0xff] }
  0x15   : > { %v518_v14 = vadd.f32 %v508_v11, %v2426_v9  ;;  %v519_v15 = vadd.f32 %v509_v12, %v2429_v10  ;;  %v2442_v18 = vld [vmem:[%s2407_s24 + $0x28] sm:$0xff]  ;;  %v510_v19 = vld [vmem:[%s2413_s27 + $0x20] sm:$0xff]  ;;  %v2452_v24 = vld [vmem:[%s2407_s24 + $0x30] sm:$0xff]  ;;  %s2848_s28 = scalar_lea.vmem %s2961_s10, %s2193_s25 }
  0x16   : > { %v694_v13 = vpack.c.bf16 %v517_v8, %v516_v7  ;;  %v511_v20 = vld [vmem:[%s2413_s27 + $0x28] sm:$0xff]  ;;  %v520_v21 = vadd.f32 %v510_v19, %v2439_v17  ;;  %v2455_v25 = vld [vmem:[%s2407_s24 + $0x38] sm:$0xff]  ;;  %v512_v26 = vld [vmem:[%s2413_s27 + $0x30] sm:$0xff] }
  0x17   : > { %v695_v16 = vpack.c.bf16 %v519_v15, %v518_v14  ;;  %v521_v22 = vadd.f32 %v511_v20, %v2442_v18  ;;  %v513_v27 = vld [vmem:[%s2413_s27 + $0x38] sm:$0xff]  ;;  %v522_v28 = vadd.f32 %v512_v26, %v2452_v24  ;;  %v2465_v31 = vld [vmem:[%s2407_s24 + $0x40] sm:$0xff]  ;;  %v2468_v32 = vld [vmem:[%s2407_s24 + $0x48] sm:$0xff]  ;;  %s2311_s24 = smov 80  }
  0x18   : > { %2124 = vmatmul.mubr.msk.bf16.vlgmr.msra.gmra.mrb[0].mxu1 %vm554_vm1, %v694_v13  ;;  %v523_v29 = vadd.f32 %v513_v27, %v2455_v25  ;;  %v514_v33 = vld [vmem:[%s2413_s27 + $0x40] sm:$0xff]  ;;  %v515_v34 = vld [vmem:[%s2413_s27 + $0x48] sm:$0xff]  ;;  %v526_v27 = vpack.c.bf16 %v2419_v4, %v2416_v3  ;;  %v528_v3 = vpack.c.bf16 %v2442_v18, %v2439_v17  ;;  %v873_v4 = vld [vmem:[%s2958_s7 + $0x10] sm:$0xff]  ;;  %v530_v17 = vpack.c.bf16 %v2468_v32, %v2465_v31  ;;  %s2306_s27 = smov 64  }
  0x19   : > { %2127 = vmatprep.mubr.msk.bf16.mxu1 %vm2304_vm0, %v2303_v1  ;;  %v696_v23 = vpack.c.bf16 %v521_v22, %v520_v21  ;;  %v524_v35 = vadd.f32 %v514_v33, %v2465_v31  ;;  %v525_v36 = vadd.f32 %v515_v34, %v2468_v32  ;;  %v2305_v22 = vmov 0   ;;  %v2238_v26 = vld [vmem:[%s2954_s3 + $0x8] sm:$0xff]  }
  0x1a   : > { %v697_v30 = vpack.c.bf16 %v523_v29, %v522_v28  ;;  %2227 = vset.pattern.permute.xlu0 %v2305_v22  ;;  %2228 = vset.pattern.permute.xlu1 %v2305_v22  ;;  %v871_v28 = vld [vmem:[%s2958_s7] sm:$0xff]  ;;  %v872_v29 = vld [vmem:[%s2958_s7 + $0x8] sm:$0xff]  ;;  %v527_v33 = vpack.c.bf16 %v2429_v10, %v2426_v9  ;;  %v874_v9 = vld [vmem:[%s2958_s7 + $0x18] sm:$0xff]  ;;  %v529_v34 = vpack.c.bf16 %v2455_v25, %v2452_v24 }
  0x1b   : > { %v698_v37 = vpack.c.bf16 %v525_v36, %v524_v35  ;;  %v2187_v10 = vpack.c.bf16 %v874_v9, %v873_v4  ;;  %v1262_v22 = vld [vmem:[%s473_s30 + $0x8] sm:$0xff]  ;;  %v1265_v4 = vld [vmem:[%s473_s30 + $0x20] sm:$0xff] }
  0x20   : > { %2128 = vmatmul.mubr.msk.bf16.gmra.mrb[4].mxu1 %vm554_vm1, %v695_v16 }
  0x21   : > { %2131 = vmatprep.mubr.msk.bf16.mxu1 %vm2304_vm0, %v2303_v1 }
  0x28   : > { %2132 = vmatmul.mubr.msk.bf16.gmra.mrb[8].mxu1 %vm554_vm1, %v696_v23  ;;  %v2237_v23 = vld [vmem:[%s2954_s3] sm:$0xff]  }
  0x29   : > { %2135 = vmatprep.mubr.msk.bf16.mxu1 %vm2304_vm0, %v2303_v1  ;;  %2096 = vmatpush3.bf16.msra.mxu0 %v2237_v23 }
  0x2a   : > { %2097 = vmatprep.subr.bf16.mxu0 %v2303_v1 }
  0x2d   : > { %2098 = vmatpush3.bf16.msra.mxu0 %v2238_v26 }
  0x30   : > { %2136 = vmatmul.mubr.msk.bf16.gmra.mrb[12].mxu1 %vm554_vm1, %v697_v30  ;;  %2100 = vmatmul.mubr.msk.bf16.vlgmr.msra.gmra.mrb[0].mxu0 %vm554_vm1, %v526_v27  ;;  %v2183_v30 = vpack.c.bf16 %v872_v29, %v871_v28  ;;  %v1264_v27 = vld [vmem:[%s473_s30 + $0x18] sm:$0xff]  ;;  %v1272_v28 = vmul.f32 8.0, %v1262_v22  ;;  %v1263_v29 = vld [vmem:[%s473_s30 + $0x10] sm:$0xff] }
  0x31   : > { %2139 = vmatprep.mubr.msk.bf16.mxu1 %vm2304_vm0, %v2303_v1  ;;  %2103 = vmatprep.mubr.msk.bf16.mxu0 %vm2304_vm0, %v2303_v1 }
  0x32   : > { %2184 = vmatprep.subr.bf16.mxu0 %v2183_v30 }
  0x33   : > { %2186 = vmatpush3.bf16.msra.mxu0 %v2183_v30  ;;  %v1274_v30 = vmul.f32 8.0, %v1264_v27 }
  0x34   : > { %2188 = vmatprep.subr.bf16.mxu0 %v2187_v10 }
  0x37   : > { %2190 = vmatpush3.bf16.msra.mxu0 %v2187_v10  ;;  %v1268_v10 = vld [vmem:[%s473_s30 + $0x38] sm:$0xff] }
  0x38   : > { %2140 = vmatmul.mubr.msk.bf16.gmra.mrb[16].mxu1 %vm554_vm1, %v698_v37  ;;  %2104 = vmatmul.mubr.msk.bf16.gmra.mrb[4].mxu0 %vm554_vm1, %v527_v33  ;;  %v1266_v33 = vld [vmem:[%s473_s30 + $0x28] sm:$0xff] }
  0x39   : > { %2107 = vmatprep.mubr.msk.bf16.mxu0 %vm2304_vm0, %v2303_v1  ;;  %v1276_v9 = vmul.f32 8.0, %v1266_v33 }
  0x40   : > { %2108 = vmatmul.mubr.msk.bf16.gmra.mrb[8].mxu0 %vm554_vm1, %v528_v3  ;;  %v1273_v3 = vmul.f32 8.0, %v1263_v29 }
  0x41   : > { %2111 = vmatprep.mubr.msk.bf16.mxu0 %vm2304_vm0, %v2303_v1 }
  0x48   : > { %2112 = vmatmul.mubr.msk.bf16.gmra.mrb[12].mxu0 %vm554_vm1, %v529_v34  ;;  %v1275_v34 = vmul.f32 8.0, %v1265_v4 }
  0x49   : > { %2115 = vmatprep.mubr.msk.bf16.mxu0 %vm2304_vm0, %v2303_v1 }
  0x50   : > { %2116 = vmatmul.mubr.msk.bf16.gmra.mrb[16].mxu0 %vm554_vm1, %v530_v17  ;;  %v1267_v17 = vld [vmem:[%s473_s30 + $0x30] sm:$0xff] }
  0xeb   : > { %v771_v39 = vpop.f32.mrb[0].mxu1 }
  0xec   : > { %v2481_v40 = vadd.f32 %v1965_v38, %v771_v39  ;;  %v2125_v41 = vpop.f32.mrb[1].mxu1 }
  0xed   : > { %v774_v42 = vpop.f32.mrb[2].mxu1 }
  0xee   : > { %v2483_v43 = vadd.f32 %v1965_v38, %v774_v42  ;;  %v2126_v44 = vpop.f32.mrb[3].mxu1  ;;  %v811_v45 = vsel %vm810_vm2, %v2481_v40, -inf }
  0xef   : > { %812 = vmax.xlane.f32.xlu0 %v811_v45 }
  0xf0   : > { %v814_v46 = vsel %vm810_vm2, %v2483_v43, -inf }
  0xf3   : > { %815 = vmax.xlane.f32.xlu0 %v814_v46  ;;  %v779_v47 = vpop.f32.mrb[4].mxu1 }
  0xf4   : > { %v2489_v48 = vadd.f32 %v1965_v38, %v779_v47  ;;  %v2129_v49 = vpop.f32.mrb[5].mxu1 }
  0xf5   : > { %v782_v50 = vpop.f32.mrb[6].mxu1 }
  0xf6   : > { %v2491_v51 = vadd.f32 %v1965_v38, %v782_v50  ;;  %v2130_v52 = vpop.f32.mrb[7].mxu1  ;;  %v817_v53 = vsel %vm810_vm2, %v2489_v48, -inf }
  0xf7   : > { %818 = vmax.xlane.f32.xlu1 %v817_v53 }
  0xf8   : > { %v820_v54 = vsel %vm810_vm2, %v2491_v51, -inf }
  0xfb   : > { %821 = vmax.xlane.f32.xlu1 %v820_v54  ;;  %v787_v55 = vpop.f32.mrb[8].mxu1 }
  0xfc   : > { %v2497_v56 = vadd.f32 %v1965_v38, %v787_v55  ;;  %v2133_v57 = vpop.f32.mrb[9].mxu1 }
  0xfd   : > { %v790_v58 = vpop.f32.mrb[10].mxu1 }
  0xfe   : > { %v2499_v59 = vadd.f32 %v1965_v38, %v790_v58  ;;  %v2134_v60 = vpop.f32.mrb[11].mxu1  ;;  %v823_v61 = vsel %vm810_vm2, %v2497_v56, -inf }
  0xff   : > { %824 = vmax.xlane.f32.xlu0 %v823_v61 }
 0x100   : > { %v826_v62 = vsel %vm810_vm2, %v2499_v59, -inf }
 0x101   : > { %827 = vmax.xlane.f32.xlu1 %v826_v62 }
 0x103   : > { %v795_v63 = vpop.f32.mrb[12].mxu1 }
 0x104   : > { %v2505_v0 = vadd.f32 %v1965_v38, %v795_v63  ;;  %v2137_v2 = vpop.f32.mrb[13].mxu1 }
 0x105   : > { %v798_v5 = vpop.f32.mrb[14].mxu1 }
 0x106   : > { %v2507_v6 = vadd.f32 %v1965_v38, %v798_v5  ;;  %v2138_v7 = vpop.f32.mrb[15].mxu1  ;;  %v829_v8 = vsel %vm810_vm2, %v2505_v0, -inf }
 0x107   : > { %830 = vmax.xlane.f32.xlu0 %v829_v8 }
 0x108   : > { %v832_v11 = vsel %vm810_vm2, %v2507_v6, -inf }
 0x109   : > { %833 = vmax.xlane.f32.xlu1 %v832_v11 }
 0x10b   : > { %v803_v12 = vpop.f32.mrb[16].mxu1 }
 0x10c   : > { %v2513_v13 = vadd.f32 %v1965_v38, %v803_v12  ;;  %v2141_v14 = vpop.f32.mrb[17].mxu1 }
 0x10d   : > { %v806_v15 = vpop.f32.mrb[18].mxu1 }
 0x10e   : > { %v2515_v16 = vadd.f32 %v1965_v38, %v806_v15  ;;  %v2142_v19 = vpop.f32.mrb[19].mxu1  ;;  %v835_v20 = vsel %vm810_vm2, %v2513_v13, -inf }
 0x10f   : > { %836 = vmax.xlane.f32.xlu0 %v835_v20  ;;  %v1261_v20 = vld [vmem:[%s473_s30] sm:$0xff] }
 0x110   : > { %v838_v21 = vsel %vm810_vm2, %v2515_v16, -inf  ;;  %v1271_v23 = vmul.f32 8.0, %v1261_v20 }
 0x111   : > { %839 = vmax.xlane.f32.xlu1 %v838_v21 }
 0x17c   : > { %v813_v18 = vpop.xlane.xlu0 %812 }
 0x17d   : > { %v841_v35 = vsub.f32 %v2481_v40, %v813_v18  ;;  %v1278_v18 = vmul.f32 8.0, %v1268_v10 }
 0x17f   : > { %v851_v36 = vmul.f32 1.442695, %v841_v35  ;;  %v1270_v35 = vld [vmem:[%s473_s30 + $0x48] sm:$0xff] }
 0x180   : > { %v816_v37 = vpop.xlane.xlu0 %815 }
 0x181   : > { %2239 = vpow2.f32 %v851_v36  ;;  %v842_v24 = vsub.f32 %v2483_v43, %v816_v37  ;;  %v1277_v36 = vmul.f32 8.0, %v1267_v17  ;;  %v1269_v37 = vld [vmem:[%s473_s30 + $0x40] sm:$0xff] }
 0x183   : > { %v853_v25 = vmul.f32 1.442695, %v842_v24  ;;  %v1280_v24 = vmul.f32 8.0, %v1270_v35 }
 0x184   : > { %v819_v38 = vpop.xlane.xlu1 %818 }
 0x185   : > { %2241 = vpow2.f32 %v853_v25  ;;  %v843_v39 = vsub.f32 %v2489_v48, %v819_v38  ;;  %v1279_v25 = vmul.f32 8.0, %v1269_v37  ;;  %v2307_v38 = vmov 1  }
 0x187   : > { %v855_v41 = vmul.f32 1.442695, %v843_v39  ;;  %v1483_v39 = vmul.f32 4.0, %v1261_v20  ;;  %v2634_v20 = vld [vmem:[%s2955_s4] ss:$0 sm:$0xff] }
 0x188   : > { %v822_v1 = vpop.xlane.xlu1 %821 }
 0x189   : > { %2243 = vpow2.f32 %v855_v41  ;;  %v844_v31 = vsub.f32 %v2491_v51, %v822_v1  ;;  %v2308_v41 = vmov 2   ;;  %v1486_v1 = vmul.f32 4.0, %v1264_v27 }
 0x18b   : > { %v2567_v32 = vpop.eup %2239  ;;  %v857_v42 = vmul.f32 1.442695, %v844_v31  ;;  %v1488_v31 = vmul.f32 4.0, %v1266_v33 }
 0x18c   : > { %v825_v44 = vpop.xlane.xlu0 %824  ;;  %885 = vrot.lane.b32.xlu0 %v2567_v32, %s2306_s27 }
 0x18d   : > { %2245 = vpow2.f32 %v857_v42  ;;  %v845_v45 = vsub.f32 %v2497_v56, %v825_v44  ;;  %v1484_v42 = vmul.f32 4.0, %v1262_v22  ;;  %v1490_v44 = vmul.f32 4.0, %v1268_v10  ;;  %v604_v22 = vpop.f32.mrb[0].mxu0 }
 0x18e   : > { %v828_v46 = vpop.xlane.xlu1 %827  ;;  %v2101_v27 = vpop.f32.mrb[1].mxu0 }
 0x18f   : > { %v2572_v47 = vpop.eup %2241  ;;  %v859_v49 = vmul.f32 1.442695, %v845_v45  ;;  %v846_v50 = vsub.f32 %v2499_v59, %v828_v46  ;;  %v1485_v45 = vmul.f32 4.0, %v1263_v29  ;;  %v1492_v46 = vmul.f32 4.0, %v1270_v35 }
 0x190   : > { %887 = vrot.lane.b32.xlu1 %v2572_v47, %s2306_s27 }
 0x191   : > { %2247 = vpow2.f32 %v859_v49  ;;  %v861_v52 = vmul.f32 1.442695, %v846_v50  ;;  %v1487_v49 = vmul.f32 4.0, %v1265_v4  ;;  %v1489_v50 = vmul.f32 4.0, %v1267_v17 }
 0x193   : > { %v2577_v53 = vpop.eup %2243  ;;  %2249 = vpow2.f32 %v861_v52  ;;  %v2309_v52 = vmov 3  }
 0x194   : > { %v831_v54 = vpop.xlane.xlu0 %830  ;;  %889 = vrot.lane.b32.xlu1 %v2577_v53, %s2306_s27 }
 0x195   : > { %v847_v55 = vsub.f32 %v2505_v0, %v831_v54  ;;  %v1491_v54 = vmul.f32 4.0, %v1269_v37 }
 0x196   : > { %v834_v57 = vpop.xlane.xlu1 %833 }
 0x197   : > { %v2582_v58 = vpop.eup %2245  ;;  %v863_v60 = vmul.f32 1.442695, %v847_v55  ;;  %v848_v61 = vsub.f32 %v2507_v6, %v834_v57 }
 0x198   : > { %891 = vrot.lane.b32.xlu1 %v2582_v58, %s2306_s27 }
 0x199   : > { %2251 = vpow2.f32 %v863_v60  ;;  %v865_v62 = vmul.f32 1.442695, %v848_v61 }
 0x19b   : > { %v2587_v63 = vpop.eup %2247  ;;  %2253 = vpow2.f32 %v865_v62  ;;  %v1060_v62 = vld [vmem:[%s2959_s8] sm:$0xf] }
 0x19c   : > { %893 = vrot.lane.b32.xlu0 %v2587_v63, %s2306_s27  ;;  %v837_v2 = vpop.xlane.xlu0 %836  ;;  %2166 = vmatprep.subr.msk.mxu1 %vm1092_vm3, %v1060_v62 }
 0x19d   : > { %v2591_v5 = vpop.eup %2249  ;;  %v849_v7 = vsub.f32 %v2513_v13, %v837_v2  ;;  %2167 = vmatpush3.msk.msra.mxu1 %vm1092_vm3, %v1060_v62 }
 0x19e   : > { %895 = vrot.lane.b32.xlu1 %v2591_v5, %s2306_s27  ;;  %v840_v8 = vpop.xlane.xlu1 %839 }
 0x19f   : > { %v867_v11 = vmul.f32 1.442695, %v849_v7  ;;  %v850_v12 = vsub.f32 %v2515_v16, %v840_v8 }
 0x1a1   : > { %2255 = vpow2.f32 %v867_v11  ;;  %v869_v14 = vmul.f32 1.442695, %v850_v12 }
 0x1a3   : > { %v2597_v15 = vpop.eup %2251  ;;  %2257 = vpow2.f32 %v869_v14 }
 0x1a4   : > { %897 = vrot.lane.b32.xlu0 %v2597_v15, %s2306_s27 }
 0x1a5   : > { %v2601_v19 = vpop.eup %2253 }
 0x1a6   : > { %899 = vrot.lane.b32.xlu1 %v2601_v19, %s2306_s27 }
 0x1ab   : > { %v2609_v21 = vpop.eup %2255 }
 0x1ac   : > { %901 = vrot.lane.b32.xlu0 %v2609_v21, %s2306_s27 }
 0x1ad   : > { %v2613_v26 = vpop.eup %2257 }
 0x1ae   : > { %903 = vrot.lane.b32.xlu1 %v2613_v26, %s2306_s27 }
 0x1b0   : > { %1283 = vperm.xlu0 %2227, %v1271_v23  }
 0x1b2   : > { %1288 = vperm.xlu1 %2228, %v1272_v28  }
 0x1b4   : > { %1298 = vperm.xlu0 %2227, %v1274_v30  }
 0x1b6   : > { %1293 = vperm.xlu1 %2228, %v1273_v3  }
 0x1b8   : > { %1308 = vperm.xlu0 %2227, %v1276_v9  }
 0x1ba   : > { %1303 = vperm.xlu1 %2228, %v1275_v34  }
 0x1bc   : > { %1318 = vperm.xlu0 %2227, %v1278_v18  }
 0x1be   : > { %1313 = vperm.xlu1 %2228, %v1277_v36  }
 0x1c0   : > { %1328 = vperm.xlu0 %2227, %v1280_v24  }
 0x1c2   : > { %1323 = vperm.xlu1 %2228, %v1279_v25  }
 0x1c4   : > { %2230 = vset.pattern.permute.xlu0 %v2307_v38 }
 0x1c5   : > { %1356 = vperm.xlu0 %2230, %v1272_v28   ;;  %v607_v28 = vpop.f32.mrb[2].mxu0 }
 0x1c6   : > { %2229 = vset.pattern.permute.xlu1 %v2307_v38  ;;  %v2102_v33 = vpop.f32.mrb[3].mxu0 }
 0x1c7   : > { %1352 = vperm.xlu1 %2229, %v1271_v23   ;;  %v605_v23 = vadd.f32 %v2634_v20, %v604_v22 }
 0x1c9   : > { %1368 = vperm.xlu0 %2230, %v1275_v34   ;;  %v2046_v29 = vpack.c.bf16 %v605_v23, %v605_v23  ;;  %v612_v34 = vpop.f32.mrb[4].mxu0 }
 0x1ca   : > { %v613_v17 = vadd.f32 %v2634_v20, %v612_v34 }
 0x1cb   : > { %1360 = vperm.xlu1 %2229, %v1273_v3   ;;  %684 = vst.msk [vmem:[%s2640_s22] sm:$0xf] %vm683_vm4, %v2046_v29 }
 0x1cc   : > { %v2048_v37 = vpack.c.bf16 %v613_v17, %v613_v17 }
 0x1cd   : > { %1376 = vperm.xlu0 %2230, %v1277_v36  }
 0x1ce   : > { %686 = vst.msk [vmem:[%s2640_s22 + $0x8] sm:$0xf] %vm683_vm4, %v2048_v37 }
 0x1cf   : > { %1364 = vperm.xlu1 %2229, %v1274_v30   ;;  %v608_v30 = vadd.f32 %v2634_v20, %v607_v28 }
 0x1d1   : > { %1384 = vperm.xlu0 %2230, %v1279_v25   ;;  %v2047_v4 = vpack.c.bf16 %v608_v30, %v608_v30 }
 0x1d3   : > { %1372 = vperm.xlu1 %2229, %v1276_v9   ;;  %685 = vst.msk [vmem:[%s2640_s22 + $0x4] sm:$0xf] %vm683_vm4, %v2047_v4 }
 0x1d5   : > { %2231 = vset.pattern.permute.xlu0 %v2308_v41 }
 0x1d6   : > { %1495 = vperm.xlu0 %2231, %v1483_v39  }
 0x1d7   : > { %1380 = vperm.xlu1 %2229, %v1278_v18   ;;  %v2105_v18 = vpop.f32.mrb[5].mxu0 }
 0x1d8   : > { %v615_v36 = vpop.f32.mrb[6].mxu0 }
 0x1d9   : > { %v2106_v25 = vpop.f32.mrb[7].mxu0 }
 0x1da   : > { %1510 = vperm.xlu0 %2231, %v1486_v1  }
 0x1db   : > { %1388 = vperm.xlu1 %2229, %v1280_v24   ;;  %v616_v24 = vadd.f32 %v2634_v20, %v615_v36 }
 0x1de   : > { %1520 = vperm.xlu0 %2231, %v1488_v31  }
 0x1df   : > { %2232 = vset.pattern.permute.xlu1 %v2308_v41 }
 0x1e0   : > { %1500 = vperm.xlu1 %2232, %v1484_v42  }
 0x1e2   : > { %1530 = vperm.xlu0 %2231, %v1490_v44  }
 0x1e4   : > { %1505 = vperm.xlu1 %2232, %v1485_v45  }
 0x1e6   : > { %1540 = vperm.xlu0 %2231, %v1492_v46  }
 0x1e8   : > { %1515 = vperm.xlu1 %2232, %v1487_v49  }
 0x1ea   : > { %2234 = vset.pattern.permute.xlu0 %v2309_v52 }
 0x1eb   : > { %1568 = vperm.xlu0 %2234, %v1484_v42  }
 0x1ec   : > { %1525 = vperm.xlu1 %2232, %v1489_v50  }
 0x1ef   : > { %1580 = vperm.xlu0 %2234, %v1487_v49  }
 0x1f0   : > { %1535 = vperm.xlu1 %2232, %v1491_v54  }
 0x1f3   : > { %1588 = vperm.xlu0 %2234, %v1489_v50  }
 0x1f4   : > { %2233 = vset.pattern.permute.xlu1 %v2309_v52 }
 0x1f5   : > { %1564 = vperm.xlu1 %2233, %v1483_v39   ;;  %v2049_v39 = vpack.c.bf16 %v616_v24, %v616_v24 }
 0x1f7   : > { %1596 = vperm.xlu0 %2234, %v1491_v54   ;;  %687 = vst.msk [vmem:[%s2640_s22 + $0xc] sm:$0xf] %vm683_vm4, %v2049_v39 }
 0x1f9   : > { %1572 = vperm.xlu1 %2233, %v1485_v45  }
 0x1fd   : > { %1576 = vperm.xlu1 %2233, %v1486_v1  }
 0x1fe   : > { %v886_v55 = vpop.permute.xlu0 %885 }
 0x1ff   : > { %2151 = vmatprep.mubr.msk.f32.mxu0 %vm554_vm1, %v886_v55 }
 0x201   : > { %1584 = vperm.xlu1 %2233, %v1488_v31   ;;  %v620_v31 = vpop.f32.mrb[8].mxu0 }
 0x202   : > { %v888_v57 = vpop.permute.xlu1 %887  ;;  %v621_v42 = vadd.f32 %v2634_v20, %v620_v31 }
 0x203   : > { %2152 = vmatmul.mubr.msk.f32.vlgmr.msra.gmra.mrb[20].mxu0 %vm554_vm1, %v888_v57 }
 0x204   : > { %v2050_v49 = vpack.c.bf16 %v621_v42, %v621_v42 }
 0x205   : > { %1592 = vperm.xlu1 %2233, %v1490_v44   ;;  %v2109_v44 = vpop.f32.mrb[9].mxu0 }
 0x206   : > { %v890_v60 = vpop.permute.xlu1 %889  ;;  %688 = vst.msk [vmem:[%s2640_s22 + $0x10] sm:$0xf] %vm683_vm4, %v2050_v49 }
 0x207   : > { %2154 = vmatprep.mubr.msk.f32.mxu0 %vm554_vm1, %v890_v60 }
 0x209   : > { %1600 = vperm.xlu1 %2233, %v1492_v46   ;;  %v623_v46 = vpop.f32.mrb[10].mxu0 }
 0x20a   : > { %v892_v61 = vpop.permute.xlu1 %891  ;;  %v624_v50 = vadd.f32 %v2634_v20, %v623_v46  ;;  %v2110_v52 = vpop.f32.mrb[11].mxu0 }
 0x20b   : > { %2155 = vmatmul.mubr.msk.f32.gmra.mrb[22].mxu0 %vm554_vm1, %v892_v61 }
 0x20c   : > { %v2051_v55 = vpack.c.bf16 %v624_v50, %v624_v50 }
 0x20e   : > { %v894_v2 = vpop.permute.xlu0 %893  ;;  %689 = vst.msk [vmem:[%s2640_s22 + $0x14] sm:$0xf] %vm683_vm4, %v2051_v55 }
 0x20f   : > { %2157 = vmatprep.mubr.msk.f32.mxu0 %vm554_vm1, %v894_v2  ;;  %v628_v2 = vpop.f32.mrb[12].mxu0 }
 0x210   : > { %v896_v7 = vpop.permute.xlu1 %895 }
 0x211   : > { %2158 = vmatmul.mubr.msk.f32.gmra.mrb[24].mxu0 %vm554_vm1, %v896_v7 }
 0x216   : > { %v898_v8 = vpop.permute.xlu0 %897 }
 0x217   : > { %2160 = vmatprep.mubr.msk.f32.mxu0 %vm554_vm1, %v898_v8  ;;  %v629_v8 = vadd.f32 %v2634_v20, %v628_v2 }
 0x218   : > { %v900_v11 = vpop.permute.xlu1 %899 }
 0x219   : > { %2161 = vmatmul.mubr.msk.f32.gmra.mrb[26].mxu0 %vm554_vm1, %v900_v11  ;;  %v2113_v11 = vpop.f32.mrb[13].mxu0  ;;  %v2052_v29 = vpack.c.bf16 %v629_v8, %v629_v8 }
 0x21a   : > { %v631_v23 = vpop.f32.mrb[14].mxu0 }
 0x21b   : > { %v632_v30 = vadd.f32 %v2634_v20, %v631_v23  ;;  %v2114_v33 = vpop.f32.mrb[15].mxu0  ;;  %690 = vst.msk [vmem:[%s2640_s22 + $0x18] sm:$0xf] %vm683_vm4, %v2052_v29 }
 0x21c   : > { %v636_v46 = vpop.f32.mrb[16].mxu0 }
 0x21d   : > { %v2053_v17 = vpack.c.bf16 %v632_v30, %v632_v30 }
 0x21e   : > { %v902_v12 = vpop.permute.xlu0 %901 }
 0x21f   : > { %2163 = vmatprep.mubr.msk.f32.mxu0 %vm554_vm1, %v902_v12  ;;  %691 = vst.msk [vmem:[%s2640_s22 + $0x1c] sm:$0xf] %vm683_vm4, %v2053_v17 }
 0x220   : > { %v904_v14 = vpop.permute.xlu1 %903 }
 0x221   : > { %2164 = vmatmul.mubr.msk.f32.gmra.mrb[28].mxu0 %vm554_vm1, %v904_v14 }
 0x22f   : > { %v1284_v3 = vpop.permute.xlu0 %1283 }
 0x230   : > { %v1331_v61 = vadd.f32 %v1284_v3, %v2481_v40 }
 0x231   : > { %v1289_v9 = vpop.permute.xlu1 %1288 }
 0x232   : > { %v1332_v60 = vadd.f32 %v1289_v9, %v2483_v43  ;;  %v1994_v3 = vadd.f32 -0.5, %v1331_v61 }
 0x233   : > { %v1299_v10 = vpop.permute.xlu0 %1298 }
 0x234   : > { %v1995_v12 = vadd.f32 -0.5, %v1332_v60  ;;  %v1334_v42 = vadd.f32 %v1299_v10, %v2491_v51 }
 0x235   : > { %v1294_v35 = vpop.permute.xlu1 %1293 }
 0x236   : > { %v1333_v36 = vadd.f32 %v1294_v35, %v2489_v48  ;;  %v637_v35 = vadd.f32 %v2634_v20, %v636_v46 }
 0x237   : > { %v2649_v38 = vpop.permute.xlu0 %1308 }
 0x238   : > { %v1996_v55 = vadd.f32 -0.5, %v1333_v36  ;;  %v2054_v8 = vpack.c.bf16 %v637_v35, %v637_v35 }
 0x239   : > { %v1304_v41 = vpop.permute.xlu1 %1303 }
 0x23a   : > { %v1335_v14 = vadd.f32 %v1304_v41, %v2497_v56  ;;  %692 = vst.msk [vmem:[%s2640_s22 + $0x20] sm:$0xf] %vm683_vm4, %v2054_v8 }
 0x23b   : > { %v2655_v1 = vpop.permute.xlu0 %1318 }
 0x23c   : > { %v1998_v25 = vadd.f32 -0.5, %v1335_v14  ;;  %v1997_v14 = vadd.f32 -0.5, %v1334_v42 }
 0x23d   : > { %v1314_v45 = vpop.permute.xlu1 %1313 }
 0x23e   : > { %v1337_v37 = vadd.f32 %v1314_v45, %v2505_v0  ;;  %v2117_v45 = vpop.f32.mrb[17].mxu0 }
 0x23f   : > { %v2659_v54 = vpop.permute.xlu0 %1328  ;;  %v639_v2 = vpop.f32.mrb[18].mxu0 }
 0x240   : > { %v2000_v60 = vadd.f32 -0.5, %v1337_v37  ;;  %v640_v11 = vadd.f32 %v2634_v20, %v639_v2  ;;  %v1340_v46 = vadd.f32 %v2659_v54, %v2515_v16 }
 0x241   : > { %v1324_v57 = vpop.permute.xlu1 %1323 }
 0x242   : > { %v1339_v61 = vadd.f32 %v1324_v57, %v2513_v13  ;;  %v2055_v29 = vpack.c.bf16 %v640_v11, %v640_v11 }
 0x244   : > { %v1357_v62 = vpop.permute.xlu0 %1356  ;;  %v2002_v20 = vadd.f32 -0.5, %v1339_v61  ;;  %693 = vst.msk [vmem:[%s2640_s22 + $0x24] sm:$0xf] %vm683_vm4, %v2055_v29 }
 0x245   : > { %v1392_v7 = vadd.f32 %v1357_v62, %v2483_v43 }
 0x246   : > { %v1353_v22 = vpop.permute.xlu1 %1352 }
 0x247   : > { %v2005_v27 = vadd.f32 -0.5, %v1392_v7  ;;  %v1391_v28 = vadd.f32 %v1353_v22, %v2481_v40  ;;  %v1336_v22 = vadd.f32 %v2649_v38, %v2499_v59 }
 0x248   : > { %v1369_v4 = vpop.permute.xlu0 %1368 }
 0x249   : > { %v2004_v9 = vadd.f32 -0.5, %v1391_v28  ;;  %v1395_v34 = vadd.f32 %v1369_v4, %v2497_v56  ;;  %v2676_v18 = vsel %vm1451_vm5, %v1995_v12, %v2005_v27  ;;  %v2118_v12 = vpop.f32.mrb[19].mxu0 }
 0x24a   : > { %v1361_v24 = vpop.permute.xlu1 %1360 }
 0x24b   : > { %v2008_v39 = vadd.f32 -0.5, %v1395_v34  ;;  %v1393_v41 = vadd.f32 %v1361_v24, %v2489_v48  ;;  %v2684_v31 = vsel %vm1451_vm5, %v1994_v3, %v2004_v9  ;;  %v1999_v9 = vadd.f32 -0.5, %v1336_v22 }
 0x24c   : > { %v1377_v44 = vpop.permute.xlu0 %1376  ;;  %v1338_v34 = vadd.f32 %v2655_v1, %v2507_v6 }
 0x24d   : > { %v2006_v49 = vadd.f32 -0.5, %v1393_v41  ;;  %v1397_v50 = vadd.f32 %v1377_v44, %v2505_v0  ;;  %v2690_v52 = vsel %vm1451_vm5, %v1998_v25, %v2008_v39 }
 0x24e   : > { %v1365_v62 = vpop.permute.xlu1 %1364  ;;  %v2001_v44 = vadd.f32 -0.5, %v1338_v34 }
 0x24f   : > { %v2010_v7 = vadd.f32 -0.5, %v1397_v50  ;;  %v1394_v10 = vadd.f32 %v1365_v62, %v2491_v51  ;;  %v2698_v27 = vsel %vm1451_vm5, %v1996_v55, %v2006_v49  ;;  %v2003_v55 = vadd.f32 -0.5, %v1340_v46 }
 0x250   : > { %v1385_v23 = vpop.permute.xlu0 %1384 }
 0x251   : > { %v2007_v28 = vadd.f32 -0.5, %v1394_v10  ;;  %v1399_v57 = vadd.f32 %v1385_v23, %v2513_v13  ;;  %v2704_v30 = vsel %vm1451_vm5, %v2000_v60, %v2010_v7 }
 0x252   : > { %v1373_v33 = vpop.permute.xlu1 %1372 }
 0x253   : > { %v2012_v3 = vadd.f32 -0.5, %v1399_v57  ;;  %v1396_v4 = vadd.f32 %v1373_v33, %v2499_v59  ;;  %v2710_v38 = vsel %vm1451_vm5, %v1997_v14, %v2007_v28 }
 0x255   : > { %v2009_v17 = vadd.f32 -0.5, %v1396_v4  ;;  %v1496_v36 = vpop.permute.xlu0 %1495  ;;  %v2715_v37 = vsel %vm1451_vm5, %v2002_v20, %v2012_v3 }
 0x256   : > { %v1543_v24 = vadd.f32 %v1496_v36, %v2481_v40  ;;  %v1381_v25 = vpop.permute.xlu1 %1380 }
 0x257   : > { %v1398_v39 = vadd.f32 %v1381_v25, %v2507_v6  ;;  %v2720_v41 = vsel %vm1451_vm5, %v1999_v9, %v2009_v17 }
 0x258   : > { %v2014_v42 = vadd.f32 -0.5, %v1543_v24 }
 0x259   : > { %v2011_v49 = vadd.f32 -0.5, %v1398_v39  ;;  %v1511_v1 = vpop.permute.xlu0 %1510 }
 0x25a   : > { %1633 = vrot.lane.b32.xlu0 %v2014_v42, %s2310_s23  ;;  %v1389_v50 = vpop.permute.xlu1 %1388  ;;  %v1546_v7 = vadd.f32 %v1511_v1, %v2491_v51 }
 0x25b   : > { %v1400_v35 = vadd.f32 %v1389_v50, %v2515_v16  ;;  %v2727_v45 = vsel %vm1451_vm5, %v2001_v44, %v2011_v49 }
 0x25c   : > { %v2017_v14 = vadd.f32 -0.5, %v1546_v7 }
 0x25d   : > { %v2013_v60 = vadd.f32 -0.5, %v1400_v35  ;;  %v1521_v61 = vpop.permute.xlu0 %1520 }
 0x25e   : > { %v1548_v22 = vadd.f32 %v1521_v61, %v2499_v59 }
 0x25f   : > { %v1501_v62 = vpop.permute.xlu1 %1500  ;;  %v2730_v2 = vsel %vm1451_vm5, %v2003_v55, %v2013_v60 }
 0x260   : > { %v1544_v54 = vadd.f32 %v1501_v62, %v2483_v43  ;;  %v2019_v29 = vadd.f32 -0.5, %v1548_v22 }
 0x261   : > { %v1531_v12 = vpop.permute.xlu0 %1530 }
 0x262   : > { %v2015_v10 = vadd.f32 -0.5, %v1544_v54  ;;  %v1550_v33 = vadd.f32 %v1531_v12, %v2507_v6 }
 0x263   : > { %v1506_v8 = vpop.permute.xlu1 %1505 }
 0x264   : > { %v1545_v11 = vadd.f32 %v1506_v8, %v2489_v48  ;;  %1635 = vrot.lane.b32.xlu1 %v2015_v10, %s2310_s23  ;;  %v2021_v34 = vadd.f32 -0.5, %v1550_v33 }
 0x265   : > { %v1541_v3 = vpop.permute.xlu0 %1540 }
 0x266   : > { %v2016_v23 = vadd.f32 -0.5, %v1545_v11  ;;  %v1552_v17 = vadd.f32 %v1541_v3, %v2515_v16 }
 0x267   : > { %v1516_v28 = vpop.permute.xlu1 %1515 }
 0x268   : > { %v1547_v57 = vadd.f32 %v1516_v28, %v2497_v56  ;;  %1639 = vrot.lane.b32.xlu1 %v2017_v14, %s2310_s23  ;;  %1637 = vrot.lane.b32.xlu0 %v2016_v23, %s2310_s23  ;;  %v2023_v39 = vadd.f32 -0.5, %v1552_v17 }
 0x26a   : > { %v2018_v20 = vadd.f32 -0.5, %v1547_v57 }
 0x26b   : > { %v1526_v4 = vpop.permute.xlu1 %1525 }
 0x26c   : > { %v1549_v9 = vadd.f32 %v1526_v4, %v2505_v0  ;;  %1643 = vrot.lane.b32.xlu1 %v2019_v29, %s2310_s23  ;;  %1641 = vrot.lane.b32.xlu0 %v2018_v20, %s2310_s23 }
 0x26e   : > { %v2020_v36 = vadd.f32 -0.5, %v1549_v9 }
 0x26f   : > { %v1536_v24 = vpop.permute.xlu1 %1535 }
 0x270   : > { %v1551_v25 = vadd.f32 %v1536_v24, %v2513_v13  ;;  %1647 = vrot.lane.b32.xlu1 %v2021_v34, %s2310_s23  ;;  %1645 = vrot.lane.b32.xlu0 %v2020_v36, %s2310_s23 }
 0x272   : > { %v2022_v42 = vadd.f32 -0.5, %v1551_v25 }
 0x274   : > { %1651 = vrot.lane.b32.xlu1 %v2023_v39, %s2310_s23  ;;  %1649 = vrot.lane.b32.xlu0 %v2022_v42, %s2310_s23 }
 0x2d6   : > { %v2153_v44 = vpop.f32.mrb[20].mxu0 }
 0x2d7   : > { %v1041_v46 = vmax.f32 %v2153_v44, 1e-20  ;;  %v991_v49 = vpop.f32.mrb[21].mxu0  ;;  %v1565_v44 = vpop.permute.xlu1 %1564 }
 0x2d8   : > { %v1040_v1 = vmax.f32 %v991_v49, 1e-20 }
 0x2da   : > { %2259 = vrcp.f32 %v1040_v1 }
 0x2db   : > { %2261 = vrcp.f32 %v1041_v46  ;;  %v1573_v1 = vpop.permute.xlu1 %1572 }
 0x2de   : > { %v2156_v50 = vpop.f32.mrb[22].mxu0 }
 0x2df   : > { %v1043_v35 = vmax.f32 %v2156_v50, 1e-20  ;;  %v1001_v55 = vpop.f32.mrb[23].mxu0 }
 0x2e0   : > { %v1042_v60 = vmax.f32 %v1001_v55, 1e-20  ;;  %v1577_v55 = vpop.permute.xlu1 %1576 }
 0x2e2   : > { %2263 = vrcp.f32 %v1042_v60  ;;  %v1569_v60 = vpop.permute.xlu0 %1568 }
 0x2e3   : > { %2265 = vrcp.f32 %v1043_v35 }
 0x2e4   : > { %v2260_v61 = vpop.eup %2259  ;;  %v2159_v62 = vpop.f32.mrb[24].mxu0 }
 0x2e5   : > { %v2262_v54 = vpop.eup %2261  ;;  %v1045_v7 = vmax.f32 %v2159_v62, 1e-20  ;;  %v1011_v10 = vpop.f32.mrb[25].mxu0  ;;  %2168 = vmatprep.mubr.msk.f32.mxu1 %vm1061_vm6, %v2260_v61  ;;  %v1604_v61 = vadd.f32 %v1569_v60, %v2483_v43  ;;  %v1603_v62 = vadd.f32 %v1565_v44, %v2481_v40 }
 0x2e6   : > { %v1044_v8 = vmax.f32 %v1011_v10, 1e-20  ;;  %2169 = vmatmul.mubr.msk.f32.vlgmr.msra.gmra.mrb[20].mxu1 %vm1061_vm6, %v2262_v54  ;;  %v1585_v54 = vpop.permute.xlu1 %1584  ;;  %v1581_v10 = vpop.permute.xlu0 %1580 }
 0x2e8   : > { %2267 = vrcp.f32 %v1044_v8 }
 0x2e9   : > { %2269 = vrcp.f32 %v1045_v7 }
 0x2ea   : > { %v1589_v40 = vpop.permute.xlu0 %1588 }
 0x2ec   : > { %v2264_v11 = vpop.eup %2263  ;;  %v2162_v12 = vpop.f32.mrb[26].mxu0 }
 0x2ed   : > { %v2266_v14 = vpop.eup %2265  ;;  %v1047_v22 = vmax.f32 %v2162_v12, 1e-20  ;;  %v1021_v23 = vpop.f32.mrb[27].mxu0  ;;  %2171 = vmatprep.mubr.msk.f32.mxu1 %vm1061_vm6, %v2264_v11  ;;  %v2025_v11 = vadd.f32 -0.5, %v1604_v61  ;;  %v1606_v12 = vadd.f32 %v1577_v55, %v2491_v51 }
 0x2ee   : > { %v1046_v28 = vmax.f32 %v1021_v23, 1e-20  ;;  %2172 = vmatmul.mubr.msk.f32.gmra.mrb[22].mxu1 %vm1061_vm6, %v2266_v14  ;;  %v2024_v14 = vadd.f32 -0.5, %v1603_v62  ;;  %v1593_v23 = vpop.permute.xlu1 %1592 }
 0x2ef   : > { %v2027_v43 = vadd.f32 -0.5, %v1606_v12 }
 0x2f0   : > { %2271 = vrcp.f32 %v1046_v28  ;;  %v1608_v28 = vadd.f32 %v1585_v54, %v2499_v59 }
 0x2f1   : > { %2273 = vrcp.f32 %v1047_v22  ;;  %v1605_v22 = vadd.f32 %v1573_v1, %v2489_v48 }
 0x2f2   : > { %v2268_v57 = vpop.eup %2267  ;;  %v2029_v51 = vadd.f32 -0.5, %v1608_v28 }
 0x2f3   : > { %v2270_v29 = vpop.eup %2269  ;;  %2174 = vmatprep.mubr.msk.f32.mxu1 %vm1061_vm6, %v2268_v57  ;;  %v1607_v57 = vadd.f32 %v1581_v10, %v2497_v56 }
 0x2f4   : > { %v2165_v33 = vpop.f32.mrb[28].mxu0  ;;  %2175 = vmatmul.mubr.msk.f32.gmra.mrb[24].mxu1 %vm1061_vm6, %v2270_v29  ;;  %v2026_v29 = vadd.f32 -0.5, %v1605_v22 }
 0x2f5   : > { %v1049_v20 = vmax.f32 %v2165_v33, 1e-20  ;;  %v1031_v3 = vpop.f32.mrb[29].mxu0  ;;  %v1610_v33 = vadd.f32 %v1593_v23, %v2507_v6  ;;  %v2028_v48 = vadd.f32 -0.5, %v1607_v57 }
 0x2f6   : > { %v1048_v4 = vmax.f32 %v1031_v3, 1e-20  ;;  %v1601_v3 = vpop.permute.xlu1 %1600 }
 0x2f7   : > { %v2031_v59 = vadd.f32 -0.5, %v1610_v33  ;;  %v1612_v56 = vadd.f32 %v1601_v3, %v2515_v16 }
 0x2f8   : > { %2275 = vrcp.f32 %v1048_v4  ;;  %v1597_v4 = vpop.permute.xlu0 %1596 }
 0x2f9   : > { %2277 = vrcp.f32 %v1049_v20  ;;  %v1609_v20 = vadd.f32 %v1589_v40, %v2505_v0  ;;  %v2033_v6 = vadd.f32 -0.5, %v1612_v56 }
 0x2fa   : > { %v2272_v9 = vpop.eup %2271  ;;  %v2790_v0 = vpop.permute.xlu1 %1635 }
 0x2fb   : > { %v2274_v34 = vpop.eup %2273  ;;  %2177 = vmatprep.mubr.msk.f32.mxu1 %vm1061_vm6, %v2272_v9  ;;  %v2030_v9 = vadd.f32 -0.5, %v1609_v20 }
 0x2fc   : > { %2178 = vmatmul.mubr.msk.f32.gmra.mrb[26].mxu1 %vm1061_vm6, %v2274_v34  ;;  %v1611_v34 = vadd.f32 %v1597_v4, %v2513_v13 }
 0x302   : > { %v2276_v17 = vpop.eup %2275 }
 0x303   : > { %v2278_v36 = vpop.eup %2277  ;;  %2180 = vmatprep.mubr.msk.f32.mxu1 %vm1061_vm6, %v2276_v17  ;;  %v2032_v17 = vadd.f32 -0.5, %v1611_v34 }
 0x304   : > { %2181 = vmatmul.mubr.msk.f32.gmra.mrb[28].mxu1 %vm1061_vm6, %v2278_v36  ;;  %v2792_v36 = vpop.permute.xlu0 %1633 }
 0x308   : > { %v2796_v16 = vpop.permute.xlu0 %1637 }
 0x30c   : > { %v2800_v13 = vpop.permute.xlu0 %1641 }
 0x3b9   : > { %v2170_v24 = vpop.f32.mrb[20].mxu1 }
 0x3ba   : > { %1223 = vrot.lane.b32.xlu1 %v2170_v24, %s2306_s27  ;;  %v1162_v25 = vpop.f32.mrb[21].mxu1  ;;  %v2794_v24 = vpop.permute.xlu1 %1639 }
 0x3bb   : > { %1221 = vrot.lane.b32.xlu0 %v1162_v25, %s2306_s27 }
 0x3be   : > { %v2798_v25 = vpop.permute.xlu1 %1643 }
 0x3c1   : > { %v2173_v39 = vpop.f32.mrb[22].mxu1 }
 0x3c2   : > { %1227 = vrot.lane.b32.xlu1 %v2173_v39, %s2306_s27  ;;  %v1172_v42 = vpop.f32.mrb[23].mxu1  ;;  %v2802_v39 = vpop.permute.xlu1 %1647 }
 0x3c3   : > { %1225 = vrot.lane.b32.xlu0 %v1172_v42, %s2306_s27  ;;  %v2804_v42 = vpop.permute.xlu0 %1645 }
 0x3c6   : > { %v2806_v44 = vpop.permute.xlu1 %1651 }
 0x3c7   : > { %v2176_v46 = vpop.f32.mrb[24].mxu1 }
 0x3c8   : > { %1231 = vrot.lane.b32.xlu1 %v2176_v46, %s2306_s27  ;;  %v1182_v49 = vpop.f32.mrb[25].mxu1  ;;  %v2808_v46 = vpop.permute.xlu0 %1649 }
 0x3c9   : > { %1229 = vrot.lane.b32.xlu0 %v1182_v49, %s2306_s27 }
 0x3cf   : > { %v2179_v50 = vpop.f32.mrb[26].mxu1 }
 0x3d0   : > { %1235 = vrot.lane.b32.xlu1 %v2179_v50, %s2306_s27  ;;  %v1192_v35 = vpop.f32.mrb[27].mxu1 }
 0x3d1   : > { %1233 = vrot.lane.b32.xlu0 %v1192_v35, %s2306_s27 }
 0x3d7   : > { %v2182_v7 = vpop.f32.mrb[28].mxu1 }
 0x3d8   : > { %1239 = vrot.lane.b32.xlu1 %v2182_v7, %s2306_s27  ;;  %v1202_v8 = vpop.f32.mrb[29].mxu1 }
 0x3d9   : > { %1237 = vrot.lane.b32.xlu0 %v1202_v8, %s2306_s27 }
 0x3dc   : > { %1675 = vrot.lane.b32.xlu1 %v2025_v11, %s2310_s23 }
 0x3dd   : > { %1673 = vrot.lane.b32.xlu0 %v2024_v14, %s2310_s23 }
 0x3e0   : > { %1679 = vrot.lane.b32.xlu1 %v2027_v43, %s2310_s23 }
 0x3e1   : > { %1677 = vrot.lane.b32.xlu0 %v2026_v29, %s2310_s23 }
 0x3e4   : > { %1683 = vrot.lane.b32.xlu1 %v2029_v51, %s2310_s23 }
 0x3e5   : > { %1681 = vrot.lane.b32.xlu0 %v2028_v48, %s2310_s23 }
 0x3e8   : > { %1687 = vrot.lane.b32.xlu1 %v2031_v59, %s2310_s23 }
 0x3e9   : > { %1685 = vrot.lane.b32.xlu0 %v2030_v9, %s2310_s23 }
 0x3ec   : > { %1691 = vrot.lane.b32.xlu1 %v2033_v6, %s2310_s23 }
 0x3ed   : > { %1689 = vrot.lane.b32.xlu0 %v2032_v17, %s2310_s23 }
 0x42c   : > { %v1224_v49 = vpop.permute.xlu1 %1223 }
 0x42d   : > { %v1252_v1 = vmul.f32 %v2572_v47, %v1224_v49  ;;  %v1222_v50 = vpop.permute.xlu0 %1221 }
 0x42e   : > { %v1251_v35 = vmul.f32 %v2567_v32, %v1222_v50 }
 0x42f   : > { %1423 = vrot.lane.b32.xlu1 %v1252_v1, %s2310_s23 }
 0x430   : > { %1421 = vrot.lane.b32.xlu0 %v1251_v35, %s2310_s23 }
 0x433   : > { %1705 = vrot.lane.b32.xlu1 %v1252_v1, %s2311_s24 }
 0x434   : > { %v1228_v55 = vpop.permute.xlu1 %1227  ;;  %1703 = vrot.lane.b32.xlu0 %v1251_v35, %s2311_s24 }
 0x435   : > { %v1254_v60 = vmul.f32 %v2582_v58, %v1228_v55  ;;  %v1226_v61 = vpop.permute.xlu0 %1225 }
 0x436   : > { %v1253_v62 = vmul.f32 %v2577_v53, %v1226_v61 }
 0x437   : > { %1427 = vrot.lane.b32.xlu1 %v1254_v60, %s2310_s23 }
 0x438   : > { %1425 = vrot.lane.b32.xlu0 %v1253_v62, %s2310_s23 }
 0x43a   : > { %v1232_v32 = vpop.permute.xlu1 %1231 }
 0x43b   : > { %v1230_v47 = vpop.permute.xlu0 %1229  ;;  %1709 = vrot.lane.b32.xlu1 %v1254_v60, %s2311_s24  ;;  %v1256_v54 = vmul.f32 %v2591_v5, %v1232_v32 }
 0x43c   : > { %1707 = vrot.lane.b32.xlu0 %v1253_v62, %s2311_s24  ;;  %v1255_v7 = vmul.f32 %v2587_v63, %v1230_v47 }
 0x43f   : > { %1431 = vrot.lane.b32.xlu1 %v1256_v54, %s2310_s23 }
 0x440   : > { %1429 = vrot.lane.b32.xlu0 %v1255_v7, %s2310_s23 }
 0x442   : > { %v1236_v58 = vpop.permute.xlu1 %1235 }
 0x443   : > { %v1234_v53 = vpop.permute.xlu0 %1233  ;;  %1713 = vrot.lane.b32.xlu1 %v1256_v54, %s2311_s24  ;;  %v1258_v10 = vmul.f32 %v2601_v19, %v1236_v58 }
 0x444   : > { %1711 = vrot.lane.b32.xlu0 %v1255_v7, %s2311_s24  ;;  %v1257_v8 = vmul.f32 %v2597_v15, %v1234_v53 }
 0x447   : > { %1435 = vrot.lane.b32.xlu1 %v1258_v10, %s2310_s23 }
 0x448   : > { %1433 = vrot.lane.b32.xlu0 %v1257_v8, %s2310_s23 }
 0x44a   : > { %v1240_v5 = vpop.permute.xlu1 %1239 }
 0x44b   : > { %1717 = vrot.lane.b32.xlu1 %v1258_v10, %s2311_s24  ;;  %v1238_v63 = vpop.permute.xlu0 %1237  ;;  %v1260_v11 = vmul.f32 %v2613_v26, %v1240_v5 }
 0x44c   : > { %1715 = vrot.lane.b32.xlu0 %v1257_v8, %s2311_s24  ;;  %v1259_v12 = vmul.f32 %v2609_v21, %v1238_v63 }
 0x44e   : > { %v1676_v15 = vpop.permute.xlu1 %1675 }
 0x44f   : > { %1439 = vrot.lane.b32.xlu1 %v1260_v11, %s2310_s23  ;;  %v1674_v19 = vpop.permute.xlu0 %1673  ;;  %v1734_v48 = vsel %vm1451_vm5, %v2790_v0, %v1676_v15 }
 0x450   : > { %1437 = vrot.lane.b32.xlu0 %v1259_v12, %s2310_s23  ;;  %v1733_v3 = vsel %vm1451_vm5, %v2792_v36, %v1674_v19 }
 0x452   : > { %v1680_v14 = vpop.permute.xlu1 %1679 }
 0x453   : > { %1721 = vrot.lane.b32.xlu1 %v1260_v11, %s2311_s24  ;;  %v1678_v22 = vpop.permute.xlu0 %1677  ;;  %v1736_v6 = vsel %vm1451_vm5, %v2794_v24, %v1680_v14 }
 0x454   : > { %1719 = vrot.lane.b32.xlu0 %v1259_v12, %s2311_s24  ;;  %v1735_v0 = vsel %vm1451_vm5, %v2796_v16, %v1678_v22 }
 0x456   : > { %v1684_v23 = vpop.permute.xlu1 %1683 }
 0x457   : > { %v1682_v40 = vpop.permute.xlu0 %1681  ;;  %v1738_v50 = vsel %vm1451_vm5, %v2798_v25, %v1684_v23 }
 0x458   : > { %v1737_v55 = vsel %vm1451_vm5, %v2800_v13, %v1682_v40 }
 0x45a   : > { %v1688_v43 = vpop.permute.xlu1 %1687 }
 0x45b   : > { %v1686_v28 = vpop.permute.xlu0 %1685  ;;  %v1740_v32 = vsel %vm1451_vm5, %v2802_v39, %v1688_v43 }
 0x45c   : > { %v1739_v54 = vsel %vm1451_vm5, %v2804_v42, %v1686_v28 }
 0x45e   : > { %v2841_v26 = vpop.permute.xlu1 %1691 }
 0x45f   : > { %v2843_v21 = vpop.permute.xlu0 %1689  ;;  %v1742_v10 = vsel %vm1451_vm5, %v2806_v44, %v2841_v26 }
 0x460   : > { %v1741_v5 = vsel %vm1451_vm5, %v2808_v46, %v2843_v21 }
 0x4a1   : > { %v1424_v57 = vpop.permute.xlu1 %1423 }
 0x4a2   : > { %v1463_v29 = vsel %vm554_vm1, %v2676_v18, %v1424_v57  ;;  %v1422_v51 = vpop.permute.xlu0 %1421 }
 0x4a3   : > { %1474 = vst.msk [vmem:[%s2848_s28 + $0x8] sm:$0xff] %vm1472_vm7, %v1463_v29  ;;  %v1462_v33 = vsel %vm554_vm1, %v2684_v31, %v1422_v51 }
 0x4a4   : > { %1473 = vst.msk [vmem:[%s2848_s28] sm:$0xff] %vm1472_vm7, %v1462_v33 }
 0x4a5   : > { %v1706_v20 = vpop.permute.xlu1 %1705 }
 0x4a6   : > { %v1744_v4 = vsel %vm554_vm1, %v1734_v48, %v1706_v20  ;;  %v1704_v18 = vpop.permute.xlu0 %1703 }
 0x4a7   : > { %2035 = vst.msk [vmem:[%s2848_s28 + $0x58] sm:$0xff] %vm1472_vm7, %v1744_v4  ;;  %v1743_v59 = vsel %vm554_vm1, %v1733_v3, %v1704_v18 }
 0x4a8   : > { %2034 = vst.msk [vmem:[%s2848_s28 + $0x50] sm:$0xff] %vm1472_vm7, %v1743_v59 }
 0x4a9   : > { %v1428_v31 = vpop.permute.xlu1 %1427 }
 0x4aa   : > { %v1465_v56 = vsel %vm554_vm1, %v2710_v38, %v1428_v31  ;;  %v1426_v9 = vpop.permute.xlu0 %1425 }
 0x4ab   : > { %1476 = vst.msk [vmem:[%s2848_s28 + $0x18] sm:$0xff] %vm1472_vm7, %v1465_v56  ;;  %v1464_v34 = vsel %vm554_vm1, %v2698_v27, %v1426_v9 }
 0x4ac   : > { %1475 = vst.msk [vmem:[%s2848_s28 + $0x10] sm:$0xff] %vm1472_vm7, %v1464_v34 }
 0x4ad   : > { %v1710_v17 = vpop.permute.xlu1 %1709 }
 0x4ae   : > { %v1746_v36 = vsel %vm554_vm1, %v1736_v6, %v1710_v17  ;;  %v1708_v38 = vpop.permute.xlu0 %1707 }
 0x4af   : > { %2037 = vst.msk [vmem:[%s2848_s28 + $0x68] sm:$0xff] %vm1472_vm7, %v1746_v36  ;;  %v1745_v49 = vsel %vm554_vm1, %v1735_v0, %v1708_v38 }
 0x4b0   : > { %2036 = vst.msk [vmem:[%s2848_s28 + $0x60] sm:$0xff] %vm1472_vm7, %v1745_v49 }
 0x4b1   : > { %v1432_v27 = vpop.permute.xlu1 %1431 }
 0x4b2   : > { %v1467_v1 = vsel %vm554_vm1, %v2720_v41, %v1432_v27  ;;  %v1430_v24 = vpop.permute.xlu0 %1429 }
 0x4b3   : > { %1478 = vst.msk [vmem:[%s2848_s28 + $0x28] sm:$0xff] %vm1472_vm7, %v1467_v1  ;;  %v1466_v16 = vsel %vm554_vm1, %v2690_v52, %v1430_v24 }
 0x4b4   : > { %1477 = vst.msk [vmem:[%s2848_s28 + $0x20] sm:$0xff] %vm1472_vm7, %v1466_v16 }
 0x4b5   : > { %v1714_v35 = vpop.permute.xlu1 %1713 }
 0x4b6   : > { %v1748_v60 = vsel %vm554_vm1, %v1738_v50, %v1714_v35  ;;  %v1712_v41 = vpop.permute.xlu0 %1711 }
 0x4b7   : > { %2039 = vst.msk [vmem:[%s2848_s28 + $0x78] sm:$0xff] %vm1472_vm7, %v1748_v60  ;;  %v1747_v61 = vsel %vm554_vm1, %v1737_v55, %v1712_v41 }
 0x4b8   : > { %2038 = vst.msk [vmem:[%s2848_s28 + $0x70] sm:$0xff] %vm1472_vm7, %v1747_v61 }
 0x4b9   : > { %v1436_v52 = vpop.permute.xlu1 %1435 }
 0x4ba   : > { %v1469_v62 = vsel %vm554_vm1, %v2727_v45, %v1436_v52  ;;  %v1434_v25 = vpop.permute.xlu0 %1433 }
 0x4bb   : > { %1480 = vst.msk [vmem:[%s2848_s28 + $0x38] sm:$0xff] %vm1472_vm7, %v1469_v62  ;;  %v1468_v13 = vsel %vm554_vm1, %v2704_v30, %v1434_v25 }
 0x4bc   : > { %1479 = vst.msk [vmem:[%s2848_s28 + $0x30] sm:$0xff] %vm1472_vm7, %v1468_v13 }
 0x4bd   : > { %v1718_v47 = vpop.permute.xlu1 %1717 }
 0x4be   : > { %v1750_v7 = vsel %vm554_vm1, %v1740_v32, %v1718_v47  ;;  %v1716_v45 = vpop.permute.xlu0 %1715 }
 0x4bf   : > { %2041 = vst.msk [vmem:[%s2848_s28 + $0x88] sm:$0xff] %vm1472_vm7, %v1750_v7  ;;  %v1749_v58 = vsel %vm554_vm1, %v1739_v54, %v1716_v45 }
 0x4c0   : > { %2040 = vst.msk [vmem:[%s2848_s28 + $0x80] sm:$0xff] %vm1472_vm7, %v1749_v58 }
 0x4c1   : > { %v1440_v30 = vpop.permute.xlu1 %1439 }
 0x4c2   : > { %v1471_v53 = vsel %vm554_vm1, %v2730_v2, %v1440_v30  ;;  %v1438_v39 = vpop.permute.xlu0 %1437 }
 0x4c3   : > { %1482 = vst.msk [vmem:[%s2848_s28 + $0x48] sm:$0xff] %vm1472_vm7, %v1471_v53  ;;  %v1470_v42 = vsel %vm554_vm1, %v2715_v37, %v1438_v39 }
 0x4c4   : > { %1481 = vst.msk [vmem:[%s2848_s28 + $0x40] sm:$0xff] %vm1472_vm7, %v1470_v42 }
 0x4c5   : > { %v1722_v8 = vpop.permute.xlu1 %1721 }
 0x4c6   : > { %v1752_v63 = vsel %vm554_vm1, %v1742_v10, %v1722_v8  ;;  %v1720_v2 = vpop.permute.xlu0 %1719 }
 0x4c7   : > { %2043 = vst.msk [vmem:[%s2848_s28 + $0x98] sm:$0xff] %vm1472_vm7, %v1752_v63  ;;  %v1751_v11 = vsel %vm554_vm1, %v1741_v5, %v1720_v2 }
 0x4c8   : > { %2042 = vst.msk [vmem:[%s2848_s28 + $0x90] sm:$0xff] %vm1472_vm7, %v1751_v11 }
 0x4c9 PF: > { %s21_s15 = sadd.s32 1, %s2301_s15   ;;  %s2962_s13 = smov %s2297_s14 }
 0x4ca   : > { %p18_p5 = scmp.ge.s32.totalorder %s21_s15, 4   ;;  %s2963_s14 = smov %s2965_s16 }
 0x4cc   :  { %20 = sbr.rel (!%p18_p5) target bundleno = 2 (0x2), region = 105 }

// kernel: encoder_layer_forward.4
= control target key start
LH: loop header
LB: loop body
LE: loop exit
PB: predicated region body
PF: predicated region fallthrough
CT: control target
= control target key end

     0   :  { %s5933_s27 = smov 0   ;;  %s5935_s28 = smov 0   ;;  %s9353_s0 = inlined_call_operand.vmem [shape: f32[2,2,80,48], index: 0, kind: input, shape index: {}]   ;;  %s9354_s1 = inlined_call_operand.vmem [shape: f32[2,2,80], index: 1, kind: input, shape index: {}]   ;;  %s9355_s2 = inlined_call_operand.vmem [shape: bf16[2,80,32], index: 2, kind: input, shape index: {}]   ;;  %s9356_s3 = inlined_call_operand.vmem [shape: f32[2,80,32], index: 3, kind: input, shape index: {}]   ;;  %s9357_s4 = inlined_call_operand.vmem [shape: bf16[32,32], index: 4, kind: input, shape index: {}]   ;;  %s9358_s5 = inlined_call_operand.vmem [shape: f32[1,32], index: 5, kind: input, shape index: {}]   ;;  %s9359_s6 = inlined_call_operand.vmem [shape: f32[1,32], index: 6, kind: input, shape index: {}]   ;;  %s9360_s7 = inlined_call_operand.vmem [shape: f32[1,32], index: 7, kind: input, shape index: {}]   ;;  %s9361_s8 = inlined_call_operand.vmem [shape: f32[2,80,32], index: 8, kind: output, shape index: {}]  }
   0x1   :  { %s5937_s29 = smov 0   ;;  %s5939_s30 = smov 0  }
   0x2   :  { %s5941_s9 = smov 0  }
   0x3 LB: > { %9434 = sst [smem:[#allocation3_spill]] %s5823_s30  ;;  %s30_s10 = sadd.s32 1, %s5819_s29  ;;  %s5827_s9 = sphi %s5941_s9, %s18_s9   ;;  %s5823_s30 = sphi %s5939_s30, %s10150_s30   ;;  %s5819_s29 = sphi %s5937_s29, %s10152_s29   ;;  %s5815_s28 = sphi %s5935_s28, %s10148_s28   ;;  %s5811_s27 = sphi %s5933_s27, %s10151_s27  }
   0x4   : > { %s37_s11 = sadd.s32 1, %s5823_s30  ;;  %p31_p0 = scmp.ge.s32.totalorder %s30_s10, 2 }
   0x5   : > { %p5236_p1 = scmp.ge.s32.totalorder %s5827_s9, 1  ;;  %p332_p2 = scmp.lt.s32.totalorder %s5827_s9, 5 }
   0x6   : > { %s10154_s10 = smov (%p31_p0, %s30_s10), 0  ;;  %s10156_s11 = smov (!%p31_p0, %s37_s11), %s5823_s30 }
   0x7   : > { %9435 = sst [smem:[#allocation4_spill]] %s10154_s10  ;;  %p333_p3 = pnand %p5236_p1, %p332_p2 }
   0x8   : > { %p39_p4 = scmp.ge.s32.totalorder %s10156_s11, 2 }
   0x9   : > { %336 = sbr.rel (%p333_p3) target bundleno = 2245 (0x8c5), region = 52 }
   0xa   : > { %s10158_s11 = smov (%p39_p4, %s10156_s11), 0 }
   0xb   : > { %9436 = sst [smem:[#allocation5_spill]] %s10158_s11 }
  0x10   : > { %p397_p5 = scmp.lt.s32.totalorder %s5815_s28, 1  ;;  %p399_p6 = scmp.lt.s32.totalorder %s5811_s27, 1 }
  0x11   : > { %p5242_p7 = scmp.ne.s32.totalorder %s5811_s27, 0 }
  0x12   : > { %s10160_s28 = smov (!%p397_p5, %s5815_s28), 1  ;;  %vm444_vm0 = vcmask (!%p5242_p7), 261120   ;;  %v5829_v0 = vmov (!%p5242_p7), 0.0  }
  0x13   : > { %s400_s12 = scalar_select %p399_p6, %s5811_s27, 1 }
  0x14   : > { %s5477_s13 = smul.u32 20, %s10160_s28  ;;  %445 = vst.msk [vmem:[#allocation2] sm:$0xff] (!%p5242_p7), %vm444_vm0, %v5829_v0  ;;  %446 = vst.msk [vmem:[#allocation2 + $0x8] sm:$0xff] (!%p5242_p7), %vm444_vm0, %v5829_v0 }
  0x15   : > { %s5476_s14 = smul.u32 10, %s400_s12  ;;  %s5238_s15 = sshll.u32 %s400_s12, 1  ;;  %447 = vst.msk [vmem:[#allocation2 + $0x10] sm:$0xff] (!%p5242_p7), %vm444_vm0, %v5829_v0  ;;  %448 = vst.msk [vmem:[#allocation2 + $0x18] sm:$0xff] (!%p5242_p7), %vm444_vm0, %v5829_v0 }
  0x16   : > { %s5970_s18 = scalar_lea.vmem %s9354_s1, %s5238_s15  ;;  %s5478_s19 = smul.u32 40, %s10160_s28  ;;  %449 = vst.msk [vmem:[#allocation2 + $0x20] sm:$0xff] (!%p5242_p7), %vm444_vm0, %v5829_v0  ;;  %450 = vst.msk [vmem:[#allocation2 + $0x28] sm:$0xff] (!%p5242_p7), %vm444_vm0, %v5829_v0 }
  0x17   : > { %s406_s20 = sadd.s32 %s5477_s13, %s5476_s14  ;;  %s5479_s21 = smul.u32 80, %s10160_s28  ;;  %451 = vst.msk [vmem:[#allocation2 + $0x30] sm:$0xff] (!%p5242_p7), %vm444_vm0, %v5829_v0  ;;  %452 = vst.msk [vmem:[#allocation2 + $0x38] sm:$0xff] (!%p5242_p7), %vm444_vm0, %v5829_v0 }
  0x18   : > { %s5237_s22 = sshll.u32 %s406_s20, 3  ;;  %s5975_s25 = scalar_lea.vmem %s9355_s2, %s5478_s19  ;;  %453 = vst.msk [vmem:[#allocation2 + $0x40] sm:$0xff] (!%p5242_p7), %vm444_vm0, %v5829_v0  ;;  %454 = vst.msk [vmem:[#allocation2 + $0x48] sm:$0xff] (!%p5242_p7), %vm444_vm0, %v5829_v0 }
  0x19   : > { %s5980_s10 = scalar_lea.vmem %s9353_s0, %s5237_s22  ;;  %s5985_s16 = scalar_lea.vmem %s9356_s3, %s5479_s21 }
  0x1a   : > { %s5990_s28 = scalar_lea.vmem %s9361_s8, %s5479_s21  ;;  %443 = sbr.rel (%p5242_p7) target bundleno = 33 (0x21), region = 56 }
  0x21 PF: > { %v5994_v1 = vld [vmem:[%s5980_s10 + $0x10] sm:$0xff]  ;;  %v5997_v2 = vld [vmem:[%s5980_s10] sm:$0xff]  ;;  %v5830_v3 = vmov 0   ;;  %v6002_v4 = vld [vmem:[%s5980_s10 + $0x18] sm:$0xff]  ;;  %v5831_v12 = vmov 16   ;;  %v5832_v13 = vmov 32  }
  0x22   : > { %5580 = vset.pattern.permute.xlu1 %v5830_v3  ;;  %5579 = vset.pattern.permute.xlu0 %v5830_v3  ;;  %v6005_v5 = vld [vmem:[%s5980_s10 + $0x8] sm:$0xff]  ;;  %v6013_v7 = vld [vmem:[%s5980_s10 + $0x20] sm:$0xff]  ;;  %v6018_v8 = vld [vmem:[%s5980_s10 + $0x38] sm:$0xff]  ;;  %v5833_v14 = vmov 1   ;;  %v5834_v15 = vmov 17   ;;  %v5835_v16 = vmov 33  }
  0x23   : > { %478 = vperm.xlu1 %5580, %v5994_v1   ;;  %468 = vperm.xlu0 %5579, %v5997_v2   ;;  %v6010_v6 = vld [vmem:[%s5980_s10 + $0x28] sm:$0xff]  ;;  %9437 = vst [vmem:[#allocation6_spill] sm:$0xff] %v6018_v8  ;;  %v6021_v9 = vld [vmem:[%s5980_s10 + $0x30] sm:$0xff]  ;;  %v6029_v11 = vld [vmem:[%s5980_s10 + $0x40] sm:$0xff]  ;;  %v5836_v17 = vmov 2   ;;  %v5837_v22 = vmov 18  }
  0x24   : > { %v6026_v10 = vld [vmem:[%s5980_s10 + $0x48] sm:$0xff]  ;;  %v5838_v33 = vmov 34   ;;  %v5839_v42 = vmov 3   ;;  %v5840_v53 = vmov 19   ;;  %v5841_v63 = vmov 35   ;;  %s5856_s30 = smov 120  }
  0x25   : > { %9438 = vst [vmem:[#allocation7_spill] sm:$0xff] %v6026_v10  ;;  %vm5845_vm1 = vmmov 0   ;;  %vm1439_vm2 = vcmask 654336   ;;  %s5869_s11 = smov 112   ;;  %s5875_s13 = smov 104   ;;  %vm4712_vm3 = vcmask 64512  }
  0x26   : > { %s5883_s14 = smov 8   ;;  %vm4723_vm4 = vcmask 130048   ;;  %vm4734_vm5 = vcmask 195584   ;;  %vm4755_vm6 = vcmask 261120   ;;  %p5268_p8 = scmp.ne.s32.totalorder %s5811_s27, 1 }
  0x27   : > { %483 = vperm.xlu1 %5580, %v6002_v4   ;;  %473 = vperm.xlu0 %5579, %v6005_v5   ;;  %vm5887_vm7 = vmmov (!%p5268_p8), 0  }
  0x2b   : > { %493 = vperm.xlu1 %5580, %v6010_v6   ;;  %488 = vperm.xlu0 %5579, %v6013_v7  }
  0x2f   : > { %503 = vperm.xlu1 %5580, %v6018_v8   ;;  %498 = vperm.xlu0 %5579, %v6021_v9  }
  0x33   : > { %513 = vperm.xlu1 %5580, %v6026_v10   ;;  %508 = vperm.xlu0 %5579, %v6029_v11  }
  0x37   : > { %5582 = vset.pattern.permute.xlu1 %v5831_v12  ;;  %5581 = vset.pattern.permute.xlu0 %v5831_v12 }
  0x38   : > { %565 = vperm.xlu1 %5582, %v6005_v5   ;;  %561 = vperm.xlu0 %5581, %v5997_v2  }
  0x3c   : > { %569 = vperm.xlu1 %5582, %v5994_v1   ;;  %573 = vperm.xlu0 %5581, %v6002_v4  }
  0x40   : > { %577 = vperm.xlu1 %5582, %v6013_v7   ;;  %581 = vperm.xlu0 %5581, %v6010_v6  }
  0x44   : > { %585 = vperm.xlu1 %5582, %v6021_v9   ;;  %589 = vperm.xlu0 %5581, %v6018_v8  }
  0x48   : > { %593 = vperm.xlu1 %5582, %v6029_v11   ;;  %597 = vperm.xlu0 %5581, %v6026_v10  }
  0x4c   : > { %5583 = vset.pattern.permute.xlu1 %v5832_v13  ;;  %5584 = vset.pattern.permute.xlu0 %v5832_v13 }
  0x4d   : > { %655 = vperm.xlu1 %5583, %v5997_v2   ;;  %659 = vperm.xlu0 %5584, %v6005_v5  }
  0x51   : > { %663 = vperm.xlu1 %5583, %v5994_v1   ;;  %671 = vperm.xlu0 %5584, %v6013_v7  }
  0x55   : > { %667 = vperm.xlu1 %5583, %v6002_v4   ;;  %679 = vperm.xlu0 %5584, %v6021_v9  }
  0x59   : > { %675 = vperm.xlu1 %5583, %v6010_v6   ;;  %687 = vperm.xlu0 %5584, %v6029_v11  }
  0x5d   : > { %683 = vperm.xlu1 %5583, %v6018_v8   ;;  %5585 = vset.pattern.permute.xlu0 %v5833_v14 }
  0x5e   : > { %705 = vperm.xlu0 %5585, %v5997_v2  }
  0x61   : > { %691 = vperm.xlu1 %5583, %v6026_v10  }
  0x62   : > { %717 = vperm.xlu0 %5585, %v6002_v4  }
  0x65   : > { %5586 = vset.pattern.permute.xlu1 %v5833_v14 }
  0x66   : > { %709 = vperm.xlu1 %5586, %v6005_v5   ;;  %725 = vperm.xlu0 %5585, %v6010_v6  }
  0x6a   : > { %713 = vperm.xlu1 %5586, %v5994_v1   ;;  %733 = vperm.xlu0 %5585, %v6018_v8  }
  0x6e   : > { %721 = vperm.xlu1 %5586, %v6013_v7   ;;  %741 = vperm.xlu0 %5585, %v6026_v10  }
  0x72   : > { %729 = vperm.xlu1 %5586, %v6021_v9   ;;  %5588 = vset.pattern.permute.xlu0 %v5834_v15 }
  0x73   : > { %789 = vperm.xlu0 %5588, %v6005_v5  }
  0x76   : > { %737 = vperm.xlu1 %5586, %v6029_v11  }
  0x77   : > { %801 = vperm.xlu0 %5588, %v6013_v7  }
  0x7a   : > { %5587 = vset.pattern.permute.xlu1 %v5834_v15 }
  0x7b   : > { %785 = vperm.xlu1 %5587, %v5997_v2   ;;  %809 = vperm.xlu0 %5588, %v6021_v9  }
  0x7f   : > { %793 = vperm.xlu1 %5587, %v5994_v1   ;;  %817 = vperm.xlu0 %5588, %v6029_v11  }
  0x83   : > { %797 = vperm.xlu1 %5587, %v6002_v4   ;;  %5589 = vset.pattern.permute.xlu0 %v5835_v16 }
  0x84   : > { %875 = vperm.xlu0 %5589, %v5997_v2  }
  0x87   : > { %805 = vperm.xlu1 %5587, %v6010_v6  }
  0x88   : > { %887 = vperm.xlu0 %5589, %v6002_v4  }
  0x8b   : > { %813 = vperm.xlu1 %5587, %v6018_v8  }
  0x8c   : > { %895 = vperm.xlu0 %5589, %v6010_v6  }
  0x8f   : > { %821 = vperm.xlu1 %5587, %v6026_v10  }
  0x90   : > { %903 = vperm.xlu0 %5589, %v6018_v8  }
  0x93   : > { %5590 = vset.pattern.permute.xlu1 %v5835_v16 }
  0x94   : > { %879 = vperm.xlu1 %5590, %v6005_v5   ;;  %911 = vperm.xlu0 %5589, %v6026_v10  }
  0x98   : > { %883 = vperm.xlu1 %5590, %v5994_v1   ;;  %5592 = vset.pattern.permute.xlu0 %v5836_v17 }
  0x99   : > { %939 = vperm.xlu0 %5592, %v6005_v5  }
  0x9c   : > { %891 = vperm.xlu1 %5590, %v6013_v7  }
  0x9d   : > { %951 = vperm.xlu0 %5592, %v6013_v7  }
  0xa0   : > { %899 = vperm.xlu1 %5590, %v6021_v9  }
  0xa1   : > { %959 = vperm.xlu0 %5592, %v6021_v9  }
  0xa2   : > { %v6085_v18 = vpop.permute.xlu1 %478  ;;  %v6087_v19 = vpop.permute.xlu0 %468 }
  0xa4   : > { %907 = vperm.xlu1 %5590, %v6029_v11  }
  0xa5   : > { %967 = vperm.xlu0 %5592, %v6029_v11  }
  0xa6   : > { %v6091_v20 = vpop.permute.xlu1 %483  ;;  %v6093_v21 = vpop.permute.xlu0 %473 }
  0xa8   : > { %5591 = vset.pattern.permute.xlu1 %v5836_v17 }
  0xa9   : > { %935 = vperm.xlu1 %5591, %v5997_v2   ;;  %5593 = vset.pattern.permute.xlu0 %v5837_v22 }
  0xaa   : > { %v6096_v23 = vpop.permute.xlu1 %493  ;;  %1015 = vperm.xlu0 %5593, %v5997_v2   ;;  %v6099_v24 = vpop.permute.xlu0 %488 }
  0xad   : > { %943 = vperm.xlu1 %5591, %v5994_v1  }
  0xae   : > { %v6102_v25 = vpop.permute.xlu1 %503  ;;  %1027 = vperm.xlu0 %5593, %v6002_v4   ;;  %v6105_v26 = vpop.permute.xlu0 %498 }
  0xb1   : > { %947 = vperm.xlu1 %5591, %v6002_v4  }
  0xb2   : > { %v6108_v27 = vpop.permute.xlu1 %513  ;;  %1035 = vperm.xlu0 %5593, %v6010_v6   ;;  %v6111_v28 = vpop.permute.xlu0 %508 }
  0xb5   : > { %955 = vperm.xlu1 %5591, %v6010_v6  }
  0xb6   : > { %1043 = vperm.xlu0 %5593, %v6018_v8  }
  0xb7   : > { %v6115_v29 = vpop.permute.xlu1 %565  ;;  %v6117_v30 = vpop.permute.xlu0 %561 }
  0xb9   : > { %963 = vperm.xlu1 %5591, %v6018_v8  }
  0xba   : > { %1051 = vperm.xlu0 %5593, %v6026_v10  }
  0xbb   : > { %v6121_v31 = vpop.permute.xlu1 %569  ;;  %v6123_v32 = vpop.permute.xlu0 %573 }
  0xbd   : > { %971 = vperm.xlu1 %5591, %v6026_v10  }
  0xbe   : > { %5596 = vset.pattern.permute.xlu0 %v5838_v33 }
  0xbf   : > { %v6126_v34 = vpop.permute.xlu1 %577  ;;  %1109 = vperm.xlu0 %5596, %v6005_v5   ;;  %v6129_v35 = vpop.permute.xlu0 %581 }
  0xc1   : > { %5594 = vset.pattern.permute.xlu1 %v5837_v22 }
  0xc2   : > { %1019 = vperm.xlu1 %5594, %v6005_v5  }
  0xc3   : > { %v6132_v36 = vpop.permute.xlu1 %585  ;;  %1121 = vperm.xlu0 %5596, %v6013_v7   ;;  %v6135_v37 = vpop.permute.xlu0 %589 }
  0xc6   : > { %1023 = vperm.xlu1 %5594, %v5994_v1  }
  0xc7   : > { %v6138_v38 = vpop.permute.xlu1 %593  ;;  %1129 = vperm.xlu0 %5596, %v6021_v9   ;;  %v6141_v39 = vpop.permute.xlu0 %597 }
  0xca   : > { %1031 = vperm.xlu1 %5594, %v6013_v7  }
  0xcb   : > { %1137 = vperm.xlu0 %5596, %v6029_v11  }
  0xcc   : > { %v6145_v40 = vpop.permute.xlu1 %655  ;;  %v6147_v41 = vpop.permute.xlu0 %659 }
  0xce   : > { %1039 = vperm.xlu1 %5594, %v6021_v9  }
  0xcf   : > { %5597 = vset.pattern.permute.xlu0 %v5839_v42 }
  0xd0   : > { %v6150_v43 = vpop.permute.xlu1 %663  ;;  %1165 = vperm.xlu0 %5597, %v5997_v2   ;;  %v6153_v44 = vpop.permute.xlu0 %671 }
  0xd2   : > { %1047 = vperm.xlu1 %5594, %v6029_v11  }
  0xd4   : > { %v6156_v45 = vpop.permute.xlu1 %667  ;;  %1177 = vperm.xlu0 %5597, %v6002_v4   ;;  %v6159_v46 = vpop.permute.xlu0 %679 }
  0xd6   : > { %5595 = vset.pattern.permute.xlu1 %v5838_v33 }
  0xd7   : > { %1105 = vperm.xlu1 %5595, %v5997_v2  }
  0xd8   : > { %v6162_v47 = vpop.permute.xlu1 %675  ;;  %1185 = vperm.xlu0 %5597, %v6010_v6   ;;  %v6165_v48 = vpop.permute.xlu0 %687 }
  0xd9   : > { %9439 = vst [vmem:[#allocation8_spill] sm:$0xff] %v6165_v48 }
  0xdb   : > { %1113 = vperm.xlu1 %5595, %v5994_v1  }
  0xdc   : > { %v6168_v49 = vpop.permute.xlu1 %683  ;;  %1193 = vperm.xlu0 %5597, %v6018_v8  }
  0xdd   : > { %v6171_v50 = vpop.permute.xlu0 %705 }
  0xdf   : > { %1117 = vperm.xlu1 %5595, %v6002_v4  }
  0xe0   : > { %v6174_v51 = vpop.permute.xlu1 %691  ;;  %1201 = vperm.xlu0 %5597, %v6026_v10  }
  0xe1   : > { %9440 = vst [vmem:[#allocation9_spill] sm:$0xff] %v6174_v51  ;;  %v6177_v52 = vpop.permute.xlu0 %717 }
  0xe3   : > { %1125 = vperm.xlu1 %5595, %v6010_v6  }
  0xe4   : > { %5600 = vset.pattern.permute.xlu0 %v5840_v53 }
  0xe5   : > { %v6180_v54 = vpop.permute.xlu1 %709  ;;  %1249 = vperm.xlu0 %5600, %v6005_v5   ;;  %v6183_v55 = vpop.permute.xlu0 %725 }
  0xe7   : > { %1133 = vperm.xlu1 %5595, %v6018_v8  }
  0xe9   : > { %v6186_v56 = vpop.permute.xlu1 %713  ;;  %1261 = vperm.xlu0 %5600, %v6013_v7   ;;  %v6189_v57 = vpop.permute.xlu0 %733 }
  0xeb   : > { %1141 = vperm.xlu1 %5595, %v6026_v10  }
  0xed   : > { %v6192_v58 = vpop.permute.xlu1 %721  ;;  %1269 = vperm.xlu0 %5600, %v6021_v9   ;;  %v6195_v59 = vpop.permute.xlu0 %741 }
  0xee   : > { %9441 = vst [vmem:[#allocation10_spill] sm:$0xff] %v6195_v59 }
  0xef   : > { %5598 = vset.pattern.permute.xlu1 %v5839_v42  ;;  %v9363_v42 = vmov 4  }
  0xf0   : > { %1169 = vperm.xlu1 %5598, %v6005_v5  }
  0xf1   : > { %v6198_v60 = vpop.permute.xlu1 %729  ;;  %1277 = vperm.xlu0 %5600, %v6029_v11  }
  0xf2   : > { %9442 = vst [vmem:[#allocation11_spill] sm:$0xff] %v6198_v60  ;;  %v6201_v61 = vpop.permute.xlu0 %789 }
  0xf4   : > { %1173 = vperm.xlu1 %5598, %v5994_v1  }
  0xf5   : > { %v6204_v62 = vpop.permute.xlu1 %737  ;;  %5601 = vset.pattern.permute.xlu0 %v5841_v63 }
  0xf6   : > { %9443 = vst [vmem:[#allocation12_spill] sm:$0xff] %v6204_v62  ;;  %1335 = vperm.xlu0 %5601, %v5997_v2   ;;  %v6207_v0 = vpop.permute.xlu0 %801 }
  0xf8   : > { %1181 = vperm.xlu1 %5598, %v6013_v7  }
  0xfa   : > { %v6210_v3 = vpop.permute.xlu1 %785  ;;  %1347 = vperm.xlu0 %5601, %v6002_v4   ;;  %v6213_v12 = vpop.permute.xlu0 %809 }
  0xfb   : > { %9444 = vst [vmem:[#allocation13_spill] sm:$0xff] %v6213_v12 }
  0xfc   : > { %1189 = vperm.xlu1 %5598, %v6021_v9  }
  0xfe   : > { %v6216_v13 = vpop.permute.xlu1 %793  ;;  %1355 = vperm.xlu0 %5601, %v6010_v6   ;;  %v6219_v14 = vpop.permute.xlu0 %817 }
  0xff   : > { %9445 = vst [vmem:[#allocation14_spill] sm:$0xff] %v6216_v13  ;;  %9446 = vst [vmem:[#allocation15_spill] sm:$0xff] %v6219_v14  ;;  %v9364_v14 = vmov 20  }
 0x100   : > { %1197 = vperm.xlu1 %5598, %v6029_v11  }
 0x102   : > { %v6222_v15 = vpop.permute.xlu1 %797  ;;  %1363 = vperm.xlu0 %5601, %v6018_v8  }
 0x103   : > { %v6225_v16 = vpop.permute.xlu0 %875 }
 0x104   : > { %9447 = vst [vmem:[#allocation16_spill] sm:$0xff] %v6225_v16  ;;  %5599 = vset.pattern.permute.xlu1 %v5840_v53  ;;  %v9365_v16 = vmov 0.0  }
 0x105   : > { %1245 = vperm.xlu1 %5599, %v5997_v2   ;;  %5328 = vmatprep.subr.bf16.mxu0 %v9365_v16 }
 0x106   : > { %v6228_v17 = vpop.permute.xlu1 %805  ;;  %1371 = vperm.xlu0 %5601, %v6026_v10   ;;  %5358 = vmatprep.subr.bf16.mxu1 %v9365_v16 }
 0x107   : > { %v6231_v22 = vpop.permute.xlu0 %887  ;;  %5338 = vmatprep.mubr.msk.bf16.mxu0 %vm5845_vm1, %v9365_v16  ;;  %5368 = vmatprep.mubr.msk.bf16.mxu1 %vm5845_vm1, %v9365_v16 }
 0x108   : > { %9448 = vst [vmem:[#allocation17_spill] sm:$0xff] %v6231_v22  ;;  %v5709_v22 = vld [vmem:[%s5975_s25] sm:$0xff]  }
 0x109   : > { %1253 = vperm.xlu1 %5599, %v5994_v1   ;;  %5329 = vmatpush3.bf16.msra.mxu0 %v5709_v22 }
 0x10a   : > { %v6234_v33 = vpop.permute.xlu1 %813  ;;  %5604 = vset.pattern.permute.xlu0 %v9363_v42  ;;  %5330 = vmatprep.subr.bf16.mxu0 %v9365_v16 }
 0x10b   : > { %9449 = vst [vmem:[#allocation18_spill] sm:$0xff] %v6234_v33  ;;  %1533 = vperm.xlu0 %5604, %v6005_v5   ;;  %v6238_v51 = vpop.permute.xlu0 %895  ;;  %v465_v33 = vld [vmem:[%s5970_s18] sm:$0x3]  ;;  %s5885_s18 = smov 24  }
 0x10c   : > { %9450 = vst [vmem:[#allocation19_spill] sm:$0xff] %v6238_v51 }
 0x10d   : > { %1257 = vperm.xlu1 %5599, %v6002_v4  }
 0x10e   : > { %v6241_v53 = vpop.permute.xlu1 %821 }
 0x10f   : > { %9451 = vst [vmem:[#allocation20_spill] sm:$0xff] %v6241_v53  ;;  %1545 = vperm.xlu0 %5604, %v6013_v7   ;;  %v6244_v48 = vpop.permute.xlu0 %903  ;;  %v5710_v53 = vld [vmem:[%s5975_s25 + $0x8] sm:$0xff]  }
 0x110   : > { %9452 = vst [vmem:[#allocation21_spill] sm:$0xff] %v6244_v48  ;;  %5331 = vmatpush3.bf16.msra.mxu0 %v5710_v53 }
 0x111   : > { %1265 = vperm.xlu1 %5599, %v6010_v6   ;;  %5332 = vmatprep.subr.bf16.mxu0 %v9365_v16 }
 0x113   : > { %v6250_v42 = vpop.permute.xlu1 %879  ;;  %1553 = vperm.xlu0 %5604, %v6021_v9   ;;  %v6253_v51 = vpop.permute.xlu0 %911 }
 0x114   : > { %9453 = vst [vmem:[#allocation22_spill] sm:$0xff] %v6250_v42  ;;  %9454 = vst [vmem:[#allocation23_spill] sm:$0xff] %v6253_v51  ;;  %v5711_v42 = vld [vmem:[%s5975_s25 + $0x10] sm:$0xff]  }
 0x115   : > { %1273 = vperm.xlu1 %5599, %v6018_v8   ;;  %5333 = vmatpush3.bf16.msra.mxu0 %v5711_v42 }
 0x116   : > { %5334 = vmatprep.subr.bf16.mxu0 %v9365_v16 }
 0x117   : > { %v6258_v48 = vpop.permute.xlu1 %883  ;;  %1561 = vperm.xlu0 %5604, %v6029_v11  }
 0x118   : > { %9455 = vst [vmem:[#allocation24_spill] sm:$0xff] %v6258_v48  ;;  %v6262_v22 = vpop.permute.xlu0 %939  ;;  %v5712_v48 = vld [vmem:[%s5975_s25 + $0x18] sm:$0xff]  }
 0x119   : > { %9456 = vst [vmem:[#allocation25_spill] sm:$0xff] %v6262_v22  ;;  %1281 = vperm.xlu1 %5599, %v6026_v10   ;;  %5335 = vmatpush3.bf16.msra.mxu0 %v5712_v48 }
 0x11a   : > { %5336 = vmatprep.subr.bf16.mxu0 %v9365_v16 }
 0x11b   : > { %v6266_v51 = vpop.permute.xlu1 %891  ;;  %5605 = vset.pattern.permute.xlu0 %v9364_v14  ;;  %v5713_v14 = vld [vmem:[%s5975_s25 + $0x20] sm:$0xff]  }
 0x11c   : > { %9457 = vst [vmem:[#allocation26_spill] sm:$0xff] %v6266_v51  ;;  %1609 = vperm.xlu0 %5605, %v5997_v2   ;;  %v6271_v53 = vpop.permute.xlu0 %951 }
 0x11d   : > { %9458 = vst [vmem:[#allocation27_spill] sm:$0xff] %v6271_v53  ;;  %5602 = vset.pattern.permute.xlu1 %v5841_v63  ;;  %5337 = vmatpush3.bf16.msra.mxu0 %v5713_v14  ;;  %v9469_v53 = vmov 4  }
 0x11e   : > { %1339 = vperm.xlu1 %5602, %v6005_v5   ;;  %5388 = vmatprep.subr.bf16.mxu0 %v9365_v16  ;;  %v9367_v16 = vmov 36  }
 0x11f   : > { %v6275_v22 = vpop.permute.xlu1 %899 }
 0x120   : > { %9459 = vst [vmem:[#allocation28_spill] sm:$0xff] %v6275_v22  ;;  %1621 = vperm.xlu0 %5605, %v6002_v4   ;;  %v6279_v42 = vpop.permute.xlu0 %959 }
 0x121   : > { %9460 = vst [vmem:[#allocation29_spill] sm:$0xff] %v6279_v42 }
 0x122   : > { %1343 = vperm.xlu1 %5602, %v5994_v1  }
 0x123   : > { %v6283_v51 = vpop.permute.xlu1 %907 }
 0x124   : > { %9461 = vst [vmem:[#allocation30_spill] sm:$0xff] %v6283_v51  ;;  %1629 = vperm.xlu0 %5605, %v6010_v6   ;;  %v6287_v63 = vpop.permute.xlu0 %967 }
 0x125   : > { %9462 = vst [vmem:[#allocation31_spill] sm:$0xff] %v6287_v63 }
 0x126   : > { %1351 = vperm.xlu1 %5602, %v6013_v7  }
 0x128   : > { %v6294_v48 = vpop.permute.xlu1 %935  ;;  %1637 = vperm.xlu0 %5605, %v6018_v8  }
 0x129   : > { %9463 = vst [vmem:[#allocation32_spill] sm:$0xff] %v6294_v48  ;;  %v6297_v14 = vpop.permute.xlu0 %1015 }
 0x12a   : > { %9464 = vst [vmem:[#allocation33_spill] sm:$0xff] %v6297_v14  ;;  %1359 = vperm.xlu1 %5602, %v6021_v9  }
 0x12c   : > { %v6300_v51 = vpop.permute.xlu1 %943  ;;  %1645 = vperm.xlu0 %5605, %v6026_v10  }
 0x12d   : > { %9465 = vst [vmem:[#allocation34_spill] sm:$0xff] %v6300_v51  ;;  %v6303_v22 = vpop.permute.xlu0 %1027  ;;  %v516_v51 = vlaneseq }
 0x12e   : > { %9466 = vst [vmem:[#allocation35_spill] sm:$0xff] %v6303_v22  ;;  %1367 = vperm.xlu1 %5602, %v6029_v11  }
 0x130   : > { %v6306_v63 = vpop.permute.xlu1 %947  ;;  %5608 = vset.pattern.permute.xlu0 %v9367_v16 }
 0x131   : > { %9467 = vst [vmem:[#allocation36_spill] sm:$0xff] %v6306_v63  ;;  %1703 = vperm.xlu0 %5608, %v6005_v5   ;;  %v6310_v42 = vpop.permute.xlu0 %1035  ;;  %v517_v63 = vshrl.u32 %v516_v51, 7 }
 0x132   : > { %9468 = vst [vmem:[#allocation37_spill] sm:$0xff] %v6310_v42  ;;  %5603 = vset.pattern.permute.xlu1 %v9469_v53 }
 0x133   : > { %1529 = vperm.xlu1 %5603, %v5997_v2   ;;  %v518_v53 = vsub.s32 0, %v517_v63  ;;  %v602_v12 = vsub.s32 1, %v517_v63 }
 0x134   : > { %v6314_v14 = vpop.permute.xlu1 %955 }
 0x135   : > { %9470 = vst [vmem:[#allocation38_spill] sm:$0xff] %v6314_v14  ;;  %1715 = vperm.xlu0 %5608, %v6013_v7   ;;  %v6317_v22 = vpop.permute.xlu0 %1043  ;;  %v6369_v63 = vrot.slane %v465_v33, %v602_v12 }
 0x136   : > { %9471 = vst [vmem:[#allocation39_spill] sm:$0xff] %v6317_v22  ;;  %v6333_v22 = vrot.slane %v465_v33, %v518_v53 }
 0x137   : > { %1537 = vperm.xlu1 %5603, %v5994_v1  }
 0x138   : > { %v6320_v16 = vpop.permute.xlu1 %963  ;;  %v523_v53 = vsub.f32 %v6091_v20, %v6333_v22  ;;  %v525_v59 = vsub.f32 %v6096_v23, %v6333_v22  ;;  %v527_v33 = vsub.f32 %v6102_v25, %v6333_v22 }
 0x139   : > { %9472 = vst [vmem:[#allocation40_spill] sm:$0xff] %v6320_v16  ;;  %1723 = vperm.xlu0 %5608, %v6021_v9   ;;  %v6323_v48 = vpop.permute.xlu0 %1051  ;;  %v9369_v16 = vmov 5  }
 0x13a   : > { %9473 = vst [vmem:[#allocation41_spill] sm:$0xff] %v6323_v48 }
 0x13b   : > { %1541 = vperm.xlu1 %5603, %v6002_v4  }
 0x13c   : > { %v6326_v42 = vpop.permute.xlu1 %971 }
 0x13d   : > { %9474 = vst [vmem:[#allocation42_spill] sm:$0xff] %v6326_v42  ;;  %1731 = vperm.xlu0 %5608, %v6029_v11   ;;  %v522_v42 = vsub.f32 %v6085_v18, %v6333_v22  ;;  %v533_v18 = vand.u32 2147483647, %v523_v53 }
 0x13e   : > { %v6330_v14 = vpop.permute.xlu0 %1109 }
 0x13f   : > { %9475 = vst [vmem:[#allocation43_spill] sm:$0xff] %v6330_v14  ;;  %1549 = vperm.xlu1 %5603, %v6010_v6   ;;  %v520_v14 = vsub.f32 %v6087_v19, %v6333_v22 }
 0x141   : > { %v6335_v51 = vpop.permute.xlu1 %1019  ;;  %5609 = vset.pattern.permute.xlu0 %v9369_v16  ;;  %v521_v16 = vsub.f32 %v6093_v21, %v6333_v22  ;;  %v530_v13 = vand.u32 2147483647, %v520_v14  ;;  %v524_v14 = vsub.f32 %v6099_v24, %v6333_v22  ;;  %v604_v24 = vsub.f32 %v6117_v30, %v6369_v63 }
 0x142   : > { %9476 = vst [vmem:[#allocation44_spill] sm:$0xff] %v6335_v51  ;;  %1749 = vperm.xlu0 %5609, %v5997_v2   ;;  %v6339_v48 = vpop.permute.xlu0 %1121  ;;  %v607_v30 = vsub.f32 %v6123_v32, %v6369_v63  ;;  %v528_v32 = vsub.f32 %v6111_v28, %v6333_v22 }
 0x143   : > { %9477 = vst [vmem:[#allocation45_spill] sm:$0xff] %v6339_v48  ;;  %1557 = vperm.xlu1 %5603, %v6018_v8   ;;  %v532_v48 = vand.u32 2147483647, %v522_v42  ;;  %v531_v19 = vand.u32 2147483647, %v521_v16  ;;  %v543_v42 = vsub.f32 1.0, %v533_v18 }
 0x144   : > { %v534_v18 = vand.u32 2147483647, %v524_v14 }
 0x145   : > { %v6348_v62 = vpop.permute.xlu1 %1023  ;;  %v542_v21 = vsub.f32 1.0, %v532_v48  ;;  %v541_v16 = vsub.f32 1.0, %v531_v19  ;;  %v535_v48 = vand.u32 2147483647, %v525_v59  ;;  %v605_v59 = vsub.f32 %v6115_v29, %v6369_v63 }
 0x146   : > { %9478 = vst [vmem:[#allocation46_spill] sm:$0xff] %v6348_v62  ;;  %1761 = vperm.xlu0 %5609, %v6002_v4   ;;  %v6353_v51 = vpop.permute.xlu0 %1129  ;;  %v9482_v62 = vmov 20   ;;  %v529_v29 = vsub.f32 %v6108_v27, %v6333_v22 }
 0x147   : > { %9479 = vst [vmem:[#allocation47_spill] sm:$0xff] %v6353_v51  ;;  %1565 = vperm.xlu1 %5603, %v6026_v10   ;;  %v540_v51 = vsub.f32 1.0, %v530_v13  ;;  %v6379_v13 = vmax.f32 %v543_v42, 0.0  ;;  %v6385_v12 = vmax.f32 %v541_v16, 0.0  ;;  %v608_v42 = vsub.f32 %v6126_v34, %v6369_v63 }
 0x148   : > { %v545_v25 = vsub.f32 1.0, %v535_v48  ;;  %v610_v16 = vsub.f32 %v6132_v36, %v6369_v63  ;;  %v611_v34 = vsub.f32 %v6135_v37, %v6369_v63  ;;  %v537_v48 = vand.u32 2147483647, %v527_v33 }
 0x149   : > { %v6356_v60 = vpop.permute.xlu1 %1031  ;;  %v6377_v23 = vmax.f32 %v540_v51, 0.0  ;;  %v606_v51 = vsub.f32 %v6121_v31, %v6369_v63  ;;  %v609_v31 = vsub.f32 %v6129_v35, %v6369_v63  ;;  %v617_v36 = vand.u32 2147483647, %v607_v30 }
 0x14a   : > { %9480 = vst [vmem:[#allocation48_spill] sm:$0xff] %v6356_v60  ;;  %1769 = vperm.xlu0 %5609, %v6010_v6   ;;  %v6359_v20 = vpop.permute.xlu0 %1137  ;;  %v9372_v60 = vmov 21   ;;  %v539_v28 = vand.u32 2147483647, %v529_v29  ;;  %v538_v37 = vand.u32 2147483647, %v528_v32  ;;  %v613_v30 = vsub.f32 %v6141_v39, %v6369_v63 }
 0x14b   : > { %9481 = vst [vmem:[#allocation49_spill] sm:$0xff] %v6359_v20  ;;  %5606 = vset.pattern.permute.xlu1 %v9482_v62  ;;  %v6374_v62 = vmax.f32 %v542_v21, 0.0  ;;  %v526_v21 = vsub.f32 %v6105_v26, %v6333_v22  ;;  %v544_v26 = vsub.f32 1.0, %v534_v18 }
 0x14c   : > { %1613 = vperm.xlu1 %5606, %v6005_v5  }
 0x14d   : > { %v6367_v53 = vpop.permute.xlu1 %1039  ;;  %v536_v35 = vand.u32 2147483647, %v526_v21  ;;  %v554_v29 = vmax.f32 %v544_v26, 0.0  ;;  %v623_v26 = vand.u32 2147483647, %v613_v30 }
 0x14e   : > { %9483 = vst [vmem:[#allocation50_spill] sm:$0xff] %v6367_v53  ;;  %1777 = vperm.xlu0 %5609, %v6018_v8   ;;  %v615_v53 = vand.u32 2147483647, %v605_v59  ;;  %v621_v59 = vand.u32 2147483647, %v611_v34  ;;  %v549_v34 = vsub.f32 1.0, %v539_v28 }
 0x14f   : > { %v6372_v20 = vpop.permute.xlu0 %1165 }
 0x150   : > { %9484 = vst [vmem:[#allocation51_spill] sm:$0xff] %v6372_v20  ;;  %1617 = vperm.xlu1 %5606, %v5994_v1   ;;  %v618_v20 = vand.u32 2147483647, %v608_v42  ;;  %v555_v42 = vmax.f32 %v545_v25, 0.0 }
 0x151   : > { %v6383_v19 = vpop.permute.xlu1 %1047 }
 0x152   : > { %9485 = vst [vmem:[#allocation52_spill] sm:$0xff] %v6383_v19  ;;  %1785 = vperm.xlu0 %5609, %v6026_v10   ;;  %v614_v19 = vand.u32 2147483647, %v604_v24  ;;  %v619_v24 = vand.u32 2147483647, %v609_v31  ;;  %v627_v31 = vsub.f32 1.0, %v617_v36 }
 0x153   : > { %v6400_v14 = vpop.permute.xlu0 %1177  ;;  %v620_v10 = vand.u32 2147483647, %v610_v16  ;;  %v628_v16 = vsub.f32 1.0, %v618_v20 }
 0x154   : > { %9486 = vst [vmem:[#allocation53_spill] sm:$0xff] %v6400_v14  ;;  %1625 = vperm.xlu1 %5606, %v6013_v7   ;;  %v616_v14 = vand.u32 2147483647, %v606_v51  ;;  %v624_v33 = vsub.f32 1.0, %v614_v19  ;;  %v612_v51 = vsub.f32 %v6138_v38, %v6369_v63  ;;  %v546_v19 = vsub.f32 1.0, %v536_v35 }
 0x155   : > { %v630_v38 = vsub.f32 1.0, %v620_v10  ;;  %v637_v20 = vmax.f32 %v627_v31, 0.0  ;;  %v744_v35 = vsub.f32 %v6171_v50, %v6333_v22  ;;  %v747_v10 = vsub.f32 %v6177_v52, %v6333_v22 }
 0x156   : > { %v6413_v27 = vpop.permute.xlu1 %1105  ;;  %5612 = vset.pattern.permute.xlu0 %v9372_v60  ;;  %v625_v60 = vsub.f32 1.0, %v615_v53  ;;  %v626_v21 = vsub.f32 1.0, %v616_v14  ;;  %v548_v53 = vsub.f32 1.0, %v538_v37  ;;  %v634_v14 = vmax.f32 %v624_v33, 0.0 }
 0x157   : > { %9487 = vst [vmem:[#allocation54_spill] sm:$0xff] %v6413_v27  ;;  %1833 = vperm.xlu0 %5612, %v6005_v5   ;;  %v6417_v18 = vpop.permute.xlu0 %1185  ;;  %v547_v27 = vsub.f32 1.0, %v537_v48  ;;  %v631_v48 = vsub.f32 1.0, %v621_v59  ;;  %v622_v39 = vand.u32 2147483647, %v612_v51  ;;  %v6439_v37 = vmax.f32 %v549_v34, 0.0 }
 0x158   : > { %9488 = vst [vmem:[#allocation55_spill] sm:$0xff] %v6417_v18  ;;  %1633 = vperm.xlu1 %5606, %v6021_v9   ;;  %v629_v18 = vsub.f32 1.0, %v619_v24  ;;  %v636_v25 = vmax.f32 %v626_v21, 0.0  ;;  %v556_v24 = vmax.f32 %v546_v19, 0.0  ;;  %v9491_v33 = vmov 36  }
 0x159   : > { %v557_v8 = vmax.f32 %v547_v27, 0.0  ;;  %9490 = vst [vmem:[#allocation57_spill] sm:$0xff] %v6439_v37  ;;  %v640_v27 = vmax.f32 %v630_v38, 0.0  ;;  %v6442_v59 = vmax.f32 %v548_v53, 0.0  ;;  %v641_v51 = vmax.f32 %v631_v48, 0.0 }
 0x15a   : > { %v6424_v5 = vpop.permute.xlu1 %1113  ;;  %v632_v21 = vsub.f32 1.0, %v622_v39  ;;  %v644_v50 = vmul.f32 %v634_v14, %v6377_v23  ;;  %v633_v52 = vsub.f32 1.0, %v623_v26  ;;  %v646_v30 = vmul.f32 %v636_v25, %v6374_v62 }
 0x15b   : > { %9489 = vst [vmem:[#allocation56_spill] sm:$0xff] %v6424_v5  ;;  %1845 = vperm.xlu0 %5612, %v6013_v7   ;;  %v6427_v32 = vpop.permute.xlu0 %1193  ;;  %v635_v5 = vmax.f32 %v625_v60, 0.0  ;;  %v638_v7 = vmax.f32 %v628_v16, 0.0  ;;  %v639_v60 = vmax.f32 %v629_v18, 0.0  ;;  %9492 = vst [vmem:[#allocation58_spill] sm:$0xff] %v6442_v59  ;;  %v745_v31 = vsub.f32 %v6180_v54, %v6333_v22 }
 0x15c   : > { %1641 = vperm.xlu1 %5606, %v6029_v11   ;;  %v647_v19 = vmul.f32 %v637_v20, %v6379_v13  ;;  %v754_v34 = vand.u32 2147483647, %v744_v35  ;;  %v757_v38 = vand.u32 2147483647, %v747_v10  ;;  %v650_v23 = vmul.f32 %v640_v27, %v556_v24  ;;  %v9499_v27 = vld [vmem:[#allocation10_spill] sm:$0xff] }
 0x15d   : > { %v648_v16 = vmul.f32 %v638_v7, %v554_v29  ;;  %v649_v53 = vmul.f32 %v639_v60, %v555_v42  ;;  %v749_v14 = vsub.f32 %v6183_v55, %v6333_v22  ;;  %v6458_v62 = vmax.f32 %v632_v21, 0.0 }
 0x15e   : > { %v6430_v36 = vpop.permute.xlu1 %1117  ;;  %v6461_v54 = vmul.f32 %v6145_v40, %v644_v50  ;;  %v651_v13 = vmul.f32 %v641_v51, %v557_v8  ;;  %v6467_v29 = vmax.f32 %v633_v52, 0.0  ;;  %v824_v42 = vsub.f32 %v6210_v3, %v6369_v63  ;;  %v9500_v51 = vld [vmem:[#allocation13_spill] sm:$0xff] }
 0x15f   : > { %1853 = vperm.xlu0 %5612, %v6021_v9   ;;  %v6437_v28 = vpop.permute.xlu0 %1201  ;;  %v645_v9 = vmul.f32 %v635_v5, %v6385_v12  ;;  %9493 = vst [vmem:[#allocation59_spill] sm:$0xff] %v6458_v62  ;;  %v827_v55 = vsub.f32 %v6222_v15, %v6369_v63  ;;  %v6476_v40 = vmul.f32 %v6150_v43, %v646_v30  ;;  %v764_v39 = vsub.f32 1.0, %v754_v34  ;;  %v9502_v30 = vld [vmem:[#allocation14_spill] sm:$0xff] }
 0x160   : > { %5607 = vset.pattern.permute.xlu1 %v9491_v33  ;;  %9494 = vst [vmem:[#allocation60_spill] sm:$0xff] %v6467_v29  ;;  %v829_v8 = vsub.f32 %v6228_v17, %v6369_v63  ;;  %v6482_v25 = vmul.f32 %v6153_v44, %v648_v16  ;;  %v6485_v3 = vmul.f32 %v6156_v45, %v647_v19  ;;  %v759_v26 = vand.u32 2147483647, %v749_v14  ;;  %v9504_v14 = vld [vmem:[#allocation18_spill] sm:$0xff] }
 0x161   : > { %1699 = vperm.xlu1 %5607, %v5997_v2   ;;  %v6464_v5 = vmul.f32 %v6147_v41, %v645_v9  ;;  %v767_v41 = vsub.f32 1.0, %v757_v38  ;;  %v6488_v15 = vmul.f32 %v6159_v46, %v650_v23  ;;  %v6494_v20 = vmul.f32 %v6162_v47, %v649_v53  ;;  %v9501_v9 = vld [vmem:[#allocation11_spill] sm:$0xff]  ;;  %v9503_v38 = vld [vmem:[#allocation12_spill] sm:$0xff] }
 0x162   : > { %v6450_v18 = vpop.permute.xlu1 %1125  ;;  %v6497_v17 = vmul.f32 %v6168_v49, %v651_v13  ;;  %v746_v44 = vsub.f32 %v6186_v56, %v6333_v22  ;;  %v751_v45 = vsub.f32 %v6189_v57, %v6333_v22  ;;  %v834_v7 = vand.u32 2147483647, %v824_v42 }
 0x163   : > { %1861 = vperm.xlu0 %5612, %v6029_v11   ;;  %v755_v11 = vand.u32 2147483647, %v745_v31  ;;  %9496 = vst [vmem:[#allocation62_spill] sm:$0xff] %v6488_v15  ;;  %v837_v35 = vand.u32 2147483647, %v827_v55  ;;  %v774_v47 = vmax.f32 %v764_v39, 0.0  ;;  %v828_v49 = vsub.f32 %v6207_v0, %v6369_v63 }
 0x164   : > { %v6456_v12 = vpop.permute.xlu0 %1249  ;;  %9497 = vst [vmem:[#allocation63_spill] sm:$0xff] %v6497_v17  ;;  %v777_v24 = vmax.f32 %v767_v41, 0.0  ;;  %v839_v60 = vand.u32 2147483647, %v829_v8  ;;  %v769_v56 = vsub.f32 1.0, %v759_v26  ;;  %v748_v57 = vsub.f32 %v6192_v58, %v6333_v22  ;;  %v9505_v41 = vld [vmem:[#allocation15_spill] sm:$0xff] }
 0x165   : > { %1707 = vperm.xlu1 %5607, %v5994_v1   ;;  %v9376_v1 = vmov 37   ;;  %v765_v46 = vsub.f32 1.0, %v755_v11  ;;  %v753_v33 = vsub.f32 %v9499_v27, %v6333_v22  ;;  %v756_v50 = vand.u32 2147483647, %v746_v44 }
 0x166   : > { %v6473_v48 = vpop.permute.xlu1 %1133  ;;  %v761_v52 = vand.u32 2147483647, %v751_v45  ;;  %v750_v0 = vsub.f32 %v9501_v9, %v6333_v22  ;;  %v826_v31 = vsub.f32 %v9502_v30, %v6369_v63  ;;  %v844_v19 = vsub.f32 1.0, %v834_v7 }
 0x167   : > { %9495 = vst [vmem:[#allocation61_spill] sm:$0xff] %v6473_v48  ;;  %5613 = vset.pattern.permute.xlu0 %v9376_v1  ;;  %v775_v58 = vmax.f32 %v765_v46, 0.0  ;;  %v847_v34 = vsub.f32 1.0, %v837_v35  ;;  %v752_v23 = vsub.f32 %v9503_v38, %v6333_v22  ;;  %v849_v53 = vsub.f32 1.0, %v839_v60 }
 0x168   : > { %1919 = vperm.xlu0 %5613, %v5997_v2   ;;  %v6491_v43 = vpop.permute.xlu0 %1261  ;;  %v825_v2 = vsub.f32 %v6201_v61, %v6369_v63  ;;  %v830_v61 = vsub.f32 %v9500_v51, %v6369_v63  ;;  %v831_v13 = vsub.f32 %v9504_v14, %v6369_v63  ;;  %v758_v42 = vand.u32 2147483647, %v748_v57 }
 0x169   : > { %1711 = vperm.xlu1 %5607, %v6002_v4   ;;  %v763_v55 = vand.u32 2147483647, %v753_v33  ;;  %v832_v8 = vsub.f32 %v9505_v41, %v6369_v63  ;;  %v766_v26 = vsub.f32 1.0, %v756_v50  ;;  %v771_v44 = vsub.f32 1.0, %v761_v52 }
 0x16a   : > { %v6506_v10 = vpop.permute.xlu1 %1141  ;;  %v835_v16 = vand.u32 2147483647, %v825_v2  ;;  %v840_v39 = vand.u32 2147483647, %v830_v61  ;;  %v760_v45 = vand.u32 2147483647, %v750_v0 }
 0x16b   : > { %9498 = vst [vmem:[#allocation64_spill] sm:$0xff] %v6506_v10  ;;  %v836_v46 = vand.u32 2147483647, %v826_v31  ;;  %v9506_v2 = vld [vmem:[#allocation6_spill] sm:$0xff]  ;;  %v779_v35 = vmax.f32 %v769_v56, 0.0  ;;  %v854_v60 = vmax.f32 %v844_v19, 0.0 }
 0x16c   : > { %1931 = vperm.xlu0 %5613, %v6002_v4   ;;  %v6517_v21 = vpop.permute.xlu0 %1269  ;;  %v838_v4 = vand.u32 2147483647, %v828_v49  ;;  %v845_v49 = vsub.f32 1.0, %v835_v16  ;;  %v857_v27 = vmax.f32 %v847_v34, 0.0  ;;  %v762_v57 = vand.u32 2147483647, %v752_v23 }
 0x16d   : > { %1719 = vperm.xlu1 %5607, %v6010_v6   ;;  %v859_v51 = vmax.f32 %v849_v53, 0.0  ;;  %v841_v61 = vand.u32 2147483647, %v831_v13  ;;  %v768_v30 = vsub.f32 1.0, %v758_v42  ;;  %v850_v50 = vsub.f32 1.0, %v840_v39  ;;  %v9507_v56 = vld [vmem:[#allocation7_spill] sm:$0xff] }
 0x16e   : > { %v848_v33 = vsub.f32 1.0, %v838_v4  ;;  %v842_v52 = vand.u32 2147483647, %v832_v8  ;;  %v776_v0 = vmax.f32 %v766_v26, 0.0  ;;  %v781_v31 = vmax.f32 %v771_v44, 0.0  ;;  %v9508_v4 = vld [vmem:[#allocation20_spill] sm:$0xff] }
 0x16f   : > { %v6528_v11 = vpop.permute.xlu1 %1169  ;;  %v770_v38 = vsub.f32 1.0, %v760_v45  ;;  %v846_v14 = vsub.f32 1.0, %v836_v46  ;;  %v855_v19 = vmax.f32 %v845_v49, 0.0  ;;  %v864_v34 = vmul.f32 %v854_v60, %v774_v47 }
 0x170   : > { %1939 = vperm.xlu0 %5613, %v6010_v6   ;;  %v6534_v7 = vpop.permute.xlu0 %1277  ;;  %v773_v6 = vsub.f32 1.0, %v763_v55  ;;  %v867_v23 = vmul.f32 %v857_v27, %v777_v24  ;;  %v833_v53 = vsub.f32 %v9508_v4, %v6369_v63  ;;  %v772_v13 = vsub.f32 1.0, %v762_v57  ;;  %v9510_v24 = vld [vmem:[#allocation25_spill] sm:$0xff] }
 0x171   : > { %1727 = vperm.xlu1 %5607, %v9506_v2   ;;  %v858_v42 = vmax.f32 %v848_v33, 0.0  ;;  %v851_v55 = vsub.f32 1.0, %v841_v61  ;;  %v869_v39 = vmul.f32 %v859_v51, %v779_v35  ;;  %v778_v8 = vmax.f32 %v768_v30, 0.0  ;;  %v9512_v35 = vld [vmem:[#allocation16_spill] sm:$0xff]  ;;  %v9513_v57 = vld [vmem:[#allocation17_spill] sm:$0xff] }
 0x172   : > { %v6546_v26 = vmax.f32 %v773_v6, 0.0  ;;  %v860_v44 = vmax.f32 %v850_v50, 0.0  ;;  %v852_v45 = vsub.f32 1.0, %v842_v52  ;;  %v780_v46 = vmax.f32 %v770_v38, 0.0  ;;  %v6557_v30 = vld [vmem:[%s5980_s10 + $0x8] sm:$0xff]  ;;  %v9515_v52 = vld [vmem:[#allocation19_spill] sm:$0xff] }
 0x173   : > { %v6536_v9 = vpop.permute.xlu1 %1173  ;;  %v856_v47 = vmax.f32 %v846_v14, 0.0  ;;  %v9511_v49 = vmov 5   ;;  %v914_v27 = vmul.f32 %v9512_v35, %v864_v34  ;;  %v917_v33 = vmul.f32 %v9513_v57, %v867_v23  ;;  %v9517_v23 = vld [vmem:[#allocation32_spill] sm:$0xff]  ;;  %v9522_v57 = vld [vmem:[#allocation22_spill] sm:$0xff] }
 0x174   : > { %1947 = vperm.xlu0 %5613, %v9506_v2   ;;  %9509 = vst [vmem:[#allocation10_spill] sm:$0xff] %v6546_v26  ;;  %v975_v2 = vsub.f32 %v9510_v24, %v6333_v22  ;;  %v843_v51 = vand.u32 2147483647, %v833_v53  ;;  %v865_v61 = vmul.f32 %v855_v19, %v775_v58  ;;  %v6560_v6 = vmax.f32 %v772_v13, 0.0  ;;  %v9518_v58 = vld [vmem:[#allocation33_spill] sm:$0xff] }
 0x175   : > { %1735 = vperm.xlu1 %5607, %v9507_v56   ;;  %v6540_v16 = vpop.permute.xlu0 %1335  ;;  %v861_v50 = vmax.f32 %v851_v55, 0.0  ;;  %v919_v38 = vmul.f32 %v9515_v52, %v869_v39  ;;  %v868_v14 = vmul.f32 %v858_v42, %v778_v8  ;;  %v6565_v4 = vmax.f32 %v852_v45, 0.0  ;;  %v9519_v39 = vld [vmem:[#allocation27_spill] sm:$0xff]  ;;  %v9520_v8 = vld [vmem:[#allocation29_spill] sm:$0xff] }
 0x176   : > { %9514 = vst [vmem:[#allocation13_spill] sm:$0xff] %v6560_v6  ;;  %v870_v34 = vmul.f32 %v860_v44, %v780_v46  ;;  %v974_v53 = vsub.f32 %v9517_v23, %v6333_v22  ;;  %v1054_v19 = vsub.f32 %v9518_v58, %v6369_v63  ;;  %v9375_v24 = vmov 6   ;;  %v9523_v23 = vld [vmem:[#allocation24_spill] sm:$0xff] }
 0x177   : > { %v6544_v41 = vpop.permute.xlu1 %1181  ;;  %9516 = vst [vmem:[#allocation11_spill] sm:$0xff] %v6565_v4  ;;  %v866_v13 = vmul.f32 %v856_v47, %v776_v0  ;;  %v985_v55 = vand.u32 2147483647, %v975_v2  ;;  %v978_v42 = vsub.f32 %v9519_v39, %v6333_v22  ;;  %v6580_v45 = vadd.f32 %v914_v27, %v6461_v54  ;;  %v6586_v0 = vld [vmem:[%s5980_s10 + $0x10] sm:$0xff] }
 0x178   : > { %1955 = vperm.xlu0 %5613, %v9507_v56   ;;  %v6583_v46 = vadd.f32 %v917_v33, %v6485_v3  ;;  %v853_v35 = vsub.f32 1.0, %v843_v51  ;;  %v6590_v47 = vadd.f32 %v919_v38, %v6494_v20  ;;  %v871_v2 = vmul.f32 %v861_v50, %v781_v31  ;;  %v9524_v54 = vld [vmem:[#allocation26_spill] sm:$0xff]  ;;  %v9526_v20 = vld [vmem:[#allocation35_spill] sm:$0xff]  ;;  %v6602_v31 = vld [vmem:[%s5980_s10 + $0x20] sm:$0xff] }
 0x179   : > { %5610 = vset.pattern.permute.xlu1 %v9511_v49  ;;  %v6552_v60 = vpop.permute.xlu0 %1347  ;;  %v980_v49 = vsub.f32 %v9520_v8, %v6333_v22  ;;  %v915_v52 = vmul.f32 %v9522_v57, %v865_v61  ;;  %v916_v58 = vmul.f32 %v9523_v23, %v866_v13  ;;  %v918_v27 = vmul.f32 %v9524_v54, %v868_v14  ;;  %v9525_v51 = vld [vmem:[#allocation34_spill] sm:$0xff]  ;;  %v9529_v14 = vld [vmem:[#allocation36_spill] sm:$0xff]  ;;  %v9534_v54 = vld [vmem:[#allocation31_spill] sm:$0xff] }
 0x17a   : > { %1753 = vperm.xlu1 %5610, %v6557_v30   ;;  %9521 = vst [vmem:[#allocation14_spill] sm:$0xff] %v6590_v47  ;;  %v984_v3 = vand.u32 2147483647, %v974_v53  ;;  %v1064_v33 = vand.u32 2147483647, %v1054_v19  ;;  %v976_v8 = vsub.f32 %v9525_v51, %v6333_v22  ;;  %v1057_v38 = vsub.f32 %v9526_v20, %v6369_v63  ;;  %v9530_v19 = vld [vmem:[#allocation37_spill] sm:$0xff] }
 0x17b   : > { %v6563_v56 = vpop.permute.xlu1 %1189  ;;  %v988_v1 = vand.u32 2147483647, %v978_v42  ;;  %v990_v10 = vand.u32 2147483647, %v980_v49  ;;  %v6607_v50 = vmax.f32 %v853_v35, 0.0  ;;  %v977_v53 = vsub.f32 %v9529_v14, %v6333_v22  ;;  %v9532_v49 = vld [vmem:[#allocation21_spill] sm:$0xff] }
 0x17c   : > { %5616 = vset.pattern.permute.xlu0 %v9375_v24  ;;  %v995_v24 = vsub.f32 1.0, %v985_v55  ;;  %v1059_v13 = vsub.f32 %v9530_v19, %v6369_v63  ;;  %v9531_v55 = vld [vmem:[#allocation44_spill] sm:$0xff]  ;;  %v6617_v57 = vmul.f32 %v9532_v49, %v871_v2  ;;  %v6620_v23 = vadd.f32 %v915_v52, %v6464_v5  ;;  %v6633_v5 = vld [vmem:[%s5980_s10 + $0x30] sm:$0xff] }
 0x17d   : > { %1983 = vperm.xlu0 %5616, %v6557_v30   ;;  %v6577_v44 = vpop.permute.xlu0 %1355  ;;  %9528 = vst [vmem:[#allocation18_spill] sm:$0xff] %v6607_v50  ;;  %v1055_v42 = vsub.f32 %v9531_v55, %v6369_v63  ;;  %v6623_v35 = vadd.f32 %v916_v58, %v6476_v40  ;;  %v982_v51 = vsub.f32 %v9534_v54, %v6333_v22  ;;  %v994_v14 = vsub.f32 1.0, %v984_v3  ;;  %v9536_v52 = vld [vmem:[#allocation28_spill] sm:$0xff] }
 0x17e   : > { %1757 = vperm.xlu1 %5610, %v6586_v0   ;;  %9533 = vst [vmem:[#allocation15_spill] sm:$0xff] %v6617_v57  ;;  %v6628_v20 = vadd.f32 %v918_v27, %v6482_v25  ;;  %v1074_v19 = vsub.f32 1.0, %v1064_v33  ;;  %v986_v55 = vand.u32 2147483647, %v976_v8  ;;  %v6630_v37 = vmax.f32 %v995_v24, 0.0  ;;  %v9539_v33 = vld [vmem:[#allocation51_spill] sm:$0xff] }
 0x17f   : > { %v6594_v39 = vpop.permute.xlu1 %1197  ;;  %v998_v2 = vsub.f32 1.0, %v988_v1  ;;  %v1000_v49 = vsub.f32 1.0, %v990_v10  ;;  %v1067_v62 = vand.u32 2147483647, %v1057_v38  ;;  %v6639_v58 = vmul.f32 %v9536_v52, %v870_v34  ;;  %v9538_v1 = vld [vmem:[#allocation38_spill] sm:$0xff] }
 0x180   : > { %v987_v25 = vand.u32 2147483647, %v977_v53  ;;  %v1069_v27 = vand.u32 2147483647, %v1059_v13  ;;  %v1065_v3 = vand.u32 2147483647, %v1055_v42  ;;  %v979_v10 = vsub.f32 %v9538_v1, %v6333_v22 }
 0x181   : > { %1995 = vperm.xlu0 %5616, %v6602_v31   ;;  %v6605_v61 = vpop.permute.xlu0 %1363  ;;  %9537 = vst [vmem:[#allocation7_spill] sm:$0xff] %v6639_v58  ;;  %v6642_v24 = vand.u32 2147483647, %v982_v51  ;;  %v1204_v8 = vsub.f32 %v9539_v33, %v6333_v22  ;;  %v1004_v38 = vmax.f32 %v994_v14, 0.0  ;;  %v1084_v54 = vmax.f32 %v1074_v19, 0.0  ;;  %v9540_v51 = vld [vmem:[#allocation39_spill] sm:$0xff] }
 0x182   : > { %9527 = vst [vmem:[#allocation12_spill] sm:$0xff] %v6605_v61  ;;  %1765 = vperm.xlu1 %5610, %v6602_v31   ;;  %v6651_v53 = vmax.f32 %v998_v2, 0.0  ;;  %v6653_v13 = vmax.f32 %v1000_v49, 0.0  ;;  %v1077_v42 = vsub.f32 1.0, %v1067_v62  ;;  %v1061_v59 = vsub.f32 %v9540_v51, %v6369_v63  ;;  %v6658_v61 = vld [vmem:[%s5980_s10 + $0x40] sm:$0xff] }
 0x183   : > { %9541 = vst [vmem:[#allocation20_spill] sm:$0xff] %v6658_v61  ;;  %v997_v1 = vsub.f32 1.0, %v987_v25  ;;  %v1079_v14 = vsub.f32 1.0, %v1069_v27  ;;  %v1075_v19 = vsub.f32 1.0, %v1065_v3  ;;  %v989_v62 = vand.u32 2147483647, %v979_v10 }
 0x184   : > { %v1246_v29 = vpop.permute.xlu1 %1245  ;;  %v1214_v33 = vand.u32 2147483647, %v1204_v8  ;;  %v1285_v51 = vsub.f32 %v6456_v12, %v6369_v63  ;;  %v6671_v25 = vmul.f32 %v1084_v54, %v1004_v38  ;;  %v1205_v27 = vsub.f32 %v6528_v11, %v6333_v22  ;;  %v9545_v10 = vld [vmem:[#allocation48_spill] sm:$0xff] }
 0x185   : > { %2003 = vperm.xlu0 %5616, %v6633_v5   ;;  %v6636_v40 = vpop.permute.xlu0 %1371  ;;  %v1284_v34 = vsub.f32 %v1246_v29, %v6369_v63  ;;  %v1087_v4 = vmax.f32 %v1077_v42, 0.0  ;;  %v1071_v49 = vand.u32 2147483647, %v1061_v59  ;;  %v1058_v8 = vsub.f32 %v9545_v10, %v6369_v63  ;;  %v6684_v11 = vld [vmem:[%s5980_s10] sm:$0xff] }
 0x186   : > { %9535 = vst [vmem:[#allocation6_spill] sm:$0xff] %v6636_v40  ;;  %1773 = vperm.xlu1 %5610, %v6633_v5   ;;  %v996_v40 = vsub.f32 1.0, %v986_v55  ;;  %v9542_v55 = vld [vmem:[#allocation46_spill] sm:$0xff]  ;;  %v9377_v58 = vmov 22   ;;  %v1007_v12 = vmax.f32 %v997_v1, 0.0  ;;  %v1085_v38 = vmax.f32 %v1075_v19, 0.0 }
 0x187   : > { %v1056_v29 = vsub.f32 %v9542_v55, %v6369_v63  ;;  %v1294_v3 = vand.u32 2147483647, %v1284_v34  ;;  %v9546_v15 = vmov 21   ;;  %9547 = vst [vmem:[#allocation16_spill] sm:$0xff] %v6684_v11  ;;  %v999_v59 = vsub.f32 1.0, %v989_v62 }
 0x188   : > { %v6649_v52 = vpop.permute.xlu1 %1253  ;;  %v6669_v48 = vmax.f32 %v996_v40, 0.0  ;;  %v6680_v40 = vmax.f32 %v1079_v14, 0.0  ;;  %v1224_v42 = vsub.f32 1.0, %v1214_v33  ;;  %v1215_v1 = vand.u32 2147483647, %v1205_v27  ;;  %v9550_v33 = vld [vmem:[#allocation41_spill] sm:$0xff] }
 0x189   : > { %2011 = vperm.xlu0 %5616, %v6658_v61   ;;  %v1066_v54 = vand.u32 2147483647, %v1056_v29  ;;  %v1304_v14 = vsub.f32 1.0, %v1294_v3  ;;  %v1081_v62 = vsub.f32 1.0, %v1071_v49  ;;  %v1206_v27 = vsub.f32 %v6536_v9, %v6333_v22 }
 0x18a   : > { %1781 = vperm.xlu1 %5610, %v6658_v61   ;;  %v6664_v2 = vpop.permute.xlu0 %1533  ;;  %v1234_v49 = vmax.f32 %v1224_v42, 0.0 }
 0x18b   : > { %9543 = vst [vmem:[#allocation25_spill] sm:$0xff] %v6664_v2  ;;  %v9544_v2 = vld [vmem:[#allocation40_spill] sm:$0xff]  ;;  %v1076_v26 = vsub.f32 1.0, %v1066_v54  ;;  %v6716_v54 = vmax.f32 %v1081_v62, 0.0  ;;  %v1216_v61 = vand.u32 2147483647, %v1206_v27 }
 0x18c   : > { %v1258_v55 = vpop.permute.xlu1 %1257  ;;  %v981_v6 = vsub.f32 %v9544_v2, %v6333_v22  ;;  %v9549_v2 = vld [vmem:[#allocation53_spill] sm:$0xff] }
 0x18d   : > { %5617 = vset.pattern.permute.xlu0 %v9377_v58  ;;  %v1207_v10 = vsub.f32 %v9549_v2, %v6333_v22  ;;  %v1295_v58 = vand.u32 2147483647, %v1285_v51  ;;  %v1287_v19 = vsub.f32 %v1258_v55, %v6369_v63  ;;  %v1068_v2 = vand.u32 2147483647, %v1058_v8  ;;  %9553 = vst [vmem:[#allocation33_spill] sm:$0xff] %v6716_v54 }
 0x18e   : > { %5611 = vset.pattern.permute.xlu1 %v9546_v15  ;;  %2059 = vperm.xlu0 %5617, %v6684_v11   ;;  %v6687_v34 = vpop.permute.xlu0 %1545  ;;  %v1286_v15 = vsub.f32 %v6649_v52, %v6369_v63  ;;  %v6697_v50 = vand.u32 2147483647, %v981_v6  ;;  %v1095_v51 = vmul.f32 %v1085_v38, %v6630_v37  ;;  %v6707_v52 = vld [vmem:[%s5980_s10 + $0x18] sm:$0xff]  ;;  %v1009_v6 = vmax.f32 %v999_v59, 0.0  ;;  %v9554_v59 = vld [vmem:[#allocation42_spill] sm:$0xff] }
 0x18f   : > { %9548 = vst [vmem:[#allocation17_spill] sm:$0xff] %v6687_v34  ;;  %1829 = vperm.xlu1 %5611, %v6684_v11   ;;  %v1063_v34 = vsub.f32 %v9550_v33, %v6369_v63  ;;  %v6702_v11 = vmul.f32 %v1087_v4, %v1007_v12  ;;  %9551 = vst [vmem:[#allocation19_spill] sm:$0xff] %v6707_v52  ;;  %v1217_v55 = vand.u32 2147483647, %v1207_v10  ;;  %v1305_v33 = vsub.f32 1.0, %v1295_v58  ;;  %v9555_v58 = vld [vmem:[#allocation43_spill] sm:$0xff] }
 0x190   : > { %v6695_v29 = vpop.permute.xlu1 %1265  ;;  %v1225_v8 = vsub.f32 1.0, %v1215_v1  ;;  %v1314_v37 = vmax.f32 %v1304_v14, 0.0  ;;  %v1296_v4 = vand.u32 2147483647, %v1286_v15  ;;  %v1297_v12 = vand.u32 2147483647, %v1287_v19 }
 0x191   : > { %v6718_v57 = vand.u32 2147483647, %v1063_v34  ;;  %v1086_v10 = vmax.f32 %v1076_v26, 0.0  ;;  %v1145_v17 = vmul.f32 %v9555_v58, %v1095_v51  ;;  %v6724_v1 = vld [vmem:[%s5980_s10 + $0x28] sm:$0xff]  ;;  %v9558_v15 = vld [vmem:[#allocation50_spill] sm:$0xff]  ;;  %v1227_v62 = vsub.f32 1.0, %v1217_v55 }
 0x192   : > { %2071 = vperm.xlu0 %5617, %v6707_v52   ;;  %v6710_v3 = vpop.permute.xlu0 %1553  ;;  %9556 = vst [vmem:[#allocation27_spill] sm:$0xff] %v6724_v1  ;;  %v1060_v19 = vsub.f32 %v9558_v15, %v6369_v63  ;;  %v9559_v34 = vld [vmem:[#allocation55_spill] sm:$0xff]  ;;  %v1315_v9 = vmax.f32 %v1305_v33, 0.0  ;;  %v1235_v26 = vmax.f32 %v1225_v8, 0.0  ;;  %v1306_v51 = vsub.f32 1.0, %v1296_v4  ;;  %v9560_v8 = vld [vmem:[#allocation54_spill] sm:$0xff] }
 0x193   : > { %9552 = vst [vmem:[#allocation32_spill] sm:$0xff] %v6710_v3  ;;  %1837 = vperm.xlu1 %5611, %v6586_v0   ;;  %v1078_v3 = vsub.f32 1.0, %v1068_v2  ;;  %v1209_v2 = vsub.f32 %v9559_v34, %v6333_v22  ;;  %v1307_v27 = vsub.f32 1.0, %v1297_v12  ;;  %v1324_v58 = vmul.f32 %v1314_v37, %v1234_v49 }
 0x194   : > { %v6713_v38 = vpop.permute.xlu1 %1273  ;;  %v1288_v55 = vsub.f32 %v6491_v43, %v6369_v63  ;;  %v1289_v15 = vsub.f32 %v6695_v29, %v6369_v63  ;;  %v1155_v33 = vadd.f32 %v1145_v17, %v6620_v23  ;;  %v1144_v4 = vmul.f32 %v9560_v8, %v6671_v25 }
 0x195   : > { %v1088_v54 = vmax.f32 %v1078_v3, 0.0  ;;  %v6746_v49 = vmul.f32 %v6680_v40, %v1009_v6  ;;  %v1226_v37 = vsub.f32 1.0, %v1216_v61  ;;  %v6749_v3 = vld [vmem:[%s5980_s10 + $0x38] sm:$0xff]  ;;  %v1096_v43 = vmul.f32 %v1086_v10, %v6669_v48  ;;  %v9561_v10 = vld [vmem:[#allocation56_spill] sm:$0xff] }
 0x196   : > { %2079 = vperm.xlu0 %5617, %v6724_v1   ;;  %v6727_v14 = vpop.permute.xlu0 %1561  ;;  %v1237_v12 = vmax.f32 %v1227_v62, 0.0  ;;  %v1219_v29 = vand.u32 2147483647, %v1209_v2  ;;  %v1316_v23 = vmax.f32 %v1306_v51, 0.0  ;;  %v1317_v25 = vmax.f32 %v1307_v27, 0.0 }
 0x197   : > { %9557 = vst [vmem:[#allocation29_spill] sm:$0xff] %v6727_v14  ;;  %1841 = vperm.xlu1 %5611, %v6707_v52   ;;  %v1208_v14 = vsub.f32 %v6544_v41, %v6333_v22  ;;  %v6752_v41 = vand.u32 2147483647, %v1060_v19  ;;  %v1374_v40 = vmul.f32 %v6540_v16, %v1324_v58  ;;  %v1325_v61 = vmul.f32 %v1315_v9, %v1235_v26 }
 0x198   : > { %v6734_v42 = vpop.permute.xlu1 %1281  ;;  %v1098_v6 = vmul.f32 %v1088_v54, %v6651_v53  ;;  %v1298_v8 = vand.u32 2147483647, %v1288_v55  ;;  %v1299_v19 = vand.u32 2147483647, %v1289_v15  ;;  %v1154_v48 = vadd.f32 %v1144_v4, %v6580_v45 }
 0x199   : > { %v1218_v34 = vand.u32 2147483647, %v1208_v14  ;;  %v1146_v62 = vmul.f32 %v9561_v10, %v1096_v43  ;;  %v1236_v2 = vmax.f32 %v1226_v37, 0.0  ;;  %v1229_v51 = vsub.f32 1.0, %v1219_v29  ;;  %v9565_v10 = vld [vmem:[#allocation45_spill] sm:$0xff] }
 0x19a   : > { %2087 = vperm.xlu0 %5617, %v6749_v3   ;;  %v1211_v16 = vsub.f32 %v6427_v32, %v6333_v22  ;;  %v1210_v53 = vsub.f32 %v6563_v56, %v6333_v22  ;;  %v1290_v9 = vsub.f32 %v6517_v21, %v6369_v63  ;;  %v1384_v54 = vadd.f32 %v1374_v40, %v1154_v48  ;;  %v9562_v56 = vld [vmem:[#allocation52_spill] sm:$0xff] }
 0x19b   : > { %1849 = vperm.xlu1 %5611, %v6724_v1   ;;  %v6756_v17 = vpop.permute.xlu0 %1609  ;;  %v6763_v1 = vld [vmem:[%s5980_s10 + $0x48] sm:$0xff]  ;;  %v1326_v26 = vmul.f32 %v1316_v23, %v1236_v2  ;;  %v1228_v27 = vsub.f32 1.0, %v1218_v34  ;;  %v1308_v58 = vsub.f32 1.0, %v1298_v8  ;;  %v1309_v55 = vsub.f32 1.0, %v1299_v19 }
 0x19c   : > { %v1291_v32 = vsub.f32 %v6713_v38, %v6369_v63  ;;  %v1062_v4 = vsub.f32 %v9562_v56, %v6369_v63  ;;  %v1147_v21 = vmul.f32 %v6430_v36, %v6702_v11  ;;  %v5852_v29 = vmov 38  }
 0x19d   : > { %v1340_v52 = vpop.permute.xlu1 %1339  ;;  %v1221_v23 = vand.u32 2147483647, %v1211_v16  ;;  %v1300_v38 = vand.u32 2147483647, %v1290_v9  ;;  %v1156_v36 = vadd.f32 %v1146_v62, %v6623_v35  ;;  %v1239_v11 = vmax.f32 %v1229_v51, 0.0 }
 0x19e   : > { %v1375_v47 = vmul.f32 %v1340_v52, %v1325_v61  ;;  %2095 = vperm.xlu0 %5617, %v6763_v1   ;;  %v1327_v52 = vmul.f32 %v1317_v25, %v1237_v12  ;;  %v1080_v12 = vsub.f32 1.0, %v6752_v41  ;;  %v1220_v40 = vand.u32 2147483647, %v1210_v53 }
 0x19f   : > { %1857 = vperm.xlu1 %5611, %v6749_v3   ;;  %v6773_v45 = vpop.permute.xlu0 %1621  ;;  %v1318_v34 = vmax.f32 %v1308_v58, 0.0  ;;  %v1319_v8 = vmax.f32 %v1309_v55, 0.0  ;;  %v1301_v41 = vand.u32 2147483647, %v1291_v32  ;;  %v9564_v48 = vmov 0.0  }
 0x1a0   : > { %v1385_v14 = vadd.f32 %v1375_v47, %v1155_v33  ;;  %v9563_v47 = vsub.f32 1.0, %v6697_v50  ;;  %v1377_v61 = vmul.f32 %v6552_v60, %v1327_v52  ;;  %v1238_v50 = vmax.f32 %v1228_v27, 0.0 }
 0x1a1   : > { %v1344_v15 = vpop.permute.xlu1 %1343  ;;  %v1148_v2 = vmul.f32 %v9565_v10, %v1098_v6  ;;  %v1072_v16 = vand.u32 2147483647, %v1062_v4  ;;  %v1157_v9 = vadd.f32 %v1147_v21, %v6583_v46  ;;  %v1090_v62 = vmax.f32 %v1080_v12, 0.0 }
 0x1a2   : > { %v1404_v37 = vpack.c.bf16 %v1385_v14, %v1384_v54  ;;  %v1376_v43 = vmul.f32 %v1344_v15, %v1326_v26  ;;  %5620 = vset.pattern.permute.xlu0 %v5852_v29  ;;  %v6784_v33 = vmax.f32 %v9563_v47, 0.0  ;;  %v1231_v51 = vsub.f32 1.0, %v1221_v23 }
 0x1a3   : > { %1865 = vperm.xlu1 %5611, %v6763_v1   ;;  %2153 = vperm.xlu0 %5620, %v6557_v30   ;;  %v6789_v25 = vpop.permute.xlu0 %1629  ;;  %v1213_v60 = vsub.f32 %v6437_v28, %v6333_v22  ;;  %v1310_v53 = vsub.f32 1.0, %v1300_v38  ;;  %v9566_v54 = vmov 37   ;;  %v1230_v14 = vsub.f32 1.0, %v1220_v40 }
 0x1a4   : > { %5339 = vmatmul.mubr.msk.bf16.vlgmr.msra.gmra.mrb[0].mxu0 %vm1439_vm2, %v1404_v37  ;;  %v1386_v35 = vadd.f32 %v1376_v43, %v1156_v36  ;;  %v1212_v6 = vsub.f32 %v6594_v39, %v6333_v22  ;;  %v1292_v46 = vsub.f32 %v6534_v7, %v6369_v63  ;;  %v1387_v26 = vadd.f32 %v1377_v61, %v1157_v9 }
 0x1a5   : > { %v1352_v19 = vpop.permute.xlu1 %1351  ;;  %5342 = vmatprep.mubr.msk.bf16.mxu0 %vm5845_vm1, %v9564_v48  ;;  %v1311_v27 = vsub.f32 1.0, %v1301_v41  ;;  %v1329_v58 = vmul.f32 %v1319_v8, %v1239_v11  ;;  %v1293_v28 = vsub.f32 %v6734_v42, %v6369_v63  ;;  %v1328_v55 = vmul.f32 %v1318_v34, %v1238_v50  ;;  %v9569_v8 = vld [vmem:[#allocation14_spill] sm:$0xff] }
 0x1a6   : > { %v9567_v15 = vsub.f32 %v9554_v59, %v6333_v22  ;;  %v1158_v4 = vadd.f32 %v1148_v2, %v6628_v20  ;;  %v1082_v39 = vsub.f32 1.0, %v1072_v16  ;;  %v1405_v21 = vpack.c.bf16 %v1387_v26, %v1386_v35  ;;  %v9572_v16 = vld [vmem:[#allocation47_spill] sm:$0xff]  ;;  %v9576_v26 = vld [vmem:[#allocation18_spill] sm:$0xff] }
 0x1a7   : > { %5614 = vset.pattern.permute.xlu1 %v9566_v54  ;;  %2165 = vperm.xlu0 %5620, %v6602_v31   ;;  %v6802_v52 = vpop.permute.xlu0 %1637  ;;  %v1100_v7 = vmul.f32 %v1090_v62, %v6653_v13  ;;  %v1149_v37 = vmul.f32 %v6450_v18, %v6746_v49  ;;  %v1223_v43 = vand.u32 2147483647, %v1213_v60  ;;  %v1378_v47 = vmul.f32 %v1352_v19, %v1328_v55  ;;  %v9570_v19 = vld [vmem:[#allocation33_spill] sm:$0xff] }
 0x1a8   : > { %1923 = vperm.xlu1 %5614, %v6557_v30   ;;  %v993_v56 = vand.u32 2147483647, %v9567_v15  ;;  %v1241_v42 = vmax.f32 %v1231_v51, 0.0  ;;  %v1320_v12 = vmax.f32 %v1310_v53, 0.0  ;;  %v1222_v23 = vand.u32 2147483647, %v1212_v6 }
 0x1a9   : > { %v1360_v32 = vpop.permute.xlu1 %1359  ;;  %v1302_v38 = vand.u32 2147483647, %v1292_v46  ;;  %v1240_v59 = vmax.f32 %v1230_v14, 0.0  ;;  %v1321_v36 = vmax.f32 %v1311_v27, 0.0  ;;  %v1379_v13 = vmul.f32 %v6577_v44, %v1329_v58  ;;  %v9571_v44 = vld [vmem:[#allocation20_spill] sm:$0xff]  ;;  %v9573_v14 = vld [vmem:[#allocation63_spill] sm:$0xff] }
 0x1aa   : > { %v1303_v11 = vand.u32 2147483647, %v1293_v28  ;;  %v9568_v49 = vsub.f32 1.0, %v6642_v24  ;;  %v1003_v61 = vsub.f32 1.0, %v993_v56  ;;  %v1083_v50 = vsub.f32 1.0, %v6718_v57  ;;  %v9574_v6 = vld [vmem:[#allocation15_spill] sm:$0xff] }
 0x1ab   : > { %2173 = vperm.xlu0 %5620, %v6633_v5   ;;  %v6821_v20 = vpop.permute.xlu0 %1645  ;;  %v1092_v34 = vmax.f32 %v1082_v39, 0.0  ;;  %v1159_v41 = vadd.f32 %v1149_v37, %v9569_v8  ;;  %v1101_v10 = vmul.f32 %v9570_v19, %v6784_v33  ;;  %v1388_v2 = vadd.f32 %v1378_v47, %v1158_v4  ;;  %v9575_v33 = vld [vmem:[#allocation10_spill] sm:$0xff]  ;;  %v9578_v28 = vld [vmem:[#allocation7_spill] sm:$0xff]  ;;  %v9579_v15 = vld [vmem:[#allocation13_spill] sm:$0xff] }
 0x1ac   : > { %1927 = vperm.xlu1 %5614, %v6586_v0   ;;  %5343 = vmatmul.mubr.msk.bf16.gmra.mrb[4].mxu0 %vm1439_vm2, %v1405_v21  ;;  %v1012_v40 = vmax.f32 %v9568_v49, 0.0  ;;  %v1150_v9 = vmul.f32 %v9572_v16, %v1100_v7  ;;  %v1233_v35 = vsub.f32 1.0, %v1223_v43  ;;  %v1232_v62 = vsub.f32 1.0, %v1222_v23  ;;  %v9577_v58 = vld [vmem:[#allocation62_spill] sm:$0xff]  ;;  %v9580_v56 = vld [vmem:[#allocation11_spill] sm:$0xff]  ;;  %v9581_v7 = vld [vmem:[#allocation61_spill] sm:$0xff] }
 0x1ad   : > { %v6824_v18 = vpop.permute.xlu1 %1367  ;;  %5346 = vmatprep.mubr.msk.bf16.mxu0 %vm5845_vm1, %v9564_v48  ;;  %v1312_v51 = vsub.f32 1.0, %v1302_v38  ;;  %v1389_v60 = vadd.f32 %v1379_v13, %v1159_v41  ;;  %v1313_v57 = vsub.f32 1.0, %v1303_v11  ;;  %v1331_v53 = vmul.f32 %v1321_v36, %v1241_v42  ;;  %v9582_v36 = vld [vmem:[#allocation16_spill] sm:$0xff]  ;;  %v9585_v19 = vld [vmem:[#allocation59_spill] sm:$0xff]  ;;  %v9588_v16 = vld [vmem:[#allocation30_spill] sm:$0xff] }
 0x1ae   : > { %v1330_v54 = vmul.f32 %v1320_v12, %v1240_v59  ;;  %v931_v46 = vadd.f32 %v9574_v6, %v9573_v14  ;;  %v873_v27 = vmul.f32 %v9576_v26, %v9575_v33  ;;  %v930_v55 = vadd.f32 %v9578_v28, %v9577_v58  ;;  %v9583_v8 = vld [vmem:[#allocation12_spill] sm:$0xff]  ;;  %v9591_v14 = vld [vmem:[#allocation19_spill] sm:$0xff]  ;;  %v9592_v33 = vld [vmem:[#allocation49_spill] sm:$0xff] }
 0x1af   : > { %2181 = vperm.xlu0 %5620, %v9571_v44   ;;  %v872_v4 = vmul.f32 %v9580_v56, %v9579_v15  ;;  %v1093_v21 = vmax.f32 %v1083_v50, 0.0  ;;  %v1151_v37 = vmul.f32 %v9581_v7, %v1101_v10  ;;  %v1406_v43 = vpack.c.bf16 %v1389_v60, %v1388_v2  ;;  %v9593_v15 = vld [vmem:[#allocation9_spill] sm:$0xff]  ;;  %v9594_v7 = vld [vmem:[#allocation64_spill] sm:$0xff] }
 0x1b0   : > { %1935 = vperm.xlu1 %5614, %v6602_v31   ;;  %v6837_v24 = vpop.permute.xlu0 %1703  ;;  %v1380_v47 = vmul.f32 %v1360_v32, %v1330_v54  ;;  %v5853_v42 = vmov 7   ;;  %v1013_v12 = vmax.f32 %v1003_v61, 0.0  ;;  %v1160_v23 = vadd.f32 %v1150_v9, %v930_v55  ;;  %v9584_v32 = vld [vmem:[#allocation58_spill] sm:$0xff] }
 0x1b1   : > { %v1102_v38 = vmul.f32 %v1092_v34, %v1012_v40  ;;  %v1243_v59 = vmax.f32 %v1233_v35, 0.0  ;;  %v1242_v11 = vmax.f32 %v1232_v62, 0.0  ;;  %v1322_v49 = vmax.f32 %v1312_v51, 0.0  ;;  %v9586_v40 = vld [vmem:[#allocation57_spill] sm:$0xff]  ;;  %v9587_v34 = vld [vmem:[#allocation60_spill] sm:$0xff] }
 0x1b2   : > { %v6847_v39 = vpop.permute.xlu1 %1529  ;;  %v1323_v50 = vmax.f32 %v1313_v57, 0.0  ;;  %v1381_v41 = vmul.f32 %v9583_v8, %v1331_v53  ;;  %v652_v10 = vmul.f32 %v9585_v19, %v9584_v32  ;;  %v653_v2 = vmul.f32 %v9587_v34, %v9586_v40  ;;  %v9589_v51 = vld [vmem:[#allocation8_spill] sm:$0xff]  ;;  %v9590_v57 = vld [vmem:[#allocation23_spill] sm:$0xff] }
 0x1b3   : > { %5621 = vset.pattern.permute.xlu0 %v5853_v42  ;;  %v922_v9 = vmul.f32 %v9588_v16, %v872_v4  ;;  %v1161_v35 = vadd.f32 %v1151_v37, %v931_v46  ;;  %v1390_v62 = vadd.f32 %v1380_v47, %v1160_v23  ;;  %v923_v53 = vmul.f32 %v9590_v57, %v873_v27  ;;  %v9596_v47 = vld [vmem:[#allocation27_spill] sm:$0xff] }
 0x1b4   : > { %1943 = vperm.xlu1 %5614, %v6633_v5   ;;  %2209 = vperm.xlu0 %5621, %v9582_v36   ;;  %v6853_v13 = vpop.permute.xlu0 %1715  ;;  %v702_v60 = vmul.f32 %v9589_v51, %v652_v10  ;;  %v1103_v54 = vmul.f32 %v1093_v21, %v1013_v12  ;;  %v1152_v26 = vmul.f32 %v9592_v33, %v1102_v38  ;;  %v9388_v34 = vmov 23  }
 0x1b5   : > { %5347 = vmatmul.mubr.msk.bf16.gmra.mrb[8].mxu0 %vm1439_vm2, %v1406_v43  ;;  %v1391_v58 = vadd.f32 %v1381_v41, %v1161_v35  ;;  %v1333_v28 = vmul.f32 %v1323_v50, %v1243_v59  ;;  %v1332_v55 = vmul.f32 %v1322_v49, %v1242_v11  ;;  %v703_v56 = vmul.f32 %v9593_v15, %v653_v2  ;;  %v9598_v59 = vld [vmem:[#allocation6_spill] sm:$0xff] }
 0x1b6   : > { %v6859_v61 = vpop.permute.xlu1 %1537  ;;  %5350 = vmatprep.mubr.msk.bf16.mxu0 %vm5845_vm1, %v9564_v48  ;;  %v932_v4 = vadd.f32 %v922_v9, %v702_v60  ;;  %v1153_v37 = vmul.f32 %v9594_v7, %v1103_v54  ;;  %v9595_v43 = vmov 6   ;;  %v9599_v60 = vmov 22  }
 0x1b7   : > { %v1407_v27 = vpack.c.bf16 %v1391_v58, %v1390_v62  ;;  %v1382_v21 = vmul.f32 %v6824_v18, %v1332_v55  ;;  %v933_v23 = vadd.f32 %v923_v53, %v703_v56  ;;  %v1383_v11 = vmul.f32 %v9598_v59, %v1333_v28 }
 0x1b8   : > { %1951 = vperm.xlu1 %5614, %v9571_v44   ;;  %2221 = vperm.xlu0 %5621, %v9591_v14   ;;  %v6870_v6 = vpop.permute.xlu0 %1723  ;;  %v1162_v38 = vadd.f32 %v1152_v26, %v932_v4  ;;  %v9387_v54 = vmov 39  }
 0x1b9   : > { %v1163_v18 = vadd.f32 %v1153_v37, %v933_v23  ;;  %v5725_v23 = vld [vmem:[%s5975_s25 + $0x18] sm:$0xff]  }
 0x1ba   : > { %v6874_v46 = vpop.permute.xlu1 %1541  ;;  %v1392_v50 = vadd.f32 %v1382_v21, %v1162_v38  ;;  %v9386_v21 = vmov 8  }
 0x1bb   : > { %v1393_v8 = vadd.f32 %v1383_v11, %v1163_v18 }
 0x1bc   : > { %5615 = vset.pattern.permute.xlu1 %v9595_v43  ;;  %2229 = vperm.xlu0 %5621, %v9596_v47   ;;  %v6880_v12 = vpop.permute.xlu0 %1731 }
 0x1bd   : > { %9597 = vst [vmem:[#allocation22_spill] sm:$0xff] %v6880_v12  ;;  %5351 = vmatmul.mubr.msk.bf16.gmra.mrb[12].mxu0 %vm1439_vm2, %v1407_v27  ;;  %1979 = vperm.xlu1 %5615, %v9582_v36   ;;  %v1408_v19 = vpack.c.bf16 %v1393_v8, %v1392_v50  ;;  %v5724_v27 = vld [vmem:[%s5975_s25 + $0x8] sm:$0xff]  }
 0x1be   : > { %v6885_v49 = vpop.permute.xlu1 %1549  ;;  %5354 = vmatprep.mubr.msk.bf16.mxu0 %vm5845_vm1, %v9564_v48 }
 0x1c0   : > { %2237 = vperm.xlu0 %5621, %v6749_v3  }
 0x1c1   : > { %1987 = vperm.xlu1 %5615, %v6586_v0   ;;  %v6891_v41 = vpop.permute.xlu0 %1749 }
 0x1c2   : > { %v6893_v32 = vpop.permute.xlu1 %1557 }
 0x1c4   : > { %2245 = vperm.xlu0 %5621, %v6763_v1  }
 0x1c5   : > { %5355 = vmatmul.mubr.msk.bf16.gmra.mrb[16].mxu0 %vm1439_vm2, %v1408_v19  ;;  %1991 = vperm.xlu1 %5615, %v9591_v14   ;;  %v6898_v10 = vpop.permute.xlu0 %1761 }
 0x1c6   : > { %v6900_v40 = vpop.permute.xlu1 %1565  ;;  %5398 = vmatprep.mubr.msk.bf16.mxu0 %vm5845_vm1, %v9564_v48  ;;  %v9614_v48 = vmov 23  }
 0x1c8   : > { %5624 = vset.pattern.permute.xlu0 %v9388_v34  ;;  %v9389_v34 = vmov 24  }
 0x1c9   : > { %1999 = vperm.xlu1 %5615, %v9596_v47   ;;  %2293 = vperm.xlu0 %5624, %v6557_v30   ;;  %v6907_v2 = vpop.permute.xlu0 %1769 }
 0x1cb   : > { %v6909_v16 = vpop.permute.xlu1 %1613 }
 0x1cd   : > { %2007 = vperm.xlu1 %5615, %v6749_v3   ;;  %2305 = vperm.xlu0 %5624, %v6602_v31   ;;  %v6913_v9 = vpop.permute.xlu0 %1777 }
 0x1cf   : > { %v6915_v35 = vpop.permute.xlu1 %1617 }
 0x1d1   : > { %2015 = vperm.xlu1 %5615, %v6763_v1   ;;  %2313 = vperm.xlu0 %5624, %v6633_v5   ;;  %v6919_v62 = vpop.permute.xlu0 %1785 }
 0x1d3   : > { %v6921_v51 = vpop.permute.xlu1 %1625 }
 0x1d5   : > { %5618 = vset.pattern.permute.xlu1 %v9599_v60  ;;  %2321 = vperm.xlu0 %5624, %v9571_v44  }
 0x1d6   : > { %2063 = vperm.xlu1 %5618, %v6557_v30   ;;  %v6926_v57 = vpop.permute.xlu0 %1833 }
 0x1d7   : > { %v6928_v53 = vpop.permute.xlu1 %1633 }
 0x1d9   : > { %5625 = vset.pattern.permute.xlu0 %v9387_v54 }
 0x1da   : > { %2067 = vperm.xlu1 %5618, %v6586_v0   ;;  %2379 = vperm.xlu0 %5625, %v9582_v36   ;;  %v6933_v33 = vpop.permute.xlu0 %1845 }
 0x1db   : > { %v6935_v26 = vpop.permute.xlu1 %1641 }
 0x1de   : > { %2075 = vperm.xlu1 %5618, %v6602_v31   ;;  %2391 = vperm.xlu0 %5625, %v9591_v14   ;;  %v6939_v58 = vpop.permute.xlu0 %1853 }
 0x1e0   : > { %v6941_v28 = vpop.permute.xlu1 %1699 }
 0x1e2   : > { %2083 = vperm.xlu1 %5618, %v6633_v5   ;;  %2399 = vperm.xlu0 %5625, %v9596_v47   ;;  %v6945_v55 = vpop.permute.xlu0 %1861 }
 0x1e4   : > { %v6947_v15 = vpop.permute.xlu1 %1707 }
 0x1e6   : > { %2091 = vperm.xlu1 %5618, %v9571_v44   ;;  %2407 = vperm.xlu0 %5625, %v6749_v3  }
 0x1e7   : > { %v6951_v56 = vpop.permute.xlu0 %1919 }
 0x1e8   : > { %9600 = vst [vmem:[#allocation24_spill] sm:$0xff] %v6951_v56  ;;  %v6953_v4 = vpop.permute.xlu1 %1711  ;;  %v9391_v56 = vmov 40  }
 0x1ea   : > { %5619 = vset.pattern.permute.xlu1 %v5852_v29  ;;  %2415 = vperm.xlu0 %5625, %v6763_v1  }
 0x1eb   : > { %2149 = vperm.xlu1 %5619, %v9582_v36   ;;  %v6958_v7 = vpop.permute.xlu0 %1931 }
 0x1ec   : > { %9601 = vst [vmem:[#allocation26_spill] sm:$0xff] %v6958_v7  ;;  %v6960_v37 = vpop.permute.xlu1 %1719 }
 0x1ed   : > { %9602 = vst [vmem:[#allocation34_spill] sm:$0xff] %v6960_v37 }
 0x1ee   : > { %2445 = vrot.lane.b32.xlu0 %v5724_v27, %s5856_s30 }
 0x1ef   : > { %2157 = vperm.xlu1 %5619, %v6586_v0   ;;  %5627 = vset.pattern.permute.xlu0 %v9386_v21  ;;  %v6966_v43 = vpop.permute.xlu0 %1939 }
 0x1f0   : > { %9603 = vst [vmem:[#allocation35_spill] sm:$0xff] %v6966_v43  ;;  %v6968_v29 = vpop.permute.xlu1 %1727 }
 0x1f1   : > { %9604 = vst [vmem:[#allocation36_spill] sm:$0xff] %v6968_v29 }
 0x1f2   : > { %2449 = vrot.lane.b32.xlu0 %v5725_v23, %s5856_s30 }
 0x1f3   : > { %2161 = vperm.xlu1 %5619, %v9591_v14   ;;  %v6973_v38 = vpop.permute.xlu0 %1947 }
 0x1f4   : > { %9605 = vst [vmem:[#allocation37_spill] sm:$0xff] %v6973_v38  ;;  %v6975_v59 = vpop.permute.xlu1 %1735 }
 0x1f5   : > { %9606 = vst [vmem:[#allocation44_spill] sm:$0xff] %v6975_v59 }
 0x1f6   : > { %2547 = vperm.xlu0 %5627, %v9582_v36  }
 0x1f7   : > { %2169 = vperm.xlu1 %5619, %v9596_v47   ;;  %v6979_v11 = vpop.permute.xlu0 %1955 }
 0x1f8   : > { %9607 = vst [vmem:[#allocation21_spill] sm:$0xff] %v6979_v11 }
 0x1f9   : > { %v6981_v18 = vpop.permute.xlu1 %1753 }
 0x1fa   : > { %2559 = vperm.xlu0 %5627, %v9591_v14  }
 0x1fb   : > { %2177 = vperm.xlu1 %5619, %v6749_v3  }
 0x1fc   : > { %v6985_v50 = vpop.permute.xlu0 %1983 }
 0x1fd   : > { %v6987_v8 = vpop.permute.xlu1 %1757 }
 0x1fe   : > { %2567 = vperm.xlu0 %5627, %v9596_v47  }
 0x1ff   : > { %2185 = vperm.xlu1 %5619, %v6763_v1  }
 0x200   : > { %v6991_v19 = vpop.permute.xlu0 %1995 }
 0x201   : > { %v6993_v60 = vpop.permute.xlu1 %1765 }
 0x202   : > { %2575 = vperm.xlu0 %5627, %v6749_v3  }
 0x203   : > { %5622 = vset.pattern.permute.xlu1 %v5853_v42 }
 0x204   : > { %2213 = vperm.xlu1 %5622, %v6557_v30   ;;  %v6998_v27 = vpop.permute.xlu0 %2003 }
 0x205   : > { %v7000_v23 = vpop.permute.xlu1 %1773 }
 0x206   : > { %2583 = vperm.xlu0 %5627, %v6763_v1  }
 0x208   : > { %2217 = vperm.xlu1 %5622, %v6586_v0   ;;  %v7004_v21 = vpop.permute.xlu0 %2011 }
 0x209   : > { %9608 = vst [vmem:[#allocation31_spill] sm:$0xff] %v7004_v21  ;;  %v7006_v54 = vpop.permute.xlu1 %1781 }
 0x20a   : > { %9609 = vst [vmem:[#allocation28_spill] sm:$0xff] %v7006_v54  ;;  %5630 = vset.pattern.permute.xlu0 %v9389_v34  ;;  %v9392_v54 = vmov 9  }
 0x20b   : > { %2631 = vperm.xlu0 %5630, %v6557_v30  }
 0x20c   : > { %2225 = vperm.xlu1 %5622, %v6602_v31  }
 0x20d   : > { %v7011_v42 = vpop.permute.xlu0 %2059 }
 0x20e   : > { %9610 = vst [vmem:[#allocation38_spill] sm:$0xff] %v7011_v42  ;;  %v7013_v59 = vpop.permute.xlu1 %1829 }
 0x20f   : > { %2643 = vperm.xlu0 %5630, %v6602_v31  }
 0x210   : > { %2233 = vperm.xlu1 %5622, %v6633_v5  }
 0x211   : > { %v7017_v11 = vpop.permute.xlu0 %2071 }
 0x212   : > { %9611 = vst [vmem:[#allocation51_spill] sm:$0xff] %v7017_v11  ;;  %v7019_v12 = vpop.permute.xlu1 %1837 }
 0x213   : > { %9612 = vst [vmem:[#allocation39_spill] sm:$0xff] %v7019_v12  ;;  %2651 = vperm.xlu0 %5630, %v6633_v5   ;;  %v5728_v12 = vld [vmem:[%s5975_s25 + $0x20] sm:$0xff]  }
 0x214   : > { %2241 = vperm.xlu1 %5622, %v9571_v44  }
 0x215   : > { %v7023_v34 = vpop.permute.xlu0 %2079 }
 0x216   : > { %9613 = vst [vmem:[#allocation46_spill] sm:$0xff] %v7023_v34  ;;  %v7025_v38 = vpop.permute.xlu1 %1841 }
 0x217   : > { %2659 = vperm.xlu0 %5630, %v9571_v44  }
 0x218   : > { %5623 = vset.pattern.permute.xlu1 %v9614_v48 }
 0x219   : > { %2289 = vperm.xlu1 %5623, %v9582_v36   ;;  %v7030_v43 = vpop.permute.xlu0 %2087 }
 0x21a   : > { %9615 = vst [vmem:[#allocation40_spill] sm:$0xff] %v7030_v43  ;;  %v7032_v7 = vpop.permute.xlu1 %1849 }
 0x21b   : > { %9616 = vst [vmem:[#allocation48_spill] sm:$0xff] %v7032_v7  ;;  %5631 = vset.pattern.permute.xlu0 %v9391_v56 }
 0x21c   : > { %2717 = vperm.xlu0 %5631, %v9582_v36  }
 0x21d   : > { %2297 = vperm.xlu1 %5623, %v6586_v0   ;;  %v7037_v34 = vpop.permute.xlu0 %2095 }
 0x21e   : > { %9617 = vst [vmem:[#allocation53_spill] sm:$0xff] %v7037_v34  ;;  %v7039_v11 = vpop.permute.xlu1 %1857 }
 0x21f   : > { %9618 = vst [vmem:[#allocation41_spill] sm:$0xff] %v7039_v11 }
 0x220   : > { %2729 = vperm.xlu0 %5631, %v9591_v14  }
 0x221   : > { %2301 = vperm.xlu1 %5623, %v9591_v14  }
 0x222   : > { %v7043_v48 = vpop.permute.xlu1 %1865  ;;  %v7045_v43 = vpop.permute.xlu0 %2153 }
 0x223   : > { %9619 = vst [vmem:[#allocation42_spill] sm:$0xff] %v7043_v48  ;;  %9620 = vst [vmem:[#allocation43_spill] sm:$0xff] %v7045_v43 }
 0x224   : > { %2737 = vperm.xlu0 %5631, %v9596_v47  }
 0x225   : > { %2309 = vperm.xlu1 %5623, %v9596_v47  }
 0x226   : > { %v7049_v56 = vpop.permute.xlu0 %2165 }
 0x227   : > { %9621 = vst [vmem:[#allocation50_spill] sm:$0xff] %v7049_v56  ;;  %v7051_v42 = vpop.permute.xlu1 %1923  ;;  %v9627_v56 = vmov 39  }
 0x228   : > { %9622 = vst [vmem:[#allocation55_spill] sm:$0xff] %v7051_v42  ;;  %2745 = vperm.xlu0 %5631, %v6749_v3  }
 0x229   : > { %2317 = vperm.xlu1 %5623, %v6749_v3  }
 0x22a   : > { %v7055_v34 = vpop.permute.xlu0 %2173 }
 0x22b   : > { %9623 = vst [vmem:[#allocation54_spill] sm:$0xff] %v7055_v34  ;;  %v7057_v11 = vpop.permute.xlu1 %1927 }
 0x22c   : > { %9624 = vst [vmem:[#allocation56_spill] sm:$0xff] %v7057_v11  ;;  %2753 = vperm.xlu0 %5631, %v6763_v1  }
 0x22d   : > { %2325 = vperm.xlu1 %5623, %v6763_v1  }
 0x22e   : > { %v7061_v43 = vpop.permute.xlu0 %2181 }
 0x22f   : > { %9625 = vst [vmem:[#allocation52_spill] sm:$0xff] %v7061_v43  ;;  %v7063_v48 = vpop.permute.xlu1 %1935 }
 0x230   : > { %9626 = vst [vmem:[#allocation45_spill] sm:$0xff] %v7063_v48  ;;  %5634 = vset.pattern.permute.xlu0 %v9392_v54 }
 0x231   : > { %5626 = vset.pattern.permute.xlu1 %v9627_v56  ;;  %2771 = vperm.xlu0 %5634, %v6557_v30  }
 0x232   : > { %2383 = vperm.xlu1 %5626, %v6557_v30  }
 0x233   : > { %v7069_v34 = vpop.permute.xlu1 %1943  ;;  %v7071_v11 = vpop.permute.xlu0 %2209 }
 0x234   : > { %9628 = vst [vmem:[#allocation14_spill] sm:$0xff] %v7069_v34  ;;  %9629 = vst [vmem:[#allocation33_spill] sm:$0xff] %v7071_v11 }
 0x235   : > { %2783 = vperm.xlu0 %5634, %v6602_v31  }
 0x236   : > { %2387 = vperm.xlu1 %5626, %v6586_v0  }
 0x237   : > { %v7075_v43 = vpop.permute.xlu1 %1951  ;;  %v7077_v48 = vpop.permute.xlu0 %2221 }
 0x238   : > { %9630 = vst [vmem:[#allocation20_spill] sm:$0xff] %v7075_v43  ;;  %9631 = vst [vmem:[#allocation47_spill] sm:$0xff] %v7077_v48  ;;  %v9393_v43 = vmov 25   ;;  %v5726_v48 = vld [vmem:[%s5975_s25] sm:$0xff]  }
 0x239   : > { %2791 = vperm.xlu0 %5634, %v6633_v5  }
 0x23a   : > { %2395 = vperm.xlu1 %5626, %v6602_v31  }
 0x23b   : > { %v7081_v56 = vpop.permute.xlu0 %2229 }
 0x23c   : > { %9632 = vst [vmem:[#allocation63_spill] sm:$0xff] %v7081_v56  ;;  %v7083_v54 = vpop.permute.xlu1 %1979 }
 0x23d   : > { %9633 = vst [vmem:[#allocation15_spill] sm:$0xff] %v7083_v54  ;;  %2799 = vperm.xlu0 %5634, %v9571_v44  }
 0x23e   : > { %2403 = vperm.xlu1 %5626, %v6633_v5  }
 0x23f   : > { %v7087_v34 = vpop.permute.xlu0 %2237 }
 0x240   : > { %9634 = vst [vmem:[#allocation10_spill] sm:$0xff] %v7087_v34  ;;  %v7089_v42 = vpop.permute.xlu1 %1987  ;;  %v9638_v34 = vmov 8  }
 0x241   : > { %9635 = vst [vmem:[#allocation18_spill] sm:$0xff] %v7089_v42  ;;  %5635 = vset.pattern.permute.xlu0 %v9393_v43  ;;  %v5727_v43 = vld [vmem:[%s5975_s25 + $0x10] sm:$0xff]  }
 0x242   : > { %2411 = vperm.xlu1 %5626, %v9571_v44   ;;  %2847 = vperm.xlu0 %5635, %v9582_v36  }
 0x243   : > { %v7094_v56 = vpop.permute.xlu0 %2245 }
 0x244   : > { %9636 = vst [vmem:[#allocation62_spill] sm:$0xff] %v7094_v56  ;;  %v7096_v54 = vpop.permute.xlu1 %1991 }
 0x245   : > { %9637 = vst [vmem:[#allocation7_spill] sm:$0xff] %v7096_v54 }
 0x246   : > { %2443 = vrot.lane.b32.xlu1 %v5726_v48, %s5856_s30  ;;  %2859 = vperm.xlu0 %5635, %v9591_v14  }
 0x247   : > { %5628 = vset.pattern.permute.xlu1 %v9638_v34 }
 0x248   : > { %v7102_v42 = vpop.permute.xlu1 %1999  ;;  %v7104_v11 = vpop.permute.xlu0 %2293 }
 0x249   : > { %9639 = vst [vmem:[#allocation13_spill] sm:$0xff] %v7102_v42  ;;  %9640 = vst [vmem:[#allocation11_spill] sm:$0xff] %v7104_v11 }
 0x24a   : > { %2447 = vrot.lane.b32.xlu1 %v5727_v43, %s5856_s30  ;;  %2867 = vperm.xlu0 %5635, %v9596_v47  }
 0x24c   : > { %v7109_v56 = vpop.permute.xlu1 %2007  ;;  %v7111_v54 = vpop.permute.xlu0 %2305 }
 0x24d   : > { %9641 = vst [vmem:[#allocation61_spill] sm:$0xff] %v7109_v56  ;;  %9642 = vst [vmem:[#allocation16_spill] sm:$0xff] %v7111_v54  ;;  %v9395_v56 = vmov 41   ;;  %v9655_v54 = vmov 24  }
 0x24e   : > { %2451 = vrot.lane.b32.xlu1 %v5728_v12, %s5856_s30  ;;  %2875 = vperm.xlu0 %5635, %v6749_v3   ;;  %v7129_v12 = vld [vmem:[%s5980_s10 + $0x8] sm:$0xff] }
 0x250   : > { %v7116_v34 = vpop.permute.xlu1 %2015  ;;  %v7118_v48 = vpop.permute.xlu0 %2313 }
 0x251   : > { %9643 = vst [vmem:[#allocation12_spill] sm:$0xff] %v7116_v34  ;;  %9644 = vst [vmem:[#allocation58_spill] sm:$0xff] %v7118_v48 }
 0x252   : > { %2551 = vperm.xlu1 %5628, %v6557_v30   ;;  %2883 = vperm.xlu0 %5635, %v6763_v1  }
 0x254   : > { %v7122_v43 = vpop.permute.xlu0 %2321 }
 0x255   : > { %9645 = vst [vmem:[#allocation59_spill] sm:$0xff] %v7122_v43  ;;  %v7124_v42 = vpop.permute.xlu1 %2063 }
 0x256   : > { %9646 = vst [vmem:[#allocation57_spill] sm:$0xff] %v7124_v42  ;;  %2555 = vperm.xlu1 %5628, %v6586_v0   ;;  %5638 = vset.pattern.permute.xlu0 %v9395_v56  ;;  %v1655_v42 = vsub.f32 %v6802_v52, %v6369_v63 }
 0x257   : > { %2941 = vperm.xlu0 %5638, %v7129_v12  }
 0x258   : > { %v1665_v29 = vand.u32 2147483647, %v1655_v42 }
 0x259   : > { %v7132_v34 = vpop.permute.xlu1 %2067  ;;  %v7134_v48 = vpop.permute.xlu0 %2379 }
 0x25a   : > { %9647 = vst [vmem:[#allocation60_spill] sm:$0xff] %v7132_v34  ;;  %9648 = vst [vmem:[#allocation30_spill] sm:$0xff] %v7134_v48  ;;  %2563 = vperm.xlu1 %5628, %v6602_v31  }
 0x25b   : > { %2953 = vperm.xlu0 %5638, %v6602_v31  }
 0x25d   : > { %v7138_v30 = vpop.permute.xlu1 %2075  ;;  %v7140_v43 = vpop.permute.xlu0 %2391 }
 0x25e   : > { %9649 = vst [vmem:[#allocation8_spill] sm:$0xff] %v7138_v30  ;;  %9650 = vst [vmem:[#allocation23_spill] sm:$0xff] %v7140_v43  ;;  %2571 = vperm.xlu1 %5628, %v6633_v5   ;;  %v9396_v43 = vmov 10  }
 0x25f   : > { %2961 = vperm.xlu0 %5638, %v6633_v5  }
 0x261   : > { %v7144_v0 = vpop.permute.xlu1 %2083  ;;  %v7146_v56 = vpop.permute.xlu0 %2399 }
 0x262   : > { %9651 = vst [vmem:[#allocation19_spill] sm:$0xff] %v7144_v0  ;;  %9652 = vst [vmem:[#allocation49_spill] sm:$0xff] %v7146_v56  ;;  %2579 = vperm.xlu1 %5628, %v9571_v44   ;;  %v7163_v0 = vld [vmem:[%s5980_s10 + $0x10] sm:$0xff] }
 0x263   : > { %2969 = vperm.xlu0 %5638, %v9571_v44  }
 0x265   : > { %v7150_v48 = vpop.permute.xlu1 %2091  ;;  %v7152_v31 = vpop.permute.xlu0 %2407 }
 0x266   : > { %9653 = vst [vmem:[#allocation9_spill] sm:$0xff] %v7150_v48  ;;  %9654 = vst [vmem:[#allocation64_spill] sm:$0xff] %v7152_v31  ;;  %5629 = vset.pattern.permute.xlu1 %v9655_v54 }
 0x267   : > { %2627 = vperm.xlu1 %5629, %v9582_v36   ;;  %5639 = vset.pattern.permute.xlu0 %v9396_v43 }
 0x268   : > { %2997 = vperm.xlu0 %5639, %v9582_v36  }
 0x269   : > { %v7158_v5 = vpop.permute.xlu0 %2415 }
 0x26a   : > { %9656 = vst [vmem:[#allocation27_spill] sm:$0xff] %v7158_v5  ;;  %v7160_v56 = vpop.permute.xlu1 %2149 }
 0x26b   : > { %9657 = vst [vmem:[#allocation6_spill] sm:$0xff] %v7160_v56  ;;  %2635 = vperm.xlu1 %5629, %v7163_v0  }
 0x26c   : > { %3009 = vperm.xlu0 %5639, %v9591_v14  }
 0x26d   : > { %v7167_v44 = vpop.permute.xlu0 %2445 }
 0x26e   : > { %9658 = vst [vmem:[#allocation65_spill] sm:$0xff] %v7167_v44  ;;  %v7169_v54 = vpop.permute.xlu1 %2157 }
 0x26f   : > { %9659 = vst [vmem:[#allocation66_spill] sm:$0xff] %v7169_v54  ;;  %2639 = vperm.xlu1 %5629, %v9591_v14  }
 0x270   : > { %3017 = vperm.xlu0 %5639, %v9596_v47  }
 0x271   : > { %v7173_v43 = vpop.permute.xlu0 %2449 }
 0x272   : > { %9660 = vst [vmem:[#allocation67_spill] sm:$0xff] %v7173_v43  ;;  %v7175_v36 = vpop.permute.xlu1 %2161 }
 0x273   : > { %9661 = vst [vmem:[#allocation68_spill] sm:$0xff] %v7175_v36  ;;  %2647 = vperm.xlu1 %5629, %v9596_v47   ;;  %v9667_v36 = vld [vmem:[#allocation25_spill] sm:$0xff] }
 0x274   : > { %3025 = vperm.xlu0 %5639, %v6749_v3   ;;  %v1569_v47 = vsub.f32 %v9667_v36, %v6333_v22  ;;  %v9672_v36 = vld [vmem:[#allocation32_spill] sm:$0xff] }
 0x275   : > { %v7179_v5 = vpop.permute.xlu0 %2547 }
 0x276   : > { %9662 = vst [vmem:[#allocation69_spill] sm:$0xff] %v7179_v5  ;;  %v7181_v31 = vpop.permute.xlu1 %2169  ;;  %v9397_v5 = vmov 26  }
 0x277   : > { %9663 = vst [vmem:[#allocation70_spill] sm:$0xff] %v7181_v31  ;;  %2655 = vperm.xlu1 %5629, %v6749_v3   ;;  %v7184_v48 = vpop.f32.mrb[0].mxu0  ;;  %v9674_v31 = vmov 40  }
 0x278   : > { %9664 = vst [vmem:[#allocation71_spill] sm:$0xff] %v7184_v48  ;;  %v5340_v54 = vpop.f32.mrb[1].mxu0  ;;  %3033 = vperm.xlu0 %5639, %v6763_v1  }
 0x279   : > { %v7187_v14 = vpop.f32.mrb[2].mxu0  ;;  %v7189_v43 = vpop.permute.xlu0 %2559  ;;  %v1579_v54 = vand.u32 2147483647, %v1569_v47 }
 0x27a   : > { %9665 = vst [vmem:[#allocation72_spill] sm:$0xff] %v7187_v14  ;;  %9666 = vst [vmem:[#allocation73_spill] sm:$0xff] %v7189_v43  ;;  %v7193_v56 = vpop.permute.xlu1 %2177  ;;  %v5341_v44 = vpop.f32.mrb[3].mxu0  ;;  %v9670_v14 = vld [vmem:[#allocation17_spill] sm:$0xff] }
 0x27b   : > { %9668 = vst [vmem:[#allocation25_spill] sm:$0xff] %v7193_v56  ;;  %2663 = vperm.xlu1 %5629, %v6763_v1   ;;  %v1572_v48 = vsub.f32 %v9670_v14, %v6333_v22  ;;  %v1574_v56 = vsub.f32 %v9672_v36, %v6333_v22  ;;  %v9673_v44 = vld [vmem:[#allocation29_spill] sm:$0xff]  ;;  %v1651_v14 = vsub.f32 %v6773_v45, %v6369_v63 }
 0x27c   : > { %5642 = vset.pattern.permute.xlu0 %v9397_v5  ;;  %v1576_v1 = vsub.f32 %v9673_v44, %v6333_v22  ;;  %v1648_v5 = vsub.f32 %v6756_v17, %v6369_v63  ;;  %v1653_v17 = vsub.f32 %v6789_v25, %v6369_v63  ;;  %v1568_v45 = vsub.f32 %v6847_v39, %v6333_v22 }
 0x27d   : > { %3081 = vperm.xlu0 %5642, %v7129_v12   ;;  %v7198_v3 = vpop.permute.xlu0 %2567  ;;  %v1582_v44 = vand.u32 2147483647, %v1572_v48  ;;  %v1584_v34 = vand.u32 2147483647, %v1574_v56  ;;  %v1571_v25 = vsub.f32 %v6874_v46, %v6333_v22  ;;  %v1661_v48 = vand.u32 2147483647, %v1651_v14 }
 0x27e   : > { %9669 = vst [vmem:[#allocation74_spill] sm:$0xff] %v7198_v3  ;;  %v7202_v43 = vpop.permute.xlu1 %2185  ;;  %v7238_v56 = vld [vmem:[%s5980_s10 + $0x30] sm:$0xff]  ;;  %v1573_v14 = vsub.f32 %v6885_v49, %v6333_v22 }
 0x27f   : > { %9671 = vst [vmem:[#allocation17_spill] sm:$0xff] %v7202_v43  ;;  %5632 = vset.pattern.permute.xlu1 %v9674_v31  ;;  %v7209_v30 = vpop.f32.mrb[4].mxu0  ;;  %v7219_v43 = vld [vmem:[%s5980_s10 + $0x20] sm:$0xff]  ;;  %v1589_v31 = vsub.f32 1.0, %v1579_v54  ;;  %v1663_v54 = vand.u32 2147483647, %v1653_v17 }
 0x280   : > { %9675 = vst [vmem:[#allocation32_spill] sm:$0xff] %v7209_v30  ;;  %2721 = vperm.xlu1 %5632, %v7129_v12   ;;  %v5344_v47 = vpop.f32.mrb[5].mxu0  ;;  %9677 = vst [vmem:[#allocation75_spill] sm:$0xff] %v7219_v43  ;;  %v1594_v52 = vsub.f32 1.0, %v1584_v34  ;;  %v1671_v34 = vsub.f32 1.0, %v1661_v48 }
 0x281   : > { %v7216_v3 = vpop.f32.mrb[6].mxu0  ;;  %3093 = vperm.xlu0 %5642, %v7219_v43   ;;  %v7222_v36 = vpop.permute.xlu0 %2575  ;;  %v1586_v47 = vand.u32 2147483647, %v1576_v1  ;;  %v1673_v42 = vsub.f32 1.0, %v1663_v54  ;;  %v1675_v54 = vsub.f32 1.0, %v1665_v29 }
 0x282   : > { %9676 = vst [vmem:[#allocation29_spill] sm:$0xff] %v7216_v3  ;;  %9678 = vst [vmem:[#allocation76_spill] sm:$0xff] %v7222_v36  ;;  %v5345_v30 = vpop.f32.mrb[7].mxu0  ;;  %v1658_v3 = vand.u32 2147483647, %v1648_v5  ;;  %v1657_v36 = vsub.f32 %v6821_v20, %v6369_v63  ;;  %v1592_v5 = vsub.f32 1.0, %v1582_v44  ;;  %v1575_v44 = vsub.f32 %v6893_v32, %v6333_v22 }
 0x283   : > { %v7228_v11 = vpop.permute.xlu1 %2213  ;;  %v7243_v30 = vmax.f32 %v1589_v31, 0.0  ;;  %v1596_v1 = vsub.f32 1.0, %v1586_v47  ;;  %v1578_v20 = vand.u32 2147483647, %v1568_v45  ;;  %v1581_v31 = vand.u32 2147483647, %v1571_v25 }
 0x284   : > { %9679 = vst [vmem:[#allocation77_spill] sm:$0xff] %v7228_v11  ;;  %2725 = vperm.xlu1 %5632, %v7163_v0   ;;  %v1570_v11 = vsub.f32 %v6859_v61, %v6333_v22  ;;  %v1668_v46 = vsub.f32 1.0, %v1658_v3  ;;  %v1667_v37 = vand.u32 2147483647, %v1657_v36  ;;  %v1788_v61 = vsub.f32 %v6891_v41, %v6333_v22  ;;  %v7259_v47 = vld [vmem:[%s5980_s10 + $0x40] sm:$0xff] }
 0x285   : > { %3101 = vperm.xlu0 %5642, %v7238_v56   ;;  %v7241_v39 = vpop.permute.xlu0 %2583  ;;  %v7262_v49 = vmax.f32 %v1592_v5, 0.0  ;;  %v1649_v3 = vsub.f32 %v6909_v16, %v6369_v63  ;;  %v7270_v25 = vmax.f32 %v1594_v52, 0.0  ;;  %v7272_v32 = vmax.f32 %v1596_v1, 0.0 }
 0x286   : > { %9680 = vst [vmem:[#allocation78_spill] sm:$0xff] %v7241_v39  ;;  %v1588_v41 = vsub.f32 1.0, %v1578_v20  ;;  %v1580_v48 = vand.u32 2147483647, %v1570_v11  ;;  %v1678_v5 = vmax.f32 %v1668_v46, 0.0  ;;  %v1591_v16 = vsub.f32 1.0, %v1581_v31 }
 0x287   : > { %v7247_v21 = vpop.permute.xlu1 %2217  ;;  %v1585_v7 = vand.u32 2147483647, %v1575_v44  ;;  %v9400_v52 = vmov 42   ;;  %v1683_v1 = vmax.f32 %v1673_v42, 0.0  ;;  %v1659_v20 = vand.u32 2147483647, %v1649_v3 }
 0x288   : > { %9681 = vst [vmem:[#allocation79_spill] sm:$0xff] %v7247_v21  ;;  %v7251_v39 = vpop.f32.mrb[8].mxu0  ;;  %2733 = vperm.xlu1 %5632, %v7219_v43   ;;  %v1583_v21 = vand.u32 2147483647, %v1573_v14  ;;  %v1677_v43 = vsub.f32 1.0, %v1667_v37  ;;  %v1652_v11 = vsub.f32 %v6921_v51, %v6369_v63  ;;  %v1791_v46 = vsub.f32 %v6898_v10, %v6333_v22  ;;  %v7283_v14 = vld [vmem:[%s5980_s10] sm:$0xff] }
 0x289   : > { %9682 = vst [vmem:[#allocation80_spill] sm:$0xff] %v7251_v39  ;;  %v5348_v17 = vpop.f32.mrb[9].mxu0  ;;  %3109 = vperm.xlu0 %5642, %v7259_v47   ;;  %v1598_v29 = vmax.f32 %v1588_v41, 0.0  ;;  %v1590_v31 = vsub.f32 1.0, %v1580_v48  ;;  %v1650_v44 = vsub.f32 %v6915_v35, %v6369_v63  ;;  %v1685_v42 = vmax.f32 %v1675_v54, 0.0 }
 0x28a   : > { %v7266_v36 = vpop.f32.mrb[10].mxu0  ;;  %v7268_v45 = vpop.permute.xlu0 %2631  ;;  %v1593_v51 = vsub.f32 1.0, %v1583_v21  ;;  %v7294_v10 = vmax.f32 %v1677_v43, 0.0  ;;  %v1654_v3 = vsub.f32 %v6928_v53, %v6369_v63  ;;  %v1601_v41 = vmax.f32 %v1591_v16, 0.0  ;;  %v7308_v53 = vld [vmem:[%s5980_s10 + $0x18] sm:$0xff] }
 0x28b   : > { %9683 = vst [vmem:[#allocation81_spill] sm:$0xff] %v7266_v36  ;;  %9684 = vst [vmem:[#allocation82_spill] sm:$0xff] %v7268_v45  ;;  %v5349_v17 = vpop.f32.mrb[11].mxu0  ;;  %v7274_v39 = vpop.permute.xlu1 %2225  ;;  %v1681_v36 = vmax.f32 %v1671_v34, 0.0  ;;  %v1798_v45 = vand.u32 2147483647, %v1788_v61  ;;  %v1577_v34 = vsub.f32 %v6900_v40, %v6333_v22  ;;  %v1793_v35 = vsub.f32 %v6907_v2, %v6333_v22 }
 0x28c   : > { %2741 = vperm.xlu1 %5632, %v7238_v56   ;;  %9687 = vst [vmem:[#allocation85_spill] sm:$0xff] %v7294_v10  ;;  %v1595_v48 = vsub.f32 1.0, %v1585_v7  ;;  %v1662_v21 = vand.u32 2147483647, %v1652_v11  ;;  %v1795_v43 = vsub.f32 %v6913_v9, %v6333_v22  ;;  %9690 = vst [vmem:[#allocation88_spill] sm:$0xff] %v7308_v53  ;;  %v7313_v7 = vmax.f32 %v1590_v31, 0.0 }
 0x28d   : > { %5643 = vset.pattern.permute.xlu0 %v9400_v52  ;;  %v1808_v40 = vsub.f32 1.0, %v1798_v45  ;;  %v1587_v45 = vand.u32 2147483647, %v1577_v34  ;;  %v1660_v16 = vand.u32 2147483647, %v1650_v44  ;;  %v7315_v2 = vmul.f32 %v1678_v5, %v1598_v29 }
 0x28e   : > { %3167 = vperm.xlu0 %5643, %v7283_v14   ;;  %v7286_v37 = vpop.permute.xlu0 %2643  ;;  %v1603_v11 = vmax.f32 %v1593_v51, 0.0  ;;  %v1664_v9 = vand.u32 2147483647, %v1654_v3  ;;  %v9693_v10 = vmov 9   ;;  %v1605_v31 = vmax.f32 %v1595_v48, 0.0 }
 0x28f   : > { %9685 = vst [vmem:[#allocation83_spill] sm:$0xff] %v7286_v37  ;;  %v7292_v61 = vpop.permute.xlu1 %2233  ;;  %v1669_v37 = vsub.f32 1.0, %v1659_v20  ;;  %v7326_v34 = vmul.f32 %v1681_v36, %v1601_v41  ;;  %v1803_v5 = vand.u32 2147483647, %v1793_v35  ;;  %v1672_v44 = vsub.f32 1.0, %v1662_v21 }
 0x290   : > { %9686 = vst [vmem:[#allocation84_spill] sm:$0xff] %v7292_v61  ;;  %v7298_v17 = vpop.f32.mrb[12].mxu0  ;;  %2749 = vperm.xlu1 %5632, %v7259_v47   ;;  %v1801_v61 = vand.u32 2147483647, %v1791_v46  ;;  %v1656_v46 = vsub.f32 %v6935_v26, %v6369_v63  ;;  %v1805_v51 = vand.u32 2147483647, %v1795_v43  ;;  %v1869_v3 = vsub.f32 %v6926_v57, %v6369_v63 }
 0x291   : > { %9688 = vst [vmem:[#allocation86_spill] sm:$0xff] %v7298_v17  ;;  %v5352_v52 = vpop.f32.mrb[13].mxu0  ;;  %v1679_v29 = vmax.f32 %v1669_v37, 0.0  ;;  %v7332_v26 = vld [vmem:[%s5980_s10 + $0x28] sm:$0xff]  ;;  %v1670_v48 = vsub.f32 1.0, %v1660_v16  ;;  %v1872_v36 = vsub.f32 %v6933_v33, %v6369_v63  ;;  %v1674_v41 = vsub.f32 1.0, %v1664_v9 }
 0x292   : > { %v7305_v54 = vpop.f32.mrb[14].mxu0  ;;  %3179 = vperm.xlu0 %5643, %v7308_v53   ;;  %v7311_v17 = vpop.permute.xlu0 %2651  ;;  %v1666_v35 = vand.u32 2147483647, %v1656_v46  ;;  %v7339_v37 = vmul.f32 %v1683_v1, %v1603_v11  ;;  %v1682_v16 = vmax.f32 %v1672_v44, 0.0  ;;  %v1879_v11 = vand.u32 2147483647, %v1869_v3 }
 0x293   : > { %9689 = vst [vmem:[#allocation87_spill] sm:$0xff] %v7305_v54  ;;  %9691 = vst [vmem:[#allocation89_spill] sm:$0xff] %v7311_v17  ;;  %v5353_v52 = vpop.f32.mrb[15].mxu0  ;;  %v7317_v20 = vpop.permute.xlu1 %2241  ;;  %v1797_v54 = vsub.f32 %v6919_v62, %v6333_v22  ;;  %v7324_v17 = vmax.f32 %v1808_v40, 0.0  ;;  %v1811_v40 = vsub.f32 1.0, %v1801_v61  ;;  %v1874_v61 = vsub.f32 %v6939_v58, %v6369_v63  ;;  %v7356_v46 = vld [vmem:[%s5980_s10 + $0x38] sm:$0xff] }
 0x294   : > { %9692 = vst [vmem:[#allocation90_spill] sm:$0xff] %v7317_v20  ;;  %5633 = vset.pattern.permute.xlu1 %v9693_v10  ;;  %v1597_v10 = vsub.f32 1.0, %v1587_v45  ;;  %v1813_v52 = vsub.f32 1.0, %v1803_v5  ;;  %v7345_v20 = vmul.f32 %v1685_v42, %v1605_v31  ;;  %v1789_v45 = vsub.f32 %v6981_v18, %v6333_v22 }
 0x295   : > { %2767 = vperm.xlu1 %5633, %v7283_v14   ;;  %v1807_v21 = vand.u32 2147483647, %v1797_v54  ;;  %v1689_v1 = vmul.f32 %v1679_v29, %v7243_v30  ;;  %v1815_v54 = vsub.f32 1.0, %v1805_v51  ;;  %v1680_v42 = vmax.f32 %v1670_v48, 0.0 }
 0x296   : > { %3187 = vperm.xlu0 %5643, %v7332_v26   ;;  %v7335_v62 = vpop.permute.xlu0 %2659  ;;  %v7359_v31 = vmax.f32 %v1811_v40, 0.0  ;;  %v1882_v18 = vand.u32 2147483647, %v1872_v36  ;;  %v1876_v58 = vsub.f32 %v6945_v55, %v6369_v63  ;;  %v7365_v30 = vmax.f32 %v1597_v10, 0.0 }
 0x297   : > { %9694 = vst [vmem:[#allocation91_spill] sm:$0xff] %v7335_v62  ;;  %v1684_v29 = vmax.f32 %v1674_v41, 0.0  ;;  %v1676_v44 = vsub.f32 1.0, %v1666_v35  ;;  %v1817_v51 = vsub.f32 1.0, %v1807_v21  ;;  %v1799_v48 = vand.u32 2147483647, %v1789_v45 }
 0x298   : > { %v7341_v43 = vpop.f32.mrb[16].mxu0  ;;  %v7343_v57 = vpop.permute.xlu1 %2289  ;;  %9698 = vst [vmem:[#allocation95_spill] sm:$0xff] %v7365_v30  ;;  %v1884_v40 = vand.u32 2147483647, %v1874_v61  ;;  %v2019_v36 = vsub.f32 %v6985_v50, %v6333_v22  ;;  %v7375_v55 = vmul.f32 %v6837_v24, %v1689_v1  ;;  %v1692_v10 = vmul.f32 %v1682_v16, %v7262_v49  ;;  %v7381_v35 = vld [vmem:[%s5980_s10 + $0x48] sm:$0xff] }
 0x299   : > { %9695 = vst [vmem:[#allocation92_spill] sm:$0xff] %v7341_v43  ;;  %v5356_v33 = vpop.f32.mrb[17].mxu0  ;;  %2775 = vperm.xlu1 %5633, %v7163_v0   ;;  %v7369_v43 = vmax.f32 %v1813_v52, 0.0  ;;  %v1889_v41 = vsub.f32 1.0, %v1879_v11  ;;  %v1690_v21 = vmul.f32 %v1680_v42, %v7313_v7  ;;  %v1892_v52 = vsub.f32 1.0, %v1882_v18 }
 0x29a   : > { %v7353_v9 = vpop.f32.mrb[18].mxu0  ;;  %3195 = vperm.xlu0 %5643, %v7356_v46   ;;  %v1886_v45 = vand.u32 2147483647, %v1876_v58  ;;  %v1694_v50 = vmul.f32 %v1684_v29, %v7270_v25  ;;  %v7388_v24 = vmax.f32 %v1817_v51, 0.0  ;;  %v1790_v49 = vsub.f32 %v6987_v8, %v6333_v22 }
 0x29b   : > { %9696 = vst [vmem:[#allocation93_spill] sm:$0xff] %v7353_v9  ;;  %v5357_v5 = vpop.f32.mrb[19].mxu0  ;;  %v7363_v33 = vpop.permute.xlu0 %2717  ;;  %v1686_v9 = vmax.f32 %v1676_v44, 0.0  ;;  %v1809_v16 = vsub.f32 1.0, %v1799_v48  ;;  %v1868_v11 = vsub.f32 %v7013_v59, %v6369_v63  ;;  %v2029_v7 = vand.u32 2147483647, %v2019_v36 }
 0x29c   : > { %9697 = vst [vmem:[#allocation94_spill] sm:$0xff] %v7363_v33  ;;  %v7367_v3 = vpop.permute.xlu1 %2297  ;;  %v7378_v5 = vmax.f32 %v1815_v54, 0.0  ;;  %9700 = vst [vmem:[#allocation97_spill] sm:$0xff] %v7388_v24  ;;  %v1894_v54 = vsub.f32 1.0, %v1884_v40  ;;  %v7398_v42 = vmul.f32 %v6853_v13, %v1692_v10  ;;  %v1899_v25 = vmax.f32 %v1889_v41, 0.0  ;;  %v9719_v33 = vld [vmem:[#allocation40_spill] sm:$0xff] }
 0x29d   : > { %2779 = vperm.xlu1 %5633, %v7308_v53   ;;  %v1792_v18 = vsub.f32 %v6993_v60, %v6333_v22  ;;  %v1871_v8 = vsub.f32 %v7025_v38, %v6369_v63  ;;  %v9401_v58 = vmov 11   ;;  %v7407_v29 = vmul.f32 %v6941_v28, %v7315_v2 }
 0x29e   : > { %3203 = vperm.xlu0 %5643, %v7381_v35   ;;  %v7409_v59 = vmax.f32 %v1892_v52, 0.0  ;;  %v1896_v44 = vsub.f32 1.0, %v1886_v45  ;;  %v1794_v13 = vsub.f32 %v7000_v23, %v6333_v22  ;;  %v7417_v60 = vmul.f32 %v6870_v6, %v1694_v50  ;;  %v9705_v45 = vld [vmem:[#allocation48_spill] sm:$0xff] }
 0x29f   : > { %v7385_v61 = vpop.permute.xlu0 %2729  ;;  %v7420_v38 = vmul.f32 %v1686_v9, %v7272_v32  ;;  %v7423_v48 = vmul.f32 %v6947_v15, %v1690_v21  ;;  %v1800_v28 = vand.u32 2147483647, %v1790_v49  ;;  %v1819_v40 = vmax.f32 %v1809_v16, 0.0  ;;  %v9706_v49 = vld [vmem:[#allocation75_spill] sm:$0xff] }
 0x2a0   : > { %9699 = vst [vmem:[#allocation96_spill] sm:$0xff] %v7385_v61  ;;  %v7392_v1 = vpop.permute.xlu1 %2301  ;;  %9702 = vst [vmem:[#allocation99_spill] sm:$0xff] %v7417_v60  ;;  %v7427_v36 = vmax.f32 %v1894_v54, 0.0  ;;  %v1878_v23 = vand.u32 2147483647, %v1868_v11  ;;  %v2039_v10 = vsub.f32 1.0, %v2029_v7  ;;  %v2022_v6 = vsub.f32 %v6991_v19, %v6333_v22 }
 0x2a1   : > { %2787 = vperm.xlu1 %5633, %v7332_v26   ;;  %9703 = vst [vmem:[#allocation100_spill] sm:$0xff] %v7420_v38  ;;  %v1802_v41 = vand.u32 2147483647, %v1792_v18  ;;  %v1881_v52 = vand.u32 2147483647, %v1871_v8  ;;  %v2024_v32 = vsub.f32 %v6998_v27, %v6333_v22  ;;  %v7436_v15 = vmul.f32 %v6953_v4, %v7326_v34  ;;  %v9708_v54 = vld [vmem:[#allocation34_spill] sm:$0xff] }
 0x2a2   : > { %5646 = vset.pattern.permute.xlu0 %v9401_v58  ;;  %v7438_v9 = vmax.f32 %v1896_v44, 0.0  ;;  %v1804_v21 = vand.u32 2147483647, %v1794_v13  ;;  %v1873_v50 = vsub.f32 %v9705_v45, %v6369_v63  ;;  %v7447_v19 = vmul.f32 %v9708_v54, %v7339_v37  ;;  %v9709_v27 = vld [vmem:[#allocation36_spill] sm:$0xff]  ;;  %v9711_v34 = vld [vmem:[#allocation31_spill] sm:$0xff] }
 0x2a3   : > { %3231 = vperm.xlu0 %5646, %v7129_v12   ;;  %v7414_v51 = vpop.permute.xlu0 %2737  ;;  %v7451_v11 = vmul.f32 %v9709_v27, %v7345_v20  ;;  %v1810_v4 = vsub.f32 1.0, %v1800_v28  ;;  %v2026_v7 = vsub.f32 %v9711_v34, %v6333_v22  ;;  %v1888_v8 = vsub.f32 1.0, %v1878_v23  ;;  %v9712_v44 = vld [vmem:[#allocation39_spill] sm:$0xff]  ;;  %v9714_v23 = vld [vmem:[#allocation41_spill] sm:$0xff] }
 0x2a4   : > { %9701 = vst [vmem:[#allocation98_spill] sm:$0xff] %v7414_v51  ;;  %v7425_v2 = vpop.permute.xlu1 %2309  ;;  %9704 = vst [vmem:[#allocation101_spill] sm:$0xff] %v7438_v9  ;;  %v1870_v13 = vsub.f32 %v9712_v44, %v6369_v63  ;;  %v7459_v45 = vmax.f32 %v2039_v10, 0.0  ;;  %v7461_v58 = vmul.f32 %v1899_v25, %v1819_v40  ;;  %v1812_v37 = vsub.f32 1.0, %v1802_v41  ;;  %v9716_v41 = vld [vmem:[#allocation38_spill] sm:$0xff] }
 0x2a5   : > { %2795 = vperm.xlu1 %5633, %v7356_v46   ;;  %9710 = vst [vmem:[#allocation75_spill] sm:$0xff] %v7451_v11  ;;  %v1891_v54 = vsub.f32 1.0, %v1881_v52  ;;  %v2032_v20 = vand.u32 2147483647, %v2022_v6  ;;  %v2034_v27 = vand.u32 2147483647, %v2024_v32  ;;  %v1875_v61 = vsub.f32 %v9714_v23, %v6369_v63 }
 0x2a6   : > { %v1814_v28 = vsub.f32 1.0, %v1804_v21  ;;  %v1883_v51 = vand.u32 2147483647, %v1873_v50  ;;  %v7471_v25 = vmax.f32 %v1810_v4, 0.0  ;;  %v2036_v40 = vand.u32 2147483647, %v2026_v7 }
 0x2a7   : > { %3243 = vperm.xlu0 %5646, %v9706_v49   ;;  %v7443_v16 = vpop.permute.xlu0 %2745  ;;  %v2098_v52 = vsub.f32 %v9716_v41, %v6369_v63  ;;  %v9717_v6 = vld [vmem:[#allocation51_spill] sm:$0xff]  ;;  %v1880_v50 = vand.u32 2147483647, %v1870_v13  ;;  %v9718_v44 = vld [vmem:[#allocation46_spill] sm:$0xff]  ;;  %v2105_v62 = vsub.f32 %v9719_v33, %v6369_v63  ;;  %v1822_v4 = vmax.f32 %v1812_v37, 0.0 }
 0x2a8   : > { %9707 = vst [vmem:[#allocation48_spill] sm:$0xff] %v7443_v16  ;;  %v7455_v18 = vpop.permute.xlu1 %2317  ;;  %v9713_v16 = vld [vmem:[#allocation28_spill] sm:$0xff]  ;;  %v2101_v32 = vsub.f32 %v9717_v6, %v6369_v63  ;;  %v2103_v23 = vsub.f32 %v9718_v44, %v6369_v63  ;;  %v1901_v7 = vmax.f32 %v1891_v54, 0.0  ;;  %v2042_v30 = vsub.f32 1.0, %v2032_v20 }
 0x2a9   : > { %2803 = vperm.xlu1 %5633, %v7381_v35   ;;  %v1796_v34 = vsub.f32 %v9713_v16, %v6333_v22  ;;  %v1898_v16 = vmax.f32 %v1888_v8, 0.0  ;;  %v2044_v38 = vsub.f32 1.0, %v2034_v27  ;;  %v1824_v41 = vmax.f32 %v1814_v28, 0.0 }
 0x2aa   : > { %v1893_v60 = vsub.f32 1.0, %v1883_v51  ;;  %v1885_v11 = vand.u32 2147483647, %v1875_v61  ;;  %v2046_v8 = vsub.f32 1.0, %v2036_v40  ;;  %v2108_v13 = vand.u32 2147483647, %v2098_v52 }
 0x2ab   : > { %3251 = vperm.xlu0 %5646, %v7238_v56   ;;  %v7469_v10 = vpop.permute.xlu0 %2753  ;;  %v1806_v6 = vand.u32 2147483647, %v1796_v34  ;;  %v2111_v44 = vand.u32 2147483647, %v2101_v32  ;;  %v1908_v33 = vmul.f32 %v1898_v16, %v7324_v17  ;;  %v2113_v37 = vand.u32 2147483647, %v2103_v23 }
 0x2ac   : > { %9715 = vst [vmem:[#allocation34_spill] sm:$0xff] %v7469_v10  ;;  %v7477_v21 = vpop.permute.xlu1 %2325  ;;  %v9720_v10 = vmov 25   ;;  %v2115_v54 = vand.u32 2147483647, %v2105_v62  ;;  %v1911_v27 = vmul.f32 %v1901_v7, %v7359_v31  ;;  %v7492_v28 = vmax.f32 %v2042_v30, 0.0  ;;  %v9722_v51 = vld [vmem:[#allocation53_spill] sm:$0xff] }
 0x2ad   : > { %5636 = vset.pattern.permute.xlu1 %v9720_v10  ;;  %v1890_v10 = vsub.f32 1.0, %v1880_v50  ;;  %v1912_v61 = vmul.f32 %v7409_v59, %v1822_v4  ;;  %v2107_v34 = vsub.f32 %v9722_v51, %v6369_v63  ;;  %v1816_v40 = vsub.f32 1.0, %v1806_v6  ;;  %v9725_v23 = vld [vmem:[#allocation24_spill] sm:$0xff]  ;;  %v9726_v6 = vld [vmem:[#allocation26_spill] sm:$0xff] }
 0x2ae   : > { %2851 = vperm.xlu1 %5636, %v7129_v12   ;;  %v1903_v52 = vmax.f32 %v1893_v60, 0.0  ;;  %v1895_v32 = vsub.f32 1.0, %v1885_v11  ;;  %v7498_v17 = vmax.f32 %v2044_v38, 0.0  ;;  %v9402_v16 = vmov 27  }
 0x2af   : > { %3259 = vperm.xlu0 %5646, %v7259_v47   ;;  %v7501_v62 = vmax.f32 %v2046_v8, 0.0  ;;  %v2118_v31 = vsub.f32 1.0, %v2108_v13  ;;  %v2121_v30 = vsub.f32 1.0, %v2111_v44  ;;  %v7504_v50 = vmul.f32 %v7427_v36, %v1824_v41  ;;  %v9727_v8 = vld [vmem:[#allocation42_spill] sm:$0xff]  ;;  %v9729_v36 = vld [vmem:[#allocation33_spill] sm:$0xff] }
 0x2b0   : > { %v7486_v9 = vpop.permute.xlu0 %2771  ;;  %v1958_v4 = vmul.f32 %v9725_v23, %v1908_v33  ;;  %v1900_v60 = vmax.f32 %v1890_v10, 0.0  ;;  %v2123_v11 = vsub.f32 1.0, %v2113_v37  ;;  %v2125_v38 = vsub.f32 1.0, %v2115_v54  ;;  %v9731_v37 = vld [vmem:[#allocation47_spill] sm:$0xff] }
 0x2b1   : > { %9721 = vst [vmem:[#allocation36_spill] sm:$0xff] %v7486_v9  ;;  %v7489_v20 = vpop.permute.xlu1 %2383  ;;  %9723 = vst [vmem:[#allocation31_spill] sm:$0xff] %v7501_v62  ;;  %v1961_v51 = vmul.f32 %v9726_v6, %v1911_v27  ;;  %v1877_v13 = vsub.f32 %v9727_v8, %v6369_v63  ;;  %v7515_v44 = vand.u32 2147483647, %v2107_v34  ;;  %v2248_v41 = vsub.f32 %v9729_v36, %v6333_v22  ;;  %v9732_v34 = vld [vmem:[#allocation15_spill] sm:$0xff]  ;;  %v9733_v8 = vld [vmem:[#allocation57_spill] sm:$0xff] }
 0x2b2   : > { %2855 = vperm.xlu1 %5636, %v7163_v0   ;;  %v1913_v33 = vmul.f32 %v1903_v52, %v7369_v43  ;;  %v1905_v10 = vmax.f32 %v1895_v32, 0.0  ;;  %v2251_v54 = vsub.f32 %v9731_v37, %v6333_v22  ;;  %v7525_v23 = vmax.f32 %v2118_v31, 0.0 }
 0x2b3   : > { %5647 = vset.pattern.permute.xlu0 %v9402_v16  ;;  %9728 = vst [vmem:[#allocation28_spill] sm:$0xff] %v7515_v44  ;;  %v7520_v16 = vmax.f32 %v1816_v40, 0.0  ;;  %v7527_v27 = vmax.f32 %v2121_v30, 0.0  ;;  %v2018_v6 = vsub.f32 %v9732_v34, %v6333_v22  ;;  %v2099_v36 = vsub.f32 %v9733_v8, %v6369_v63 }
 0x2b4   : > { %3307 = vperm.xlu0 %5647, %v7283_v14   ;;  %v7507_v59 = vpop.permute.xlu0 %2783  ;;  %v1910_v43 = vmul.f32 %v1900_v60, %v7471_v25  ;;  %v7537_v52 = vmax.f32 %v2123_v11, 0.0  ;;  %v7539_v32 = vmax.f32 %v2125_v38, 0.0  ;;  %v7542_v31 = vadd.f32 %v1958_v4, %v7407_v29  ;;  %v9736_v25 = vld [vmem:[#allocation35_spill] sm:$0xff] }
 0x2b5   : > { %9724 = vst [vmem:[#allocation39_spill] sm:$0xff] %v7507_v59  ;;  %v7510_v7 = vpop.permute.xlu1 %2387  ;;  %9730 = vst [vmem:[#allocation41_spill] sm:$0xff] %v7520_v16  ;;  %v7546_v37 = vand.u32 2147483647, %v1877_v13  ;;  %v2258_v8 = vand.u32 2147483647, %v2248_v41  ;;  %v7550_v59 = vadd.f32 %v1961_v51, %v7436_v15  ;;  %v1963_v60 = vmul.f32 %v9736_v25, %v1913_v33 }
 0x2b6   : > { %2863 = vperm.xlu1 %5636, %v9706_v49   ;;  %9735 = vst [vmem:[#allocation51_spill] sm:$0xff] %v7539_v32  ;;  %v7555_v11 = vmul.f32 %v1905_v10, %v7378_v5  ;;  %v2261_v38 = vand.u32 2147483647, %v2251_v54  ;;  %v9737_v29 = vld [vmem:[#allocation63_spill] sm:$0xff]  ;;  %v2028_v9 = vand.u32 2147483647, %v2018_v6  ;;  %v2328_v15 = vsub.f32 %v7343_v57, %v6369_v63 }
 0x2b7   : > { %v2253_v4 = vsub.f32 %v9737_v29, %v6333_v22  ;;  %v9738_v13 = vld [vmem:[#allocation55_spill] sm:$0xff]  ;;  %v2109_v34 = vand.u32 2147483647, %v2099_v36  ;;  %v9740_v41 = vld [vmem:[#allocation56_spill] sm:$0xff]  ;;  %v9741_v5 = vld [vmem:[#allocation45_spill] sm:$0xff] }
 0x2b8   : > { %3319 = vperm.xlu0 %5647, %v7308_v53   ;;  %v7534_v40 = vpop.permute.xlu0 %2791  ;;  %v1960_v33 = vmul.f32 %v9740_v41, %v1910_v43  ;;  %v1962_v10 = vmul.f32 %v9741_v5, %v1912_v61  ;;  %v9742_v54 = vld [vmem:[#allocation11_spill] sm:$0xff]  ;;  %v9743_v29 = vld [vmem:[#allocation77_spill] sm:$0xff]  ;;  %v9747_v61 = vld [vmem:[#allocation18_spill] sm:$0xff]  ;;  %v2271_v41 = vsub.f32 1.0, %v2261_v38  ;;  %v2038_v6 = vsub.f32 1.0, %v2028_v9 }
 0x2b9   : > { %9734 = vst [vmem:[#allocation38_spill] sm:$0xff] %v7534_v40  ;;  %v7544_v30 = vpop.permute.xlu1 %2395  ;;  %v1959_v40 = vmul.f32 %v9738_v13, %v7461_v58  ;;  %v2329_v25 = vsub.f32 %v9742_v54, %v6369_v63  ;;  %v2249_v62 = vsub.f32 %v9743_v29, %v6333_v22  ;;  %v9745_v57 = vld [vmem:[#allocation7_spill] sm:$0xff]  ;;  %v2268_v13 = vsub.f32 1.0, %v2258_v8  ;;  %v9750_v9 = vld [vmem:[#allocation60_spill] sm:$0xff]  ;;  %v9759_v32 = vld [vmem:[#allocation65_spill] sm:$0xff] }
 0x2ba   : > { %2871 = vperm.xlu1 %5636, %v7238_v56   ;;  %v2021_v36 = vsub.f32 %v9745_v57, %v6333_v22  ;;  %v2020_v43 = vsub.f32 %v9747_v61, %v6333_v22  ;;  %v2263_v5 = vand.u32 2147483647, %v2253_v4  ;;  %v7583_v54 = vadd.f32 %v1963_v60, %v7447_v19 }
 0x2bb   : > { %v7586_v29 = vadd.f32 %v1959_v40, %v7375_v55  ;;  %v2338_v57 = vand.u32 2147483647, %v2328_v15  ;;  %v7590_v8 = vadd.f32 %v1960_v33, %v7423_v48  ;;  %v2339_v61 = vand.u32 2147483647, %v2329_v25  ;;  %v9752_v48 = vld [vmem:[#allocation13_spill] sm:$0xff] }
 0x2bc   : > { %3327 = vperm.xlu0 %5647, %v7332_v26   ;;  %v7564_v51 = vpop.permute.xlu0 %2799  ;;  %v2259_v38 = vand.u32 2147483647, %v2249_v62  ;;  %v2031_v60 = vand.u32 2147483647, %v2021_v36  ;;  %v2278_v55 = vmax.f32 %v2268_v13, 0.0  ;;  %v2100_v40 = vsub.f32 %v9750_v9, %v6369_v63 }
 0x2bd   : > { %9739 = vst [vmem:[#allocation46_spill] sm:$0xff] %v7564_v51  ;;  %v7572_v58 = vpop.permute.xlu1 %2403  ;;  %v9746_v51 = vld [vmem:[#allocation10_spill] sm:$0xff]  ;;  %v9751_v15 = vmov 41   ;;  %v2030_v16 = vand.u32 2147483647, %v2020_v43  ;;  %v2023_v33 = vsub.f32 %v9752_v48, %v6333_v22  ;;  %v2048_v62 = vmax.f32 %v2038_v6, 0.0 }
 0x2be   : > { %9744 = vst [vmem:[#allocation40_spill] sm:$0xff] %v7572_v58  ;;  %v2255_v44 = vsub.f32 %v9746_v51, %v6333_v22  ;;  %2879 = vperm.xlu1 %5636, %v7259_v47   ;;  %v2119_v58 = vsub.f32 1.0, %v2109_v34  ;;  %v7593_v51 = vadd.f32 %v1962_v10, %v7398_v42  ;;  %v7604_v42 = vmax.f32 %v2271_v41, 0.0 }
 0x2bf   : > { %v2273_v10 = vsub.f32 1.0, %v2263_v5  ;;  %v2349_v36 = vsub.f32 1.0, %v2339_v61  ;;  %v2269_v13 = vsub.f32 1.0, %v2259_v38  ;;  %v2331_v43 = vsub.f32 %v7392_v1, %v6369_v63  ;;  %v9755_v38 = vld [vmem:[#allocation79_spill] sm:$0xff] }
 0x2c0   : > { %3335 = vperm.xlu0 %5647, %v7356_v46   ;;  %v2265_v34 = vand.u32 2147483647, %v2255_v44  ;;  %v2129_v25 = vmax.f32 %v2119_v58, 0.0  ;;  %v2330_v44 = vsub.f32 %v7367_v3, %v6369_v63  ;;  %v2041_v41 = vsub.f32 1.0, %v2031_v60  ;;  %v9757_v60 = vld [vmem:[#allocation62_spill] sm:$0xff] }
 0x2c1   : > { %v7595_v4 = vpop.permute.xlu1 %2411  ;;  %v7597_v19 = vpop.permute.xlu0 %2847  ;;  %v2110_v5 = vand.u32 2147483647, %v2100_v40  ;;  %v2040_v6 = vsub.f32 1.0, %v2030_v16  ;;  %v7616_v61 = vmax.f32 %v2273_v10, 0.0  ;;  %v2250_v3 = vsub.f32 %v9755_v38, %v6333_v22 }
 0x2c2   : > { %9748 = vst [vmem:[#allocation53_spill] sm:$0xff] %v7595_v4  ;;  %9749 = vst [vmem:[#allocation24_spill] sm:$0xff] %v7597_v19  ;;  %5637 = vset.pattern.permute.xlu1 %v9751_v15  ;;  %v2348_v19 = vsub.f32 1.0, %v2338_v57  ;;  %v2275_v48 = vsub.f32 1.0, %v2265_v34  ;;  %v2033_v57 = vand.u32 2147483647, %v2023_v33  ;;  %v2138_v34 = vmul.f32 %v7525_v23, %v2048_v62 }
 0x2c3   : > { %2937 = vperm.xlu1 %5637, %v7283_v14   ;;  %v9754_v14 = vld [vmem:[#allocation8_spill] sm:$0xff]  ;;  %v9756_v1 = vmov 0.0   ;;  %v2359_v16 = vmax.f32 %v2349_v36, 0.0  ;;  %v2279_v33 = vmax.f32 %v2269_v13, 0.0  ;;  %v2340_v10 = vand.u32 2147483647, %v2330_v44 }
 0x2c4   : > { %3343 = vperm.xlu0 %5647, %v7381_v35   ;;  %v2102_v58 = vsub.f32 %v9754_v14, %v6369_v63  ;;  %v2358_v14 = vmax.f32 %v2348_v19, 0.0  ;;  %v2341_v4 = vand.u32 2147483647, %v2331_v43  ;;  %v2051_v24 = vmax.f32 %v2041_v41, 0.0  ;;  %v9760_v62 = vld [vmem:[#allocation16_spill] sm:$0xff]  ;;  %v9762_v43 = vld [vmem:[#allocation43_spill] sm:$0xff] }
 0x2c5   : > { %v2444_v9 = vpop.permute.xlu1 %2443  ;;  %v7612_v15 = vpop.permute.xlu0 %2859  ;;  %v2050_v23 = vmax.f32 %v2040_v6, 0.0  ;;  %v2043_v19 = vsub.f32 1.0, %v2033_v57  ;;  %v2332_v36 = vsub.f32 %v9760_v62, %v6369_v63  ;;  %v2260_v13 = vand.u32 2147483647, %v2250_v3 }
 0x2c6   : > { %9753 = vst [vmem:[#allocation26_spill] sm:$0xff] %v7612_v15  ;;  %5359 = vmatpush3.bf16.msra.mxu1 %v2444_v9  ;;  %v2139_v15 = vmul.f32 %v2129_v25, %v7459_v45  ;;  %v9404_v9 = vmov 43   ;;  %v2120_v45 = vsub.f32 1.0, %v2110_v5  ;;  %v7630_v25 = vmax.f32 %v2275_v48, 0.0 }
 0x2c7   : > { %2945 = vperm.xlu1 %5637, %v7163_v0   ;;  %5360 = vmatprep.subr.bf16.mxu1 %v9756_v1  ;;  %v2112_v40 = vand.u32 2147483647, %v2102_v58  ;;  %v2252_v5 = vsub.f32 %v7274_v39, %v6333_v22  ;;  %v2368_v48 = vmul.f32 %v2358_v14, %v2278_v55  ;;  %v2351_v58 = vsub.f32 1.0, %v2341_v4  ;;  %v9764_v39 = vld [vmem:[#allocation19_spill] sm:$0xff] }
 0x2c8   : > { %5650 = vset.pattern.permute.xlu0 %v9404_v9  ;;  %v2189_v41 = vmul.f32 %v9762_v43, %v2139_v15  ;;  %v2333_v6 = vsub.f32 %v7425_v2, %v6369_v63  ;;  %v2369_v57 = vmul.f32 %v2359_v16, %v2279_v33  ;;  %v2130_v9 = vmax.f32 %v2120_v45, 0.0  ;;  %v9765_v33 = vld [vmem:[#allocation30_spill] sm:$0xff] }
 0x2c9   : > { %v2448_v38 = vpop.permute.xlu1 %2447  ;;  %3401 = vperm.xlu0 %5650, %v7129_v12   ;;  %v7628_v0 = vpop.permute.xlu0 %2867  ;;  %v9761_v12 = vld [vmem:[#allocation61_spill] sm:$0xff]  ;;  %v2141_v15 = vmul.f32 %v7527_v27, %v2051_v24  ;;  %v2104_v55 = vsub.f32 %v9764_v39, %v6369_v63  ;;  %v2342_v4 = vand.u32 2147483647, %v2332_v36  ;;  %v2270_v14 = vsub.f32 1.0, %v2260_v13  ;;  %v9766_v13 = vld [vmem:[#allocation58_spill] sm:$0xff] }
 0x2ca   : > { %9758 = vst [vmem:[#allocation42_spill] sm:$0xff] %v7628_v0  ;;  %5361 = vmatpush3.bf16.msra.mxu1 %v9759_v32  ;;  %v2025_v44 = vsub.f32 %v9761_v12, %v6333_v22  ;;  %v2350_v32 = vsub.f32 1.0, %v2340_v10  ;;  %v2122_v0 = vsub.f32 1.0, %v2112_v40  ;;  %v9763_v12 = vld [vmem:[#allocation6_spill] sm:$0xff]  ;;  %v2419_v2 = vmul.f32 %v7489_v20, %v2369_v57 }
 0x2cb   : > { %2949 = vperm.xlu1 %5637, %v7308_v53   ;;  %5362 = vmatprep.subr.bf16.mxu1 %v9756_v1  ;;  %v2188_v53 = vmul.f32 %v9763_v12, %v2138_v34  ;;  %v2262_v40 = vand.u32 2147483647, %v2252_v5  ;;  %v2418_v34 = vmul.f32 %v9765_v33, %v2368_v48  ;;  %v2361_v24 = vmax.f32 %v2351_v58, 0.0  ;;  %v9767_v5 = vld [vmem:[#allocation67_spill] sm:$0xff]  ;;  %v9771_v33 = vld [vmem:[#allocation68_spill] sm:$0xff] }
 0x2cc   : > { %v7654_v16 = vand.u32 2147483647, %v2025_v44  ;;  %v2360_v10 = vmax.f32 %v2350_v32, 0.0  ;;  %v2343_v27 = vand.u32 2147483647, %v2333_v6  ;;  %v2132_v36 = vmax.f32 %v2122_v0, 0.0 }
 0x2cd   : > { %v2452_v3 = vpop.permute.xlu1 %2451  ;;  %3413 = vperm.xlu0 %5650, %v9706_v49   ;;  %v7645_v62 = vpop.permute.xlu0 %2875  ;;  %v2053_v49 = vmax.f32 %v2043_v19, 0.0  ;;  %v2334_v19 = vsub.f32 %v9766_v13, %v6369_v63  ;;  %v2198_v44 = vadd.f32 %v2188_v53, %v7542_v31  ;;  %v2140_v43 = vmul.f32 %v2130_v9, %v2050_v23  ;;  %v9769_v0 = vld [vmem:[#allocation84_spill] sm:$0xff] }
 0x2ce   : > { %5363 = vmatpush3.bf16.msra.mxu1 %v2448_v38  ;;  %v2199_v38 = vadd.f32 %v2189_v41, %v7586_v29  ;;  %v2114_v48 = vand.u32 2147483647, %v2104_v55  ;;  %v2352_v32 = vsub.f32 1.0, %v2342_v4  ;;  %v2280_v58 = vmax.f32 %v2270_v14, 0.0 }
 0x2cf   : > { %2957 = vperm.xlu1 %5637, %v7332_v26   ;;  %5364 = vmatprep.subr.bf16.mxu1 %v9756_v1  ;;  %v2272_v41 = vsub.f32 1.0, %v2262_v40  ;;  %v2254_v57 = vsub.f32 %v9769_v0, %v6333_v22  ;;  %v2428_v12 = vadd.f32 %v2418_v34, %v2198_v44  ;;  %v2371_v53 = vmul.f32 %v2361_v24, %v7604_v42 }
 0x2d0   : > { %v2429_v6 = vadd.f32 %v2419_v2, %v2199_v38  ;;  %v2353_v31 = vsub.f32 1.0, %v2343_v27  ;;  %v2335_v9 = vsub.f32 %v7455_v18, %v6369_v63  ;;  %v2370_v23 = vmul.f32 %v2360_v10, %v2280_v58  ;;  %v9773_v27 = vld [vmem:[#allocation23_spill] sm:$0xff] }
 0x2d1   : > { %v7658_v45 = vpop.permute.xlu1 %2551  ;;  %3421 = vperm.xlu0 %5650, %v7238_v56   ;;  %v7661_v20 = vpop.permute.xlu0 %2883  ;;  %v9768_v56 = vld [vmem:[#allocation66_spill] sm:$0xff]  ;;  %v2045_v55 = vsub.f32 1.0, %v7654_v16  ;;  %v2142_v4 = vmul.f32 %v2132_v36, %v7492_v28  ;;  %v2344_v14 = vand.u32 2147483647, %v2334_v19  ;;  %v2124_v40 = vsub.f32 1.0, %v2114_v48  ;;  %v9774_v19 = vld [vmem:[#allocation12_spill] sm:$0xff] }
 0x2d2   : > { %5365 = vmatpush3.bf16.msra.mxu1 %v9767_v5  ;;  %v2190_v29 = vmul.f32 %v9768_v56, %v2140_v43  ;;  %v2191_v42 = vmul.f32 %v9771_v33, %v2141_v15  ;;  %v2438_v34 = vpack.c.bf16 %v2429_v6, %v2428_v12  ;;  %v2420_v18 = vmul.f32 %v7510_v7, %v2370_v23  ;;  %v5739_v7 = vld [vmem:[%s5975_s25] sm:$0xff]   ;;  %v9775_v5 = vld [vmem:[#allocation59_spill] sm:$0xff]  ;;  %v9777_v6 = vld [vmem:[#allocation50_spill] sm:$0xff] }
 0x2d3   : > { %2965 = vperm.xlu1 %5637, %v7356_v46   ;;  %5366 = vmatprep.subr.bf16.mxu1 %v9756_v1  ;;  %v2362_v10 = vmax.f32 %v2352_v32, 0.0  ;;  %v2282_v28 = vmax.f32 %v2272_v41, 0.0  ;;  %v2264_v24 = vand.u32 2147483647, %v2254_v57  ;;  %v2421_v38 = vmul.f32 %v9773_v27, %v2371_v53  ;;  %v7720_v33 = vld [vmem:[%s5975_s25 + $0x10] sm:$0xff]  }
 0x2d4   : > { %v2363_v36 = vmax.f32 %v2353_v31, 0.0  ;;  %v2345_v13 = vand.u32 2147483647, %v2335_v9  ;;  %v2027_v44 = vsub.f32 %v9774_v19, %v6333_v22  ;;  %v2354_v43 = vsub.f32 1.0, %v2344_v14  ;;  %v7711_v9 = vld [vmem:[%s5980_s10 + $0x8] sm:$0xff] }
 0x2d5   : > { %v7675_v39 = vpop.permute.xlu1 %2555  ;;  %3429 = vperm.xlu0 %5650, %v7259_v47   ;;  %v9772_v47 = vld [vmem:[#allocation9_spill] sm:$0xff]  ;;  %v2143_v48 = vmul.f32 %v7537_v52, %v2053_v49  ;;  %v9410_v32 = vmov 12   ;;  %v2192_v56 = vmul.f32 %v9777_v6, %v2142_v4  ;;  %v2201_v41 = vadd.f32 %v2191_v42, %v7550_v59  ;;  %v9779_v52 = vld [vmem:[#allocation90_spill] sm:$0xff] }
 0x2d6   : > { %5367 = vmatpush3.bf16.msra.mxu1 %v2452_v3  ;;  %v7680_v2 = vpop.permute.xlu0 %2941  ;;  %v2106_v16 = vsub.f32 %v9772_v47, %v6369_v63  ;;  %v2200_v3 = vadd.f32 %v2190_v29, %v7590_v8  ;;  %v2336_v8 = vsub.f32 %v9775_v5, %v6369_v63  ;;  %v2134_v29 = vmax.f32 %v2124_v40, 0.0  ;;  %v9786_v6 = vld [vmem:[#allocation14_spill] sm:$0xff] }
 0x2d7   : > { %9770 = vst [vmem:[#allocation33_spill] sm:$0xff] %v7680_v2  ;;  %2973 = vperm.xlu1 %5637, %v7381_v35   ;;  %5418 = vmatprep.subr.bf16.mxu1 %v9756_v1  ;;  %v9778_v57 = vmov 10   ;;  %v2274_v53 = vsub.f32 1.0, %v2264_v24  ;;  %v2256_v49 = vsub.f32 %v9779_v52, %v6333_v22  ;;  %v2372_v31 = vmul.f32 %v2362_v10, %v2282_v28 }
 0x2d8   : > { %v2430_v0 = vadd.f32 %v2420_v18, %v2200_v3  ;;  %v2116_v12 = vand.u32 2147483647, %v2106_v16  ;;  %v2373_v23 = vmul.f32 %v2363_v36, %v7616_v61  ;;  %v2355_v4 = vsub.f32 1.0, %v2345_v13  ;;  %v7734_v13 = vld [vmem:[%s5980_s10 + $0x10] sm:$0xff] }
 0x2d9   : > { %v7690_v15 = vpop.permute.xlu1 %2563  ;;  %5369 = vmatmul.mubr.msk.bf16.vlgmr.msra.gmra.mrb[0].mxu1 %vm1439_vm2, %v2438_v34  ;;  %3461 = vrot.lane.b32.xlu0 %v5739_v7, %s5869_s11  ;;  %v2337_v14 = vsub.f32 %v7477_v21, %v6369_v63  ;;  %v2431_v59 = vadd.f32 %v2421_v38, %v2201_v41  ;;  %v2055_v42 = vmax.f32 %v2045_v55, 0.0  ;;  %v2037_v34 = vand.u32 2147483647, %v2027_v44  ;;  %v9782_v21 = vld [vmem:[#allocation70_spill] sm:$0xff]  ;;  %v9783_v7 = vld [vmem:[#allocation49_spill] sm:$0xff] }
 0x2da   : > { %5372 = vmatprep.mubr.msk.bf16.mxu1 %vm5845_vm1, %v9756_v1  ;;  %5652 = vset.pattern.permute.xlu0 %v9410_v32  ;;  %v7703_v58 = vpop.permute.xlu0 %2953  ;;  %v9780_v18 = vsub.f32 %v9757_v60, %v6333_v22  ;;  %v2364_v61 = vmax.f32 %v2354_v43, 0.0  ;;  %v2346_v10 = vand.u32 2147483647, %v2336_v8  ;;  %v2193_v28 = vmul.f32 %v9782_v21, %v2143_v48 }
 0x2db   : > { %9776 = vst [vmem:[#allocation47_spill] sm:$0xff] %v7703_v58  ;;  %5640 = vset.pattern.permute.xlu1 %v9778_v57  ;;  %v2439_v24 = vpack.c.bf16 %v2431_v59, %v2430_v0  ;;  %v2422_v3 = vmul.f32 %v7544_v30, %v2372_v31  ;;  %v2144_v27 = vmul.f32 %v2134_v29, %v7498_v17  ;;  %v2126_v38 = vsub.f32 1.0, %v2116_v12  ;;  %v5743_v30 = vld [vmem:[%s5975_s25 + $0x20] sm:$0xff]   ;;  %v9784_v17 = vld [vmem:[#allocation37_spill] sm:$0xff]  ;;  %v9788_v12 = vld [vmem:[#allocation51_spill] sm:$0xff] }
 0x2dc   : > { %3001 = vperm.xlu1 %5640, %v7711_v9   ;;  %v2267_v47 = vand.u32 2147483647, %v9780_v18  ;;  %v2266_v36 = vand.u32 2147483647, %v2256_v49  ;;  %v2202_v55 = vadd.f32 %v2192_v56, %v7593_v51  ;;  %v2284_v60 = vmax.f32 %v2274_v53, 0.0  ;;  %v9789_v49 = vld [vmem:[#allocation54_spill] sm:$0xff] }
 0x2dd   : > { %v7717_v40 = vpop.permute.xlu1 %2571  ;;  %3465 = vrot.lane.b32.xlu0 %v7720_v33, %s5869_s11  ;;  %v2423_v19 = vmul.f32 %v9783_v7, %v2373_v23  ;;  %v2365_v44 = vmax.f32 %v2355_v4, 0.0  ;;  %v2347_v43 = vand.u32 2147483647, %v2337_v14  ;;  %v1965_v51 = vmul.f32 %v9784_v17, %v7555_v11  ;;  %v7757_v4 = vld [vmem:[%s5980_s10 + $0x20] sm:$0xff]  ;;  %v9799_v17 = vld [vmem:[#allocation31_spill] sm:$0xff] }
 0x2de   : > { %v7727_v16 = vpop.permute.xlu0 %2961  ;;  %v9785_v8 = vsub.f32 1.0, %v7546_v37  ;;  %v1964_v56 = vmul.f32 %v9786_v6, %v7504_v50  ;;  %v2277_v29 = vsub.f32 1.0, %v2267_v47  ;;  %v2047_v0 = vsub.f32 1.0, %v2037_v34  ;;  %v9791_v34 = vld [vmem:[#allocation41_spill] sm:$0xff]  ;;  %v7777_v6 = vld [vmem:[%s5980_s10 + $0x30] sm:$0xff] }
 0x2df   : > { %9781 = vst [vmem:[#allocation15_spill] sm:$0xff] %v7727_v16  ;;  %v2203_v57 = vadd.f32 %v2193_v28, %v7583_v54  ;;  %v2145_v53 = vmul.f32 %v9788_v12, %v2055_v42  ;;  %v2432_v52 = vadd.f32 %v2422_v3, %v2202_v55  ;;  %v2194_v11 = vmul.f32 %v9789_v49, %v2144_v27  ;;  %v9790_v54 = vld [vmem:[#allocation97_spill] sm:$0xff]  ;;  %v9793_v28 = vld [vmem:[#allocation28_spill] sm:$0xff]  ;;  %v9795_v3 = vld [vmem:[#allocation75_spill] sm:$0xff] }
 0x2e0   : > { %3005 = vperm.xlu1 %5640, %v7734_v13   ;;  %v1907_v48 = vmax.f32 %v9785_v8, 0.0  ;;  %v2136_v31 = vmax.f32 %v2126_v38, 0.0  ;;  %v2356_v37 = vsub.f32 1.0, %v2346_v10  ;;  %v2276_v23 = vsub.f32 1.0, %v2266_v36  ;;  %v9792_v47 = vld [vmem:[#allocation101_spill] sm:$0xff]  ;;  %v9796_v36 = vld [vmem:[#allocation99_spill] sm:$0xff] }
 0x2e1   : > { %v7738_v5 = vpop.permute.xlu1 %2579  ;;  %5373 = vmatmul.mubr.msk.bf16.gmra.mrb[4].mxu1 %vm1439_vm2, %v2439_v24  ;;  %3469 = vrot.lane.b32.xlu0 %v5743_v30, %s5869_s11  ;;  %v2375_v50 = vmul.f32 %v2365_v44, %v7630_v25  ;;  %v2357_v14 = vsub.f32 1.0, %v2347_v43  ;;  %v2433_v59 = vadd.f32 %v2423_v19, %v2203_v57  ;;  %v2374_v18 = vmul.f32 %v2364_v61, %v2284_v60  ;;  %v9797_v55 = vld [vmem:[#allocation25_spill] sm:$0xff]  ;;  %v9798_v60 = vld [vmem:[#allocation40_spill] sm:$0xff] }
 0x2e2   : > { %5376 = vmatprep.mubr.msk.bf16.mxu1 %vm5845_vm1, %v9756_v1  ;;  %v7751_v41 = vpop.permute.xlu0 %2969  ;;  %v1917_v42 = vmul.f32 %v1907_v48, %v9790_v54  ;;  %v1916_v21 = vmul.f32 %v9792_v47, %v9791_v34  ;;  %v9794_v10 = vsub.f32 1.0, %v9793_v28  ;;  %v1975_v27 = vadd.f32 %v1965_v51, %v9795_v3  ;;  %v9800_v57 = vld [vmem:[#allocation64_spill] sm:$0xff]  ;;  %v9806_v54 = vld [vmem:[#allocation21_spill] sm:$0xff] }
 0x2e3   : > { %9787 = vst [vmem:[#allocation57_spill] sm:$0xff] %v7751_v41  ;;  %v1974_v25 = vadd.f32 %v1964_v56, %v9796_v36  ;;  %v2195_v7 = vmul.f32 %v9797_v55, %v2145_v53  ;;  %v2440_v61 = vpack.c.bf16 %v2433_v59, %v2432_v52  ;;  %v2424_v19 = vmul.f32 %v9798_v60, %v2374_v18  ;;  %v9803_v59 = vld [vmem:[#allocation22_spill] sm:$0xff]  ;;  %v7796_v28 = vld [vmem:[%s5980_s10 + $0x40] sm:$0xff]  ;;  %v9809_v60 = vld [vmem:[#allocation17_spill] sm:$0xff] }
 0x2e4   : > { %3013 = vperm.xlu1 %5640, %v7757_v4   ;;  %v2137_v24 = vmax.f32 %v9794_v10, 0.0  ;;  %v2057_v43 = vmax.f32 %v2047_v0, 0.0  ;;  %v2287_v30 = vmax.f32 %v2277_v29, 0.0  ;;  %v2146_v8 = vmul.f32 %v2136_v31, %v9799_v17  ;;  %v9801_v29 = vld [vmem:[#allocation20_spill] sm:$0xff] }
 0x2e5   : > { %3569 = vperm.xlu0 %5652, %v7711_v9   ;;  %v2366_v48 = vmax.f32 %v2356_v37, 0.0  ;;  %v2286_v51 = vmax.f32 %v2276_v23, 0.0  ;;  %v2425_v56 = vmul.f32 %v9800_v57, %v2375_v50  ;;  %v2367_v12 = vmax.f32 %v2357_v14, 0.0  ;;  %v9802_v23 = vld [vmem:[#allocation100_spill] sm:$0xff]  ;;  %v9804_v14 = vld [vmem:[#allocation95_spill] sm:$0xff] }
 0x2e6   : > { %v7768_v38 = vpop.permute.xlu1 %2627  ;;  %v2204_v53 = vadd.f32 %v2194_v11, %v1974_v25  ;;  %v1966_v0 = vmul.f32 %v9801_v29, %v1916_v21  ;;  %v2205_v49 = vadd.f32 %v2195_v7, %v1975_v27  ;;  %v1746_v50 = vmul.f32 %v9803_v59, %v9802_v23  ;;  %v9805_v11 = vld [vmem:[#allocation85_spill] sm:$0xff]  ;;  %v9807_v10 = vld [vmem:[#allocation52_spill] sm:$0xff] }
 0x2e7   : > { %v7773_v44 = vpop.permute.xlu0 %2997  ;;  %v1697_v18 = vmul.f32 %v9805_v11, %v9804_v14  ;;  %v1967_v34 = vmul.f32 %v9806_v54, %v1917_v42  ;;  %v2147_v47 = vmul.f32 %v2137_v24, %v2057_v43  ;;  %v2196_v3 = vmul.f32 %v9807_v10, %v2146_v8  ;;  %v9808_v25 = vld [vmem:[#allocation44_spill] sm:$0xff] }
 0x2e8   : > { %3021 = vperm.xlu1 %5640, %v7777_v6   ;;  %v2434_v31 = vadd.f32 %v2424_v19, %v2204_v53  ;;  %v2377_v21 = vmul.f32 %v2367_v12, %v2287_v30  ;;  %v2435_v27 = vadd.f32 %v2425_v56, %v2205_v49  ;;  %v2376_v36 = vmul.f32 %v2366_v48, %v2286_v51  ;;  %v9810_v19 = vld [vmem:[#allocation53_spill] sm:$0xff]  ;;  %v9812_v30 = vld [vmem:[#allocation27_spill] sm:$0xff]  ;;  %v7811_v51 = vld [vmem:[%s5980_s10] sm:$0xff] }
 0x2e9   : > { %5377 = vmatmul.mubr.msk.bf16.gmra.mrb[8].mxu1 %vm1439_vm2, %v2440_v61  ;;  %3581 = vperm.xlu0 %5652, %v7757_v4   ;;  %v1747_v55 = vmul.f32 %v9808_v25, %v1697_v18  ;;  %v1976_v61 = vadd.f32 %v1966_v0, %v1746_v50  ;;  %v2197_v42 = vmul.f32 %v9809_v60, %v2147_v47  ;;  %v9811_v57 = vmov 26   ;;  %v9814_v14 = vld [vmem:[#allocation88_spill] sm:$0xff] }
 0x2ea   : > { %v7783_v52 = vpop.permute.xlu1 %2635  ;;  %5380 = vmatprep.mubr.msk.bf16.mxu1 %vm5845_vm1, %v9756_v1  ;;  %v2441_v24 = vpack.c.bf16 %v2435_v27, %v2434_v31  ;;  %v2426_v43 = vmul.f32 %v9810_v19, %v2376_v36  ;;  %v2427_v56 = vmul.f32 %v9812_v30, %v2377_v21  ;;  %9813 = vst [vmem:[#allocation35_spill] sm:$0xff] %v7811_v51  ;;  %v9409_v31 = vmov 28  }
 0x2eb   : > { %v7788_v37 = vpop.permute.xlu0 %3009  ;;  %v1977_v8 = vadd.f32 %v1967_v34, %v1747_v55  ;;  %v2206_v48 = vadd.f32 %v2196_v3, %v1976_v61  ;;  %v9408_v27 = vmov 44   ;;  %v9407_v19 = vmov 13  }
 0x2ec   : > { %3029 = vperm.xlu1 %5640, %v7796_v28  }
 0x2ed   : > { %3589 = vperm.xlu0 %5652, %v7777_v6   ;;  %v2207_v53 = vadd.f32 %v2197_v42, %v1977_v8  ;;  %v2436_v29 = vadd.f32 %v2426_v43, %v2206_v48  ;;  %v9827_v8 = vmov 11  }
 0x2ee   : > { %v7802_v7 = vpop.permute.xlu1 %2639 }
 0x2ef   : > { %v7806_v17 = vpop.permute.xlu0 %3017  ;;  %v2437_v49 = vadd.f32 %v2427_v56, %v2207_v53  ;;  %v7894_v56 = vld [vmem:[%s5980_s10 + $0x18] sm:$0xff] }
 0x2f0   : > { %5641 = vset.pattern.permute.xlu1 %v9811_v57 }
 0x2f1   : > { %3077 = vperm.xlu1 %5641, %v7811_v51   ;;  %5381 = vmatmul.mubr.msk.bf16.gmra.mrb[12].mxu1 %vm1439_vm2, %v2441_v24  ;;  %v2442_v59 = vpack.c.bf16 %v2437_v49, %v2436_v29  ;;  %v7903_v29 = vld [vmem:[%s5980_s10 + $0x28] sm:$0xff] }
 0x2f2   : > { %3597 = vperm.xlu0 %5652, %v7796_v28   ;;  %v7816_v12 = vpop.permute.xlu1 %2647  ;;  %5384 = vmatprep.mubr.msk.bf16.mxu1 %vm5845_vm1, %v9756_v1 }
 0x2f3   : > { %v7820_v0 = vpop.permute.xlu0 %3025 }
 0x2f5   : > { %3085 = vperm.xlu1 %5641, %v7734_v13  }
 0x2f6   : > { %5653 = vset.pattern.permute.xlu0 %v9409_v31  ;;  %v7824_v23 = vpop.permute.xlu1 %2655 }
 0x2f7   : > { %3645 = vperm.xlu0 %5653, %v7811_v51   ;;  %v7827_v50 = vpop.permute.xlu0 %3033 }
 0x2f9   : > { %3089 = vperm.xlu1 %5641, %v9814_v14   ;;  %5385 = vmatmul.mubr.msk.bf16.gmra.mrb[16].mxu1 %vm1439_vm2, %v2442_v59 }
 0x2fa   : > { %v7831_v11 = vpop.permute.xlu1 %2663  ;;  %5428 = vmatprep.mubr.msk.bf16.mxu1 %vm5845_vm1, %v9756_v1 }
 0x2fb   : > { %3657 = vperm.xlu0 %5653, %v9814_v14   ;;  %v7912_v14 = vld [vmem:[%s5980_s10 + $0x38] sm:$0xff] }
 0x2fc   : > { %v7836_v18 = vpop.permute.xlu0 %3081 }
 0x2fd   : > { %3097 = vperm.xlu1 %5641, %v7332_v26  }
 0x2ff   : > { %3665 = vperm.xlu0 %5653, %v7332_v26   ;;  %v7840_v54 = vpop.permute.xlu1 %2721  ;;  %v9818_v26 = vmov 42  }
 0x300   : > { %v7842_v34 = vpop.permute.xlu0 %3093 }
 0x301   : > { %3105 = vperm.xlu1 %5641, %v7356_v46  }
 0x303   : > { %3673 = vperm.xlu0 %5653, %v7356_v46   ;;  %v7846_v47 = vpop.permute.xlu1 %2725 }
 0x304   : > { %9815 = vst [vmem:[#allocation63_spill] sm:$0xff] %v7846_v47  ;;  %v7848_v10 = vpop.permute.xlu0 %3101  ;;  %v9902_v47 = vld [vmem:[#allocation36_spill] sm:$0xff] }
 0x305   : > { %3113 = vperm.xlu1 %5641, %v7381_v35  }
 0x307   : > { %3681 = vperm.xlu0 %5653, %v7381_v35   ;;  %v7852_v3 = vpop.permute.xlu1 %2733 }
 0x308   : > { %9816 = vst [vmem:[#allocation55_spill] sm:$0xff] %v7852_v3  ;;  %v7854_v21 = vpop.permute.xlu0 %3109 }
 0x309   : > { %9817 = vst [vmem:[#allocation56_spill] sm:$0xff] %v7854_v21  ;;  %5644 = vset.pattern.permute.xlu1 %v9818_v26 }
 0x30a   : > { %3171 = vperm.xlu1 %5644, %v7711_v9  }
 0x30b   : > { %5656 = vset.pattern.permute.xlu0 %v9408_v27  ;;  %v7859_v46 = vpop.permute.xlu1 %2741  ;;  %v9411_v27 = vmov 29  }
 0x30c   : > { %9819 = vst [vmem:[#allocation45_spill] sm:$0xff] %v7859_v46  ;;  %3739 = vperm.xlu0 %5656, %v7711_v9  }
 0x30d   : > { %v7862_v36 = vpop.permute.xlu0 %3167 }
 0x30e   : > { %9820 = vst [vmem:[#allocation11_spill] sm:$0xff] %v7862_v36  ;;  %3175 = vperm.xlu1 %5644, %v7734_v13   ;;  %v9414_v36 = vmov 45  }
 0x30f   : > { %v7865_v25 = vpop.permute.xlu1 %2749 }
 0x310   : > { %9821 = vst [vmem:[#allocation77_spill] sm:$0xff] %v7865_v25  ;;  %3751 = vperm.xlu0 %5656, %v7757_v4  }
 0x311   : > { %v7868_v55 = vpop.permute.xlu0 %3179 }
 0x312   : > { %9822 = vst [vmem:[#allocation7_spill] sm:$0xff] %v7868_v55  ;;  %3183 = vperm.xlu1 %5644, %v7757_v4  }
 0x314   : > { %3759 = vperm.xlu0 %5656, %v7777_v6   ;;  %v7872_v61 = vpop.permute.xlu1 %2767 }
 0x315   : > { %v7874_v60 = vpop.permute.xlu0 %3187 }
 0x316   : > { %9823 = vst [vmem:[#allocation10_spill] sm:$0xff] %v7874_v60  ;;  %3191 = vperm.xlu1 %5644, %v7777_v6  }
 0x318   : > { %3767 = vperm.xlu0 %5656, %v7796_v28   ;;  %v7878_v42 = vpop.permute.xlu1 %2775 }
 0x319   : > { %9824 = vst [vmem:[#allocation18_spill] sm:$0xff] %v7878_v42  ;;  %v7880_v24 = vpop.permute.xlu0 %3195 }
 0x31a   : > { %9825 = vst [vmem:[#allocation60_spill] sm:$0xff] %v7880_v24  ;;  %3199 = vperm.xlu1 %5644, %v7796_v28  }
 0x31c   : > { %5657 = vset.pattern.permute.xlu0 %v9407_v19  ;;  %v7884_v43 = vpop.permute.xlu1 %2779 }
 0x31d   : > { %3785 = vperm.xlu0 %5657, %v7811_v51   ;;  %v7887_v57 = vpop.permute.xlu0 %3203 }
 0x31e   : > { %9826 = vst [vmem:[#allocation13_spill] sm:$0xff] %v7887_v57  ;;  %5645 = vset.pattern.permute.xlu1 %v9827_v8  ;;  %v9838_v57 = vmov 27  }
 0x31f   : > { %3227 = vperm.xlu1 %5645, %v7811_v51  }
 0x320   : > { %v7891_v30 = vpop.permute.xlu1 %2787 }
 0x321   : > { %3797 = vperm.xlu0 %5657, %v7894_v56  }
 0x322   : > { %v7897_v48 = vpop.permute.xlu0 %3231 }
 0x323   : > { %9828 = vst [vmem:[#allocation8_spill] sm:$0xff] %v7897_v48  ;;  %3235 = vperm.xlu1 %5645, %v7734_v13   ;;  %v9905_v48 = vld [vmem:[#allocation38_spill] sm:$0xff] }
 0x324   : > { %v7900_v53 = vpop.permute.xlu1 %2795 }
 0x325   : > { %9829 = vst [vmem:[#allocation79_spill] sm:$0xff] %v7900_v53  ;;  %3805 = vperm.xlu0 %5657, %v7903_v29  }
 0x326   : > { %v7906_v49 = vpop.permute.xlu0 %3243 }
 0x327   : > { %9830 = vst [vmem:[#allocation62_spill] sm:$0xff] %v7906_v49  ;;  %3239 = vperm.xlu1 %5645, %v7894_v56   ;;  %v9903_v49 = vmov 45  }
 0x328   : > { %v7909_v59 = vpop.permute.xlu1 %2803 }
 0x329   : > { %9831 = vst [vmem:[#allocation65_spill] sm:$0xff] %v7909_v59  ;;  %3813 = vperm.xlu0 %5657, %v7912_v14  }
 0x32a   : > { %v7915_v26 = vpop.permute.xlu0 %3251 }
 0x32b   : > { %9832 = vst [vmem:[#allocation16_spill] sm:$0xff] %v7915_v26  ;;  %3247 = vperm.xlu1 %5645, %v7903_v29   ;;  %v9895_v26 = vld [vmem:[#allocation82_spill] sm:$0xff] }
 0x32d   : > { %3821 = vperm.xlu0 %5657, %v7381_v35   ;;  %v7919_v8 = vpop.permute.xlu1 %2851 }
 0x32e   : > { %9833 = vst [vmem:[#allocation61_spill] sm:$0xff] %v7919_v8  ;;  %v7921_v19 = vpop.permute.xlu0 %3259 }
 0x32f   : > { %9834 = vst [vmem:[#allocation43_spill] sm:$0xff] %v7921_v19  ;;  %3255 = vperm.xlu1 %5645, %v7912_v14  }
 0x331   : > { %5660 = vset.pattern.permute.xlu0 %v9411_v27  ;;  %v7925_v31 = vpop.permute.xlu1 %2855  ;;  %v5751_v27 = vld [vmem:[%s5975_s25 + $0x8] sm:$0xff]  }
 0x332   : > { %9835 = vst [vmem:[#allocation6_spill] sm:$0xff] %v7925_v31  ;;  %3869 = vperm.xlu0 %5660, %v7711_v9  }
 0x333   : > { %3263 = vperm.xlu1 %5645, %v7381_v35   ;;  %v7929_v32 = vpop.permute.xlu0 %3307 }
 0x334   : > { %9836 = vst [vmem:[#allocation19_spill] sm:$0xff] %v7929_v32  ;;  %v9894_v32 = vld [vmem:[#allocation78_spill] sm:$0xff] }
 0x335   : > { %v7931_v25 = vpop.permute.xlu1 %2863 }
 0x336   : > { %9837 = vst [vmem:[#allocation30_spill] sm:$0xff] %v7931_v25  ;;  %3873 = vperm.xlu0 %5660, %v7734_v13  }
 0x337   : > { %5648 = vset.pattern.permute.xlu1 %v9838_v57  ;;  %v7935_v41 = vpop.permute.xlu0 %3319 }
 0x338   : > { %9839 = vst [vmem:[#allocation58_spill] sm:$0xff] %v7935_v41  ;;  %3311 = vperm.xlu1 %5648, %v7711_v9  }
 0x339   : > { %v7938_v24 = vpop.permute.xlu1 %2871 }
 0x33a   : > { %9840 = vst [vmem:[#allocation67_spill] sm:$0xff] %v7938_v24  ;;  %4481 = vrot.lane.b32.xlu0 %v5751_v27, %s5875_s13 }
 0x33b   : > { %v7942_v16 = vpop.permute.xlu0 %3327 }
 0x33c   : > { %9841 = vst [vmem:[#allocation66_spill] sm:$0xff] %v7942_v16  ;;  %3315 = vperm.xlu1 %5648, %v7734_v13   ;;  %v9892_v16 = vld [vmem:[#allocation76_spill] sm:$0xff] }
 0x33d   : > { %v7945_v35 = vpop.permute.xlu1 %2879 }
 0x33e   : > { %9842 = vst [vmem:[#allocation84_spill] sm:$0xff] %v7945_v35  ;;  %4483 = vrot.lane.b32.xlu0 %v7720_v33, %s5875_s13  ;;  %v5753_v35 = vld [vmem:[%s5975_s25 + $0x18] sm:$0xff]  }
 0x33f   : > { %v7949_v57 = vpop.permute.xlu0 %3335 }
 0x340   : > { %9843 = vst [vmem:[#allocation68_spill] sm:$0xff] %v7949_v57  ;;  %3323 = vperm.xlu1 %5648, %v7757_v4  }
 0x342   : > { %3893 = vperm.xlu0 %5660, %v7912_v14   ;;  %v7953_v60 = vpop.permute.xlu1 %2937 }
 0x343   : > { %9844 = vst [vmem:[#allocation9_spill] sm:$0xff] %v7953_v60  ;;  %v7955_v55 = vpop.permute.xlu0 %3343  ;;  %v9849_v60 = vmov 43  }
 0x344   : > { %9845 = vst [vmem:[#allocation23_spill] sm:$0xff] %v7955_v55  ;;  %3331 = vperm.xlu1 %5648, %v7777_v6  }
 0x346   : > { %5682 = vset.pattern.permute.xlu0 %v9414_v36  ;;  %v7959_v58 = vpop.permute.xlu1 %2945 }
 0x347   : > { %9846 = vst [vmem:[#allocation12_spill] sm:$0xff] %v7959_v58  ;;  %3955 = vperm.xlu0 %5682, %v7811_v51  }
 0x348   : > { %3339 = vperm.xlu1 %5648, %v7796_v28   ;;  %v7963_v33 = vpop.permute.xlu0 %3401 }
 0x349   : > { %9847 = vst [vmem:[#allocation59_spill] sm:$0xff] %v7963_v33  ;;  %v9416_v33 = vmov 30  }
 0x34a   : > { %v7965_v57 = vpop.permute.xlu1 %2949 }
 0x34b   : > { %9848 = vst [vmem:[#allocation50_spill] sm:$0xff] %v7965_v57  ;;  %3967 = vperm.xlu0 %5682, %v7894_v56  }
 0x34c   : > { %5649 = vset.pattern.permute.xlu1 %v9849_v60  ;;  %v7969_v55 = vpop.permute.xlu0 %3413 }
 0x34d   : > { %9850 = vst [vmem:[#allocation90_spill] sm:$0xff] %v7969_v55  ;;  %3397 = vperm.xlu1 %5649, %v7811_v51  }
 0x34e   : > { %v7972_v2 = vpop.permute.xlu1 %2957 }
 0x34f   : > { %9851 = vst [vmem:[#allocation70_spill] sm:$0xff] %v7972_v2  ;;  %3975 = vperm.xlu0 %5682, %v7903_v29  }
 0x350   : > { %v7975_v36 = vpop.permute.xlu0 %3421 }
 0x351   : > { %9852 = vst [vmem:[#allocation49_spill] sm:$0xff] %v7975_v36  ;;  %3405 = vperm.xlu1 %5649, %v7734_v13  }
 0x352   : > { %v7978_v58 = vpop.permute.xlu1 %2965 }
 0x353   : > { %9853 = vst [vmem:[#allocation37_spill] sm:$0xff] %v7978_v58  ;;  %5684 = vset.pattern.permute.xlu0 %v9416_v33 }
 0x354   : > { %4095 = vperm.xlu0 %5684, %v7811_v51   ;;  %v7982_v60 = vpop.permute.xlu0 %3429 }
 0x355   : > { %9854 = vst [vmem:[#allocation14_spill] sm:$0xff] %v7982_v60  ;;  %3409 = vperm.xlu1 %5649, %v7894_v56  }
 0x356   : > { %v7985_v55 = vpop.permute.xlu1 %2973 }
 0x357   : > { %9855 = vst [vmem:[#allocation51_spill] sm:$0xff] %v7985_v55  ;;  %v9419_v55 = vmov 31  }
 0x358   : > { %4111 = vperm.xlu0 %5684, %v7757_v4   ;;  %v3462_v2 = vpop.permute.xlu0 %3461 }
 0x359   : > { %3417 = vperm.xlu1 %5649, %v7903_v29   ;;  %5389 = vmatpush3.bf16.msra.mxu0 %v3462_v2  ;;  %v8003_v2 = vld [vmem:[%s5980_s10 + $0x48] sm:$0xff] }
 0x35a   : > { %5390 = vmatprep.subr.bf16.mxu0 %v9756_v1 }
 0x35b   : > { %v7990_v36 = vpop.permute.xlu1 %3001 }
 0x35c   : > { %9856 = vst [vmem:[#allocation54_spill] sm:$0xff] %v7990_v36  ;;  %4119 = vperm.xlu0 %5684, %v7777_v6   ;;  %v7993_v33 = vpop.permute.xlu0 %3465 }
 0x35d   : > { %9857 = vst [vmem:[#allocation97_spill] sm:$0xff] %v7993_v33  ;;  %3425 = vperm.xlu1 %5649, %v7912_v14   ;;  %v9862_v33 = vmov 12  }
 0x35f   : > { %v7996_v60 = vpop.permute.xlu1 %3005 }
 0x360   : > { %9858 = vst [vmem:[#allocation41_spill] sm:$0xff] %v7996_v60  ;;  %5686 = vset.pattern.permute.xlu0 %v9419_v55  ;;  %v7999_v58 = vpop.permute.xlu0 %3469 }
 0x361   : > { %9859 = vst [vmem:[#allocation101_spill] sm:$0xff] %v7999_v58  ;;  %4341 = vperm.xlu0 %5686, %v7757_v4   ;;  %3433 = vperm.xlu1 %5649, %v8003_v2   ;;  %v9421_v58 = vmov 14  }
 0x363   : > { %v8006_v1 = vpop.permute.xlu1 %3013 }
 0x364   : > { %9860 = vst [vmem:[#allocation28_spill] sm:$0xff] %v8006_v1  ;;  %v8008_v57 = vpop.permute.xlu0 %3569 }
 0x365   : > { %9861 = vst [vmem:[#allocation75_spill] sm:$0xff] %v8008_v57  ;;  %4349 = vperm.xlu0 %5686, %v7777_v6   ;;  %3463 = vrot.lane.b32.xlu1 %v5751_v27, %s5869_s11 }
 0x366   : > { %5651 = vset.pattern.permute.xlu1 %v9862_v33 }
 0x367   : > { %v8013_v60 = vpop.permute.xlu1 %3021 }
 0x368   : > { %9863 = vst [vmem:[#allocation99_spill] sm:$0xff] %v8013_v60  ;;  %v8015_v55 = vpop.permute.xlu0 %3581 }
 0x369   : > { %9864 = vst [vmem:[#allocation25_spill] sm:$0xff] %v8015_v55  ;;  %5690 = vset.pattern.permute.xlu0 %v9421_v58  ;;  %3467 = vrot.lane.b32.xlu1 %v5753_v35, %s5869_s11  ;;  %v9423_v58 = vmov 46  }
 0x36a   : > { %4027 = vperm.xlu0 %5690, %v7894_v56  }
 0x36b   : > { %v8021_v1 = vpop.permute.xlu1 %3029 }
 0x36c   : > { %9865 = vst [vmem:[#allocation40_spill] sm:$0xff] %v8021_v1  ;;  %v8023_v57 = vpop.permute.xlu0 %3589 }
 0x36d   : > { %9866 = vst [vmem:[#allocation31_spill] sm:$0xff] %v8023_v57  ;;  %3565 = vperm.xlu1 %5651, %v7811_v51  }
 0x36e   : > { %4051 = vperm.xlu0 %5690, %v8003_v2  }
 0x370   : > { %v8027_v27 = vpop.permute.xlu1 %3077 }
 0x371   : > { %9867 = vst [vmem:[#allocation64_spill] sm:$0xff] %v8027_v27  ;;  %3573 = vperm.xlu1 %5651, %v7734_v13   ;;  %v8030_v33 = vpop.permute.xlu0 %3597  ;;  %v9893_v27 = vmov 44  }
 0x372   : > { %9868 = vst [vmem:[#allocation20_spill] sm:$0xff] %v8030_v33  ;;  %5696 = vset.pattern.permute.xlu0 %v9423_v58 }
 0x373   : > { %4185 = vperm.xlu0 %5696, %v7811_v51  }
 0x374   : > { %v8034_v35 = vpop.permute.xlu1 %3085 }
 0x375   : > { %9869 = vst [vmem:[#allocation100_spill] sm:$0xff] %v8034_v35  ;;  %3577 = vperm.xlu1 %5651, %v7894_v56   ;;  %v9425_v35 = vmov 15  }
 0x376   : > { %v8037_v55 = vpop.permute.xlu0 %3645 }
 0x377   : > { %9870 = vst [vmem:[#allocation22_spill] sm:$0xff] %v8037_v55  ;;  %4197 = vperm.xlu0 %5696, %v7894_v56  }
 0x378   : > { %v8040_v57 = vpop.permute.xlu1 %3089 }
 0x379   : > { %9871 = vst [vmem:[#allocation95_spill] sm:$0xff] %v8040_v57  ;;  %3585 = vperm.xlu1 %5651, %v7903_v29  }
 0x37a   : > { %v8043_v1 = vpop.permute.xlu0 %3657 }
 0x37b   : > { %9872 = vst [vmem:[#allocation85_spill] sm:$0xff] %v8043_v1  ;;  %4205 = vperm.xlu0 %5696, %v7903_v29  }
 0x37c   : > { %v8046_v33 = vpop.permute.xlu1 %3097 }
 0x37d   : > { %9873 = vst [vmem:[#allocation21_spill] sm:$0xff] %v8046_v33  ;;  %3593 = vperm.xlu1 %5651, %v7912_v14   ;;  %v9878_v33 = vmov 28  }
 0x37e   : > { %v8049_v58 = vpop.permute.xlu0 %3665 }
 0x37f   : > { %9874 = vst [vmem:[#allocation52_spill] sm:$0xff] %v8049_v58  ;;  %4209 = vperm.xlu0 %5696, %v7777_v6  }
 0x380   : > { %v8052_v60 = vpop.permute.xlu1 %3105 }
 0x381   : > { %9875 = vst [vmem:[#allocation44_spill] sm:$0xff] %v8052_v60  ;;  %3601 = vperm.xlu1 %5651, %v8003_v2  }
 0x382   : > { %v8055_v55 = vpop.permute.xlu0 %3673 }
 0x383   : > { %9876 = vst [vmem:[#allocation17_spill] sm:$0xff] %v8055_v55  ;;  %5698 = vset.pattern.permute.xlu0 %v9425_v35 }
 0x384   : > { %4249 = vperm.xlu0 %5698, %v7711_v9   ;;  %v8059_v1 = vpop.permute.xlu1 %3113 }
 0x385   : > { %9877 = vst [vmem:[#allocation53_spill] sm:$0xff] %v8059_v1  ;;  %5654 = vset.pattern.permute.xlu1 %v9878_v33  ;;  %v9427_v33 = vmov 47  }
 0x386   : > { %3649 = vperm.xlu1 %5654, %v7711_v9   ;;  %v8063_v58 = vpop.permute.xlu0 %3681 }
 0x387   : > { %9879 = vst [vmem:[#allocation27_spill] sm:$0xff] %v8063_v58 }
 0x388   : > { %4257 = vperm.xlu0 %5698, %v7894_v56  }
 0x389   : > { %v8066_v60 = vpop.permute.xlu1 %3171 }
 0x38a   : > { %9880 = vst [vmem:[#allocation88_spill] sm:$0xff] %v8066_v60  ;;  %3653 = vperm.xlu1 %5654, %v7734_v13  }
 0x38b   : > { %v8069_v55 = vpop.permute.xlu0 %3739 }
 0x38c   : > { %9881 = vst [vmem:[#allocation102_spill] sm:$0xff] %v8069_v55  ;;  %4281 = vperm.xlu0 %5698, %v8003_v2  }
 0x38d   : > { %v8072_v35 = vpop.permute.xlu1 %3175 }
 0x38e   : > { %9882 = vst [vmem:[#allocation103_spill] sm:$0xff] %v8072_v35  ;;  %3661 = vperm.xlu1 %5654, %v7757_v4   ;;  %v9887_v35 = vld [vmem:[#allocation69_spill] sm:$0xff] }
 0x38f   : > { %v8075_v1 = vpop.permute.xlu0 %3751 }
 0x390   : > { %9883 = vst [vmem:[#allocation104_spill] sm:$0xff] %v8075_v1  ;;  %5701 = vset.pattern.permute.xlu0 %v9427_v33  ;;  %v2586_v1 = vsub.f32 %v9887_v35, %v6333_v22  ;;  %v9889_v33 = vld [vmem:[#allocation73_spill] sm:$0xff] }
 0x391   : > { %4419 = vperm.xlu0 %5701, %v7711_v9   ;;  %v8079_v58 = vpop.permute.xlu1 %3183  ;;  %v2589_v36 = vsub.f32 %v9889_v33, %v6333_v22  ;;  %v2595_v33 = vsub.f32 %v9894_v32, %v6333_v22 }
 0x392   : > { %9884 = vst [vmem:[#allocation105_spill] sm:$0xff] %v8079_v58  ;;  %3669 = vperm.xlu1 %5654, %v7777_v6   ;;  %v9890_v58 = vld [vmem:[#allocation74_spill] sm:$0xff]  ;;  %v2596_v41 = vand.u32 2147483647, %v2586_v1  ;;  %v9899_v1 = vld [vmem:[#allocation91_spill] sm:$0xff] }
 0x393   : > { %v8082_v60 = vpop.permute.xlu0 %3759  ;;  %v2591_v19 = vsub.f32 %v9890_v58, %v6333_v22  ;;  %v2599_v35 = vand.u32 2147483647, %v2589_v36  ;;  %v2667_v58 = vsub.f32 %v9895_v26, %v6369_v63 }
 0x394   : > { %9885 = vst [vmem:[#allocation106_spill] sm:$0xff] %v8082_v60  ;;  %v2606_v32 = vsub.f32 1.0, %v2596_v41 }
 0x395   : > { %4423 = vperm.xlu0 %5701, %v7734_v13   ;;  %v8085_v55 = vpop.permute.xlu1 %3191  ;;  %v2609_v26 = vsub.f32 1.0, %v2599_v35  ;;  %v2677_v3 = vand.u32 2147483647, %v2667_v58  ;;  %v2812_v35 = vsub.f32 %v9905_v48, %v6333_v22 }
 0x396   : > { %9886 = vst [vmem:[#allocation107_spill] sm:$0xff] %v8085_v55  ;;  %3677 = vperm.xlu1 %5654, %v7796_v28   ;;  %v2593_v55 = vsub.f32 %v9892_v16, %v6333_v22  ;;  %v9898_v16 = vld [vmem:[#allocation89_spill] sm:$0xff] }
 0x397   : > { %v8090_v57 = vpop.permute.xlu0 %3767  ;;  %v2672_v31 = vsub.f32 %v9898_v16, %v6369_v63  ;;  %v2687_v48 = vsub.f32 1.0, %v2677_v3  ;;  %v2822_v42 = vand.u32 2147483647, %v2812_v35  ;;  %v9911_v3 = vld [vmem:[#allocation42_spill] sm:$0xff] }
 0x398   : > { %9888 = vst [vmem:[#allocation69_spill] sm:$0xff] %v8090_v57  ;;  %v2601_v57 = vand.u32 2147483647, %v2591_v19  ;;  %v2603_v36 = vand.u32 2147483647, %v2593_v55 }
 0x399   : > { %4435 = vperm.xlu0 %5701, %v7903_v29   ;;  %v8097_v60 = vpop.permute.xlu1 %3199  ;;  %v2682_v25 = vand.u32 2147483647, %v2672_v31  ;;  %v9907_v31 = vld [vmem:[#allocation46_spill] sm:$0xff] }
 0x39a   : > { %9891 = vst [vmem:[#allocation73_spill] sm:$0xff] %v8097_v60  ;;  %5655 = vset.pattern.permute.xlu1 %v9893_v27  ;;  %v9897_v60 = vld [vmem:[#allocation83_spill] sm:$0xff]  ;;  %v2674_v27 = vsub.f32 %v9899_v1, %v6369_v63  ;;  %v2611_v59 = vsub.f32 1.0, %v2601_v57  ;;  %v2807_v1 = vsub.f32 %v9902_v47, %v6333_v22  ;;  %v2613_v55 = vsub.f32 1.0, %v2603_v36  ;;  %v9908_v47 = vld [vmem:[#allocation24_spill] sm:$0xff] }
 0x39b   : > { %3735 = vperm.xlu1 %5655, %v7811_v51   ;;  %v2670_v46 = vsub.f32 %v9897_v60, %v6369_v63  ;;  %v2886_v58 = vsub.f32 %v9908_v47, %v6369_v63  ;;  %v9910_v47 = vld [vmem:[#allocation26_spill] sm:$0xff] }
 0x39c   : > { %v8107_v24 = vpop.permute.xlu0 %3785  ;;  %v2684_v16 = vand.u32 2147483647, %v2674_v27  ;;  %v8138_v27 = vmax.f32 %v2609_v26, 0.0  ;;  %v8140_v36 = vmax.f32 %v2611_v59, 0.0  ;;  %v2817_v53 = vand.u32 2147483647, %v2807_v1 }
 0x39d   : > { %9896 = vst [vmem:[#allocation74_spill] sm:$0xff] %v8107_v24  ;;  %4439 = vperm.xlu0 %5701, %v7777_v6   ;;  %v2605_v24 = vand.u32 2147483647, %v2595_v33  ;;  %v2680_v60 = vand.u32 2147483647, %v2670_v46  ;;  %v8131_v33 = vmax.f32 %v2606_v32, 0.0  ;;  %v2814_v46 = vsub.f32 %v9907_v31, %v6333_v22 }
 0x39e   : > { %v8116_v19 = vpop.permute.xlu1 %3227  ;;  %v2694_v32 = vsub.f32 1.0, %v2684_v16  ;;  %v8144_v21 = vmax.f32 %v2613_v55, 0.0  ;;  %v2889_v8 = vsub.f32 %v9910_v47, %v6369_v63  ;;  %v2891_v26 = vsub.f32 %v9911_v3, %v6369_v63 }
 0x39f   : > { %9900 = vst [vmem:[#allocation76_spill] sm:$0xff] %v8116_v19  ;;  %3743 = vperm.xlu1 %5655, %v7734_v13   ;;  %v9904_v19 = vld [vmem:[#allocation39_spill] sm:$0xff]  ;;  %v2824_v59 = vand.u32 2147483647, %v2814_v46  ;;  %v8158_v16 = vmax.f32 %v2687_v48, 0.0  ;;  %v2587_v1 = vsub.f32 %v7658_v45, %v6333_v22  ;;  %v2895_v55 = vsub.f32 %v7661_v20, %v6369_v63 }
 0x3a0   : > { %v8119_v51 = vpop.permute.xlu0 %3797  ;;  %v2810_v41 = vsub.f32 %v9904_v19, %v6333_v22  ;;  %v2615_v19 = vsub.f32 1.0, %v2605_v24  ;;  %v2896_v24 = vand.u32 2147483647, %v2886_v58  ;;  %v8170_v58 = vmax.f32 %v2694_v32, 0.0 }
 0x3a1   : > { %9901 = vst [vmem:[#allocation78_spill] sm:$0xff] %v8119_v51  ;;  %5703 = vset.pattern.permute.xlu0 %v9903_v49  ;;  %v2690_v49 = vsub.f32 1.0, %v2680_v60  ;;  %v2590_v48 = vsub.f32 %v7690_v15, %v6333_v22  ;;  %v2899_v47 = vand.u32 2147483647, %v2889_v8  ;;  %v9914_v3 = vmov 47  }
 0x3a2   : > { %3979 = vperm.xlu0 %5703, %v7777_v6   ;;  %v8129_v57 = vpop.permute.xlu1 %3235  ;;  %v2820_v31 = vand.u32 2147483647, %v2810_v41  ;;  %v8156_v60 = vmax.f32 %v2615_v19, 0.0  ;;  %9913 = vst [vmem:[#allocation91_spill] sm:$0xff] %v8170_v58  ;;  %v2832_v19 = vsub.f32 1.0, %v2822_v42  ;;  %v2834_v20 = vsub.f32 1.0, %v2824_v59 }
 0x3a3   : > { %9906 = vst [vmem:[#allocation82_spill] sm:$0xff] %v8129_v57  ;;  %3747 = vperm.xlu1 %5655, %v7894_v56   ;;  %v2692_v57 = vsub.f32 1.0, %v2682_v25  ;;  %v2893_v25 = vsub.f32 %v7645_v62, %v6369_v63  ;;  %v8166_v35 = vmax.f32 %v2690_v49, 0.0  ;;  %v2827_v62 = vsub.f32 1.0, %v2817_v53 }
 0x3a4   : > { %v8142_v51 = vpop.permute.xlu0 %3805  ;;  %v2905_v53 = vand.u32 2147483647, %v2895_v55  ;;  %v2588_v8 = vsub.f32 %v7675_v39, %v6333_v22  ;;  %v2666_v59 = vsub.f32 %v7768_v38, %v6369_v63 }
 0x3a5   : > { %9909 = vst [vmem:[#allocation83_spill] sm:$0xff] %v8142_v51  ;;  %v8168_v46 = vmax.f32 %v2692_v57, 0.0  ;;  %v2906_v51 = vsub.f32 1.0, %v2896_v24  ;;  %v2903_v49 = vand.u32 2147483647, %v2893_v25  ;;  %v8183_v15 = vmax.f32 %v2827_v62, 0.0 }
 0x3a6   : > { %3991 = vperm.xlu0 %5703, %v8003_v2   ;;  %v8149_v56 = vpop.permute.xlu1 %3239  ;;  %v2597_v57 = vand.u32 2147483647, %v2587_v1  ;;  %v2600_v25 = vand.u32 2147483647, %v2590_v48  ;;  %v2909_v1 = vsub.f32 1.0, %v2899_v47  ;;  %v2915_v48 = vsub.f32 1.0, %v2905_v53 }
 0x3a7   : > { %3755 = vperm.xlu1 %5655, %v7903_v29   ;;  %v2830_v29 = vsub.f32 1.0, %v2820_v31  ;;  %v2592_v31 = vsub.f32 %v7717_v40, %v6333_v22  ;;  %v2913_v39 = vsub.f32 1.0, %v2903_v49  ;;  %v2669_v40 = vsub.f32 %v7802_v7, %v6369_v63 }
 0x3a8   : > { %v8164_v41 = vpop.permute.xlu0 %3813  ;;  %v2671_v47 = vsub.f32 %v7816_v12, %v6369_v63  ;;  %v8209_v7 = vmax.f32 %v2909_v1, 0.0 }
 0x3a9   : > { %9912 = vst [vmem:[#allocation89_spill] sm:$0xff] %v8164_v41  ;;  %v2901_v41 = vand.u32 2147483647, %v2891_v26  ;;  %v8191_v26 = vmax.f32 %v2830_v29, 0.0  ;;  %v2607_v29 = vsub.f32 1.0, %v2597_v57  ;;  %v2668_v57 = vsub.f32 %v7783_v52, %v6369_v63 }
 0x3aa   : > { %5707 = vset.pattern.permute.xlu0 %v9914_v3  ;;  %v8175_v45 = vpop.permute.xlu1 %3247  ;;  %v2610_v3 = vsub.f32 1.0, %v2600_v25  ;;  %v2679_v12 = vand.u32 2147483647, %v2669_v40  ;;  %v8224_v25 = vmax.f32 %v2915_v48, 0.0  ;;  %v2681_v1 = vand.u32 2147483647, %v2671_v47 }
 0x3ab   : > { %4447 = vperm.xlu0 %5707, %v7796_v28   ;;  %3763 = vperm.xlu1 %5655, %v7912_v14   ;;  %v8193_v14 = vmax.f32 %v2832_v19, 0.0  ;;  %v8203_v19 = vmax.f32 %v2906_v51, 0.0  ;;  %v3039_v40 = vsub.f32 %v7788_v37, %v6333_v22 }
 0x3ac   : > { %v8179_v32 = vpop.f32.mrb[0].mxu1  ;;  %v8181_v42 = vpop.permute.xlu0 %3821  ;;  %9920 = vst [vmem:[#allocation24_spill] sm:$0xff] %v8224_v25  ;;  %v2689_v58 = vsub.f32 1.0, %v2679_v12  ;;  %v2691_v37 = vsub.f32 1.0, %v2681_v1 }
 0x3ad   : > { %9915 = vst [vmem:[#allocation36_spill] sm:$0xff] %v8179_v32  ;;  %9916 = vst [vmem:[#allocation39_spill] sm:$0xff] %v8181_v42  ;;  %v5370_v24 = vpop.f32.mrb[1].mxu1  ;;  %v8197_v42 = vmax.f32 %v2834_v20, 0.0  ;;  %v2911_v32 = vsub.f32 1.0, %v2901_v41 }
 0x3ae   : > { %v8195_v55 = vpop.permute.xlu1 %3255  ;;  %v2510_v62 = vpop.f32.mrb[2].mxu1  ;;  %v2598_v20 = vand.u32 2147483647, %v2588_v8  ;;  %v2602_v24 = vand.u32 2147483647, %v2592_v31  ;;  %v2673_v8 = vsub.f32 %v7824_v23, %v6369_v63  ;;  %v9919_v31 = vmov 13  }
 0x3af   : > { %9917 = vst [vmem:[#allocation38_spill] sm:$0xff] %v8197_v42  ;;  %3771 = vperm.xlu1 %5655, %v8003_v2   ;;  %v5371_v38 = vpop.f32.mrb[3].mxu1  ;;  %4604 = vrot.lane.b32.xlu0 %v2510_v62, %s5883_s14  ;;  %v2676_v41 = vand.u32 2147483647, %v2666_v59  ;;  %v2594_v2 = vsub.f32 %v7738_v5, %v6333_v22  ;;  %v8217_v53 = vmax.f32 %v2911_v32, 0.0  ;;  %v8219_v62 = vmax.f32 %v2913_v39, 0.0 }
 0x3b0   : > { %v2617_v59 = vmax.f32 %v2607_v29, 0.0  ;;  %v3036_v5 = vsub.f32 %v7773_v44, %v6333_v22  ;;  %v2608_v32 = vsub.f32 1.0, %v2598_v20  ;;  %v2612_v39 = vsub.f32 1.0, %v2602_v24 }
 0x3b1   : > { %v8207_v49 = vpop.permute.xlu0 %3869  ;;  %v2686_v38 = vsub.f32 1.0, %v2676_v41  ;;  %v2620_v29 = vmax.f32 %v2610_v3, 0.0  ;;  %v2604_v48 = vand.u32 2147483647, %v2594_v2  ;;  %v2683_v25 = vand.u32 2147483647, %v2673_v8 }
 0x3b2   : > { %9918 = vst [vmem:[#allocation46_spill] sm:$0xff] %v8207_v49  ;;  %v8215_v51 = vpop.permute.xlu1 %3263  ;;  %v3043_v44 = vsub.f32 %v7820_v0, %v6333_v22  ;;  %v3046_v41 = vand.u32 2147483647, %v3036_v5  ;;  %v2675_v3 = vsub.f32 %v7831_v11, %v6369_v63  ;;  %v8245_v2 = vmul.f32 %v8158_v16, %v2617_v59 }
 0x3b3   : > { %5658 = vset.pattern.permute.xlu1 %v9919_v31  ;;  %v2678_v31 = vand.u32 2147483647, %v2668_v57  ;;  %v2622_v57 = vmax.f32 %v2612_v39, 0.0  ;;  %v3049_v12 = vand.u32 2147483647, %v3039_v40  ;;  %v3045_v0 = vsub.f32 %v7827_v50, %v6333_v22 }
 0x3b4   : > { %3789 = vperm.xlu1 %5658, %v7711_v9   ;;  %v8229_v52 = vpop.f32.mrb[4].mxu1  ;;  %v3041_v9 = vsub.f32 %v7806_v17, %v6333_v22  ;;  %v2696_v17 = vmax.f32 %v2686_v38, 0.0  ;;  %v8253_v5 = vmul.f32 %v8166_v35, %v2620_v29  ;;  %v2699_v11 = vmax.f32 %v2689_v58, 0.0 }
 0x3b5   : > { %9921 = vst [vmem:[#allocation26_spill] sm:$0xff] %v8229_v52  ;;  %v5374_v23 = vpop.f32.mrb[5].mxu1  ;;  %v8233_v49 = vpop.permute.xlu0 %3873  ;;  %v2688_v1 = vsub.f32 1.0, %v2678_v31  ;;  %v3053_v59 = vand.u32 2147483647, %v3043_v44  ;;  %v3056_v39 = vsub.f32 1.0, %v3046_v41  ;;  %v3117_v50 = vsub.f32 %v7836_v18, %v6369_v63 }
 0x3b6   : > { %9922 = vst [vmem:[#allocation42_spill] sm:$0xff] %v8233_v49  ;;  %v2518_v47 = vpop.f32.mrb[6].mxu1  ;;  %v2618_v23 = vmax.f32 %v2608_v32, 0.0  ;;  %v3051_v16 = vand.u32 2147483647, %v3041_v9  ;;  %v2706_v40 = vmul.f32 %v2696_v17, %v8131_v33  ;;  %v3059_v35 = vsub.f32 1.0, %v3049_v12 }
 0x3b7   : > { %v8239_v20 = vpop.permute.xlu1 %3311  ;;  %v5375_v24 = vpop.f32.mrb[7].mxu1  ;;  %4608 = vrot.lane.b32.xlu0 %v2518_v47, %s5883_s14  ;;  %v2614_v47 = vsub.f32 1.0, %v2604_v48  ;;  %v2685_v38 = vand.u32 2147483647, %v2675_v3  ;;  %v3055_v29 = vand.u32 2147483647, %v3045_v0  ;;  %v8264_v58 = vmul.f32 %v8168_v46, %v2622_v57 }
 0x3b8   : > { %3793 = vperm.xlu1 %5658, %v7734_v13   ;;  %v2693_v24 = vsub.f32 1.0, %v2683_v25  ;;  %v2701_v13 = vmax.f32 %v2691_v37, 0.0  ;;  %v2698_v9 = vmax.f32 %v2688_v1, 0.0  ;;  %v3120_v18 = vsub.f32 %v7842_v34, %v6369_v63  ;;  %v9927_v1 = vld [vmem:[#allocation94_spill] sm:$0xff] }
 0x3b9   : > { %v8250_v8 = vpop.permute.xlu0 %4481  ;;  %v8268_v31 = vmax.f32 %v2614_v47, 0.0  ;;  %v2709_v33 = vmul.f32 %v2699_v11, %v8138_v27  ;;  %v3061_v41 = vsub.f32 1.0, %v3051_v16  ;;  %v3063_v3 = vsub.f32 1.0, %v3053_v59 }
 0x3ba   : > { %9923 = vst [vmem:[#allocation108_spill] sm:$0xff] %v8250_v8  ;;  %v2703_v37 = vmax.f32 %v2693_v24, 0.0  ;;  %v2711_v17 = vmul.f32 %v2701_v13, %v8140_v36  ;;  %v8279_v12 = vmax.f32 %v3056_v39, 0.0  ;;  %v2695_v0 = vsub.f32 1.0, %v2685_v38 }
 0x3bb   : > { %v8255_v52 = vpop.permute.xlu1 %3315  ;;  %9926 = vst [vmem:[#allocation111_spill] sm:$0xff] %v8268_v31  ;;  %v3127_v34 = vand.u32 2147483647, %v3117_v50  ;;  %v3065_v47 = vsub.f32 1.0, %v3055_v29  ;;  %v2806_v27 = vsub.f32 %v7872_v61, %v6333_v22  ;;  %v8287_v11 = vmul.f32 %v9927_v1, %v2706_v40  ;;  %v9930_v50 = vld [vmem:[#allocation96_spill] sm:$0xff] }
 0x3bc   : > { %3801 = vperm.xlu1 %5658, %v7757_v4   ;;  %v8260_v32 = vpop.f32.mrb[8].mxu1  ;;  %v3122_v4 = vsub.f32 %v7848_v10, %v6369_v63  ;;  %v8282_v10 = vmax.f32 %v3059_v35, 0.0  ;;  %v2708_v16 = vmul.f32 %v2698_v9, %v2618_v23  ;;  %v3130_v59 = vand.u32 2147483647, %v3120_v18 }
 0x3bd   : > { %9924 = vst [vmem:[#allocation109_spill] sm:$0xff] %v8260_v32  ;;  %v5378_v25 = vpop.f32.mrb[9].mxu1  ;;  %v8266_v48 = vpop.permute.xlu0 %4483  ;;  %v2809_v13 = vsub.f32 %v7884_v43, %v6333_v22  ;;  %v2713_v39 = vmul.f32 %v2703_v37, %v8144_v21  ;;  %v8296_v38 = vmax.f32 %v3063_v3, 0.0  ;;  %v8299_v35 = vmul.f32 %v9930_v50, %v2709_v33  ;;  %v9935_v3 = vld [vmem:[#allocation18_spill] sm:$0xff]  ;;  %v9940_v50 = vld [vmem:[#allocation48_spill] sm:$0xff] }
 0x3be   : > { %9925 = vst [vmem:[#allocation110_spill] sm:$0xff] %v8266_v48  ;;  %v2526_v44 = vpop.f32.mrb[10].mxu1  ;;  %v3132_v36 = vand.u32 2147483647, %v3122_v4  ;;  %v2705_v40 = vmax.f32 %v2695_v0, 0.0  ;;  %v3137_v29 = vsub.f32 1.0, %v3127_v34  ;;  %v2811_v23 = vsub.f32 %v7891_v30, %v6333_v22 }
 0x3bf   : > { %v8275_v46 = vpop.permute.xlu1 %3323  ;;  %v5379_v57 = vpop.f32.mrb[11].mxu1  ;;  %4612 = vrot.lane.b32.xlu0 %v2526_v44, %s5883_s14  ;;  %9929 = vst [vmem:[#allocation112_spill] sm:$0xff] %v8296_v38  ;;  %v9931_v25 = vld [vmem:[#allocation98_spill] sm:$0xff]  ;;  %v8313_v43 = vmul.f32 %v7840_v54, %v8245_v2  ;;  %v8315_v18 = vmax.f32 %v3065_v47, 0.0  ;;  %v2816_v4 = vand.u32 2147483647, %v2806_v27 }
 0x3c0   : > { %3809 = vperm.xlu1 %5658, %v7777_v6   ;;  %v8294_v6 = vmax.f32 %v3061_v41, 0.0  ;;  %v8306_v9 = vmul.f32 %v9931_v25, %v2711_v17  ;;  %v9934_v44 = vld [vmem:[#allocation61_spill] sm:$0xff]  ;;  %v3140_v41 = vsub.f32 1.0, %v3130_v59  ;;  %v3142_v30 = vsub.f32 1.0, %v3132_v36  ;;  %v9937_v34 = vld [vmem:[#allocation56_spill] sm:$0xff]  ;;  %v9938_v2 = vld [vmem:[#allocation79_spill] sm:$0xff] }
 0x3c1   : > { %v8289_v24 = vpop.permute.xlu0 %3893  ;;  %9933 = vst [vmem:[#allocation98_spill] sm:$0xff] %v8315_v18  ;;  %v2887_v33 = vsub.f32 %v9934_v44, %v6369_v63  ;;  %v2808_v57 = vsub.f32 %v9935_v3, %v6333_v22  ;;  %v2819_v17 = vand.u32 2147483647, %v2809_v13  ;;  %v3124_v54 = vsub.f32 %v9937_v34, %v6369_v63  ;;  %v9939_v27 = vld [vmem:[#allocation8_spill] sm:$0xff]  ;;  %v9943_v3 = vld [vmem:[#allocation62_spill] sm:$0xff] }
 0x3c2   : > { %9928 = vst [vmem:[#allocation94_spill] sm:$0xff] %v8289_v24  ;;  %v2813_v47 = vsub.f32 %v9938_v2, %v6333_v22  ;;  %v3267_v1 = vsub.f32 %v9939_v27, %v6333_v22  ;;  %v8330_v25 = vmul.f32 %v9940_v50, %v2713_v39  ;;  %v8336_v13 = vmul.f32 %v2705_v40, %v8156_v60  ;;  %v9945_v27 = vld [vmem:[#allocation63_spill] sm:$0xff] }
 0x3c3   : > { %v8301_v61 = vpop.permute.xlu1 %3331  ;;  %v8338_v44 = vmax.f32 %v3137_v29, 0.0  ;;  %v3270_v34 = vsub.f32 %v9943_v3, %v6333_v22  ;;  %v9944_v2 = vmov 29   ;;  %v2826_v39 = vsub.f32 1.0, %v2816_v4  ;;  %v9950_v3 = vld [vmem:[#allocation55_spill] sm:$0xff] }
 0x3c4   : > { %3817 = vperm.xlu1 %5658, %v7796_v28   ;;  %v8309_v21 = vpop.f32.mrb[12].mxu1  ;;  %9941 = vst [vmem:[#allocation18_spill] sm:$0xff] %v8330_v25  ;;  %9942 = vst [vmem:[#allocation56_spill] sm:$0xff] %v8336_v13  ;;  %v2897_v50 = vand.u32 2147483647, %v2887_v33  ;;  %v8349_v60 = vmax.f32 %v3140_v41, 0.0  ;;  %v8357_v48 = vmul.f32 %v9950_v3, %v8253_v5 }
 0x3c5   : > { %9932 = vst [vmem:[#allocation96_spill] sm:$0xff] %v8309_v21  ;;  %v5382_v37 = vpop.f32.mrb[13].mxu1  ;;  %v8344_v21 = vmul.f32 %v9945_v27, %v2708_v16  ;;  %v8351_v40 = vmax.f32 %v3142_v30, 0.0  ;;  %v2818_v29 = vand.u32 2147483647, %v2808_v57  ;;  %v9953_v41 = vld [vmem:[#allocation6_spill] sm:$0xff] }
 0x3c6   : > { %v2534_v28 = vpop.f32.mrb[14].mxu1  ;;  %v8321_v0 = vpop.permute.xlu0 %3955  ;;  %v2821_v37 = vand.u32 2147483647, %v2811_v23  ;;  %v2829_v23 = vsub.f32 1.0, %v2819_v17  ;;  %v8359_v16 = vand.u32 2147483647, %v3124_v54  ;;  %v2888_v30 = vsub.f32 %v9953_v41, %v6369_v63 }
 0x3c7   : > { %9936 = vst [vmem:[#allocation61_spill] sm:$0xff] %v8321_v0  ;;  %v8332_v59 = vpop.permute.xlu1 %3339  ;;  %v5383_v36 = vpop.f32.mrb[15].mxu1  ;;  %4616 = vrot.lane.b32.xlu0 %v2534_v28, %s5883_s14  ;;  %v9947_v28 = vld [vmem:[#allocation35_spill] sm:$0xff]  ;;  %9948 = vst [vmem:[#allocation79_spill] sm:$0xff] %v8351_v40  ;;  %v2823_v4 = vand.u32 2147483647, %v2813_v47 }
 0x3c8   : > { %5659 = vset.pattern.permute.xlu1 %v9944_v2  ;;  %v9946_v36 = vld [vmem:[#allocation30_spill] sm:$0xff]  ;;  %9951 = vst [vmem:[#allocation48_spill] sm:$0xff] %v8359_v16  ;;  %v3277_v33 = vand.u32 2147483647, %v3267_v1  ;;  %v2831_v27 = vsub.f32 1.0, %v2821_v37  ;;  %v2836_v54 = vmax.f32 %v2826_v39, 0.0 }
 0x3c9   : > { %v2890_v32 = vsub.f32 %v9946_v36, %v6369_v63  ;;  %3865 = vperm.xlu1 %5659, %v9947_v28   ;;  %v9952_v36 = vld [vmem:[#allocation65_spill] sm:$0xff]  ;;  %v3280_v0 = vand.u32 2147483647, %v3270_v34  ;;  %v2907_v3 = vsub.f32 1.0, %v2897_v50  ;;  %v9957_v1 = vmov 14   ;;  %v9958_v13 = vld [vmem:[#allocation67_spill] sm:$0xff] }
 0x3ca   : > { %v8353_v49 = vpop.permute.xlu0 %3967  ;;  %v2815_v8 = vsub.f32 %v9952_v36, %v6333_v22  ;;  %v2828_v24 = vsub.f32 1.0, %v2818_v29  ;;  %v2839_v36 = vmax.f32 %v2829_v23, 0.0  ;;  %v2892_v41 = vsub.f32 %v9958_v13, %v6369_v63  ;;  %v9959_v34 = vld [vmem:[#allocation16_spill] sm:$0xff]  ;;  %v9961_v39 = vld [vmem:[#allocation19_spill] sm:$0xff] }
 0x3cb   : > { %9949 = vst [vmem:[#allocation8_spill] sm:$0xff] %v8353_v49  ;;  %v9955_v49 = vld [vmem:[#allocation45_spill] sm:$0xff]  ;;  %v2900_v47 = vand.u32 2147483647, %v2890_v32  ;;  %v3272_v31 = vsub.f32 %v9959_v34, %v6333_v22  ;;  %v3287_v32 = vsub.f32 1.0, %v3277_v33  ;;  %v3346_v50 = vsub.f32 %v9961_v39, %v6369_v63 }
 0x3cc   : > { %v8365_v57 = vpop.permute.xlu1 %3397  ;;  %v8367_v17 = vpop.f32.mrb[16].mxu1  ;;  %v8371_v5 = vmul.f32 %v9955_v49, %v8264_v58  ;;  %v2833_v58 = vsub.f32 1.0, %v2823_v4  ;;  %v2841_v13 = vmax.f32 %v2831_v27, 0.0  ;;  %v2825_v23 = vand.u32 2147483647, %v2815_v8  ;;  %v9962_v4 = vld [vmem:[#allocation58_spill] sm:$0xff] }
 0x3cd   : > { %9954 = vst [vmem:[#allocation62_spill] sm:$0xff] %v8367_v17  ;;  %5661 = vset.pattern.permute.xlu1 %v9957_v1  ;;  %v5386_v37 = vpop.f32.mrb[17].mxu1  ;;  %v3290_v34 = vsub.f32 1.0, %v3280_v0  ;;  %v2910_v25 = vsub.f32 1.0, %v2900_v47  ;;  %v3349_v33 = vsub.f32 %v9962_v4, %v6369_v63  ;;  %v2838_v49 = vmax.f32 %v2828_v24, 0.0  ;;  %v8396_v27 = vld [vmem:[%s5980_s10 + $0x8] sm:$0xff] }
 0x3ce   : > { %9956 = vst [vmem:[#allocation63_spill] sm:$0xff] %v8371_v5  ;;  %4015 = vperm.xlu1 %5661, %v9947_v28   ;;  %v2542_v17 = vpop.f32.mrb[18].mxu1  ;;  %v8379_v18 = vpop.permute.xlu0 %3975  ;;  %v2898_v37 = vand.u32 2147483647, %v2888_v30  ;;  %v2917_v28 = vmax.f32 %v2907_v3, 0.0  ;;  %v2843_v8 = vmax.f32 %v2833_v58, 0.0 }
 0x3cf   : > { %9960 = vst [vmem:[#allocation30_spill] sm:$0xff] %v8379_v18  ;;  %v5387_v29 = vpop.f32.mrb[19].mxu1  ;;  %4620 = vrot.lane.b32.xlu0 %v2542_v17, %s5883_s14  ;;  %v8388_v18 = vmul.f32 %v8203_v19, %v2836_v54  ;;  %v2902_v39 = vand.u32 2147483647, %v2892_v41  ;;  %v3282_v42 = vand.u32 2147483647, %v3272_v31 }
 0x3d0   : > { %v8385_v5 = vpop.permute.xlu1 %3405  ;;  %v8393_v29 = vmul.f32 %v8209_v7, %v2839_v36  ;;  %v8399_v0 = vmax.f32 %v3287_v32, 0.0  ;;  %v3356_v30 = vand.u32 2147483647, %v3346_v50  ;;  %v9963_v19 = vld [vmem:[#allocation64_spill] sm:$0xff]  ;;  %v2835_v3 = vsub.f32 1.0, %v2825_v23  ;;  %v9965_v32 = vld [vmem:[#allocation66_spill] sm:$0xff] }
 0x3d1   : > { %v3116_v17 = vsub.f32 %v9963_v19, %v6369_v63  ;;  %v2908_v24 = vsub.f32 1.0, %v2898_v37  ;;  %v8405_v47 = vmax.f32 %v3290_v34, 0.0  ;;  %v8408_v7 = vmul.f32 %v8217_v53, %v2841_v13  ;;  %v9967_v37 = vld [vmem:[#allocation54_spill] sm:$0xff]  ;;  %v9969_v53 = vld [vmem:[#allocation84_spill] sm:$0xff] }
 0x3d2   : > { %4019 = vperm.xlu1 %5661, %v8396_v27   ;;  %v2927_v36 = vmul.f32 %v2917_v28, %v8183_v15  ;;  %v2920_v41 = vmax.f32 %v2910_v25, 0.0  ;;  %v3359_v58 = vand.u32 2147483647, %v3349_v33  ;;  %v3351_v50 = vsub.f32 %v9965_v32, %v6369_v63 }
 0x3d3   : > { %v8403_v54 = vpop.permute.xlu0 %4095  ;;  %v2912_v4 = vsub.f32 1.0, %v2902_v39  ;;  %v3292_v19 = vsub.f32 1.0, %v3282_v42  ;;  %v3037_v34 = vsub.f32 %v9967_v37, %v6333_v22  ;;  %v9968_v16 = vmov 30   ;;  %v9973_v39 = vld [vmem:[#allocation76_spill] sm:$0xff] }
 0x3d4   : > { %9964 = vst [vmem:[#allocation35_spill] sm:$0xff] %v8403_v54  ;;  %v8410_v31 = vpop.permute.xlu1 %3409  ;;  %v9966_v54 = vld [vmem:[#allocation43_spill] sm:$0xff]  ;;  %v2894_v13 = vsub.f32 %v9969_v53, %v6369_v63  ;;  %v3366_v40 = vsub.f32 1.0, %v3356_v30  ;;  %v8423_v15 = vmul.f32 %v8219_v62, %v2843_v8  ;;  %v3126_v25 = vand.u32 2147483647, %v3116_v17  ;;  %v9974_v30 = vld [vmem:[#allocation33_spill] sm:$0xff] }
 0x3d5   : > { %v3274_v23 = vsub.f32 %v9966_v54, %v6333_v22  ;;  %v8428_v42 = vmax.f32 %v2835_v3, 0.0  ;;  %v2918_v33 = vmax.f32 %v2908_v24, 0.0  ;;  %v3266_v54 = vsub.f32 %v9973_v39, %v6333_v22 }
 0x3d6   : > { %5662 = vset.pattern.permute.xlu1 %v9968_v16  ;;  %9970 = vst [vmem:[#allocation55_spill] sm:$0xff] %v8423_v15  ;;  %v3347_v32 = vsub.f32 %v8239_v20, %v6369_v63  ;;  %v2977_v53 = vmul.f32 %v9974_v30, %v2927_v36  ;;  %v2930_v62 = vmul.f32 %v2920_v41, %v8191_v26  ;;  %v3369_v8 = vsub.f32 1.0, %v3359_v58  ;;  %v9976_v16 = vld [vmem:[#allocation95_spill] sm:$0xff]  ;;  %v9979_v58 = vld [vmem:[#allocation68_spill] sm:$0xff] }
 0x3d7   : > { %4099 = vperm.xlu1 %5662, %v8396_v27   ;;  %v8426_v28 = vpop.permute.xlu0 %4111  ;;  %9972 = vst [vmem:[#allocation6_spill] sm:$0xff] %v8428_v42  ;;  %v3361_v17 = vand.u32 2147483647, %v3351_v50  ;;  %v2922_v15 = vmax.f32 %v2912_v4, 0.0  ;;  %v8440_v3 = vand.u32 2147483647, %v3274_v23  ;;  %v3119_v38 = vsub.f32 %v9976_v16, %v6369_v63 }
 0x3d8   : > { %9971 = vst [vmem:[#allocation65_spill] sm:$0xff] %v8426_v28  ;;  %v8434_v37 = vpop.permute.xlu1 %3417  ;;  %v8438_v28 = vmax.f32 %v3292_v19, 0.0  ;;  %v3047_v24 = vand.u32 2147483647, %v3037_v34  ;;  %v8442_v42 = vand.u32 2147483647, %v2894_v13  ;;  %v2928_v41 = vmul.f32 %v2918_v33, %v2838_v49 }
 0x3d9   : > { %v8444_v39 = vmax.f32 %v3366_v40, 0.0  ;;  %v3136_v20 = vsub.f32 1.0, %v3126_v25  ;;  %v9977_v36 = vmov 15   ;;  %v3353_v50 = vsub.f32 %v9979_v58, %v6369_v63  ;;  %v8454_v23 = vld [vmem:[%s5980_s10] sm:$0xff]  ;;  %v9982_v34 = vld [vmem:[#allocation47_spill] sm:$0xff] }
 0x3da   : > { %9975 = vst [vmem:[#allocation45_spill] sm:$0xff] %v8438_v28  ;;  %v3276_v4 = vand.u32 2147483647, %v3266_v54  ;;  %v3357_v19 = vand.u32 2147483647, %v3347_v32  ;;  %9980 = vst [vmem:[#allocation16_spill] sm:$0xff] %v8454_v23  ;;  %v2980_v13 = vmul.f32 %v9982_v34, %v2930_v62  ;;  %v8463_v30 = vadd.f32 %v2977_v53, %v8313_v43 }
 0x3db   : > { %5663 = vset.pattern.permute.xlu1 %v9977_v36  ;;  %v8449_v26 = vpop.permute.xlu0 %4119  ;;  %v8460_v25 = vmax.f32 %v3369_v8, 0.0  ;;  %v3371_v16 = vsub.f32 1.0, %v3361_v17  ;;  %v8466_v49 = vmul.f32 %v2922_v15, %v8193_v14  ;;  %v3057_v33 = vsub.f32 1.0, %v3047_v24  ;;  %v9983_v54 = vld [vmem:[#allocation41_spill] sm:$0xff]  ;;  %v9984_v58 = vld [vmem:[#allocation100_spill] sm:$0xff]  ;;  %v9989_v36 = vld [vmem:[#allocation23_spill] sm:$0xff] }
 0x3dc   : > { %9978 = vst [vmem:[#allocation67_spill] sm:$0xff] %v8449_v26  ;;  %4245 = vperm.xlu1 %5663, %v8454_v23   ;;  %v8457_v40 = vpop.permute.xlu1 %3425  ;;  %v3038_v32 = vsub.f32 %v9983_v54, %v6333_v22  ;;  %v3118_v26 = vsub.f32 %v9984_v58, %v6369_v63  ;;  %v9985_v62 = vld [vmem:[#allocation9_spill] sm:$0xff]  ;;  %v3146_v34 = vmax.f32 %v3136_v20, 0.0  ;;  %v3129_v17 = vand.u32 2147483647, %v3119_v38 }
 0x3dd   : > { %9981 = vst [vmem:[#allocation19_spill] sm:$0xff] %v8457_v40  ;;  %v2976_v8 = vmul.f32 %v9985_v62, %v8388_v18  ;;  %v8475_v40 = vand.u32 2147483647, %v3353_v50  ;;  %v3286_v43 = vsub.f32 1.0, %v3276_v4  ;;  %v3269_v14 = vsub.f32 %v8149_v56, %v6333_v22  ;;  %v9990_v38 = vld [vmem:[#allocation21_spill] sm:$0xff]  ;;  %v9991_v18 = vld [vmem:[#allocation82_spill] sm:$0xff] }
 0x3de   : > { %v3367_v15 = vsub.f32 1.0, %v3357_v19  ;;  %v9986_v53 = vmov 31   ;;  %v8484_v58 = vmax.f32 %v3371_v16, 0.0  ;;  %v3121_v20 = vsub.f32 %v9990_v38, %v6369_v63  ;;  %v9997_v38 = vld [vmem:[#allocation11_spill] sm:$0xff] }
 0x3df   : > { %v8491_v50 = vadd.f32 %v2980_v13, %v8357_v48  ;;  %v3067_v56 = vmax.f32 %v3057_v33, 0.0  ;;  %v3048_v4 = vand.u32 2147483647, %v3038_v32  ;;  %v3128_v19 = vand.u32 2147483647, %v3118_v26  ;;  %v9993_v26 = vld [vmem:[#allocation12_spill] sm:$0xff] }
 0x3e0   : > { %5664 = vset.pattern.permute.xlu1 %v9986_v53  ;;  %v8480_v24 = vpop.permute.xlu1 %3433  ;;  %v8482_v54 = vpop.permute.xlu0 %4341  ;;  %v3348_v62 = vsub.f32 %v8255_v52, %v6369_v63  ;;  %v2986_v16 = vadd.f32 %v2976_v8, %v8287_v11  ;;  %v3139_v53 = vsub.f32 1.0, %v3129_v17  ;;  %v3296_v48 = vmax.f32 %v3286_v43, 0.0  ;;  %v9994_v52 = vld [vmem:[#allocation50_spill] sm:$0xff] }
 0x3e1   : > { %9987 = vst [vmem:[#allocation58_spill] sm:$0xff] %v8480_v24  ;;  %9988 = vst [vmem:[#allocation64_spill] sm:$0xff] %v8482_v54  ;;  %4325 = vperm.xlu1 %5664, %v8454_v23   ;;  %v3156_v54 = vmul.f32 %v3146_v34, %v8279_v12  ;;  %v3268_v24 = vsub.f32 %v9991_v18, %v6333_v22  ;;  %v3279_v13 = vand.u32 2147483647, %v3269_v14  ;;  %v3377_v28 = vmax.f32 %v3367_v15, 0.0  ;;  %v9995_v12 = vld [vmem:[#allocation28_spill] sm:$0xff] }
 0x3e2   : > { %v8504_v32 = vmul.f32 %v9993_v26, %v2928_v41  ;;  %v2979_v11 = vmul.f32 %v9994_v52, %v8393_v29  ;;  %v3040_v8 = vsub.f32 %v9995_v12, %v6333_v22  ;;  %v3131_v34 = vand.u32 2147483647, %v3121_v20 }
 0x3e3   : > { %v3058_v17 = vsub.f32 1.0, %v3048_v4  ;;  %v3138_v43 = vsub.f32 1.0, %v3128_v19  ;;  %v3157_v14 = vmul.f32 %v8338_v44, %v3067_v56  ;;  %v3358_v15 = vand.u32 2147483647, %v3348_v62 }
 0x3e4   : > { %v3464_v23 = vpop.permute.xlu1 %3463  ;;  %v8501_v33 = vpop.permute.xlu0 %4349  ;;  %v9996_v18 = vmov 0.0   ;;  %v3206_v41 = vmul.f32 %v9997_v38, %v3156_v54  ;;  %v3149_v26 = vmax.f32 %v3139_v53, 0.0  ;;  %v3271_v29 = vsub.f32 %v8175_v45, %v6333_v22  ;;  %v9998_v53 = vld [vmem:[#allocation44_spill] sm:$0xff]  ;;  %v9999_v45 = vld [vmem:[#allocation97_spill] sm:$0xff] }
 0x3e5   : > { %9992 = vst [vmem:[#allocation66_spill] sm:$0xff] %v8501_v33  ;;  %4329 = vperm.xlu1 %5664, %v8396_v27   ;;  %5391 = vmatpush3.bf16.msra.mxu0 %v3464_v23  ;;  %v3278_v33 = vand.u32 2147483647, %v3268_v24  ;;  %v3289_v52 = vsub.f32 1.0, %v3279_v13  ;;  %v3387_v20 = vmul.f32 %v3377_v28, %v8399_v0  ;;  %v3350_v23 = vsub.f32 %v8275_v46, %v6369_v63  ;;  %v10001_v28 = vld [vmem:[#allocation88_spill] sm:$0xff] }
 0x3e6   : > { %5392 = vmatprep.subr.bf16.mxu0 %v9996_v18  ;;  %v3386_v4 = vmul.f32 %v8444_v39, %v3296_v48  ;;  %v8521_v56 = vadd.f32 %v2979_v11, %v8299_v35  ;;  %v3050_v19 = vand.u32 2147483647, %v3040_v8  ;;  %v3141_v54 = vsub.f32 1.0, %v3131_v34  ;;  %v8532_v48 = vld [vmem:[%s5980_s10 + $0x18] sm:$0xff] }
 0x3e7   : > { %v3123_v24 = vsub.f32 %v9998_v53, %v6369_v63  ;;  %v3148_v0 = vmax.f32 %v3138_v43, 0.0  ;;  %v3207_v46 = vmul.f32 %v10001_v28, %v3157_v14  ;;  %v3368_v38 = vsub.f32 1.0, %v3358_v15  ;;  %v10002_v34 = vld [vmem:[#allocation59_spill] sm:$0xff] }
 0x3e8   : > { %v3468_v44 = vpop.permute.xlu1 %3467  ;;  %v3436_v39 = vmul.f32 %v8365_v57, %v3386_v4  ;;  %v3068_v35 = vmax.f32 %v3058_v17, 0.0  ;;  %v3159_v13 = vmul.f32 %v3149_v26, %v8282_v10  ;;  %v3288_v11 = vsub.f32 1.0, %v3278_v33  ;;  %v10003_v4 = vld [vmem:[#allocation99_spill] sm:$0xff] }
 0x3e9   : > { %5665 = vset.pattern.permute.xlu1 %v9944_v2  ;;  %5393 = vmatpush3.bf16.msra.mxu0 %v9999_v45  ;;  %v8527_v62 = vpop.permute.xlu0 %4027  ;;  %v3281_v12 = vand.u32 2147483647, %v3271_v29  ;;  %v3299_v8 = vmax.f32 %v3289_v52, 0.0  ;;  %v3437_v43 = vmul.f32 %v10002_v34, %v3387_v20  ;;  %v3360_v53 = vand.u32 2147483647, %v3350_v23  ;;  %v5757_v52 = vld [vmem:[%s5975_s25] sm:$0xff]  }
 0x3ea   : > { %10000 = vst [vmem:[#allocation43_spill] sm:$0xff] %v8527_v62  ;;  %3877 = vperm.xlu1 %5665, %v8532_v48   ;;  %5394 = vmatprep.subr.bf16.mxu0 %v9996_v18  ;;  %v3216_v14 = vadd.f32 %v3206_v41, %v2986_v16  ;;  %v3060_v57 = vsub.f32 1.0, %v3050_v19  ;;  %v3042_v45 = vsub.f32 %v10003_v4, %v6333_v22  ;;  %v3151_v28 = vmax.f32 %v3141_v54, 0.0  ;;  %v10005_v16 = vld [vmem:[#allocation7_spill] sm:$0xff] }
 0x3eb   : > { %v3133_v62 = vand.u32 2147483647, %v3123_v24  ;;  %v3217_v10 = vadd.f32 %v3207_v46, %v8463_v30  ;;  %v3158_v33 = vmul.f32 %v3148_v0, %v3068_v35  ;;  %v3378_v26 = vmax.f32 %v3368_v38, 0.0 }
 0x3ec   : > { %v8538_v15 = vpop.permute.xlu1 %3565  ;;  %v3446_v29 = vadd.f32 %v3436_v39, %v3216_v14  ;;  %v3209_v41 = vmul.f32 %v10005_v16, %v3159_v13  ;;  %v3298_v20 = vmax.f32 %v3288_v11, 0.0  ;;  %v3291_v23 = vsub.f32 1.0, %v3281_v12  ;;  %v10007_v11 = vld [vmem:[#allocation101_spill] sm:$0xff]  ;;  %v10008_v12 = vld [vmem:[#allocation103_spill] sm:$0xff] }
 0x3ed   : > { %5395 = vmatpush3.bf16.msra.mxu0 %v3468_v44  ;;  %v8542_v17 = vpop.permute.xlu0 %4051  ;;  %v3273_v19 = vsub.f32 %v8195_v55, %v6333_v22  ;;  %v10006_v44 = vmov 45   ;;  %v3370_v54 = vsub.f32 1.0, %v3360_v53  ;;  %v3352_v30 = vsub.f32 %v8301_v61, %v6369_v63 }
 0x3ee   : > { %10004 = vst [vmem:[#allocation54_spill] sm:$0xff] %v8542_v17  ;;  %4479 = vrot.lane.b32.xlu1 %v5757_v52, %s5875_s13  ;;  %5396 = vmatprep.subr.bf16.mxu0 %v9996_v18  ;;  %v3447_v24 = vadd.f32 %v3437_v43, %v3217_v10  ;;  %v3389_v0 = vmul.f32 %v8460_v25, %v3299_v8  ;;  %v3070_v38 = vmax.f32 %v3060_v57, 0.0  ;;  %v3052_v39 = vand.u32 2147483647, %v3042_v45  ;;  %v10009_v8 = vld [vmem:[#allocation53_spill] sm:$0xff]  ;;  %v10086_v17 = vld [vmem:[#allocation35_spill] sm:$0xff] }
 0x3ef   : > { %5666 = vset.pattern.permute.xlu1 %v10006_v44  ;;  %v3161_v35 = vmul.f32 %v3151_v28, %v8294_v6  ;;  %v3143_v13 = vsub.f32 1.0, %v3133_v62  ;;  %v3208_v55 = vmul.f32 %v10008_v12, %v3158_v33  ;;  %v3388_v14 = vmul.f32 %v3378_v26, %v3298_v20 }
 0x3f0   : > { %v8555_v46 = vpop.permute.xlu1 %3573  ;;  %v3456_v34 = vpack.c.bf16 %v3447_v24, %v3446_v29  ;;  %v3439_v53 = vmul.f32 %v8410_v31, %v3389_v0  ;;  %v2988_v25 = vadd.f32 %v8504_v32, %v8344_v21  ;;  %v3125_v43 = vsub.f32 %v10009_v8, %v6369_v63  ;;  %v10010_v31 = vld [vmem:[#allocation70_spill] sm:$0xff]  ;;  %v10011_v32 = vld [vmem:[#allocation40_spill] sm:$0xff] }
 0x3f1   : > { %5397 = vmatpush3.bf16.msra.mxu0 %v10007_v11  ;;  %v3301_v6 = vmax.f32 %v3291_v23, 0.0  ;;  %v3283_v62 = vand.u32 2147483647, %v3273_v19  ;;  %v3380_v57 = vmax.f32 %v3370_v54, 0.0  ;;  %v3362_v4 = vand.u32 2147483647, %v3352_v30 }
 0x3f2   : > { %3959 = vperm.xlu1 %5666, %v8396_v27   ;;  %v8562_v61 = vpop.permute.xlu0 %4185  ;;  %v3438_v45 = vmul.f32 %v8385_v5, %v3388_v14  ;;  %v3219_v28 = vadd.f32 %v3209_v41, %v8521_v56  ;;  %v2981_v33 = vmul.f32 %v10010_v31, %v8408_v7  ;;  %v3062_v21 = vsub.f32 1.0, %v3052_v39  ;;  %v10012_v5 = vld [vmem:[#allocation10_spill] sm:$0xff] }
 0x3f3   : > { %v3044_v26 = vsub.f32 %v10011_v32, %v6333_v22  ;;  %v3160_v29 = vmul.f32 %v8349_v60, %v3070_v38  ;;  %v3211_v52 = vmul.f32 %v10012_v5, %v3161_v35  ;;  %v3153_v56 = vmax.f32 %v3143_v13, 0.0  ;;  %v8588_v60 = vld [vmem:[%s5980_s10 + $0x10] sm:$0xff]  ;;  %v10023_v5 = vld [vmem:[#allocation37_spill] sm:$0xff] }
 0x3f4   : > { %v8570_v10 = vpop.permute.xlu1 %3577  ;;  %5399 = vmatmul.mubr.msk.bf16.vlgmr.msra.gmra.mrb[20].mxu0 %vm1439_vm2, %v3456_v34  ;;  %v3218_v16 = vadd.f32 %v3208_v55, %v2988_v25  ;;  %v3449_v41 = vadd.f32 %v3439_v53, %v3219_v28  ;;  %v3135_v23 = vand.u32 2147483647, %v3125_v43  ;;  %v3293_v7 = vsub.f32 1.0, %v3283_v62  ;;  %v10015_v34 = vld [vmem:[#allocation105_spill] sm:$0xff]  ;;  %v10016_v25 = vld [vmem:[#allocation112_spill] sm:$0xff] }
 0x3f5   : > { %5402 = vmatprep.mubr.msk.bf16.mxu0 %vm5845_vm1, %v9996_v18  ;;  %v3275_v19 = vsub.f32 %v8215_v51, %v6333_v22  ;;  %v3391_v54 = vmul.f32 %v8484_v58, %v3301_v6  ;;  %v3390_v30 = vmul.f32 %v3380_v57, %v8405_v47  ;;  %v3372_v24 = vsub.f32 1.0, %v3362_v4  ;;  %v10018_v57 = vld [vmem:[#allocation90_spill] sm:$0xff] }
 0x3f6   : > { %5667 = vset.pattern.permute.xlu1 %v9957_v1  ;;  %v8582_v20 = vpop.permute.xlu0 %4197  ;;  %v3354_v0 = vsub.f32 %v8332_v59, %v6369_v63  ;;  %v3448_v38 = vadd.f32 %v3438_v45, %v3218_v16  ;;  %v10013_v35 = vsub.f32 1.0, %v8475_v40  ;;  %v2991_v51 = vadd.f32 %v2981_v33, %v8306_v9 }
 0x3f7   : > { %4023 = vperm.xlu1 %5667, %v8588_v60   ;;  %v10014_v58 = vsub.f32 %v9989_v36, %v6369_v63  ;;  %v3072_v12 = vmax.f32 %v3062_v21, 0.0  ;;  %v3054_v55 = vand.u32 2147483647, %v3044_v26  ;;  %v3210_v47 = vmul.f32 %v10015_v34, %v3160_v29  ;;  %v10022_v29 = vld [vmem:[#allocation55_spill] sm:$0xff] }
 0x3f8   : > { %v8594_v39 = vpop.permute.xlu1 %3585  ;;  %v3383_v13 = vmax.f32 %v10013_v35, 0.0  ;;  %v3457_v14 = vpack.c.bf16 %v3449_v41, %v3448_v38  ;;  %v3441_v53 = vmul.f32 %v8434_v37, %v3391_v54  ;;  %v3163_v8 = vmul.f32 %v3153_v56, %v10016_v25  ;;  %v10020_v37 = vld [vmem:[#allocation15_spill] sm:$0xff] }
 0x3f9   : > { %v3365_v11 = vand.u32 2147483647, %v10014_v58  ;;  %v3145_v43 = vsub.f32 1.0, %v3135_v23  ;;  %v3285_v40 = vand.u32 2147483647, %v3275_v19  ;;  %v3221_v6 = vadd.f32 %v3211_v52, %v2991_v51  ;;  %v10029_v58 = vld [vmem:[#allocation48_spill] sm:$0xff] }
 0x3fa   : > { %v8604_v59 = vpop.permute.xlu0 %4205  ;;  %v10017_v62 = vmov 30   ;;  %v3303_v9 = vmax.f32 %v3293_v7, 0.0  ;;  %v3440_v36 = vmul.f32 %v10018_v57, %v3390_v30  ;;  %v3382_v4 = vmax.f32 %v3372_v24, 0.0  ;;  %v10025_v7 = vld [vmem:[#allocation60_spill] sm:$0xff]  ;;  %v10036_v57 = vld [vmem:[#allocation19_spill] sm:$0xff] }
 0x3fb   : > { %5668 = vset.pattern.permute.xlu1 %v10017_v62  ;;  %v3364_v45 = vand.u32 2147483647, %v3354_v0  ;;  %v2982_v31 = vmul.f32 %v10020_v37, %v8466_v49  ;;  %v10021_v33 = vsub.f32 1.0, %v8442_v42  ;;  %v3294_v32 = vsub.f32 1.0, %v8440_v3  ;;  %v10026_v42 = vld [vmem:[#allocation79_spill] sm:$0xff]  ;;  %v10027_v3 = vld [vmem:[#allocation45_spill] sm:$0xff] }
 0x3fc   : > { %4103 = vperm.xlu1 %5668, %v8588_v60   ;;  %v8610_v28 = vpop.permute.xlu1 %3593  ;;  %5403 = vmatmul.mubr.msk.bf16.gmra.mrb[24].mxu0 %vm1439_vm2, %v3457_v14  ;;  %v3375_v26 = vsub.f32 1.0, %v3365_v11  ;;  %v2983_v52 = vmul.f32 %v10023_v5, %v10022_v29  ;;  %v3064_v56 = vsub.f32 1.0, %v3054_v55  ;;  %v3220_v16 = vadd.f32 %v3210_v47, %v8491_v50  ;;  %v10031_v55 = vld [vmem:[#allocation38_spill] sm:$0xff]  ;;  %v10038_v37 = vld [vmem:[#allocation63_spill] sm:$0xff] }
 0x3fd   : > { %10019 = vst [vmem:[#allocation84_spill] sm:$0xff] %v8610_v28  ;;  %v2924_v21 = vmax.f32 %v10021_v33, 0.0  ;;  %5406 = vmatprep.mubr.msk.bf16.mxu0 %vm5845_vm1, %v9996_v18  ;;  %v3451_v41 = vadd.f32 %v3441_v53, %v3221_v6  ;;  %v3213_v49 = vmul.f32 %v10025_v7, %v3163_v8  ;;  %v3155_v19 = vmax.f32 %v3145_v43, 0.0  ;;  %v10032_v14 = vld [vmem:[#allocation6_spill] sm:$0xff]  ;;  %v10033_v53 = vld [vmem:[#allocation24_spill] sm:$0xff]  ;;  %v10035_v43 = vld [vmem:[#allocation107_spill] sm:$0xff] }
 0x3fe   : > { %v8623_v23 = vpop.permute.xlu0 %4209  ;;  %v3162_v54 = vmul.f32 %v10026_v42, %v3072_v12  ;;  %v3295_v30 = vsub.f32 1.0, %v3285_v40  ;;  %v3392_v24 = vmul.f32 %v3382_v4, %v10027_v3  ;;  %v3374_v0 = vsub.f32 1.0, %v3364_v45  ;;  %v10034_v12 = vld [vmem:[#allocation18_spill] sm:$0xff]  ;;  %v10044_v3 = vld [vmem:[#allocation57_spill] sm:$0xff] }
 0x3ff   : > { %10024 = vst [vmem:[#allocation76_spill] sm:$0xff] %v8623_v23  ;;  %v3450_v38 = vadd.f32 %v3440_v36, %v3220_v16  ;;  %v3393_v35 = vmul.f32 %v3383_v13, %v3303_v9  ;;  %v10030_v50 = vsub.f32 1.0, %v10029_v58  ;;  %v2934_v34 = vmul.f32 %v2924_v21, %v10031_v55  ;;  %v10037_v4 = vld [vmem:[#allocation98_spill] sm:$0xff] }
 0x400   : > { %4107 = vperm.xlu1 %5668, %v8532_v48   ;;  %v8629_v51 = vpop.permute.xlu1 %3601  ;;  %v3304_v47 = vmax.f32 %v3294_v32, 0.0  ;;  %v2935_v25 = vmul.f32 %v10033_v53, %v10032_v14  ;;  %v2993_v8 = vadd.f32 %v2983_v52, %v10034_v12  ;;  %v3212_v40 = vmul.f32 %v10035_v43, %v3162_v54  ;;  %v10039_v32 = vld [vmem:[#allocation49_spill] sm:$0xff]  ;;  %v10043_v54 = vld [vmem:[#allocation91_spill] sm:$0xff] }
 0x401   : > { %10028 = vst [vmem:[#allocation33_spill] sm:$0xff] %v8629_v51  ;;  %v3154_v11 = vmax.f32 %v10030_v50, 0.0  ;;  %v3458_v6 = vpack.c.bf16 %v3451_v41, %v3450_v38  ;;  %v3443_v13 = vmul.f32 %v10036_v57, %v3393_v35  ;;  %v3385_v9 = vmax.f32 %v3375_v26, 0.0  ;;  %v10041_v26 = vld [vmem:[#allocation51_spill] sm:$0xff]  ;;  %v10048_v12 = vld [vmem:[#allocation77_spill] sm:$0xff] }
 0x402   : > { %v3074_v36 = vmax.f32 %v3064_v56, 0.0  ;;  %v3165_v45 = vmul.f32 %v3155_v19, %v10037_v4  ;;  %v2992_v33 = vadd.f32 %v2982_v31, %v10038_v37  ;;  %v3305_v21 = vmax.f32 %v3295_v30, 0.0  ;;  %v10042_v19 = vld [vmem:[#allocation111_spill] sm:$0xff] }
 0x403   : > { %v8641_v29 = vpop.permute.xlu0 %4249  ;;  %v3442_v5 = vmul.f32 %v10039_v32, %v3392_v24  ;;  %v3384_v16 = vmax.f32 %v3374_v0, 0.0  ;;  %v3223_v7 = vadd.f32 %v3213_v49, %v2993_v8  ;;  %v10040_v42 = vmov 46   ;;  %v10045_v24 = vld [vmem:[#allocation56_spill] sm:$0xff]  ;;  %v10046_v0 = vld [vmem:[#allocation34_spill] sm:$0xff] }
 0x404   : > { %5669 = vset.pattern.permute.xlu1 %v10040_v42  ;;  %5407 = vmatmul.mubr.msk.bf16.gmra.mrb[28].mxu0 %vm1439_vm2, %v3458_v6  ;;  %v2985_v31 = vmul.f32 %v10041_v26, %v2935_v25  ;;  %v3222_v56 = vadd.f32 %v3212_v40, %v2992_v33  ;;  %v2714_v30 = vmul.f32 %v10043_v54, %v10042_v19  ;;  %v10049_v8 = vmov 15   ;;  %v10050_v6 = vld [vmem:[#allocation73_spill] sm:$0xff]  ;;  %v10060_v19 = vld [vmem:[#allocation16_spill] sm:$0xff] }
 0x405   : > { %4189 = vperm.xlu1 %5669, %v8396_v27   ;;  %v8647_v52 = vpop.permute.xlu1 %3649  ;;  %5410 = vmatprep.mubr.msk.bf16.mxu0 %vm5845_vm1, %v9996_v18  ;;  %v3453_v41 = vadd.f32 %v3443_v13, %v3223_v7  ;;  %v2984_v49 = vmul.f32 %v10044_v3, %v2934_v34  ;;  %v2765_v38 = vmul.f32 %v10046_v0, %v10045_v24  ;;  %v10047_v27 = vld [vmem:[#allocation13_spill] sm:$0xff]  ;;  %v10051_v13 = vld [vmem:[#allocation58_spill] sm:$0xff]  ;;  %v10055_v32 = vmov 31  }
 0x406   : > { %v3164_v35 = vmul.f32 %v3154_v11, %v3074_v36  ;;  %v3215_v50 = vmul.f32 %v10047_v27, %v3165_v45  ;;  %v3394_v55 = vmul.f32 %v3384_v16, %v3304_v47  ;;  %v3452_v14 = vadd.f32 %v3442_v5, %v3222_v56  ;;  %v10053_v47 = vld [vmem:[#allocation14_spill] sm:$0xff]  ;;  %v5760_v0 = vld [vmem:[%s5980_s10 + $0x28] sm:$0xff] }
 0x407   : > { %v8657_v58 = vpop.permute.xlu0 %4257  ;;  %v3395_v53 = vmul.f32 %v3385_v9, %v3305_v21  ;;  %v2764_v25 = vmul.f32 %v10048_v12, %v2714_v30  ;;  %v2995_v40 = vadd.f32 %v2985_v31, %v2765_v38 }
 0x408   : > { %v3214_v34 = vmul.f32 %v10050_v6, %v3164_v35  ;;  %v3459_v57 = vpack.c.bf16 %v3453_v41, %v3452_v14  ;;  %v3444_v45 = vmul.f32 %v10053_v47, %v3394_v55  ;;  %v10059_v41 = vmov 47  }
 0x409   : > { %5670 = vset.pattern.permute.xlu1 %v10049_v8  ;;  %v8662_v43 = vpop.permute.xlu1 %3653  ;;  %v3445_v4 = vmul.f32 %v10051_v13, %v3395_v53  ;;  %v2994_v36 = vadd.f32 %v2984_v49, %v2764_v25  ;;  %v3225_v9 = vadd.f32 %v3215_v50, %v2995_v40  ;;  %v8697_v49 = vld [vmem:[%s5980_s10 + $0x20] sm:$0xff]  ;;  %v10067_v53 = vld [vmem:[#allocation89_spill] sm:$0xff]  ;;  %v10068_v25 = vld [vmem:[#allocation94_spill] sm:$0xff] }
 0x40a   : > { %4253 = vperm.xlu1 %5670, %v8588_v60   ;;  %v3831_v12 = vsub.f32 %v10067_v53, %v6333_v22  ;;  %v3911_v40 = vsub.f32 %v10068_v25, %v6369_v63 }
 0x40b   : > { %v8667_v11 = vpop.permute.xlu0 %4281  ;;  %v3224_v33 = vadd.f32 %v3214_v34, %v2994_v36  ;;  %v3455_v21 = vadd.f32 %v3445_v4, %v3225_v9 }
 0x40c   : > { %10052 = vst [vmem:[#allocation95_spill] sm:$0xff] %v8667_v11  ;;  %5411 = vmatmul.mubr.msk.bf16.gmra.mrb[32].mxu0 %vm1439_vm2, %v3459_v57  ;;  %v3841_v57 = vand.u32 2147483647, %v3831_v12  ;;  %v3921_v13 = vand.u32 2147483647, %v3911_v40  ;;  %v10074_v12 = vld [vmem:[#allocation87_spill] sm:$0xff] }
 0x40d   : > { %v8671_v37 = vpop.permute.xlu1 %3661  ;;  %5414 = vmatprep.mubr.msk.bf16.mxu0 %vm5845_vm1, %v9996_v18  ;;  %v3454_v5 = vadd.f32 %v3444_v45, %v3224_v33  ;;  %v10072_v33 = vld [vmem:[#allocation81_spill] sm:$0xff] }
 0x40e   : > { %10054 = vst [vmem:[#allocation68_spill] sm:$0xff] %v8671_v37  ;;  %5671 = vset.pattern.permute.xlu1 %v10055_v32  ;;  %v3851_v47 = vsub.f32 1.0, %v3841_v57  ;;  %v3931_v45 = vsub.f32 1.0, %v3921_v13 }
 0x40f   : > { %4333 = vperm.xlu1 %5671, %v8588_v60   ;;  %v3460_v26 = vpack.c.bf16 %v3455_v21, %v3454_v5 }
 0x410   : > { %v8677_v16 = vpop.permute.xlu0 %4419 }
 0x411   : > { %v8679_v7 = vpop.permute.xlu1 %3669 }
 0x412   : > { %10056 = vst [vmem:[#allocation47_spill] sm:$0xff] %v8679_v7  ;;  %v8840_v7 = vld [vmem:[%s5980_s10 + $0x48] sm:$0xff] }
 0x413   : > { %4337 = vperm.xlu1 %5671, %v8532_v48  }
 0x414   : > { %5415 = vmatmul.mubr.msk.bf16.gmra.mrb[36].mxu0 %vm1439_vm2, %v3460_v26  ;;  %v8683_v31 = vpop.permute.xlu0 %4423  ;;  %v3861_v26 = vmax.f32 %v3851_v47, 0.0 }
 0x415   : > { %10057 = vst [vmem:[#allocation41_spill] sm:$0xff] %v8683_v31  ;;  %v8685_v56 = vpop.permute.xlu1 %3677 }
 0x416   : > { %10058 = vst [vmem:[#allocation100_spill] sm:$0xff] %v8685_v56 }
 0x417   : > { %5672 = vset.pattern.permute.xlu1 %v10059_v41 }
 0x418   : > { %4415 = vperm.xlu1 %5672, %v10060_v19   ;;  %v8689_v54 = vpop.permute.xlu0 %4435  ;;  %v3941_v19 = vmax.f32 %v3931_v45, 0.0 }
 0x419   : > { %10061 = vst [vmem:[#allocation9_spill] sm:$0xff] %v8689_v54 }
 0x41a   : > { %v8691_v30 = vpop.permute.xlu1 %3735  ;;  %v8748_v57 = vmul.f32 %v3941_v19, %v3861_v26  ;;  %v5761_v26 = vld [vmem:[%s5975_s25 + $0x18] sm:$0xff]  }
 0x41c   : > { %5673 = vset.pattern.permute.xlu1 %v9944_v2  ;;  %v8694_v3 = vpop.permute.xlu0 %4439  ;;  %10077 = vst [vmem:[#allocation99_spill] sm:$0xff] %v8748_v57 }
 0x41d   : > { %10062 = vst [vmem:[#allocation23_spill] sm:$0xff] %v8694_v3  ;;  %3881 = vperm.xlu1 %5673, %v8697_v49  }
 0x41e   : > { %v8700_v24 = vpop.permute.xlu1 %3743 }
 0x421   : > { %3885 = vperm.xlu1 %5673, %v5760_v0   ;;  %v8703_v38 = vpop.permute.xlu0 %3979 }
 0x422   : > { %10063 = vst [vmem:[#allocation21_spill] sm:$0xff] %v8703_v38  ;;  %v8705_v35 = vpop.permute.xlu1 %3747 }
 0x425   : > { %5674 = vset.pattern.permute.xlu1 %v10006_v44  ;;  %v8708_v27 = vpop.permute.xlu0 %3991 }
 0x426   : > { %10064 = vst [vmem:[#allocation82_spill] sm:$0xff] %v8708_v27  ;;  %3963 = vperm.xlu1 %5674, %v8588_v60   ;;  %v8711_v50 = vpop.permute.xlu1 %3755  ;;  %v10085_v27 = vld [vmem:[#allocation46_spill] sm:$0xff] }
 0x427   : > { %v3905_v11 = vsub.f32 %v10085_v27, %v6369_v63  ;;  %v10087_v27 = vld [vmem:[#allocation22_spill] sm:$0xff] }
 0x428   : > { %v3684_v57 = vsub.f32 %v10087_v27, %v6369_v63 }
 0x429   : > { %v3915_v28 = vand.u32 2147483647, %v3905_v11 }
 0x42a   : > { %v8713_v55 = vpop.permute.xlu0 %4447  ;;  %5675 = vset.pattern.permute.xlu1 %v9957_v1  ;;  %v8716_v14 = vpop.permute.xlu1 %3763 }
 0x42b   : > { %10065 = vst [vmem:[#allocation12_spill] sm:$0xff] %v8713_v55  ;;  %10066 = vst [vmem:[#allocation50_spill] sm:$0xff] %v8716_v14  ;;  %4031 = vperm.xlu1 %5675, %v8697_v49   ;;  %v10083_v55 = vld [vmem:[#allocation110_spill] sm:$0xff]  ;;  %v3925_v23 = vsub.f32 1.0, %v3915_v28 }
 0x42e   : > { %v8723_v6 = vpop.permute.xlu0 %4604  ;;  %v8725_v34 = vpop.permute.xlu1 %3771 }
 0x42f   : > { %10069 = vst [vmem:[#allocation28_spill] sm:$0xff] %v8723_v6  ;;  %10070 = vst [vmem:[#allocation11_spill] sm:$0xff] %v8725_v34  ;;  %4035 = vperm.xlu1 %5675, %v5760_v0   ;;  %v10084_v34 = vld [vmem:[#allocation75_spill] sm:$0xff] }
 0x432   : > { %v8727_v4 = vpop.permute.xlu0 %4608 }
 0x433   : > { %10071 = vst [vmem:[#allocation44_spill] sm:$0xff] %v8727_v4  ;;  %5676 = vset.pattern.permute.xlu1 %v10017_v62  ;;  %v8730_v36 = vpop.permute.xlu1 %3789 }
 0x434   : > { %4115 = vperm.xlu1 %5676, %v5760_v0  }
 0x436   : > { %v4613_v9 = vpop.permute.xlu0 %4612 }
 0x437   : > { %v8734_v21 = vsel %vm4712_vm3, %v10072_v33, %v4613_v9  ;;  %v8736_v5 = vpop.permute.xlu1 %3793 }
 0x438   : > { %10073 = vst [vmem:[#allocation97_spill] sm:$0xff] %v8734_v21  ;;  %5677 = vset.pattern.permute.xlu1 %v10040_v42 }
 0x439   : > { %4193 = vperm.xlu1 %5677, %v8588_v60   ;;  %v10079_v60 = vld [vmem:[#allocation74_spill] sm:$0xff] }
 0x43a   : > { %v4617_v53 = vpop.permute.xlu0 %4616  ;;  %v3824_v47 = vsub.f32 %v10079_v60, %v6333_v22 }
 0x43b   : > { %v8742_v25 = vsel %vm4712_vm3, %v10074_v12, %v4617_v53  ;;  %v8744_v40 = vpop.permute.xlu1 %3801 }
 0x43c   : > { %10075 = vst [vmem:[#allocation88_spill] sm:$0xff] %v8742_v25  ;;  %10076 = vst [vmem:[#allocation59_spill] sm:$0xff] %v8744_v40  ;;  %v3834_v9 = vand.u32 2147483647, %v3824_v47  ;;  %v3694_v40 = vand.u32 2147483647, %v3684_v57 }
 0x43d   : > { %5678 = vset.pattern.permute.xlu1 %v10049_v8 }
 0x43e   : > { %4261 = vperm.xlu1 %5678, %v8697_v49   ;;  %v3844_v53 = vsub.f32 1.0, %v3834_v9  ;;  %v10081_v9 = vld [vmem:[#allocation61_spill] sm:$0xff] }
 0x43f   : > { %v8750_v13 = vpop.permute.xlu1 %3809 }
 0x440   : > { %10078 = vst [vmem:[#allocation7_spill] sm:$0xff] %v8750_v13  ;;  %v3854_v19 = vmax.f32 %v3844_v53, 0.0  ;;  %v8779_v53 = vld [vmem:[%s5980_s10 + $0x38] sm:$0xff] }
 0x442   : > { %4265 = vperm.xlu1 %5678, %v5760_v0  }
 0x443   : > { %v8754_v45 = vpop.permute.xlu1 %3817 }
 0x444   : > { %10080 = vst [vmem:[#allocation101_spill] sm:$0xff] %v8754_v45  ;;  %v4134_v45 = vsub.f32 %v10086_v17, %v6369_v63 }
 0x446   : > { %5679 = vset.pattern.permute.xlu1 %v10055_v32 }
 0x447   : > { %4345 = vperm.xlu1 %5679, %v5760_v0  }
 0x448   : > { %v3866_v33 = vpop.permute.xlu1 %3865 }
 0x449   : > { %v3904_v12 = vsub.f32 %v3866_v33, %v6369_v63  ;;  %v5762_v33 = vld [vmem:[%s5980_s10 + $0x30] sm:$0xff] }
 0x44b   : > { %v3914_v21 = vand.u32 2147483647, %v3904_v12  ;;  %4485 = vrot.lane.b32.xlu1 %v5761_v26, %s5875_s13  ;;  %v5763_v26 = vld [vmem:[%s5975_s25 + $0x20] sm:$0xff]  }
 0x44c   : > { %5680 = vset.pattern.permute.xlu1 %v10059_v41 }
 0x44d   : > { %v3924_v60 = vsub.f32 1.0, %v3914_v21  ;;  %v4016_v4 = vpop.permute.xlu1 %4015 }
 0x44e   : > { %v4054_v51 = vsub.f32 %v4016_v4, %v6333_v22  ;;  %v4144_v4 = vand.u32 2147483647, %v4134_v45 }
 0x44f   : > { %v3934_v6 = vmax.f32 %v3924_v60, 0.0  ;;  %4427 = vperm.xlu1 %5680, %v8532_v48  }
 0x450   : > { %v4154_v45 = vsub.f32 1.0, %v4144_v4 }
 0x451   : > { %v3944_v47 = vmul.f32 %v3934_v6, %v3854_v19  ;;  %v8762_v0 = vpop.permute.xlu1 %4019 }
 0x452   : > { %v4055_v17 = vsub.f32 %v8762_v0, %v6333_v22  ;;  %v8832_v0 = vld [vmem:[%s5980_s10 + $0x40] sm:$0xff]  ;;  %s5884_s10 = smov 16  }
 0x453   : > { %v8765_v25 = vmul.f32 %v10081_v9, %v3944_v47  ;;  %5681 = vset.pattern.permute.xlu1 %v9944_v2  ;;  %v10082_v9 = vld [vmem:[#allocation108_spill] sm:$0xff] }
 0x454   : > { %3889 = vperm.xlu1 %5681, %v5762_v33   ;;  %v4065_v38 = vand.u32 2147483647, %v4055_v17 }
 0x456   : > { %v4100_v12 = vpop.permute.xlu1 %4099  ;;  %v4075_v17 = vsub.f32 1.0, %v4065_v38 }
 0x458   : > { %4487 = vrot.lane.b32.xlu1 %v5763_v26, %s5875_s13 }
 0x459   : > { %5683 = vset.pattern.permute.xlu1 %v10006_v44 }
 0x45b   : > { %v8772_v21 = vpop.permute.xlu1 %4245 }
 0x45c   : > { %3971 = vperm.xlu1 %5683, %v8697_v49   ;;  %v4284_v28 = vsub.f32 %v8772_v21, %v6333_v22 }
 0x45e   : > { %v4294_v21 = vand.u32 2147483647, %v4284_v28 }
 0x460   : > { %5685 = vset.pattern.permute.xlu1 %v9957_v1  ;;  %v8776_v48 = vpop.permute.xlu1 %4325 }
 0x461   : > { %4039 = vperm.xlu1 %5685, %v5762_v33  }
 0x464   : > { %v4330_v6 = vpop.permute.xlu1 %4329 }
 0x465   : > { %4043 = vperm.xlu1 %5685, %v8779_v53   ;;  %v4365_v11 = vsub.f32 %v4330_v6, %v6369_v63  ;;  %v3704_v6 = vsub.f32 1.0, %v3694_v40 }
 0x467   : > { %v4375_v57 = vand.u32 2147483647, %v4365_v11 }
 0x469   : > { %5687 = vset.pattern.permute.xlu1 %v10017_v62  ;;  %v8783_v19 = vpop.permute.xlu1 %3877  ;;  %v4385_v11 = vsub.f32 1.0, %v4375_v57  ;;  %v10088_v57 = vld [vmem:[#allocation102_spill] sm:$0xff] }
 0x46a   : > { %4123 = vperm.xlu1 %5687, %v8779_v53  }
 0x46d   : > { %v4480_v60 = vpop.permute.xlu1 %4479 }
 0x46e   : > { %5688 = vset.pattern.permute.xlu1 %v10040_v42  ;;  %5419 = vmatpush3.bf16.msra.mxu1 %v4480_v60 }
 0x46f   : > { %4201 = vperm.xlu1 %5688, %v8697_v49   ;;  %5420 = vmatprep.subr.bf16.mxu1 %v9996_v18 }
 0x471   : > { %v8789_v47 = vpop.permute.xlu1 %3959 }
 0x472   : > { %5421 = vmatpush3.bf16.msra.mxu1 %v10082_v9  ;;  %v3605_v9 = vsub.f32 %v10084_v34, %v6333_v22  ;;  %v4135_v34 = vsub.f32 %v4100_v12, %v6369_v63  ;;  %v4285_v12 = vsub.f32 %v8641_v29, %v6333_v22 }
 0x473   : > { %5689 = vset.pattern.permute.xlu1 %v10049_v8  ;;  %5422 = vmatprep.subr.bf16.mxu1 %v9996_v18 }
 0x474   : > { %4269 = vperm.xlu1 %5689, %v5762_v33   ;;  %v3685_v33 = vsub.f32 %v8647_v52, %v6369_v63  ;;  %v3615_v14 = vand.u32 2147483647, %v3605_v9  ;;  %v3604_v52 = vsub.f32 %v8538_v15, %v6333_v22  ;;  %v4064_v9 = vand.u32 2147483647, %v4054_v51 }
 0x475   : > { %v4145_v27 = vand.u32 2147483647, %v4135_v34  ;;  %v4295_v29 = vand.u32 2147483647, %v4285_v12  ;;  %v3935_v34 = vmax.f32 %v3925_v23, 0.0  ;;  %v4164_v12 = vmax.f32 %v4154_v45, 0.0 }
 0x476   : > { %v8794_v26 = vpop.permute.xlu1 %4023  ;;  %5423 = vmatpush3.bf16.msra.mxu1 %v10083_v55  ;;  %v3825_v55 = vsub.f32 %v8730_v36, %v6333_v22  ;;  %v3695_v36 = vand.u32 2147483647, %v3685_v33  ;;  %v3625_v15 = vsub.f32 1.0, %v3615_v14  ;;  %v3614_v33 = vand.u32 2147483647, %v3604_v52 }
 0x477   : > { %5424 = vmatprep.subr.bf16.mxu1 %v9996_v18  ;;  %v4074_v51 = vsub.f32 1.0, %v4064_v9  ;;  %v4155_v14 = vsub.f32 1.0, %v4145_v27  ;;  %v4305_v9 = vsub.f32 1.0, %v4295_v29  ;;  %v4395_v45 = vmax.f32 %v4385_v11, 0.0 }
 0x478   : > { %4273 = vperm.xlu1 %5689, %v8779_v53   ;;  %v3835_v54 = vand.u32 2147483647, %v3825_v55  ;;  %v3705_v55 = vsub.f32 1.0, %v3695_v36  ;;  %v3624_v52 = vsub.f32 1.0, %v3614_v33  ;;  %v4085_v33 = vmax.f32 %v4075_v17, 0.0 }
 0x479   : > { %v4084_v13 = vmax.f32 %v4074_v51, 0.0  ;;  %v4165_v27 = vmax.f32 %v4155_v14, 0.0 }
 0x47a   : > { %v3845_v37 = vsub.f32 1.0, %v3835_v54  ;;  %v3635_v54 = vmax.f32 %v3625_v15, 0.0  ;;  %v3714_v15 = vmax.f32 %v3704_v6, 0.0  ;;  %v3634_v40 = vmax.f32 %v3624_v52, 0.0 }
 0x47b   : > { %v8799_v60 = vpop.permute.xlu1 %4103  ;;  %v4174_v38 = vmul.f32 %v4164_v12, %v4084_v13  ;;  %v4175_v51 = vmul.f32 %v4165_v27, %v4085_v33 }
 0x47c   : > { %5691 = vset.pattern.permute.xlu1 %v10055_v32  ;;  %v3855_v36 = vmax.f32 %v3845_v37, 0.0  ;;  %v4315_v37 = vmax.f32 %v4305_v9, 0.0  ;;  %v3724_v14 = vmul.f32 %v3714_v15, %v3634_v40  ;;  %v10090_v15 = vld [vmem:[#allocation52_spill] sm:$0xff] }
 0x47d   : > { %4353 = vperm.xlu1 %5691, %v8779_v53   ;;  %v4224_v13 = vmul.f32 %v8562_v61, %v4174_v38  ;;  %v3689_v40 = vsub.f32 %v10090_v15, %v6369_v63 }
 0x47e   : > { %v3945_v18 = vmul.f32 %v3935_v34, %v3855_v36  ;;  %v3774_v34 = vmul.f32 %v8691_v30, %v3724_v14  ;;  %v4405_v36 = vmul.f32 %v4395_v45, %v4315_v37 }
 0x47f   : > { %v8814_v56 = vpop.permute.xlu1 %4107 }
 0x480   : > { %v3995_v29 = vmul.f32 %v8789_v47, %v3945_v18 }
 0x481   : > { %5692 = vset.pattern.permute.xlu1 %v10059_v41 }
 0x482   : > { %4431 = vperm.xlu1 %5692, %v8697_v49   ;;  %v4364_v49 = vsub.f32 %v8776_v48, %v6369_v63 }
 0x484   : > { %v4190_v3 = vpop.permute.xlu1 %4189  ;;  %v4374_v4 = vand.u32 2147483647, %v4364_v49  ;;  %v4304_v49 = vsub.f32 1.0, %v4294_v21 }
 0x485   : > { %v4225_v6 = vmul.f32 %v4190_v3, %v4175_v51  ;;  %v4455_v3 = vmul.f32 %v8677_v16, %v4405_v36 }
 0x486   : > { %5693 = vset.pattern.permute.xlu1 %v9944_v2  ;;  %v3715_v2 = vmax.f32 %v3705_v55, 0.0  ;;  %v4384_v31 = vsub.f32 1.0, %v4374_v4 }
 0x487   : > { %3897 = vperm.xlu1 %5693, %v8832_v0  }
 0x488   : > { %v3725_v23 = vmul.f32 %v3715_v2, %v3635_v54  ;;  %v4394_v28 = vmax.f32 %v4384_v31, 0.0  ;;  %v4314_v2 = vmax.f32 %v4304_v49, 0.0  ;;  %v4004_v31 = vadd.f32 %v8765_v25, %v3774_v34  ;;  %v10091_v49 = vld [vmem:[#allocation85_spill] sm:$0xff] }
 0x489   : > { %v8837_v48 = vpop.permute.xlu1 %4253  ;;  %v3687_v45 = vsub.f32 %v10091_v49, %v6369_v63 }
 0x48a   : > { %v3775_v54 = vmul.f32 %v10088_v57, %v3725_v23  ;;  %v4404_v47 = vmul.f32 %v4394_v28, %v4314_v2  ;;  %v4234_v12 = vadd.f32 %v4224_v13, %v4004_v31  ;;  %v3609_v23 = vsub.f32 %v8594_v39, %v6333_v22 }
 0x48b   : > { %3901 = vperm.xlu1 %5693, %v8840_v7   ;;  %v3699_v28 = vand.u32 2147483647, %v3689_v40  ;;  %v8891_v34 = vand.u32 2147483647, %v3687_v45  ;;  %v3606_v40 = vsub.f32 %v8555_v46, %v6333_v22  ;;  %v4136_v46 = vsub.f32 %v8799_v60, %v6369_v63 }
 0x48c   : > { %v4005_v17 = vadd.f32 %v3995_v29, %v3775_v54  ;;  %v10092_v29 = vld [vmem:[#allocation78_spill] sm:$0xff]  ;;  %v3619_v57 = vand.u32 2147483647, %v3609_v23 }
 0x48d   : > { %v3827_v51 = vsub.f32 %v10092_v29, %v6333_v22 }
 0x48e   : > { %v8843_v55 = vpop.permute.xlu1 %4333  ;;  %v4235_v18 = vadd.f32 %v4225_v6, %v4005_v17  ;;  %v3709_v17 = vsub.f32 1.0, %v3699_v28 }
 0x48f   : > { %5694 = vset.pattern.permute.xlu1 %v10006_v44  ;;  %v3837_v13 = vand.u32 2147483647, %v3827_v51  ;;  %v3607_v51 = vsub.f32 %v8570_v10, %v6333_v22  ;;  %v10095_v10 = vld [vmem:[#allocation30_spill] sm:$0xff] }
 0x490   : > { %3983 = vperm.xlu1 %5694, %v8779_v53   ;;  %v8858_v30 = vadd.f32 %v4455_v3, %v4235_v18  ;;  %v3629_v18 = vsub.f32 1.0, %v3619_v57  ;;  %v3719_v15 = vmax.f32 %v3709_v17, 0.0  ;;  %v4146_v17 = vand.u32 2147483647, %v4136_v46 }
 0x491   : > { %v3847_v3 = vsub.f32 1.0, %v3837_v13 }
 0x492   : > { %v8849_v52 = vpop.permute.xlu1 %4337  ;;  %v3639_v23 = vmax.f32 %v3629_v18, 0.0 }
 0x494   : > { %5695 = vset.pattern.permute.xlu1 %v9957_v1 }
 0x495   : > { %4047 = vperm.xlu1 %5695, %v8832_v0  }
 0x497   : > { %v4416_v4 = vpop.permute.xlu1 %4415 }
 0x498   : > { %v4454_v9 = vmul.f32 %v4416_v4, %v4404_v47  ;;  %v3707_v4 = vsub.f32 1.0, %v8891_v34 }
 0x499   : > { %5697 = vset.pattern.permute.xlu1 %v10017_v62  ;;  %v10089_v62 = vld [vmem:[#allocation83_spill] sm:$0xff] }
 0x49a   : > { %v8860_v61 = vadd.f32 %v4454_v9, %v4234_v12  ;;  %4127 = vperm.xlu1 %5697, %v8832_v0   ;;  %v3829_v21 = vsub.f32 %v10089_v62, %v6333_v22 }
 0x49c   : > { %v4474_v1 = vpack.c.bf16 %v8858_v30, %v8860_v61  ;;  %v8865_v27 = vpop.permute.xlu1 %3881  ;;  %v3839_v33 = vand.u32 2147483647, %v3829_v21  ;;  %v3826_v21 = vsub.f32 %v8736_v5, %v6333_v22  ;;  %v3857_v5 = vmax.f32 %v3847_v3, 0.0 }
 0x49e   : > { %4131 = vperm.xlu1 %5697, %v8840_v7   ;;  %v3849_v39 = vsub.f32 1.0, %v3839_v33  ;;  %v3907_v33 = vsub.f32 %v8783_v19, %v6369_v63  ;;  %v4137_v19 = vsub.f32 %v8814_v56, %v6369_v63  ;;  %v3836_v28 = vand.u32 2147483647, %v3826_v21 }
 0x49f   : > { %v3617_v56 = vand.u32 2147483647, %v3607_v51 }
 0x4a0   : > { %v3886_v25 = vpop.permute.xlu1 %3885  ;;  %v3859_v47 = vmax.f32 %v3849_v39, 0.0  ;;  %v3616_v39 = vand.u32 2147483647, %v3606_v40  ;;  %v4147_v18 = vand.u32 2147483647, %v4137_v19  ;;  %v4156_v40 = vsub.f32 1.0, %v4146_v17 }
 0x4a1   : > { %v3909_v11 = vsub.f32 %v3886_v25, %v6369_v63  ;;  %v10094_v25 = vld [vmem:[#allocation43_spill] sm:$0xff] }
 0x4a2   : > { %5699 = vset.pattern.permute.xlu1 %v10040_v42  ;;  %v4057_v62 = vsub.f32 %v10094_v25, %v6333_v22  ;;  %v4367_v25 = vsub.f32 %v8849_v52, %v6369_v63 }
 0x4a3   : > { %4213 = vperm.xlu1 %5699, %v8779_v53   ;;  %v3919_v37 = vand.u32 2147483647, %v3909_v11 }
 0x4a4   : > { %v4377_v51 = vand.u32 2147483647, %v4367_v25 }
 0x4a5   : > { %v8870_v16 = vpop.permute.xlu1 %3963  ;;  %v3929_v54 = vsub.f32 1.0, %v3919_v37  ;;  %v3686_v37 = vsub.f32 %v8662_v43, %v6369_v63 }
 0x4a7   : > { %5700 = vset.pattern.permute.xlu1 %v10049_v8  ;;  %v10093_v8 = vld [vmem:[#allocation42_spill] sm:$0xff]  ;;  %v3939_v31 = vmax.f32 %v3929_v54, 0.0  ;;  %v3729_v54 = vmul.f32 %v3719_v15, %v3639_v23  ;;  %v3696_v13 = vand.u32 2147483647, %v3686_v37 }
 0x4a8   : > { %4277 = vperm.xlu1 %5700, %v8832_v0   ;;  %v3906_v14 = vsub.f32 %v10093_v8, %v6369_v63 }
 0x4a9   : > { %v3949_v49 = vmul.f32 %v3939_v31, %v3859_v47  ;;  %v4366_v47 = vsub.f32 %v8843_v55, %v6369_v63  ;;  %v4287_v31 = vsub.f32 %v8657_v58, %v6333_v22  ;;  %v3706_v21 = vsub.f32 1.0, %v3696_v13 }
 0x4aa   : > { %v8881_v38 = vpop.permute.xlu1 %4031  ;;  %v3916_v36 = vand.u32 2147483647, %v3906_v14  ;;  %v4067_v14 = vand.u32 2147483647, %v4057_v62  ;;  %v3626_v58 = vsub.f32 1.0, %v3616_v39 }
 0x4ab   : > { %v4376_v23 = vand.u32 2147483647, %v4366_v47  ;;  %v4297_v37 = vand.u32 2147483647, %v4287_v31  ;;  %v3716_v19 = vmax.f32 %v3706_v21, 0.0 }
 0x4ac   : > { %5702 = vset.pattern.permute.xlu1 %v10055_v32  ;;  %v3926_v9 = vsub.f32 1.0, %v3916_v36  ;;  %v4077_v55 = vsub.f32 1.0, %v4067_v14  ;;  %v3636_v39 = vmax.f32 %v3626_v58, 0.0 }
 0x4ad   : > { %4357 = vperm.xlu1 %5702, %v8832_v0  }
 0x4ae   : > { %v4036_v6 = vpop.permute.xlu1 %4035  ;;  %v3936_v8 = vmax.f32 %v3926_v9, 0.0  ;;  %v4087_v14 = vmax.f32 %v4077_v55, 0.0 }
 0x4af   : > { %v4059_v2 = vsub.f32 %v4036_v6, %v6333_v22  ;;  %v3917_v6 = vand.u32 2147483647, %v3907_v33  ;;  %v3627_v33 = vsub.f32 1.0, %v3617_v56 }
 0x4b1   : > { %4361 = vperm.xlu1 %5702, %v8840_v7   ;;  %v4069_v32 = vand.u32 2147483647, %v4059_v2  ;;  %v3999_v2 = vmul.f32 %v10095_v10, %v3949_v49 }
 0x4b3   : > { %v4116_v12 = vpop.permute.xlu1 %4115  ;;  %v4079_v45 = vsub.f32 1.0, %v4069_v32  ;;  %v3846_v32 = vsub.f32 1.0, %v3836_v28  ;;  %v4166_v28 = vmax.f32 %v4156_v40, 0.0 }
 0x4b4   : > { %v4139_v11 = vsub.f32 %v4116_v12, %v6369_v63  ;;  %v3927_v12 = vsub.f32 1.0, %v3917_v6  ;;  %v4307_v6 = vsub.f32 1.0, %v4297_v37 }
 0x4b5   : > { %5704 = vset.pattern.permute.xlu1 %v10059_v41  ;;  %v4089_v36 = vmax.f32 %v4079_v45, 0.0  ;;  %v3856_v49 = vmax.f32 %v3846_v32, 0.0 }
 0x4b6   : > { %v4149_v29 = vand.u32 2147483647, %v4139_v11  ;;  %4443 = vperm.xlu1 %5704, %v8779_v53   ;;  %v4056_v53 = vsub.f32 %v8794_v26, %v6333_v22  ;;  %v3779_v26 = vmul.f32 %v8711_v50, %v3729_v54  ;;  %v4157_v50 = vsub.f32 1.0, %v4147_v18 }
 0x4b7   : > { %v3937_v52 = vmax.f32 %v3927_v12, 0.0  ;;  %v3637_v54 = vmax.f32 %v3627_v33, 0.0  ;;  %v4317_v47 = vmax.f32 %v4307_v6, 0.0 }
 0x4b8   : > { %v4159_v57 = vsub.f32 1.0, %v4149_v29  ;;  %v8915_v43 = vpop.permute.xlu1 %4193  ;;  %v4066_v9 = vand.u32 2147483647, %v4056_v53  ;;  %v4009_v11 = vadd.f32 %v3999_v2, %v3779_v26  ;;  %v3946_v53 = vmul.f32 %v3936_v8, %v3856_v49  ;;  %v10096_v26 = vld [vmem:[#allocation8_spill] sm:$0xff] }
 0x4b9   : > { %v4387_v2 = vsub.f32 1.0, %v4377_v51 }
 0x4ba   : > { %v4169_v60 = vmax.f32 %v4159_v57, 0.0  ;;  %5705 = vset.pattern.permute.xlu1 %v10006_v44  ;;  %v4286_v44 = vsub.f32 %v8837_v48, %v6333_v22  ;;  %v4076_v45 = vsub.f32 1.0, %v4066_v9  ;;  %v4386_v57 = vsub.f32 1.0, %v4376_v23 }
 0x4bb   : > { %3987 = vperm.xlu1 %5705, %v8832_v0   ;;  %v3996_v56 = vmul.f32 %v8870_v16, %v3946_v53  ;;  %v4397_v12 = vmax.f32 %v4387_v2, 0.0  ;;  %v10104_v53 = vld [vmem:[#allocation109_spill] sm:$0xff] }
 0x4bc   : > { %v4179_v3 = vmul.f32 %v4169_v60, %v4089_v36  ;;  %v4296_v29 = vand.u32 2147483647, %v4286_v44  ;;  %v4086_v13 = vmax.f32 %v4076_v45, 0.0  ;;  %v3726_v36 = vmul.f32 %v3716_v19, %v3636_v39 }
 0x4bd   : > { %v8931_v62 = vpop.permute.xlu1 %4261  ;;  %v4407_v58 = vmul.f32 %v4397_v12, %v4317_v47  ;;  %v10106_v47 = vld [vmem:[#allocation96_spill] sm:$0xff] }
 0x4be   : > { %v4229_v15 = vmul.f32 %v8604_v59, %v4179_v3  ;;  %v3717_v59 = vmax.f32 %v3707_v4, 0.0  ;;  %v4306_v10 = vsub.f32 1.0, %v4296_v29  ;;  %v4396_v4 = vmax.f32 %v4386_v57, 0.0  ;;  %v10100_v29 = vld [vmem:[#allocation26_spill] sm:$0xff]  ;;  %v10102_v57 = vld [vmem:[#allocation47_spill] sm:$0xff] }
 0x4bf   : > { %5706 = vset.pattern.permute.xlu1 %v10040_v42  ;;  %v4167_v42 = vmax.f32 %v4157_v50, 0.0  ;;  %v4176_v17 = vmul.f32 %v4166_v28, %v4086_v13  ;;  %v3776_v31 = vmul.f32 %v8700_v24, %v3726_v36  ;;  %v10099_v50 = vld [vmem:[#allocation41_spill] sm:$0xff]  ;;  %v3690_v39 = vsub.f32 %v10102_v57, %v6369_v63 }
 0x4c0   : > { %v8935_v48 = vadd.f32 %v4229_v15, %v4009_v11  ;;  %4217 = vperm.xlu1 %5706, %v8832_v0   ;;  %v3947_v0 = vmul.f32 %v3937_v52, %v3857_v5  ;;  %v3727_v8 = vmul.f32 %v3717_v59, %v3637_v54  ;;  %v4316_v3 = vmax.f32 %v4306_v10, 0.0  ;;  %v10103_v54 = vld [vmem:[#allocation7_spill] sm:$0xff] }
 0x4c1   : > { %v8938_v46 = vpop.permute.xlu1 %4265  ;;  %v4177_v34 = vmul.f32 %v4167_v42, %v4087_v14  ;;  %v4226_v9 = vmul.f32 %v8915_v43, %v4176_v17  ;;  %v4006_v21 = vadd.f32 %v3996_v56, %v3776_v31  ;;  %v10097_v11 = vmov 0.0   ;;  %v10098_v43 = vld [vmem:[#allocation36_spill] sm:$0xff]  ;;  %v10101_v14 = vld [vmem:[#allocation31_spill] sm:$0xff] }
 0x4c2   : > { %v3997_v32 = vmul.f32 %v10096_v26, %v3947_v0  ;;  %v3777_v24 = vmul.f32 %v8705_v35, %v3727_v8  ;;  %v4406_v55 = vmul.f32 %v4396_v4, %v4316_v3  ;;  %v3610_v28 = vsub.f32 %v10101_v14, %v6333_v22 }
 0x4c3   : > { %v4236_v15 = vadd.f32 %v4226_v9, %v4006_v21  ;;  %v3830_v6 = vsub.f32 %v10103_v54, %v6333_v22  ;;  %v3700_v56 = vand.u32 2147483647, %v3690_v39  ;;  %v3908_v54 = vsub.f32 %v8865_v27, %v6369_v63 }
 0x4c4   : > { %4221 = vperm.xlu1 %5706, %v8840_v7   ;;  %v4456_v23 = vmul.f32 %v10099_v50, %v4406_v55  ;;  %v3620_v2 = vand.u32 2147483647, %v3610_v28 }
 0x4c5   : > { %v3840_v17 = vand.u32 2147483647, %v3830_v6  ;;  %v3710_v12 = vsub.f32 1.0, %v3700_v56 }
 0x4c6   : > { %v8943_v60 = vpop.permute.xlu1 %4345  ;;  %v4466_v52 = vadd.f32 %v4456_v23, %v4236_v15 }
 0x4c7   : > { %v8946_v18 = vpop.f32.mrb[20].mxu0  ;;  %v3850_v9 = vsub.f32 1.0, %v3840_v17  ;;  %v3720_v15 = vmax.f32 %v3710_v12, 0.0  ;;  %v4369_v56 = vsub.f32 %v8943_v60, %v6369_v63  ;;  %v4288_v60 = vsub.f32 %v8931_v62, %v6333_v22 }
 0x4c8   : > { %5708 = vset.pattern.permute.xlu1 %v10059_v41  ;;  %v5400_v5 = vpop.f32.mrb[21].mxu0  ;;  %v4227_v41 = vmul.f32 %v8582_v20, %v4177_v34  ;;  %v10105_v34 = vld [vmem:[#allocation67_spill] sm:$0xff] }
 0x4c9   : > { %4451 = vperm.xlu1 %5708, %v8840_v7   ;;  %v3528_v44 = vpop.f32.mrb[22].mxu0  ;;  %v4007_v7 = vadd.f32 %v3997_v32, %v3777_v24  ;;  %v4140_v4 = vsub.f32 %v10105_v34, %v6369_v63  ;;  %v3630_v32 = vsub.f32 1.0, %v3620_v2  ;;  %v3860_v30 = vmax.f32 %v3850_v9, 0.0  ;;  %v10114_v2 = vld [vmem:[#allocation76_spill] sm:$0xff]  ;;  %v10115_v34 = vld [vmem:[#allocation59_spill] sm:$0xff] }
 0x4ca   : > { %v4486_v16 = vpop.permute.xlu1 %4485  ;;  %v5401_v25 = vpop.f32.mrb[23].mxu0  ;;  %4644 = vrot.lane.b32.xlu0 %v3528_v44, %s5884_s10  ;;  %v10107_v44 = vld [vmem:[#allocation62_spill] sm:$0xff] }
 0x4cb   : > { %5425 = vmatpush3.bf16.msra.mxu1 %v4486_v16  ;;  %v4237_v33 = vadd.f32 %v4227_v41, %v4007_v7  ;;  %v4150_v3 = vand.u32 2147483647, %v4140_v4  ;;  %v3640_v24 = vmax.f32 %v3630_v32, 0.0  ;;  %v3828_v4 = vsub.f32 %v10115_v34, %v6333_v22  ;;  %v10116_v32 = vld [vmem:[#allocation64_spill] sm:$0xff] }
 0x4cc   : > { %5426 = vmatprep.subr.bf16.mxu1 %v10097_v11 }
 0x4cd   : > { %4602 = vrot.lane.b32.xlu1 %v10098_v43, %s5883_s14  ;;  %v4160_v41 = vsub.f32 1.0, %v4150_v3  ;;  %v3730_v23 = vmul.f32 %v3720_v15, %v3640_v24  ;;  %v4368_v3 = vsub.f32 %v10116_v32, %v6369_v63 }
 0x4ce   : > { %v4428_v40 = vpop.permute.xlu1 %4427 }
 0x4cf   : > { %v4457_v37 = vmul.f32 %v4428_v40, %v4407_v58  ;;  %v3533_v49 = vpop.f32.mrb[24].mxu0  ;;  %v4170_v50 = vmax.f32 %v4160_v41, 0.0 }
 0x4d0   : > { %v5404_v35 = vpop.f32.mrb[25].mxu0 }
 0x4d1   : > { %v4467_v45 = vadd.f32 %v4457_v37, %v4237_v33  ;;  %4606 = vrot.lane.b32.xlu1 %v10100_v29, %s5883_s14  ;;  %v3536_v20 = vpop.f32.mrb[26].mxu0  ;;  %v10108_v37 = vld [vmem:[#allocation21_spill] sm:$0xff] }
 0x4d2   : > { %v5405_v51 = vpop.f32.mrb[27].mxu0  ;;  %4648 = vrot.lane.b32.xlu0 %v3536_v20, %s5884_s10  ;;  %v10109_v29 = vld [vmem:[#allocation25_spill] sm:$0xff] }
 0x4d3   : > { %v4475_v59 = vpack.c.bf16 %v4467_v45, %v4466_v52  ;;  %v3890_v19 = vpop.permute.xlu1 %3889  ;;  %v3608_v20 = vsub.f32 %v10109_v29, %v6333_v22  ;;  %v10110_v51 = vld [vmem:[#allocation106_spill] sm:$0xff] }
 0x4d4   : > { %v3910_v42 = vsub.f32 %v3890_v19, %v6369_v63 }
 0x4d5   : > { %4610 = vrot.lane.b32.xlu1 %v10104_v53, %s5883_s14  ;;  %v10113_v53 = vld [vmem:[#allocation66_spill] sm:$0xff]  ;;  %v3618_v17 = vand.u32 2147483647, %v3608_v20 }
 0x4d6   : > { %v3920_v0 = vand.u32 2147483647, %v3910_v42  ;;  %v10111_v42 = vld [vmem:[#allocation65_spill] sm:$0xff] }
 0x4d7   : > { %v4488_v13 = vpop.permute.xlu1 %4487  ;;  %v3541_v10 = vpop.f32.mrb[28].mxu0  ;;  %v4138_v57 = vsub.f32 %v10111_v42, %v6369_v63  ;;  %v3628_v24 = vsub.f32 1.0, %v3618_v17  ;;  %v10119_v17 = vld [vmem:[#allocation9_spill] sm:$0xff] }
 0x4d8   : > { %v5408_v36 = vpop.f32.mrb[29].mxu0  ;;  %5427 = vmatpush3.bf16.msra.mxu1 %v4488_v13  ;;  %v3930_v5 = vsub.f32 1.0, %v3920_v0  ;;  %v4370_v0 = vsub.f32 %v10113_v53, %v6369_v63  ;;  %v4058_v13 = vsub.f32 %v8881_v38, %v6333_v22 }
 0x4d9   : > { %4614 = vrot.lane.b32.xlu1 %v10106_v47, %s5883_s14  ;;  %v3544_v31 = vpop.f32.mrb[30].mxu0  ;;  %v4148_v38 = vand.u32 2147483647, %v4138_v57 }
 0x4da   : > { %v5409_v8 = vpop.f32.mrb[31].mxu0  ;;  %4652 = vrot.lane.b32.xlu0 %v3544_v31, %s5884_s10  ;;  %v3940_v16 = vmax.f32 %v3930_v5, 0.0  ;;  %v3918_v31 = vand.u32 2147483647, %v3908_v54  ;;  %v4380_v12 = vand.u32 2147483647, %v4370_v0 }
 0x4db   : > { %v8977_v26 = vpop.permute.xlu1 %3971  ;;  %5429 = vmatmul.mubr.msk.bf16.vlgmr.msra.gmra.mrb[20].mxu1 %vm1439_vm2, %v4474_v1  ;;  %v4289_v8 = vsub.f32 %v8938_v46, %v6333_v22  ;;  %v4068_v9 = vand.u32 2147483647, %v4058_v13  ;;  %v4158_v41 = vsub.f32 1.0, %v4148_v38  ;;  %v4378_v46 = vand.u32 2147483647, %v4368_v3 }
 0x4dc   : > { %5432 = vmatprep.mubr.msk.bf16.mxu1 %vm5845_vm1, %v10097_v11  ;;  %v3950_v7 = vmul.f32 %v3940_v16, %v3860_v30  ;;  %v4379_v16 = vand.u32 2147483647, %v4369_v56  ;;  %v4390_v15 = vsub.f32 1.0, %v4380_v12 }
 0x4dd   : > { %4618 = vrot.lane.b32.xlu1 %v10107_v44, %s5883_s14  ;;  %v3838_v44 = vand.u32 2147483647, %v3828_v4  ;;  %v4078_v30 = vsub.f32 1.0, %v4068_v9  ;;  %v10118_v4 = vld [vmem:[#allocation23_spill] sm:$0xff] }
 0x4df   : > { %v3549_v25 = vpop.f32.mrb[32].mxu0 }
 0x4e0   : > { %v4040_v55 = vpop.permute.xlu1 %4039  ;;  %v5412_v21 = vpop.f32.mrb[33].mxu0 }
 0x4e1   : > { %v4060_v61 = vsub.f32 %v4040_v55, %v6333_v22  ;;  %4642 = vrot.lane.b32.xlu1 %v8946_v18, %s5884_s10  ;;  %v3552_v1 = vpop.f32.mrb[34].mxu0  ;;  %v4000_v18 = vmul.f32 %v10108_v37, %v3950_v7  ;;  %v3928_v55 = vsub.f32 1.0, %v3918_v31  ;;  %v4299_v21 = vand.u32 2147483647, %v4289_v8 }
 0x4e2   : > { %v5413_v43 = vpop.f32.mrb[35].mxu0  ;;  %4656 = vrot.lane.b32.xlu0 %v3552_v1, %s5884_s10  ;;  %v3848_v1 = vsub.f32 1.0, %v3838_v44  ;;  %v4389_v7 = vsub.f32 1.0, %v4379_v16  ;;  %v10120_v16 = vld [vmem:[#allocation17_spill] sm:$0xff] }
 0x4e3   : > { %v4070_v58 = vand.u32 2147483647, %v4060_v61  ;;  %5433 = vmatmul.mubr.msk.bf16.gmra.mrb[24].mxu1 %vm1439_vm2, %v4475_v59  ;;  %v3780_v59 = vmul.f32 %v10110_v51, %v3730_v23  ;;  %v4298_v43 = vand.u32 2147483647, %v4288_v60  ;;  %v3938_v62 = vmax.f32 %v3928_v55, 0.0 }
 0x4e4   : > { %v8992_v40 = vpop.permute.xlu1 %4043  ;;  %5436 = vmatprep.mubr.msk.bf16.mxu1 %vm5845_vm1, %v10097_v11  ;;  %v3858_v20 = vmax.f32 %v3848_v1, 0.0 }
 0x4e5   : > { %v4080_v33 = vsub.f32 1.0, %v4070_v58  ;;  %4646 = vrot.lane.b32.xlu1 %v3533_v49, %s5884_s10  ;;  %v10112_v49 = vld [vmem:[#allocation68_spill] sm:$0xff]  ;;  %v4308_v51 = vsub.f32 1.0, %v4298_v43 }
 0x4e6   : > { %v3688_v39 = vsub.f32 %v10112_v49, %v6369_v63  ;;  %v3948_v57 = vmul.f32 %v3938_v62, %v3858_v20 }
 0x4e7   : > { %v4090_v35 = vmax.f32 %v4080_v33, 0.0  ;;  %v3557_v52 = vpop.f32.mrb[36].mxu0  ;;  %v4309_v33 = vsub.f32 1.0, %v4299_v21 }
 0x4e8   : > { %v5416_v45 = vpop.f32.mrb[37].mxu0  ;;  %v3698_v47 = vand.u32 2147483647, %v3688_v39  ;;  %v3998_v0 = vmul.f32 %v8977_v26, %v3948_v57 }
 0x4e9   : > { %v4180_v19 = vmul.f32 %v4170_v50, %v4090_v35  ;;  %v9001_v14 = vpop.permute.xlu1 %4123  ;;  %4650 = vrot.lane.b32.xlu1 %v3541_v10, %s5884_s10  ;;  %v3560_v28 = vpop.f32.mrb[38].mxu0  ;;  %v4010_v10 = vadd.f32 %v4000_v18, %v3780_v59  ;;  %v3638_v50 = vmax.f32 %v3628_v24, 0.0  ;;  %v4168_v18 = vmax.f32 %v4158_v41, 0.0 }
 0x4ea   : > { %v5417_v6 = vpop.f32.mrb[39].mxu0  ;;  %4660 = vrot.lane.b32.xlu0 %v3560_v28, %s5884_s10  ;;  %v4388_v35 = vsub.f32 1.0, %v4378_v46  ;;  %v4088_v45 = vmax.f32 %v4078_v30, 0.0  ;;  %v4399_v59 = vmax.f32 %v4389_v7, 0.0  ;;  %v4319_v42 = vmax.f32 %v4309_v33, 0.0 }
 0x4eb   : > { %v4230_v36 = vmul.f32 %v10114_v2, %v4180_v19  ;;  %v4318_v6 = vmax.f32 %v4308_v51, 0.0  ;;  %v10117_v2 = vld [vmem:[#allocation104_spill] sm:$0xff]  ;;  %v3691_v24 = vsub.f32 %v10120_v16, %v6369_v63  ;;  %v4141_v21 = vsub.f32 %v9001_v14, %v6369_v63 }
 0x4ec   : > { %v4398_v39 = vmax.f32 %v4388_v35, 0.0  ;;  %v4178_v54 = vmul.f32 %v4168_v18, %v4088_v45  ;;  %v4409_v53 = vmul.f32 %v4399_v59, %v4319_v42  ;;  %v4061_v46 = vsub.f32 %v8992_v40, %v6333_v22  ;;  %v10122_v35 = vld [vmem:[#allocation99_spill] sm:$0xff]  ;;  %v10123_v45 = vld [vmem:[#allocation50_spill] sm:$0xff] }
 0x4ed   : > { %v4240_v27 = vadd.f32 %v4230_v36, %v4010_v10  ;;  %4654 = vrot.lane.b32.xlu1 %v3549_v25, %s5884_s10  ;;  %v3708_v25 = vsub.f32 1.0, %v3698_v47  ;;  %v3701_v41 = vand.u32 2147483647, %v3691_v24  ;;  %v4151_v30 = vand.u32 2147483647, %v4141_v21 }
 0x4ee   : > { %v4202_v5 = vpop.permute.xlu1 %4201  ;;  %v4459_v47 = vmul.f32 %v10119_v17, %v4409_v53  ;;  %v4408_v8 = vmul.f32 %v4398_v39, %v4318_v6  ;;  %v4071_v43 = vand.u32 2147483647, %v4061_v46  ;;  %v10127_v17 = vld [vmem:[#allocation100_spill] sm:$0xff]  ;;  %v10130_v46 = vld [vmem:[#allocation54_spill] sm:$0xff] }
 0x4ef   : > { %v3718_v23 = vmax.f32 %v3708_v25, 0.0  ;;  %v4228_v34 = vmul.f32 %v4202_v5, %v4178_v54  ;;  %v4161_v7 = vsub.f32 1.0, %v4151_v30  ;;  %v4063_v30 = vsub.f32 %v10130_v46, %v6333_v22 }
 0x4f0   : > { %v4469_v44 = vadd.f32 %v4459_v47, %v8935_v48  ;;  %v4081_v62 = vsub.f32 1.0, %v4071_v43 }
 0x4f1   : > { %4658 = vrot.lane.b32.xlu1 %v3557_v52, %s5884_s10  ;;  %v4400_v52 = vmax.f32 %v4390_v15, 0.0  ;;  %v3728_v28 = vmul.f32 %v3718_v23, %v3638_v50  ;;  %v4171_v33 = vmax.f32 %v4161_v7, 0.0 }
 0x4f2   : > { %v4091_v14 = vmax.f32 %v4081_v62, 0.0 }
 0x4f3   : > { %v4270_v61 = vpop.permute.xlu1 %4269  ;;  %v3778_v36 = vmul.f32 %v10117_v2, %v3728_v28 }
 0x4f4   : > { %v4290_v58 = vsub.f32 %v4270_v61, %v6333_v22  ;;  %v3711_v61 = vsub.f32 1.0, %v3701_v41  ;;  %v4181_v40 = vmul.f32 %v4171_v33, %v4091_v14 }
 0x4f5   : > { %v4008_v31 = vadd.f32 %v3998_v0, %v3778_v36 }
 0x4f6   : > { %v4300_v37 = vand.u32 2147483647, %v4290_v58  ;;  %v3721_v50 = vmax.f32 %v3711_v61, 0.0 }
 0x4f7   : > { %v9029_v29 = vpop.permute.xlu1 %4273  ;;  %v4238_v3 = vadd.f32 %v4228_v34, %v4008_v31  ;;  %v10125_v34 = vld [vmem:[#allocation27_spill] sm:$0xff] }
 0x4f8   : > { %v4310_v19 = vsub.f32 1.0, %v4300_v37  ;;  %v4291_v57 = vsub.f32 %v9029_v29, %v6333_v22  ;;  %v3692_v29 = vsub.f32 %v10127_v17, %v6369_v63 }
 0x4fa   : > { %v4320_v49 = vmax.f32 %v4310_v19, 0.0  ;;  %v4301_v53 = vand.u32 2147483647, %v4291_v57 }
 0x4fc   : > { %v4410_v13 = vmul.f32 %v4400_v52, %v4320_v49  ;;  %v4354_v10 = vpop.permute.xlu1 %4353  ;;  %v10124_v49 = vld [vmem:[#allocation20_spill] sm:$0xff]  ;;  %v4311_v47 = vsub.f32 1.0, %v4301_v53 }
 0x4fd   : > { %v4371_v28 = vsub.f32 %v4354_v10, %v6369_v63  ;;  %v3612_v39 = vsub.f32 %v10124_v49, %v6333_v22  ;;  %v10126_v10 = vld [vmem:[#allocation39_spill] sm:$0xff] }
 0x4fe   : > { %v4460_v56 = vmul.f32 %v10118_v4, %v4410_v13  ;;  %v3693_v4 = vsub.f32 %v10125_v34, %v6369_v63 }
 0x4ff   : > { %v4381_v6 = vand.u32 2147483647, %v4371_v28  ;;  %v3622_v0 = vand.u32 2147483647, %v3612_v39 }
 0x500   : > { %v9035_v38 = vadd.f32 %v4460_v56, %v4240_v27  ;;  %v10121_v27 = vld [vmem:[#allocation84_spill] sm:$0xff]  ;;  %v3833_v56 = vsub.f32 %v10126_v10, %v6333_v22 }
 0x501   : > { %v4432_v32 = vpop.permute.xlu1 %4431  ;;  %v3611_v25 = vsub.f32 %v10121_v27, %v6333_v22  ;;  %v4391_v13 = vsub.f32 1.0, %v4381_v6  ;;  %v3632_v31 = vsub.f32 1.0, %v3622_v0 }
 0x502   : > { %v4458_v12 = vmul.f32 %v4432_v32, %v4408_v8  ;;  %v10128_v32 = vld [vmem:[#allocation33_spill] sm:$0xff]  ;;  %v3843_v27 = vand.u32 2147483647, %v3833_v56 }
 0x503   : > { %v3621_v48 = vand.u32 2147483647, %v3611_v25  ;;  %v3702_v25 = vand.u32 2147483647, %v3692_v29  ;;  %v3642_v41 = vmax.f32 %v3632_v31, 0.0 }
 0x504   : > { %v4468_v9 = vadd.f32 %v4458_v12, %v4238_v3  ;;  %v3613_v3 = vsub.f32 %v10128_v32, %v6333_v22  ;;  %v4401_v12 = vmax.f32 %v4391_v13, 0.0  ;;  %v3853_v33 = vsub.f32 1.0, %v3843_v27 }
 0x505   : > { %v3631_v1 = vsub.f32 1.0, %v3621_v48 }
 0x506   : > { %v4476_v26 = vpack.c.bf16 %v4469_v44, %v4468_v9  ;;  %v3898_v60 = vpop.permute.xlu1 %3897  ;;  %v3623_v61 = vand.u32 2147483647, %v3613_v3  ;;  %v3863_v6 = vmax.f32 %v3853_v33, 0.0 }
 0x507   : > { %v3641_v23 = vmax.f32 %v3631_v1, 0.0  ;;  %v3912_v8 = vsub.f32 %v3898_v60, %v6369_v63 }
 0x508   : > { %5437 = vmatmul.mubr.msk.bf16.gmra.mrb[28].mxu1 %vm1439_vm2, %v4476_v26  ;;  %v3703_v26 = vand.u32 2147483647, %v3693_v4 }
 0x509   : > { %5440 = vmatprep.mubr.msk.bf16.mxu1 %vm5845_vm1, %v10097_v11  ;;  %v3731_v18 = vmul.f32 %v3721_v50, %v3641_v23  ;;  %v3922_v48 = vand.u32 2147483647, %v3912_v8 }
 0x50a   : > { %v3902_v5 = vpop.permute.xlu1 %3901  ;;  %v3713_v7 = vsub.f32 1.0, %v3703_v26 }
 0x50b   : > { %v3781_v20 = vmul.f32 %v10123_v45, %v3731_v18  ;;  %v3913_v2 = vsub.f32 %v3902_v5, %v6369_v63  ;;  %v10129_v5 = vld [vmem:[#allocation101_spill] sm:$0xff]  ;;  %v3712_v18 = vsub.f32 1.0, %v3702_v25 }
 0x50c   : > { %v3832_v16 = vsub.f32 %v10129_v5, %v6333_v22  ;;  %v3723_v4 = vmax.f32 %v3713_v7, 0.0  ;;  %v10132_v5 = vld [vmem:[#allocation82_spill] sm:$0xff] }
 0x50d   : > { %v3923_v9 = vand.u32 2147483647, %v3913_v2  ;;  %v3722_v53 = vmax.f32 %v3712_v18, 0.0 }
 0x50e   : > { %v3842_v50 = vand.u32 2147483647, %v3832_v16 }
 0x50f   : > { %v3984_v55 = vpop.permute.xlu1 %3983  ;;  %v3933_v1 = vsub.f32 1.0, %v3923_v9  ;;  %v3732_v31 = vmul.f32 %v3722_v53, %v3642_v41  ;;  %v10134_v41 = vld [vmem:[#allocation69_spill] sm:$0xff] }
 0x510   : > { %v4001_v52 = vmul.f32 %v3984_v55, %v10122_v35  ;;  %v4321_v55 = vmax.f32 %v4311_v47, 0.0  ;;  %v3932_v35 = vsub.f32 1.0, %v3922_v48  ;;  %v3852_v57 = vsub.f32 1.0, %v3842_v50 }
 0x512   : > { %v4011_v59 = vadd.f32 %v4001_v52, %v3781_v20  ;;  %v4411_v43 = vmul.f32 %v4401_v12, %v4321_v55  ;;  %v4073_v20 = vand.u32 2147483647, %v4063_v30  ;;  %v3862_v17 = vmax.f32 %v3852_v57, 0.0 }
 0x513   : > { %v3782_v30 = vmul.f32 %v10134_v41, %v3732_v31  ;;  %v10141_v41 = vld [vmem:[#allocation71_spill] sm:$0xff] }
 0x514   : > { %v9049_v15 = vpop.permute.xlu1 %4047  ;;  %v4083_v10 = vsub.f32 1.0, %v4073_v20 }
 0x515   : > { %v4062_v60 = vsub.f32 %v9049_v15, %v6333_v22 }
 0x517   : > { %v4072_v52 = vand.u32 2147483647, %v4062_v60 }
 0x519   : > { %v4128_v58 = vpop.permute.xlu1 %4127 }
 0x51a   : > { %v4142_v24 = vsub.f32 %v4128_v58, %v6369_v63 }
 0x51c   : > { %v4152_v23 = vand.u32 2147483647, %v4142_v24 }
 0x51d   : > { %v4132_v37 = vpop.permute.xlu1 %4131 }
 0x51e   : > { %v4143_v21 = vsub.f32 %v4132_v37, %v6369_v63  ;;  %v4162_v49 = vsub.f32 1.0, %v4152_v23 }
 0x520   : > { %v4153_v37 = vand.u32 2147483647, %v4143_v21  ;;  %v4172_v29 = vmax.f32 %v4162_v49, 0.0  ;;  %v10133_v21 = vld [vmem:[#allocation11_spill] sm:$0xff] }
 0x522   : > { %v4214_v51 = vpop.permute.xlu1 %4213  ;;  %v4163_v0 = vsub.f32 1.0, %v4153_v37 }
 0x523   : > { %v4231_v19 = vmul.f32 %v4214_v51, %v4181_v40  ;;  %v3633_v40 = vsub.f32 1.0, %v3623_v61  ;;  %v3943_v51 = vmax.f32 %v3933_v1, 0.0 }
 0x525   : > { %v4241_v42 = vadd.f32 %v4231_v19, %v4011_v59  ;;  %v10131_v19 = vld [vmem:[#allocation95_spill] sm:$0xff]  ;;  %v3643_v56 = vmax.f32 %v3633_v40, 0.0 }
 0x526   : > { %v4293_v28 = vsub.f32 %v10131_v19, %v6333_v22 }
 0x527   : > { %v4278_v54 = vpop.permute.xlu1 %4277  ;;  %v3733_v26 = vmul.f32 %v3723_v4, %v3643_v56  ;;  %v10140_v56 = vld [vmem:[#allocation92_spill] sm:$0xff] }
 0x528   : > { %v4292_v15 = vsub.f32 %v4278_v54, %v6333_v22  ;;  %v4082_v54 = vsub.f32 1.0, %v4072_v52  ;;  %v4303_v22 = vand.u32 2147483647, %v4293_v28  ;;  %v10135_v52 = vld [vmem:[#allocation12_spill] sm:$0xff] }
 0x529   : > { %v3783_v48 = vmul.f32 %v10133_v21, %v3733_v26 }
 0x52a   : > { %v4302_v34 = vand.u32 2147483647, %v4292_v15  ;;  %v4092_v8 = vmax.f32 %v4082_v54, 0.0  ;;  %v4313_v24 = vsub.f32 1.0, %v4303_v22 }
 0x52c   : > { %v4358_v36 = vpop.permute.xlu1 %4357  ;;  %v4312_v32 = vsub.f32 1.0, %v4302_v34  ;;  %v4182_v55 = vmul.f32 %v4172_v29, %v4092_v8  ;;  %v4323_v23 = vmax.f32 %v4313_v24, 0.0  ;;  %v10139_v34 = vld [vmem:[#allocation93_spill] sm:$0xff] }
 0x52d   : > { %v4372_v58 = vsub.f32 %v4358_v36, %v6369_v63  ;;  %v3942_v36 = vmax.f32 %v3932_v35, 0.0 }
 0x52e   : > { %v4322_v46 = vmax.f32 %v4312_v32, 0.0 }
 0x52f   : > { %v4382_v39 = vand.u32 2147483647, %v4372_v58  ;;  %v3952_v12 = vmul.f32 %v3942_v36, %v3862_v17  ;;  %v10138_v36 = vld [vmem:[#allocation86_spill] sm:$0xff] }
 0x530   : > { %v4362_v44 = vpop.permute.xlu1 %4361 }
 0x531   : > { %v4373_v45 = vsub.f32 %v4362_v44, %v6369_v63  ;;  %v4392_v47 = vsub.f32 1.0, %v4382_v39  ;;  %v4093_v44 = vmax.f32 %v4083_v10, 0.0 }
 0x533   : > { %v4383_v63 = vand.u32 2147483647, %v4373_v45  ;;  %v4402_v27 = vmax.f32 %v4392_v47, 0.0 }
 0x535   : > { %v4444_v62 = vpop.permute.xlu1 %4443  ;;  %v4393_v3 = vsub.f32 1.0, %v4383_v63  ;;  %v4412_v58 = vmul.f32 %v4402_v27, %v4322_v46 }
 0x536   : > { %v4461_v14 = vmul.f32 %v4444_v62, %v4411_v43  ;;  %v4621_v43 = vpop.permute.xlu0 %4620 }
 0x537   : > { %v4462_v15 = vmul.f32 %v10135_v52, %v4412_v58  ;;  %v4722_v63 = vsel %vm4712_vm3, %v10139_v34, %v4621_v43 }
 0x538   : > { %v4471_v59 = vadd.f32 %v4461_v14, %v4241_v42  ;;  %v3953_v42 = vmul.f32 %v3943_v51, %v3863_v6  ;;  %v10136_v6 = vld [vmem:[#allocation80_spill] sm:$0xff] }
 0x53a   : > { %v4477_v13 = vpack.c.bf16 %v4471_v59, %v9035_v38  ;;  %v3988_v2 = vpop.permute.xlu1 %3987  ;;  %v4173_v38 = vmax.f32 %v4163_v0, 0.0  ;;  %v4003_v16 = vmul.f32 %v10132_v5, %v3953_v42  ;;  %v10137_v0 = vld [vmem:[#allocation88_spill] sm:$0xff] }
 0x53b   : > { %v4002_v25 = vmul.f32 %v3988_v2, %v3952_v12 }
 0x53c   : > { %5441 = vmatmul.mubr.msk.bf16.gmra.mrb[32].mxu1 %vm1439_vm2, %v4477_v13  ;;  %v4183_v60 = vmul.f32 %v4173_v38, %v4093_v44  ;;  %v4013_v7 = vadd.f32 %v4003_v16, %v3783_v48  ;;  %v9088_v14 = vpop.permute.xlu0 %4644 }
 0x53d   : > { %5444 = vmatprep.mubr.msk.bf16.mxu1 %vm5845_vm1, %v10097_v11  ;;  %v4403_v11 = vmax.f32 %v4393_v3, 0.0  ;;  %v4012_v62 = vadd.f32 %v4002_v25, %v3782_v30 }
 0x53f   : > { %v4218_v9 = vpop.permute.xlu1 %4217  ;;  %v4413_v37 = vmul.f32 %v4403_v11, %v4323_v23 }
 0x540   : > { %v4232_v61 = vmul.f32 %v4218_v9, %v4182_v55 }
 0x542   : > { %v4242_v18 = vadd.f32 %v4232_v61, %v4012_v62  ;;  %v4582_v61 = vld [vmem:[#allocation2] sm:$0xff] }
 0x543   : > { %v4222_v1 = vpop.permute.xlu1 %4221 }
 0x544   : > { %v4233_v50 = vmul.f32 %v4222_v1, %v4183_v60  ;;  %v4472_v20 = vadd.f32 %v4462_v15, %v4242_v18  ;;  %v9091_v51 = vpop.permute.xlu0 %4648 }
 0x546   : > { %v4243_v33 = vadd.f32 %v4233_v50, %v4013_v7  ;;  %v10142_v7 = vld [vmem:[#allocation28_spill] sm:$0xff] }
 0x547   : > { %v10143_v50 = vld [vmem:[#allocation72_spill] sm:$0xff] }
 0x548   : > { %v4452_v35 = vpop.permute.xlu1 %4451  ;;  %v4714_v23 = vsel %vm4712_vm3, %v10143_v50, %v10142_v7 }
 0x549   : > { %v4463_v45 = vmul.f32 %v4452_v35, %v4413_v37  ;;  %v4725_v18 = vsel %vm4723_vm4, %v4714_v23, %v9088_v14 }
 0x54b   : > { %v4473_v40 = vadd.f32 %v4463_v45, %v4243_v33  ;;  %v4583_v33 = vld [vmem:[#allocation2 + $0x8] sm:$0xff] }
 0x54c   : > { %v4603_v59 = vpop.permute.xlu1 %4602  ;;  %v9094_v28 = vpop.permute.xlu0 %4652 }
 0x54d   : > { %v4478_v19 = vpack.c.bf16 %v4473_v40, %v4472_v20  ;;  %v4713_v30 = vsel %vm4712_vm3, %v10141_v41, %v4603_v59  ;;  %v10144_v59 = vld [vmem:[#allocation32_spill] sm:$0xff]  ;;  %v5886_v41 = vmov (!%p5268_p8), 0.0  }
 0x54e   : > { %5448 = vmatprep.subr.bf16.mxu0 (!%p5268_p8), %v5886_v41  ;;  %5472 = vmatprep.subr.bf16.mxu1 (!%p5268_p8), %v5886_v41 }
 0x54f   : > { %5445 = vmatmul.mubr.msk.bf16.gmra.mrb[36].mxu1 %vm1439_vm2, %v4478_v19  ;;  %v4584_v19 = vld [vmem:[#allocation2 + $0x10] sm:$0xff]  ;;  %5452 = vmatprep.mubr.msk.bf16.mxu0 (!%p5268_p8), %vm5887_vm7, %v5886_v41 }
 0x550   : > { %v9096_v57 = vpop.permute.xlu1 %4606  ;;  %5464 = vmatprep.mubr.msk.bf16.mxu1 (!%p5268_p8), %vm5887_vm7, %v5886_v41 }
 0x551   : > { %v4715_v14 = vsel %vm4712_vm3, %v10144_v59, %v9096_v57  ;;  %v4902_v59 = vld [vmem:[%s5985_s16 + $0x30] sm:$0xff] (!%p5268_p8) }
 0x554   : > { %v4611_v49 = vpop.permute.xlu1 %4610  ;;  %v4657_v39 = vpop.permute.xlu0 %4656 }
 0x555   : > { %v9100_v53 = vsel %vm4712_vm3, %v10136_v6, %v4611_v49  ;;  %v9104_v13 = vsel %vm4723_vm4, %v10137_v0, %v4657_v39  ;;  %v10145_v6 = vld [vmem:[#allocation44_spill] sm:$0xff]  ;;  %v10146_v0 = vld [vmem:[#allocation29_spill] sm:$0xff] }
 0x558   : > { %v4615_v2 = vpop.permute.xlu1 %4614 }
 0x559   : > { %v4719_v54 = vsel %vm4712_vm3, %v10138_v36, %v4615_v2  ;;  %v4716_v2 = vsel %vm4712_vm3, %v10146_v0, %v10145_v6 }
 0x55a   : > { %v4727_v34 = vsel %vm4723_vm4, %v4716_v2, %v9091_v51  ;;  %v10147_v51 = vld [vmem:[#allocation97_spill] sm:$0xff]  ;;  %v4903_v2 = vld [vmem:[%s5985_s16 + $0x38] sm:$0xff] (!%p5268_p8) }
 0x55c   : > { %v4619_v4 = vpop.permute.xlu1 %4618  ;;  %v4661_v10 = vpop.permute.xlu0 %4660 }
 0x55d   : > { %v4721_v42 = vsel %vm4712_vm3, %v10140_v56, %v4619_v4  ;;  %v9113_v22 = vsel %vm4723_vm4, %v4722_v63, %v4661_v10  ;;  %v4586_v56 = vld [vmem:[#allocation2 + $0x20] sm:$0xff] }
 0x560   : > { %v4643_v17 = vpop.permute.xlu1 %4642 }
 0x561   : > { %v4724_v1 = vsel %vm4723_vm4, %v4713_v30, %v4643_v17 }
 0x564   : > { %v4647_v29 = vpop.permute.xlu1 %4646 }
 0x565   : > { %v4726_v49 = vsel %vm4723_vm4, %v4715_v14, %v4647_v29 }
 0x568   : > { %v9115_v47 = vpop.permute.xlu1 %4650 }
 0x56c   : > { %v4655_v31 = vpop.permute.xlu1 %4654 }
 0x56d   : > { %v9118_v38 = vsel %vm4723_vm4, %v4719_v54, %v4655_v31  ;;  %v4585_v54 = vld [vmem:[#allocation2 + $0x18] sm:$0xff]  ;;  %v4587_v31 = vld [vmem:[#allocation2 + $0x28] sm:$0xff] }
 0x570   : > { %v4659_v8 = vpop.permute.xlu1 %4658 }
 0x571   : > { %v9121_v32 = vsel %vm4723_vm4, %v4721_v42, %v4659_v8  ;;  %v4728_v42 = vsel %vm4723_vm4, %v9100_v53, %v9115_v47  ;;  %v4729_v8 = vsel %vm4723_vm4, %v10147_v51, %v9094_v28  ;;  %v4589_v47 = vld [vmem:[#allocation2 + $0x38] sm:$0xff]  ;;  %v4898_v51 = vld [vmem:[%s5985_s16 + $0x10] sm:$0xff] (!%p5268_p8) }
 0x5ae   : > { %v4543_v3 = vpop.f32.mrb[20].mxu1 }
 0x5af   : > { %4682 = vrot.lane.b32.xlu1 %v4543_v3, %s5885_s18  ;;  %v5430_v12 = vpop.f32.mrb[21].mxu1 }
 0x5b0   : > { %v4546_v9 = vpop.f32.mrb[22].mxu1 }
 0x5b1   : > { %4684 = vrot.lane.b32.xlu0 %v4546_v9, %s5885_s18  ;;  %v5431_v44 = vpop.f32.mrb[23].mxu1 }
 0x5b6   : > { %v4551_v26 = vpop.f32.mrb[24].mxu1 }
 0x5b7   : > { %4686 = vrot.lane.b32.xlu1 %v4551_v26, %s5885_s18  ;;  %v5434_v5 = vpop.f32.mrb[25].mxu1  ;;  %v4588_v26 = vld [vmem:[#allocation2 + $0x30] sm:$0xff] }
 0x5b8   : > { %v4554_v16 = vpop.f32.mrb[26].mxu1 }
 0x5b9   : > { %4688 = vrot.lane.b32.xlu0 %v4554_v16, %s5885_s18  ;;  %v5435_v24 = vpop.f32.mrb[27].mxu1 }
 0x5db   : > { %v4559_v27 = vpop.f32.mrb[28].mxu1 }
 0x5dc   : > { %4690 = vrot.lane.b32.xlu1 %v4559_v27, %s5885_s18  ;;  %v5438_v25 = vpop.f32.mrb[29].mxu1 }
 0x5dd   : > { %v4562_v55 = vpop.f32.mrb[30].mxu1  ;;  %v4590_v25 = vld [vmem:[#allocation2 + $0x40] sm:$0xff] }
 0x5de   : > { %4692 = vrot.lane.b32.xlu0 %v4562_v55, %s5885_s18  ;;  %v5439_v21 = vpop.f32.mrb[31].mxu1 }
 0x60f   : > { %v4567_v48 = vpop.f32.mrb[32].mxu1 }
 0x610   : > { %4694 = vrot.lane.b32.xlu1 %v4567_v48, %s5885_s18  ;;  %v5442_v60 = vpop.f32.mrb[33].mxu1  ;;  %v4591_v48 = vld [vmem:[#allocation2 + $0x48] sm:$0xff] }
 0x611   : > { %v4570_v46 = vpop.f32.mrb[34].mxu1 }
 0x612   : > { %4696 = vrot.lane.b32.xlu0 %v4570_v46, %s5885_s18  ;;  %v5443_v11 = vpop.f32.mrb[35].mxu1 }
 0x621   : > { %v4683_v43 = vpop.permute.xlu1 %4682 }
 0x622   : > { %v4735_v58 = vsel %vm4734_vm5, %v4724_v1, %v4683_v43  ;;  %v4575_v62 = vpop.f32.mrb[36].mxu1 }
 0x623   : > { %v4745_v37 = vadd.f32 %v4735_v58, %v4582_v61  ;;  %4698 = vrot.lane.b32.xlu1 %v4575_v62, %s5885_s18  ;;  %v5446_v35 = vpop.f32.mrb[37].mxu1  ;;  %v4685_v52 = vpop.permute.xlu0 %4684 }
 0x624   : > { %v4736_v15 = vsel %vm4734_vm5, %v4725_v18, %v4685_v52  ;;  %v4578_v45 = vpop.f32.mrb[38].mxu1 }
 0x625   : > { %4756 = vst.msk [vmem:[#allocation2] sm:$0xff] %vm4755_vm6, %v4745_v37  ;;  %v4746_v20 = vadd.f32 %v4736_v15, %v4583_v33  ;;  %4700 = vrot.lane.b32.xlu0 %v4578_v45, %s5885_s18  ;;  %v5447_v40 = vpop.f32.mrb[39].mxu1  ;;  %v5269_v15 = vld [vmem:[%s9358_s5] ss:$0 sm:$0xff] (!%p5268_p8) }
 0x626   : > { %v4896_v40 = vld [vmem:[%s5985_s16] sm:$0xff] (!%p5268_p8) }
 0x627   : > { %4757 = vst.msk [vmem:[#allocation2 + $0x8] sm:$0xff] %vm4755_vm6, %v4746_v20 }
 0x629   : > { %v4687_v39 = vpop.permute.xlu1 %4686 }
 0x62a   : > { %v4737_v36 = vsel %vm4734_vm5, %v4726_v49, %v4687_v39 }
 0x62b   : > { %v4747_v63 = vadd.f32 %v4737_v36, %v4584_v19  ;;  %v4689_v4 = vpop.permute.xlu0 %4688 }
 0x62c   : > { %v4738_v10 = vsel %vm4734_vm5, %v4727_v34, %v4689_v4 }
 0x62d   : > { %4758 = vst.msk [vmem:[#allocation2 + $0x10] sm:$0xff] %vm4755_vm6, %v4747_v63  ;;  %v4748_v57 = vadd.f32 %v4738_v10, %v4585_v54 }
 0x62e   : > { %v4771_v30 = vld [vmem:[#allocation2 + $0x8] sm:$0xff] (!%p5268_p8) }
 0x62f   : > { %4759 = vst.msk [vmem:[#allocation2 + $0x18] sm:$0xff] %vm4755_vm6, %v4748_v57 }
 0x634   : > { %v4772_v50 = vld [vmem:[#allocation2 + $0x10] sm:$0xff] (!%p5268_p8) }
 0x636   : > { %v4773_v23 = vld [vmem:[#allocation2 + $0x18] sm:$0xff] (!%p5268_p8) }
 0x637   : > { %v4781_v33 = vpack.c.bf16 (!%p5268_p8), %v4773_v23, %v4772_v50 }
 0x64e   : > { %v4691_v17 = vpop.permute.xlu1 %4690 }
 0x64f   : > { %v4739_v29 = vsel %vm4734_vm5, %v4728_v42, %v4691_v17  ;;  %v4897_v42 = vld [vmem:[%s5985_s16 + $0x8] sm:$0xff] (!%p5268_p8) }
 0x650   : > { %v4749_v3 = vadd.f32 %v4739_v29, %v4586_v56  ;;  %v4693_v12 = vpop.permute.xlu0 %4692 }
 0x651   : > { %v4740_v9 = vsel %vm4734_vm5, %v4729_v8, %v4693_v12 }
 0x652   : > { %4760 = vst.msk [vmem:[#allocation2 + $0x20] sm:$0xff] %vm4755_vm6, %v4749_v3  ;;  %v4750_v44 = vadd.f32 %v4740_v9, %v4587_v31 }
 0x654   : > { %4761 = vst.msk [vmem:[#allocation2 + $0x28] sm:$0xff] %vm4755_vm6, %v4750_v44 }
 0x659   : > { %v4774_v37 = vld [vmem:[#allocation2 + $0x20] sm:$0xff] (!%p5268_p8) }
 0x65b   : > { %v4775_v35 = vld [vmem:[#allocation2 + $0x28] sm:$0xff] (!%p5268_p8) }
 0x65c   : > { %v4782_v52 = vpack.c.bf16 (!%p5268_p8), %v4775_v35, %v4774_v37 }
 0x682   : > { %v4695_v5 = vpop.permute.xlu1 %4694 }
 0x683   : > { %v4741_v53 = vsel %vm4734_vm5, %v9118_v38, %v4695_v5  ;;  %v4899_v5 = vld [vmem:[%s5985_s16 + $0x18] sm:$0xff] (!%p5268_p8) }
 0x684   : > { %v4751_v16 = vadd.f32 %v4741_v53, %v4588_v26  ;;  %v4697_v24 = vpop.permute.xlu0 %4696 }
 0x685   : > { %v4742_v28 = vsel %vm4734_vm5, %v9104_v13, %v4697_v24  ;;  %v5767_v13 = vld [vmem:[%s9357_s4] sm:$0xff] (!%p5268_p8)  }
 0x686   : > { %4762 = vst.msk [vmem:[#allocation2 + $0x30] sm:$0xff] %vm4755_vm6, %v4751_v16  ;;  %v4752_v27 = vadd.f32 %v4742_v28, %v4589_v47  ;;  %5449 = vmatpush3.bf16.msra.mxu0 (!%p5268_p8), %v5767_v13  ;;  %5474 = vmatpush3.bf16.msra.mxu1 (!%p5268_p8), %v5767_v13 }
 0x687   : > { %5450 = vmatprep.subr.bf16.mxu0 (!%p5268_p8), %v5886_v41  ;;  %5473 = vmatprep.subr.bf16.mxu1 (!%p5268_p8), %v5886_v41 }
 0x688   : > { %4763 = vst.msk [vmem:[#allocation2 + $0x38] sm:$0xff] %vm4755_vm6, %v4752_v27 }
 0x68d   : > { %v4776_v61 = vld [vmem:[#allocation2 + $0x30] sm:$0xff] (!%p5268_p8) }
 0x68f   : > { %v4777_v1 = vld [vmem:[#allocation2 + $0x38] sm:$0xff] (!%p5268_p8) }
 0x690   : > { %v4783_v7 = vpack.c.bf16 (!%p5268_p8), %v4777_v1, %v4776_v61 }
 0x695   : > { %v4699_v55 = vpop.permute.xlu1 %4698  ;;  %4769 = sbr.rel (%p5268_p8) target bundleno = 2245 (0x8c5), region = 60 }
 0x696   : > { %v4743_v21 = vsel %vm4734_vm5, %v9121_v32, %v4699_v55  ;;  %v5768_v32 = vld [vmem:[%s9357_s4 + $0x8] sm:$0xff] (!%p5268_p8)  }
 0x697   : > { %v4753_v60 = vadd.f32 %v4743_v21, %v4590_v25  ;;  %v4701_v46 = vpop.permute.xlu0 %4700  ;;  %5451 = vmatpush3.bf16.msra.mxu0 (!%p5268_p8), %v5768_v32  ;;  %5475 = vmatpush3.bf16.msra.mxu1 (!%p5268_p8), %v5768_v32 }
 0x698   : > { %v4744_v38 = vsel %vm4734_vm5, %v9113_v22, %v4701_v46  ;;  %v4770_v22 = vld [vmem:[#allocation2] sm:$0xff] (!%p5268_p8) }
 0x699   : > { %4764 = vst.msk [vmem:[#allocation2 + $0x40] sm:$0xff] %vm4755_vm6, %v4753_v60  ;;  %v4754_v11 = vadd.f32 %v4744_v38, %v4591_v48  ;;  %v4780_v43 = vpack.c.bf16 (!%p5268_p8), %v4771_v30, %v4770_v22  ;;  %v4900_v60 = vld [vmem:[%s5985_s16 + $0x20] sm:$0xff] (!%p5268_p8)  ;;  %v4901_v22 = vld [vmem:[%s5985_s16 + $0x28] sm:$0xff] (!%p5268_p8) }
 0x69a   : > { %5465 = vmatmul.mubr.msk.bf16.vlgmr.msra.gmra.mrb[0].mxu1 (!%p5268_p8), %vm4755_vm6, %v4783_v7  ;;  %v4904_v46 = vld [vmem:[%s5985_s16 + $0x40] sm:$0xff] (!%p5268_p8)  ;;  %v4905_v30 = vld [vmem:[%s5985_s16 + $0x48] sm:$0xff] (!%p5268_p8) }
 0x69b   : > { %4765 = vst.msk [vmem:[#allocation2 + $0x48] sm:$0xff] %vm4755_vm6, %v4754_v11  ;;  %5453 = vmatmul.mubr.msk.bf16.vlgmr.msra.gmra.mrb[0].mxu0 (!%p5268_p8), %vm4755_vm6, %v4780_v43  ;;  %5468 = vmatprep.mubr.msk.bf16.mxu1 (!%p5268_p8), %vm5887_vm7, %v5886_v41 }
 0x69c   : > { %5456 = vmatprep.mubr.msk.bf16.mxu0 %vm5887_vm7, %v5886_v41 }
 0x6a0   : > { %v4778_v58 = vld [vmem:[#allocation2 + $0x40] sm:$0xff] }
 0x6a2   : > { %v4779_v62 = vld [vmem:[#allocation2 + $0x48] sm:$0xff] }
 0x6a3   : > { %v4784_v18 = vpack.c.bf16 %v4779_v62, %v4778_v58  ;;  %5457 = vmatmul.mubr.msk.bf16.gmra.mrb[4].mxu0 %vm4755_vm6, %v4781_v33 }
 0x6a4   : > { %5460 = vmatprep.mubr.msk.bf16.mxu0 %vm5887_vm7, %v5886_v41 }
 0x6a5   : > { %5469 = vmatmul.mubr.msk.bf16.gmra.mrb[4].mxu1 %vm4755_vm6, %v4784_v18 }
 0x6ab   : > { %5461 = vmatmul.mubr.msk.bf16.gmra.mrb[8].mxu0 %vm4755_vm6, %v4782_v52 }
 0x76d   : > { %v4881_v20 = vpop.f32.mrb[0].mxu1 }
 0x76e   : > { %v4857_v45 = vpop.f32.mrb[0].mxu0  ;;  %v4882_v19 = vadd.f32 %v5269_v15, %v4881_v20  ;;  %v5466_v39 = vpop.f32.mrb[1].mxu1 }
 0x76f   : > { %v4858_v14 = vadd.f32 %v5269_v15, %v4857_v45  ;;  %v5454_v49 = vpop.f32.mrb[1].mxu0  ;;  %v4884_v0 = vpop.f32.mrb[2].mxu1 }
 0x770   : > { %v4860_v6 = vpop.f32.mrb[2].mxu0  ;;  %v4885_v36 = vadd.f32 %v5269_v15, %v4884_v0  ;;  %v5467_v34 = vpop.f32.mrb[3].mxu1  ;;  %v9203_v4 = vadd.f32 %v4902_v59, %v4882_v19 }
 0x771   : > { %v5455_v54 = vpop.f32.mrb[3].mxu0  ;;  %v4906_v63 = vadd.f32 %v4896_v40, %v4858_v14  ;;  %v4861_v10 = vadd.f32 %v5269_v15, %v4860_v6 }
 0x772   : > { %v9206_v56 = vadd.f32 %v4903_v2, %v4885_v36  ;;  %v4934_v29 = vsel %vm4755_vm6, %v9203_v4, 0.0 }
 0x773   : > { %v4916_v57 = vsel %vm4755_vm6, %v4906_v63, 0.0  ;;  %v4907_v9 = vadd.f32 %v4897_v42, %v4861_v10 }
 0x774   : > { %4917 = vadd.xlane.f32.xlu0 %v4916_v57  ;;  %v4937_v17 = vsel %vm4755_vm6, %v9206_v56, 0.0 }
 0x775   : > { %4938 = vadd.xlane.f32.xlu1 %v4937_v17  ;;  %v4919_v27 = vsel %vm4755_vm6, %v4907_v9, 0.0 }
 0x776   : > { %v4865_v31 = vpop.f32.mrb[4].mxu0 }
 0x777   : > { %v4866_v3 = vadd.f32 %v5269_v15, %v4865_v31  ;;  %v5458_v12 = vpop.f32.mrb[5].mxu0 }
 0x778   : > { %v4889_v8 = vpop.f32.mrb[4].mxu1  ;;  %4935 = vadd.xlane.f32.xlu0 %v4934_v29  ;;  %v4868_v26 = vpop.f32.mrb[6].mxu0 }
 0x779   : > { %v5470_v44 = vpop.f32.mrb[5].mxu1  ;;  %v4869_v47 = vadd.f32 %v5269_v15, %v4868_v26  ;;  %v5459_v16 = vpop.f32.mrb[7].mxu0  ;;  %v4908_v24 = vadd.f32 %v4898_v51, %v4866_v3  ;;  %v4890_v21 = vadd.f32 %v5269_v15, %v4889_v8 }
 0x77a   : > { %v4892_v53 = vpop.f32.mrb[6].mxu1 }
 0x77b   : > { %v5471_v28 = vpop.f32.mrb[7].mxu1  ;;  %v4922_v25 = vsel %vm4755_vm6, %v4908_v24, 0.0  ;;  %v4909_v55 = vadd.f32 %v4899_v5, %v4869_v47  ;;  %v4893_v41 = vadd.f32 %v5269_v15, %v4892_v53  ;;  %v4914_v7 = vadd.f32 %v4904_v46, %v4890_v21 }
 0x77c   : > { %4920 = vadd.xlane.f32.xlu0 %v4919_v27  ;;  %4923 = vadd.xlane.f32.xlu1 %v4922_v25 }
 0x77d   : > { %v4925_v13 = vsel %vm4755_vm6, %v4909_v55, 0.0  ;;  %v4915_v58 = vadd.f32 %v4905_v30, %v4893_v41  ;;  %v4940_v33 = vsel %vm4755_vm6, %v4914_v7, 0.0 }
 0x77e   : > { %v4873_v48 = vpop.f32.mrb[8].mxu0 }
 0x77f   : > { %v4874_v38 = vadd.f32 %v5269_v15, %v4873_v48  ;;  %v5462_v11 = vpop.f32.mrb[9].mxu0  ;;  %v4943_v18 = vsel %vm4755_vm6, %v4915_v58, 0.0 }
 0x780   : > { %4926 = vadd.xlane.f32.xlu1 %v4925_v13  ;;  %v4876_v32 = vpop.f32.mrb[10].mxu0 }
 0x781   : > { %v4877_v61 = vadd.f32 %v5269_v15, %v4876_v32  ;;  %v5463_v1 = vpop.f32.mrb[11].mxu0  ;;  %v4910_v43 = vadd.f32 %v4900_v60, %v4874_v38 }
 0x783   : > { %v4928_v50 = vsel %vm4755_vm6, %v4910_v43, 0.0  ;;  %v4911_v23 = vadd.f32 %v4901_v22, %v4877_v61 }
 0x784   : > { %4929 = vadd.xlane.f32.xlu0 %v4928_v50 }
 0x785   : > { %v4931_v62 = vsel %vm4755_vm6, %v4911_v23, 0.0 }
 0x786   : > { %4932 = vadd.xlane.f32.xlu1 %v4931_v62 }
 0x788   : > { %4941 = vadd.xlane.f32.xlu0 %v4940_v33 }
 0x78a   : > { %4944 = vadd.xlane.f32.xlu1 %v4943_v18 }
 0x801   : > { %v4918_v37 = vpop.xlane.xlu0 %4917 }
 0x802   : > { %v4947_v35 = vmul.f32 0.03125, %v4918_v37  ;;  %v4939_v15 = vpop.xlane.xlu1 %4938 }
 0x803   : > { %v4954_v59 = vmul.f32 0.03125, %v4939_v15 }
 0x804   : > { %v9226_v52 = vsub.f32 %v4906_v63, %v4947_v35  ;;  %v9281_v35 = vld [vmem:[%s9359_s6] ss:$0 sm:$0xff] }
 0x805   : > { %v4936_v45 = vpop.xlane.xlu0 %4935  ;;  %v9237_v36 = vsub.f32 %v9206_v56, %v4954_v59  ;;  %v9287_v59 = vld [vmem:[%s9360_s7] ss:$0 sm:$0xff] }
 0x806   : > { %v4953_v20 = vmul.f32 0.03125, %v4936_v45  ;;  %v4967_v40 = vmul.f32 %v9226_v52, %v9226_v52 }
 0x807   : > { %v4974_v31 = vmul.f32 %v9237_v36, %v9237_v36 }
 0x808   : > { %v9231_v14 = vsub.f32 %v9203_v4, %v4953_v20  ;;  %v4977_v19 = vsel %vm4755_vm6, %v4967_v40, 0.0 }
 0x809   : > { %v4921_v49 = vpop.xlane.xlu0 %4920  ;;  %v4924_v39 = vpop.xlane.xlu1 %4923  ;;  %4978 = vadd.xlane.f32.xlu0 %v4977_v19  ;;  %v4998_v26 = vsel %vm4755_vm6, %v4974_v31, 0.0 }
 0x80a   : > { %v4948_v6 = vmul.f32 0.03125, %v4921_v49  ;;  %v4949_v0 = vmul.f32 0.03125, %v4924_v39  ;;  %v4973_v2 = vmul.f32 %v9231_v14, %v9231_v14 }
 0x80c   : > { %v9239_v54 = vsub.f32 %v4907_v9, %v4948_v6  ;;  %v9241_v34 = vsub.f32 %v4908_v24, %v4949_v0  ;;  %v4995_v63 = vsel %vm4755_vm6, %v4973_v2, 0.0 }
 0x80d   : > { %v4927_v4 = vpop.xlane.xlu1 %4926  ;;  %4996 = vadd.xlane.f32.xlu0 %v4995_v63 }
 0x80e   : > { %v4950_v10 = vmul.f32 0.03125, %v4927_v4  ;;  %v4969_v57 = vmul.f32 %v9241_v34, %v9241_v34  ;;  %v4968_v42 = vmul.f32 %v9239_v54, %v9239_v54 }
 0x810   : > { %v9248_v17 = vsub.f32 %v4909_v55, %v4950_v10  ;;  %v4983_v56 = vsel %vm4755_vm6, %v4969_v57, 0.0  ;;  %v4980_v29 = vsel %vm4755_vm6, %v4968_v42, 0.0 }
 0x811   : > { %4984 = vadd.xlane.f32.xlu0 %v4983_v56  ;;  %v4930_v51 = vpop.xlane.xlu0 %4929  ;;  %4981 = vadd.xlane.f32.xlu1 %v4980_v29 }
 0x812   : > { %v4951_v8 = vmul.f32 0.03125, %v4930_v51  ;;  %v4970_v12 = vmul.f32 %v9248_v17, %v9248_v17 }
 0x813   : > { %v4933_v3 = vpop.xlane.xlu1 %4932 }
 0x814   : > { %v9256_v9 = vsub.f32 %v4910_v43, %v4951_v8  ;;  %v4952_v44 = vmul.f32 0.03125, %v4933_v3  ;;  %v4986_v28 = vsel %vm4755_vm6, %v4970_v12, 0.0 }
 0x815   : > { %v4942_v5 = vpop.xlane.xlu0 %4941  ;;  %4999 = vadd.xlane.f32.xlu1 %v4998_v26 }
 0x816   : > { %v9259_v53 = vsub.f32 %v4911_v23, %v4952_v44  ;;  %v4955_v47 = vmul.f32 0.03125, %v4942_v5  ;;  %v4971_v16 = vmul.f32 %v9256_v9, %v9256_v9 }
 0x817   : > { %v4945_v24 = vpop.xlane.xlu1 %4944 }
 0x818   : > { %v9264_v27 = vsub.f32 %v4914_v7, %v4955_v47  ;;  %v4956_v25 = vmul.f32 0.03125, %v4945_v24  ;;  %v4989_v55 = vsel %vm4755_vm6, %v4971_v16, 0.0  ;;  %v4972_v21 = vmul.f32 %v9259_v53, %v9259_v53 }
 0x819   : > { %4990 = vadd.xlane.f32.xlu0 %v4989_v55  ;;  %4987 = vadd.xlane.f32.xlu1 %v4986_v28 }
 0x81a   : > { %v9269_v48 = vsub.f32 %v4915_v58, %v4956_v25  ;;  %v4975_v60 = vmul.f32 %v9264_v27, %v9264_v27  ;;  %v4992_v38 = vsel %vm4755_vm6, %v4972_v21, 0.0 }
 0x81c   : > { %v5001_v46 = vsel %vm4755_vm6, %v4975_v60, 0.0  ;;  %v4976_v11 = vmul.f32 %v9269_v48, %v9269_v48 }
 0x81d   : > { %5002 = vadd.xlane.f32.xlu0 %v5001_v46  ;;  %4993 = vadd.xlane.f32.xlu1 %v4992_v38 }
 0x81e   : > { %v5004_v13 = vsel %vm4755_vm6, %v4976_v11, 0.0 }
 0x821   : > { %5005 = vadd.xlane.f32.xlu1 %v5004_v13 }
 0x896   : > { %v4979_v41 = vpop.xlane.xlu0 %4978 }
 0x897   : > { %v5007_v32 = vmul.f32 0.03125, %v4979_v41 }
 0x899   : > { %v5017_v22 = vadd.f32 1e-05, %v5007_v32 }
 0x89a   : > { %v4997_v30 = vpop.xlane.xlu0 %4996 }
 0x89b   : > { %5769 = vrsqrt.f32 %v5017_v22  ;;  %v5013_v61 = vmul.f32 0.03125, %v4997_v30 }
 0x89d   : > { %v5023_v1 = vadd.f32 1e-05, %v5013_v61 }
 0x89e   : > { %v4985_v43 = vpop.xlane.xlu0 %4984  ;;  %v4982_v7 = vpop.xlane.xlu1 %4981 }
 0x89f   : > { %5771 = vrsqrt.f32 %v5023_v1  ;;  %v5009_v50 = vmul.f32 0.03125, %v4985_v43  ;;  %v5008_v23 = vmul.f32 0.03125, %v4982_v7 }
 0x8a1   : > { %v5019_v58 = vadd.f32 1e-05, %v5009_v50  ;;  %v5018_v62 = vadd.f32 1e-05, %v5008_v23 }
 0x8a2   : > { %v5000_v33 = vpop.xlane.xlu1 %4999 }
 0x8a3   : > { %5773 = vrsqrt.f32 %v5019_v58  ;;  %v5014_v18 = vmul.f32 0.03125, %v5000_v33 }
 0x8a4   : > { %5775 = vrsqrt.f32 %v5018_v62 }
 0x8a5   : > { %v5770_v37 = vpop.eup %5769  ;;  %v5024_v15 = vadd.f32 1e-05, %v5014_v18 }
 0x8a6   : > { %v5037_v45 = vmul.f32 %v5770_v37, %v9226_v52  ;;  %v4991_v20 = vpop.xlane.xlu0 %4990  ;;  %v4988_v40 = vpop.xlane.xlu1 %4987 }
 0x8a7   : > { %5777 = vrsqrt.f32 %v5024_v15  ;;  %v5011_v19 = vmul.f32 0.03125, %v4991_v20  ;;  %v5010_v49 = vmul.f32 0.03125, %v4988_v40 }
 0x8a8   : > { %v5054_v39 = vmul.f32 %v9281_v35, %v5037_v45 }
 0x8a9   : > { %v5772_v6 = vpop.eup %5771  ;;  %v5021_v0 = vadd.f32 1e-05, %v5011_v19  ;;  %v5020_v2 = vadd.f32 1e-05, %v5010_v49 }
 0x8aa   : > { %v5071_v63 = vadd.f32 %v9287_v59, %v5054_v39  ;;  %v5043_v52 = vmul.f32 %v5772_v6, %v9231_v14  ;;  %v5003_v4 = vpop.xlane.xlu0 %5002  ;;  %v4994_v10 = vpop.xlane.xlu1 %4993 }
 0x8ab   : > { %5779 = vrsqrt.f32 %v5021_v0  ;;  %v5015_v57 = vmul.f32 0.03125, %v5003_v4  ;;  %v5012_v42 = vmul.f32 0.03125, %v4994_v10 }
 0x8ac   : > { %5081 = vst.msk [vmem:[%s5990_s28] sm:$0xff] %vm4755_vm6, %v5071_v63  ;;  %v5060_v56 = vmul.f32 %v9281_v35, %v5043_v52  ;;  %5781 = vrsqrt.f32 %v5020_v2 }
 0x8ad   : > { %v5774_v29 = vpop.eup %5773  ;;  %v5025_v31 = vadd.f32 1e-05, %v5015_v57  ;;  %v5022_v51 = vadd.f32 1e-05, %v5012_v42 }
 0x8ae   : > { %v5776_v8 = vpop.eup %5775  ;;  %v5077_v3 = vadd.f32 %v9287_v59, %v5060_v56  ;;  %v5039_v14 = vmul.f32 %v5774_v29, %v9241_v34  ;;  %v5006_v12 = vpop.xlane.xlu1 %5005 }
 0x8af   : > { %v5038_v44 = vmul.f32 %v5776_v8, %v9239_v54  ;;  %5783 = vrsqrt.f32 %v5025_v31  ;;  %v5016_v26 = vmul.f32 0.03125, %v5006_v12 }
 0x8b0   : > { %5087 = vst.msk [vmem:[%s5990_s28 + $0x30] sm:$0xff] %vm4755_vm6, %v5077_v3  ;;  %v5056_v5 = vmul.f32 %v9281_v35, %v5039_v14  ;;  %5785 = vrsqrt.f32 %v5022_v51 }
 0x8b1   : > { %v5778_v47 = vpop.eup %5777  ;;  %v5055_v16 = vmul.f32 %v9281_v35, %v5038_v44  ;;  %v5026_v24 = vadd.f32 1e-05, %v5016_v26 }
 0x8b2   : > { %v5073_v28 = vadd.f32 %v9287_v59, %v5056_v5  ;;  %v5044_v34 = vmul.f32 %v5778_v47, %v9237_v36 }
 0x8b3   : > { %v5072_v25 = vadd.f32 %v9287_v59, %v5055_v16  ;;  %5787 = vrsqrt.f32 %v5026_v24 }
 0x8b4   : > { %5083 = vst.msk [vmem:[%s5990_s28 + $0x10] sm:$0xff] %vm4755_vm6, %v5073_v28  ;;  %v5061_v54 = vmul.f32 %v9281_v35, %v5044_v34 }
 0x8b5   : > { %v5780_v55 = vpop.eup %5779  ;;  %5082 = vst.msk [vmem:[%s5990_s28 + $0x8] sm:$0xff] %vm4755_vm6, %v5072_v25 }
 0x8b6   : > { %v5782_v21 = vpop.eup %5781  ;;  %v5078_v60 = vadd.f32 %v9287_v59, %v5061_v54  ;;  %v5041_v46 = vmul.f32 %v5780_v55, %v9256_v9 }
 0x8b7   : > { %v5040_v38 = vmul.f32 %v5782_v21, %v9248_v17 }
 0x8b8   : > { %5088 = vst.msk [vmem:[%s5990_s28 + $0x38] sm:$0xff] %vm4755_vm6, %v5078_v60  ;;  %v5058_v36 = vmul.f32 %v9281_v35, %v5041_v46 }
 0x8b9   : > { %v5784_v11 = vpop.eup %5783  ;;  %v5057_v13 = vmul.f32 %v9281_v35, %v5040_v38 }
 0x8ba   : > { %v5786_v41 = vpop.eup %5785  ;;  %v5075_v32 = vadd.f32 %v9287_v59, %v5058_v36  ;;  %v5045_v22 = vmul.f32 %v5784_v11, %v9264_v27 }
 0x8bb   : > { %v5074_v30 = vadd.f32 %v9287_v59, %v5057_v13  ;;  %v5042_v9 = vmul.f32 %v5786_v41, %v9259_v53 }
 0x8bc   : > { %5085 = vst.msk [vmem:[%s5990_s28 + $0x20] sm:$0xff] %vm4755_vm6, %v5075_v32  ;;  %v5062_v17 = vmul.f32 %v9281_v35, %v5045_v22 }
 0x8bd   : > { %v5788_v61 = vpop.eup %5787  ;;  %5084 = vst.msk [vmem:[%s5990_s28 + $0x18] sm:$0xff] %vm4755_vm6, %v5074_v30  ;;  %v5059_v1 = vmul.f32 %v9281_v35, %v5042_v9 }
 0x8be   : > { %v5079_v43 = vadd.f32 %v9287_v59, %v5062_v17  ;;  %v5046_v7 = vmul.f32 %v5788_v61, %v9269_v48 }
 0x8bf   : > { %v5076_v50 = vadd.f32 %v9287_v59, %v5059_v1 }
 0x8c0   : > { %5089 = vst.msk [vmem:[%s5990_s28 + $0x40] sm:$0xff] %vm4755_vm6, %v5079_v43  ;;  %v5063_v27 = vmul.f32 %v9281_v35, %v5046_v7 }
 0x8c1   : > { %5086 = vst.msk [vmem:[%s5990_s28 + $0x28] sm:$0xff] %vm4755_vm6, %v5076_v50 }
 0x8c2   : > { %v5080_v53 = vadd.f32 %v9287_v59, %v5063_v27 }
 0x8c4   : > { %5090 = vst.msk [vmem:[%s5990_s28 + $0x48] sm:$0xff] %vm4755_vm6, %v5080_v53 }
 0x8c5 PF: > { %s18_s9 = sadd.s32 1, %s5827_s9   ;;  %s10148_s28 = sld [smem:[#allocation3_spill]] }
 0x8c6   : > { %p15_p9 = scmp.ge.s32.totalorder %s18_s9, 6   ;;  %s10149_s16 = sld [smem:[#allocation4_spill]] }
 0x8c7   : > { %s10150_s30 = sld [smem:[#allocation5_spill]]  ;;  %s10151_s27 = smov %s5819_s29 }
 0x8c8   :  { %17 = sbr.rel (!%p15_p9) target bundleno = 3 (0x3), region = 99 }
 0x8cc   : > { %s10152_s29 = smov %s10149_s16 }

</bundles_post_ra>
